<compile_context>
chip_gen: v6e
topology: v6e:2x2x1
jax: 0.10.0
libtpu: 0.0.40
codegen_flags: <defaults>
</compile_context>

<pallas_src>
import functools

import jax
import jax.numpy as jnp
from jax.experimental import pallas as pl
from jax.experimental.pallas import tpu as pltpu


def _head_kernel(feat_ref, w_ref, b_ref, out_ref, *, inv_hw):
    """One batch tile of: global-avg-pool -> Linear(C, 1) -> Sigmoid.

    feat_ref: (TB, C, HW) native dtype   last backbone feature-map tile
    w_ref:    (1, C)      float          fc weight (grid-invariant, fetched once)
    b_ref:    (1,)        float32        fc bias, in SMEM
    out_ref:  (TB, 1)     float32        sigmoid probabilities for this tile
    """
    feat = feat_ref[...].astype(jnp.float32)             # (TB, C, HW), f32 accum
    w = w_ref[...].astype(jnp.float32)                   # (1, C)

    # Spatial sum (lane-axis reduce on the XLU); the 1/HW scale is applied once
    # on the (TB, 1) logit instead of per element.
    pooled = jnp.sum(feat, axis=2)                        # (TB, C)
    # Weighted channel reduction (VPU multiply + lane reduce).
    logit = jnp.sum(pooled * w, axis=1, keepdims=True)    # (TB, 1)
    out_ref[...] = jax.nn.sigmoid(logit * inv_hw + b_ref[0])


def _pick_block_b(B, per_sample_padded_bytes, budget_bytes=4 << 20):
    """Largest batch tile (multiple of 8, divisor of B, >=2 tiles) within budget."""
    cands = [d for d in range(8, B, 8) if B % d == 0]
    fitting = [d for d in cands if d * per_sample_padded_bytes <= budget_bytes]
    if fitting:
        return max(fitting)                      # >=2 tiles, fits the budget
    if B * per_sample_padded_bytes <= budget_bytes or not cands:
        return B                                 # tiny batch: one tile
    return min(cands)                            # smallest legal tile otherwise


def discriminator_head(features, fc_weight, fc_bias, *, block_b=None):
    """Discriminator head: AdaptiveAvgPool2d(1) -> flatten -> Linear -> Sigmoid.

    features:  (B, C, H, W) float   last backbone feature map (NCHW contiguous)
    fc_weight: (1, C)       float   PyTorch nn.Linear weight layout
    fc_bias:   (1,)         float   PyTorch nn.Linear bias
    returns:   (B, 1)       float32 sigmoid probabilities
    """
    B, C, H, W = features.shape
    HW = H * W

    # Padded VMEM footprint per sample: C rounded to 8 sublanes, HW to 128 lanes.
    padded_c = ((C + 7) // 8) * 8
    padded_hw = ((HW + 127) // 128) * 128
    per_sample_padded = padded_c * padded_hw * features.dtype.itemsize

    if block_b is not None:
        if block_b <= 0 or B % block_b != 0 or (block_b != B and block_b % 8 != 0):
            raise ValueError(
                f"block_b={block_b} must divide B={B} and (unless equal to B) "
                "be a multiple of 8 (output sublane constraint)")
    else:
        block_b = _pick_block_b(B, per_sample_padded)

    # Free, contiguous reshape only -- no wrapper-side cast / transpose / repeat.
    feat = features.reshape(B, C, HW)
    weight = fc_weight.reshape(1, C)
    bias = fc_bias.reshape(1).astype(jnp.float32)

    grid = (B // block_b,)

    grid_spec = pltpu.PrefetchScalarGridSpec(
        num_scalar_prefetch=0,
        grid=grid,
        in_specs=[
            # Feature tile for batch tile i (the only real HBM stream).
            pl.BlockSpec((block_b, C, HW), lambda i: (i, 0, 0)),
            # Un-expanded fc weight: block index is grid-invariant, so it is
            # DMA'd once and stays resident across batch tiles.
            pl.BlockSpec((1, C), lambda i: (0, 0)),
            # Scalar bias in SMEM.
            pl.BlockSpec(memory_space=pltpu.MemorySpace.SMEM),
        ],
        out_specs=pl.BlockSpec((block_b, 1), lambda i: (i, 0)),
    )

    kernel = functools.partial(_head_kernel, inv_hw=1.0 / float(HW))

    return pl.pallas_call(
        kernel,
        out_shape=jax.ShapeDtypeStruct((B, 1), jnp.float32),
        grid_spec=grid_spec,
        compiler_params=pltpu.CompilerParams(
            # Batch tiles are independent -> sharded across TCs on v7x.
            dimension_semantics=("parallel",),
        ),
    )(feat, weight, bias)


def _reference(features, fc_weight, fc_bias):
    pooled = jnp.mean(features, axis=(2, 3))        # (B, C)
    logit = pooled @ fc_weight.T + fc_bias          # (B, 1)
    return jax.nn.sigmoid(logit)


if __name__ == "__main__":
    # The last legacy_xception feature map has 2048 channels; keep batch and
    # spatial extent small.
    B, C, H, W = 2, 2048, 8, 8

    key = jax.random.PRNGKey(0)
    k_feat, k_w, k_b = jax.random.split(key, 3)

    # Stand-in for backbone(x)[-1]: the last backbone feature map.
    features = jax.random.normal(k_feat, (B, C, H, W), dtype=jnp.float32)

    # Deterministic fc parameters in PyTorch Linear layout: weight (1, C), bias (1,).
    bound = 1.0 / (C ** 0.5)
    fc_weight = jax.random.uniform(k_w, (1, C), jnp.float32, -bound, bound)
    fc_bias = jax.random.uniform(k_b, (1,), jnp.float32, -bound, bound)

    ref = _reference(features, fc_weight, fc_bias)

    # Default path: single batch tile, single grid step (B=2).
    out = discriminator_head(features, fc_weight, fc_bias)
    out = jax.block_until_ready(out)
    assert out.shape == (B, 1)
    assert jnp.allclose(out, ref, atol=1e-5, rtol=1e-5)

    # Batch-tiled path: exercises >=2 tiles on the "parallel" grid axis.
    B2, C2 = 16, 512
    feat2 = jax.random.normal(jax.random.PRNGKey(1), (B2, C2, H, W), jnp.float32)
    w2 = jax.random.uniform(jax.random.PRNGKey(2), (1, C2), jnp.float32, -bound, bound)
    b2 = jax.random.uniform(jax.random.PRNGKey(3), (1,), jnp.float32, -bound, bound)
    ref2 = _reference(feat2, w2, b2)
    out2 = discriminator_head(feat2, w2, b2)        # default picks block_b=8 -> 2 tiles
    out2 = jax.block_until_ready(out2)
    assert out2.shape == (B2, 1)
    assert jnp.allclose(out2, ref2, atol=1e-5, rtol=1e-5)

    print("KERNEL_OK")
</pallas_src>

<mosaic_0001>
module attributes {stable_mosaic.version = 11 : i64} {
  func.func @_head_kernel(%arg0: i32, %arg1: memref<2x2048x64xf32, #tpu.memory_space<vmem>>, %arg2: memref<1x2048xf32, #tpu.memory_space<vmem>>, %arg3: memref<1xf32, #tpu.memory_space<smem>>, %arg4: memref<2x1xf32, #tpu.memory_space<vmem>>) attributes {dimension_semantics = [#tpu.dimension_semantics<parallel>], iteration_bounds = array<i64: 1>, scalar_prefetch = 0 : i64, scratch_operands = 0 : i64, tpu.core_type = #tpu.core_type<tc>, window_params = [{transform_indices = @transform_0, window_bounds = array<i64: 2, 2048, 64>}, {pipeline_mode = #tpu.pipeline_mode<synchronous>, transform_indices = @transform_1, window_bounds = array<i64: 1, 2048>}, {transform_indices = @transform_2, window_bounds = array<i64: 1>}, {transform_indices = @transform_3, window_bounds = array<i64: 2, 1>}]} {
    %c0 = arith.constant 0 : index
    %c0_0 = arith.constant 0 : index
    %c0_1 = arith.constant 0 : index
    %0 = vector.load %arg1[%c0, %c0_0, %c0_1] : memref<2x2048x64xf32, #tpu.memory_space<vmem>>, vector<2x2048x64xf32>
    %c0_2 = arith.constant 0 : index
    %c0_3 = arith.constant 0 : index
    %1 = vector.load %arg2[%c0_2, %c0_3] : memref<1x2048xf32, #tpu.memory_space<vmem>>, vector<1x2048xf32>
    %cst = arith.constant dense<0.000000e+00> : vector<2x2048xf32>
    %2 = vector.multi_reduction <add>, %0, %cst [2] : vector<2x2048x64xf32> to vector<2x2048xf32>
    %3 = vector.broadcast %1 : vector<1x2048xf32> to vector<2x2048xf32>
    %4 = arith.mulf %2, %3 : vector<2x2048xf32>
    %cst_4 = arith.constant dense<0.000000e+00> : vector<2xf32>
    %5 = vector.multi_reduction <add>, %4, %cst_4 [1] : vector<2x2048xf32> to vector<2xf32>
    %6 = vector.shape_cast %5 : vector<2xf32> to vector<2x1xf32>
    %cst_5 = arith.constant 1.562500e-02 : f32
    %7 = vector.broadcast %cst_5 : f32 to vector<2x1xf32>
    %8 = arith.mulf %6, %7 : vector<2x1xf32>
    %c0_6 = arith.constant 0 : index
    %9 = memref.load %arg3[%c0_6] : memref<1xf32, #tpu.memory_space<smem>>
    %10 = vector.broadcast %9 : f32 to vector<2x1xf32>
    %11 = arith.addf %8, %10 : vector<2x1xf32>
    %12 = arith.negf %11 : vector<2x1xf32>
    %13 = math.exp %12 : vector<2x1xf32>
    %cst_7 = arith.constant 1.000000e+00 : f32
    %14 = vector.broadcast %cst_7 : f32 to vector<2x1xf32>
    %15 = arith.addf %14, %13 : vector<2x1xf32>
    %16 = arith.divf %14, %15 : vector<2x1xf32>
    %c0_8 = arith.constant 0 : index
    %c0_9 = arith.constant 0 : index
    %17 = vector.load %arg4[%c0_8, %c0_9] : memref<2x1xf32, #tpu.memory_space<vmem>>, vector<2x1xf32>
    tpu.vector_store %arg4[%c0_8, %c0_9], %16 {strides = array<i32>} : memref<2x1xf32, #tpu.memory_space<vmem>>, vector<2x1xf32>,
    return
  }
  func.func @transform_0(%arg0: i32) -> (i32, i32, i32) {
    %c0_i32 = arith.constant 0 : i32
    %c0_i32_0 = arith.constant 0 : i32
    %c0_i32_1 = arith.constant 0 : i32
    return %arg0, %c0_i32, %c0_i32_0 : i32, i32, i32
  }
  func.func @transform_1(%arg0: i32) -> (i32, i32) {
    %c0_i32 = arith.constant 0 : i32
    %c0_i32_0 = arith.constant 0 : i32
    %c0_i32_1 = arith.constant 0 : i32
    return %c0_i32, %c0_i32_0 : i32, i32
  }
  func.func @transform_2(%arg0: i32) -> i32 {
    %c0_i32 = arith.constant 0 : i32
    %c0_i32_0 = arith.constant 0 : i32
    return %c0_i32 : i32
  }
  func.func @transform_3(%arg0: i32) -> (i32, i32) {
    %c0_i32 = arith.constant 0 : i32
    %c0_i32_0 = arith.constant 0 : i32
    return %arg0, %c0_i32 : i32, i32
  }
}

</mosaic_0001>

<bundles_post_ra>
// kernel: tpu_custom_call.1
= control target key start
LH: loop header
LB: loop body
LE: loop exit
PB: predicated region body
PF: predicated region fallthrough
CT: control target
= control target key end

     0   :  { %vm529_vm0 = vcmask 523264   ;;  %vm5967_vm1 = vcmask 130112   ;;  %vm16259_vm2 = vcmask 195712   ;;  %vm5981_vm3 = vcmask 261312   ;;  %s15998_s0 = inlined_call_operand.vmem [shape: f32[2,2048,64], index: 0, kind: input, shape index: {}]   ;;  %s15999_s1 = inlined_call_operand.vmem [shape: f32[1,2048], index: 1, kind: input, shape index: {}]   ;;  %s16000_s2 = inlined_call_operand.<no memory space> [shape: f32[1], index: 2, kind: input, shape index: {}]   ;;  %s16001_s3 = inlined_call_operand.vmem [shape: f32[2,1], index: 3, kind: output, shape index: {}]  }
   0x1   :  { %v17_v0 = vld [vmem:[%s15998_s0 + $0x10] sm:$0xff]  ;;  %v15_v1 = vld [vmem:[%s15998_s0] sm:$0xff]  ;;  %v18_v2 = vld [vmem:[%s15998_s0 + $0x18] sm:$0xff]  ;;  %vm5988_vm4 = vcmask 326912   ;;  %vm5995_vm5 = vcmask 392512   ;;  %vm6002_vm6 = vcmask 458112  }
   0x2   :  { %v536_v3 = vsel %vm529_vm0, %v17_v0, 0.0  ;;  %v530_v4 = vsel %vm529_vm0, %v15_v1, 0.0  ;;  %v16_v5 = vld [vmem:[%s15998_s0 + $0x8] sm:$0xff]  ;;  %v539_v6 = vsel %vm529_vm0, %v18_v2, 0.0  ;;  %v19_v9 = vld [vmem:[%s15998_s0 + $0x20] sm:$0xff]  ;;  %v22_v12 = vld [vmem:[%s15998_s0 + $0x38] sm:$0xff] }
   0x3   :  { %537 = vadd.xlane.f32.xlu1 %v536_v3  ;;  %531 = vadd.xlane.f32.xlu0 %v530_v4  ;;  %v533_v7 = vsel %vm529_vm0, %v16_v5, 0.0  ;;  %v20_v8 = vld [vmem:[%s15998_s0 + $0x28] sm:$0xff]  ;;  %v542_v11 = vsel %vm529_vm0, %v19_v9, 0.0  ;;  %v21_v13 = vld [vmem:[%s15998_s0 + $0x30] sm:$0xff]  ;;  %v551_v14 = vsel %vm529_vm0, %v22_v12, 0.0  ;;  %v23_v17 = vld [vmem:[%s15998_s0 + $0x40] sm:$0xff] }
   0x4   :  { %v545_v10 = vsel %vm529_vm0, %v20_v8, 0.0  ;;  %v548_v15 = vsel %vm529_vm0, %v21_v13, 0.0  ;;  %v24_v16 = vld [vmem:[%s15998_s0 + $0x48] sm:$0xff]  ;;  %v554_v19 = vsel %vm529_vm0, %v23_v17, 0.0  ;;  %v26_v20 = vld [vmem:[%s15998_s0 + $0x58] sm:$0xff]  ;;  %v25_v21 = vld [vmem:[%s15998_s0 + $0x50] sm:$0xff] }
   0x5   :  { %v557_v18 = vsel %vm529_vm0, %v24_v16, 0.0  ;;  %v563_v22 = vsel %vm529_vm0, %v26_v20, 0.0  ;;  %v560_v23 = vsel %vm529_vm0, %v25_v21, 0.0  ;;  %v28_v24 = vld [vmem:[%s15998_s0 + $0x68] sm:$0xff]  ;;  %v27_v25 = vld [vmem:[%s15998_s0 + $0x60] sm:$0xff]  ;;  %v30_v28 = vld [vmem:[%s15998_s0 + $0x78] sm:$0xff] }
   0x6   :  { %v569_v26 = vsel %vm529_vm0, %v28_v24, 0.0  ;;  %v566_v27 = vsel %vm529_vm0, %v27_v25, 0.0  ;;  %v29_v29 = vld [vmem:[%s15998_s0 + $0x70] sm:$0xff]  ;;  %v575_v30 = vsel %vm529_vm0, %v30_v28, 0.0  ;;  %v32_v32 = vld [vmem:[%s15998_s0 + $0x88] sm:$0xff]  ;;  %v31_v33 = vld [vmem:[%s15998_s0 + $0x80] sm:$0xff] }
   0x7   :  { %540 = vadd.xlane.f32.xlu1 %v539_v6  ;;  %534 = vadd.xlane.f32.xlu0 %v533_v7  ;;  %v572_v31 = vsel %vm529_vm0, %v29_v29, 0.0  ;;  %v581_v34 = vsel %vm529_vm0, %v32_v32, 0.0  ;;  %v578_v35 = vsel %vm529_vm0, %v31_v33, 0.0  ;;  %v34_v36 = vld [vmem:[%s15998_s0 + $0x98] sm:$0xff]  ;;  %v33_v37 = vld [vmem:[%s15998_s0 + $0x90] sm:$0xff]  ;;  %v36_v40 = vld [vmem:[%s15998_s0 + $0xa8] sm:$0xff] }
   0x8   :  { %v587_v38 = vsel %vm529_vm0, %v34_v36, 0.0  ;;  %v584_v39 = vsel %vm529_vm0, %v33_v37, 0.0  ;;  %v35_v41 = vld [vmem:[%s15998_s0 + $0xa0] sm:$0xff]  ;;  %v593_v42 = vsel %vm529_vm0, %v36_v40, 0.0  ;;  %v38_v44 = vld [vmem:[%s15998_s0 + $0xb8] sm:$0xff]  ;;  %v37_v45 = vld [vmem:[%s15998_s0 + $0xb0] sm:$0xff] }
   0x9   :  { %v590_v43 = vsel %vm529_vm0, %v35_v41, 0.0  ;;  %v599_v46 = vsel %vm529_vm0, %v38_v44, 0.0  ;;  %v596_v47 = vsel %vm529_vm0, %v37_v45, 0.0  ;;  %v40_v48 = vld [vmem:[%s15998_s0 + $0xc8] sm:$0xff]  ;;  %v39_v49 = vld [vmem:[%s15998_s0 + $0xc0] sm:$0xff]  ;;  %v42_v52 = vld [vmem:[%s15998_s0 + $0xd8] sm:$0xff] }
   0xa   :  { %v605_v50 = vsel %vm529_vm0, %v40_v48, 0.0  ;;  %v602_v51 = vsel %vm529_vm0, %v39_v49, 0.0  ;;  %v41_v53 = vld [vmem:[%s15998_s0 + $0xd0] sm:$0xff]  ;;  %v611_v54 = vsel %vm529_vm0, %v42_v52, 0.0  ;;  %v44_v56 = vld [vmem:[%s15998_s0 + $0xe8] sm:$0xff]  ;;  %v43_v57 = vld [vmem:[%s15998_s0 + $0xe0] sm:$0xff] }
   0xb   :  { %546 = vadd.xlane.f32.xlu1 %v545_v10  ;;  %543 = vadd.xlane.f32.xlu0 %v542_v11  ;;  %v608_v55 = vsel %vm529_vm0, %v41_v53, 0.0  ;;  %v617_v58 = vsel %vm529_vm0, %v44_v56, 0.0  ;;  %v614_v59 = vsel %vm529_vm0, %v43_v57, 0.0  ;;  %v46_v60 = vld [vmem:[%s15998_s0 + $0xf8] sm:$0xff]  ;;  %v45_v61 = vld [vmem:[%s15998_s0 + $0xf0] sm:$0xff]  ;;  %v48_v0 = vld [vmem:[%s15998_s0 + $0x108] sm:$0xff] }
   0xc   :  { %v623_v62 = vsel %vm529_vm0, %v46_v60, 0.0  ;;  %v620_v63 = vsel %vm529_vm0, %v45_v61, 0.0  ;;  %v47_v1 = vld [vmem:[%s15998_s0 + $0x100] sm:$0xff]  ;;  %v629_v2 = vsel %vm529_vm0, %v48_v0, 0.0  ;;  %v50_v4 = vld [vmem:[%s15998_s0 + $0x118] sm:$0xff]  ;;  %v49_v5 = vld [vmem:[%s15998_s0 + $0x110] sm:$0xff] }
   0xd   :  { %v626_v3 = vsel %vm529_vm0, %v47_v1, 0.0  ;;  %v635_v6 = vsel %vm529_vm0, %v50_v4, 0.0  ;;  %v632_v7 = vsel %vm529_vm0, %v49_v5, 0.0  ;;  %v52_v8 = vld [vmem:[%s15998_s0 + $0x128] sm:$0xff]  ;;  %v51_v9 = vld [vmem:[%s15998_s0 + $0x120] sm:$0xff]  ;;  %v54_v12 = vld [vmem:[%s15998_s0 + $0x138] sm:$0xff] }
   0xe   :  { %v641_v10 = vsel %vm529_vm0, %v52_v8, 0.0  ;;  %v638_v11 = vsel %vm529_vm0, %v51_v9, 0.0  ;;  %v53_v13 = vld [vmem:[%s15998_s0 + $0x130] sm:$0xff]  ;;  %v56_v16 = vld [vmem:[%s15998_s0 + $0x148] sm:$0xff]  ;;  %v55_v17 = vld [vmem:[%s15998_s0 + $0x140] sm:$0xff]  ;;  %vm6009_vm7 = vcmask 523712  }
   0xf   :  { %552 = vadd.xlane.f32.xlu1 %v551_v14  ;;  %549 = vadd.xlane.f32.xlu0 %v548_v15  ;;  %v647_v14 = vsel %vm529_vm0, %v54_v12, 0.0  ;;  %v644_v15 = vsel %vm529_vm0, %v53_v13, 0.0  ;;  %v58_v20 = vld [vmem:[%s15998_s0 + $0x158] sm:$0xff]  ;;  %v57_v21 = vld [vmem:[%s15998_s0 + $0x150] sm:$0xff]  ;;  %v60_v24 = vld [vmem:[%s15998_s0 + $0x168] sm:$0xff]  ;;  %vm6016_vm8 = vcmask 589312  }
  0x10   :  { %v59_v25 = vld [vmem:[%s15998_s0 + $0x160] sm:$0xff]  ;;  %v62_v28 = vld [vmem:[%s15998_s0 + $0x178] sm:$0xff]  ;;  %v61_v29 = vld [vmem:[%s15998_s0 + $0x170] sm:$0xff]  ;;  %vm16261_vm9 = vcmask 654912   ;;  %vm6030_vm10 = vcmask 720512   ;;  %vm6037_vm11 = vcmask 786112  }
  0x11   :  { %v64_v32 = vld [vmem:[%s15998_s0 + $0x188] sm:$0xff]  ;;  %v63_v33 = vld [vmem:[%s15998_s0 + $0x180] sm:$0xff]  ;;  %v66_v36 = vld [vmem:[%s15998_s0 + $0x198] sm:$0xff]  ;;  %vm6044_vm12 = vcmask 851712   ;;  %vm6051_vm13 = vcmask 917312   ;;  %vm6058_vm14 = vcmask 982912  }
  0x12   :  { %v65_v37 = vld [vmem:[%s15998_s0 + $0x190] sm:$0xff]  ;;  %v68_v40 = vld [vmem:[%s15998_s0 + $0x1a8] sm:$0xff]  ;;  %v67_v41 = vld [vmem:[%s15998_s0 + $0x1a0] sm:$0xff]  ;;  %vm6065_vm15 = vcmask 1048512  }
  0x13   :  { %558 = vadd.xlane.f32.xlu1 %v557_v18  ;;  %555 = vadd.xlane.f32.xlu0 %v554_v19  ;;  %v653_v18 = vsel %vm529_vm0, %v56_v16, 0.0  ;;  %v650_v19 = vsel %vm529_vm0, %v55_v17, 0.0  ;;  %v70_v44 = vld [vmem:[%s15998_s0 + $0x1b8] sm:$0xff]  ;;  %v69_v45 = vld [vmem:[%s15998_s0 + $0x1b0] sm:$0xff]  ;;  %v72_v48 = vld [vmem:[%s15998_s0 + $0x1c8] sm:$0xff] }
  0x14   :  { %v71_v49 = vld [vmem:[%s15998_s0 + $0x1c0] sm:$0xff]  ;;  %v74_v52 = vld [vmem:[%s15998_s0 + $0x1d8] sm:$0xff]  ;;  %v73_v53 = vld [vmem:[%s15998_s0 + $0x1d0] sm:$0xff] }
  0x15   :  { %v76_v56 = vld [vmem:[%s15998_s0 + $0x1e8] sm:$0xff]  ;;  %v75_v57 = vld [vmem:[%s15998_s0 + $0x1e0] sm:$0xff]  ;;  %v78_v60 = vld [vmem:[%s15998_s0 + $0x1f8] sm:$0xff] }
  0x16   :  { %v77_v61 = vld [vmem:[%s15998_s0 + $0x1f0] sm:$0xff]  ;;  %v80_v0 = vld [vmem:[%s15998_s0 + $0x208] sm:$0xff]  ;;  %v79_v1 = vld [vmem:[%s15998_s0 + $0x200] sm:$0xff] }
  0x17   :  { %564 = vadd.xlane.f32.xlu1 %v563_v22  ;;  %561 = vadd.xlane.f32.xlu0 %v560_v23  ;;  %v659_v22 = vsel %vm529_vm0, %v58_v20, 0.0  ;;  %v656_v23 = vsel %vm529_vm0, %v57_v21, 0.0  ;;  %v82_v4 = vld [vmem:[%s15998_s0 + $0x218] sm:$0xff]  ;;  %v81_v5 = vld [vmem:[%s15998_s0 + $0x210] sm:$0xff]  ;;  %v84_v8 = vld [vmem:[%s15998_s0 + $0x228] sm:$0xff] }
  0x18   :  { %v83_v9 = vld [vmem:[%s15998_s0 + $0x220] sm:$0xff]  ;;  %v86_v12 = vld [vmem:[%s15998_s0 + $0x238] sm:$0xff]  ;;  %v85_v13 = vld [vmem:[%s15998_s0 + $0x230] sm:$0xff] }
  0x19   :  { %v743_v16 = vsel %vm529_vm0, %v86_v12, 0.0  ;;  %v740_v17 = vsel %vm529_vm0, %v85_v13, 0.0 }
  0x1b   :  { %570 = vadd.xlane.f32.xlu1 %v569_v26  ;;  %567 = vadd.xlane.f32.xlu0 %v566_v27  ;;  %v665_v26 = vsel %vm529_vm0, %v60_v24, 0.0  ;;  %v662_v27 = vsel %vm529_vm0, %v59_v25, 0.0  ;;  %v90_v24 = vld [vmem:[%s15998_s0 + $0x258] sm:$0xff]  ;;  %v89_v25 = vld [vmem:[%s15998_s0 + $0x250] sm:$0xff] }
  0x1f   :  { %576 = vadd.xlane.f32.xlu1 %v575_v30  ;;  %573 = vadd.xlane.f32.xlu0 %v572_v31  ;;  %v671_v30 = vsel %vm529_vm0, %v62_v28, 0.0  ;;  %v668_v31 = vsel %vm529_vm0, %v61_v29, 0.0  ;;  %v755_v28 = vsel %vm529_vm0, %v90_v24, 0.0  ;;  %v752_v29 = vsel %vm529_vm0, %v89_v25, 0.0  ;;  %v110_v24 = vld [vmem:[%s15998_s0 + $0x2f8] sm:$0xff]  ;;  %v109_v25 = vld [vmem:[%s15998_s0 + $0x2f0] sm:$0xff] }
  0x23   :  { %582 = vadd.xlane.f32.xlu1 %v581_v34  ;;  %579 = vadd.xlane.f32.xlu0 %v578_v35  ;;  %v677_v34 = vsel %vm529_vm0, %v64_v32, 0.0  ;;  %v674_v35 = vsel %vm529_vm0, %v63_v33, 0.0 }
  0x27   :  { %588 = vadd.xlane.f32.xlu1 %v587_v38  ;;  %585 = vadd.xlane.f32.xlu0 %v584_v39  ;;  %v683_v38 = vsel %vm529_vm0, %v66_v36, 0.0  ;;  %v680_v39 = vsel %vm529_vm0, %v65_v37, 0.0  ;;  %v94_v36 = vld [vmem:[%s15998_s0 + $0x278] sm:$0xff]  ;;  %v93_v37 = vld [vmem:[%s15998_s0 + $0x270] sm:$0xff] }
  0x2b   :  { %594 = vadd.xlane.f32.xlu1 %v593_v42  ;;  %591 = vadd.xlane.f32.xlu0 %v590_v43  ;;  %v689_v42 = vsel %vm529_vm0, %v68_v40, 0.0  ;;  %v686_v43 = vsel %vm529_vm0, %v67_v41, 0.0  ;;  %v767_v40 = vsel %vm529_vm0, %v94_v36, 0.0  ;;  %v764_v41 = vsel %vm529_vm0, %v93_v37, 0.0 }
  0x2f   :  { %600 = vadd.xlane.f32.xlu1 %v599_v46  ;;  %597 = vadd.xlane.f32.xlu0 %v596_v47  ;;  %v695_v46 = vsel %vm529_vm0, %v70_v44, 0.0  ;;  %v692_v47 = vsel %vm529_vm0, %v69_v45, 0.0 }
  0x33   :  { %606 = vadd.xlane.f32.xlu1 %v605_v50  ;;  %603 = vadd.xlane.f32.xlu0 %v602_v51  ;;  %v701_v50 = vsel %vm529_vm0, %v72_v48, 0.0  ;;  %v698_v51 = vsel %vm529_vm0, %v71_v49, 0.0  ;;  %v98_v48 = vld [vmem:[%s15998_s0 + $0x298] sm:$0xff]  ;;  %v97_v49 = vld [vmem:[%s15998_s0 + $0x290] sm:$0xff] }
  0x37   :  { %612 = vadd.xlane.f32.xlu1 %v611_v54  ;;  %609 = vadd.xlane.f32.xlu0 %v608_v55  ;;  %v707_v54 = vsel %vm529_vm0, %v74_v52, 0.0  ;;  %v704_v55 = vsel %vm529_vm0, %v73_v53, 0.0  ;;  %v779_v52 = vsel %vm529_vm0, %v98_v48, 0.0  ;;  %v776_v53 = vsel %vm529_vm0, %v97_v49, 0.0 }
  0x3b   :  { %618 = vadd.xlane.f32.xlu1 %v617_v58  ;;  %615 = vadd.xlane.f32.xlu0 %v614_v59  ;;  %v713_v58 = vsel %vm529_vm0, %v76_v56, 0.0  ;;  %v710_v59 = vsel %vm529_vm0, %v75_v57, 0.0 }
  0x3f   :  { %624 = vadd.xlane.f32.xlu1 %v623_v62  ;;  %621 = vadd.xlane.f32.xlu0 %v620_v63  ;;  %v719_v62 = vsel %vm529_vm0, %v78_v60, 0.0  ;;  %v716_v63 = vsel %vm529_vm0, %v77_v61, 0.0  ;;  %v102_v60 = vld [vmem:[%s15998_s0 + $0x2b8] sm:$0xff]  ;;  %v101_v61 = vld [vmem:[%s15998_s0 + $0x2b0] sm:$0xff] }
  0x43   :  { %630 = vadd.xlane.f32.xlu1 %v629_v2  ;;  %627 = vadd.xlane.f32.xlu0 %v626_v3  ;;  %v725_v2 = vsel %vm529_vm0, %v80_v0, 0.0  ;;  %v722_v3 = vsel %vm529_vm0, %v79_v1, 0.0  ;;  %v791_v0 = vsel %vm529_vm0, %v102_v60, 0.0  ;;  %v788_v1 = vsel %vm529_vm0, %v101_v61, 0.0  ;;  %v118_v60 = vld [vmem:[%s15998_s0 + $0x338] sm:$0xff]  ;;  %v117_v61 = vld [vmem:[%s15998_s0 + $0x330] sm:$0xff] }
  0x47   :  { %636 = vadd.xlane.f32.xlu1 %v635_v6  ;;  %633 = vadd.xlane.f32.xlu0 %v632_v7  ;;  %v731_v6 = vsel %vm529_vm0, %v82_v4, 0.0  ;;  %v728_v7 = vsel %vm529_vm0, %v81_v5, 0.0 }
  0x4b   :  { %642 = vadd.xlane.f32.xlu1 %v641_v10  ;;  %639 = vadd.xlane.f32.xlu0 %v638_v11  ;;  %v737_v10 = vsel %vm529_vm0, %v84_v8, 0.0  ;;  %v734_v11 = vsel %vm529_vm0, %v83_v9, 0.0  ;;  %v106_v8 = vld [vmem:[%s15998_s0 + $0x2d8] sm:$0xff]  ;;  %v105_v9 = vld [vmem:[%s15998_s0 + $0x2d0] sm:$0xff] }
  0x4c   :  { %v803_v12 = vsel %vm529_vm0, %v106_v8, 0.0  ;;  %v800_v13 = vsel %vm529_vm0, %v105_v9, 0.0 }
  0x4f   :  { %648 = vadd.xlane.f32.xlu1 %v647_v14  ;;  %645 = vadd.xlane.f32.xlu0 %v644_v15 }
  0x53   :  { %654 = vadd.xlane.f32.xlu1 %v653_v18  ;;  %651 = vadd.xlane.f32.xlu0 %v650_v19  ;;  %v88_v18 = vld [vmem:[%s15998_s0 + $0x248] sm:$0xff]  ;;  %v87_v19 = vld [vmem:[%s15998_s0 + $0x240] sm:$0xff] }
  0x57   :  { %660 = vadd.xlane.f32.xlu1 %v659_v22  ;;  %657 = vadd.xlane.f32.xlu0 %v656_v23  ;;  %v749_v22 = vsel %vm529_vm0, %v88_v18, 0.0  ;;  %v746_v23 = vsel %vm529_vm0, %v87_v19, 0.0 }
  0x5b   :  { %666 = vadd.xlane.f32.xlu1 %v665_v26  ;;  %663 = vadd.xlane.f32.xlu0 %v662_v27 }
  0x5f   :  { %672 = vadd.xlane.f32.xlu1 %v671_v30  ;;  %669 = vadd.xlane.f32.xlu0 %v668_v31  ;;  %v92_v30 = vld [vmem:[%s15998_s0 + $0x268] sm:$0xff]  ;;  %v91_v31 = vld [vmem:[%s15998_s0 + $0x260] sm:$0xff] }
  0x63   :  { %678 = vadd.xlane.f32.xlu1 %v677_v34  ;;  %675 = vadd.xlane.f32.xlu0 %v674_v35  ;;  %v761_v34 = vsel %vm529_vm0, %v92_v30, 0.0  ;;  %v758_v35 = vsel %vm529_vm0, %v91_v31, 0.0  ;;  %v815_v30 = vsel %vm529_vm0, %v110_v24, 0.0  ;;  %v812_v31 = vsel %vm529_vm0, %v109_v25, 0.0 }
  0x67   :  { %684 = vadd.xlane.f32.xlu1 %v683_v38  ;;  %681 = vadd.xlane.f32.xlu0 %v680_v39 }
  0x6b   :  { %690 = vadd.xlane.f32.xlu1 %v689_v42  ;;  %687 = vadd.xlane.f32.xlu0 %v686_v43  ;;  %v96_v42 = vld [vmem:[%s15998_s0 + $0x288] sm:$0xff]  ;;  %v95_v43 = vld [vmem:[%s15998_s0 + $0x280] sm:$0xff] }
  0x6f   :  { %696 = vadd.xlane.f32.xlu1 %v695_v46  ;;  %693 = vadd.xlane.f32.xlu0 %v692_v47  ;;  %v773_v46 = vsel %vm529_vm0, %v96_v42, 0.0  ;;  %v770_v47 = vsel %vm529_vm0, %v95_v43, 0.0  ;;  %v114_v42 = vld [vmem:[%s15998_s0 + $0x318] sm:$0xff]  ;;  %v113_v43 = vld [vmem:[%s15998_s0 + $0x310] sm:$0xff] }
  0x70   :  { %v827_v48 = vsel %vm529_vm0, %v114_v42, 0.0  ;;  %v824_v49 = vsel %vm529_vm0, %v113_v43, 0.0  ;;  %v126_v42 = vld [vmem:[%s15998_s0 + $0x378] sm:$0xff]  ;;  %v125_v43 = vld [vmem:[%s15998_s0 + $0x370] sm:$0xff] }
  0x73   :  { %702 = vadd.xlane.f32.xlu1 %v701_v50  ;;  %699 = vadd.xlane.f32.xlu0 %v698_v51 }
  0x77   :  { %708 = vadd.xlane.f32.xlu1 %v707_v54  ;;  %705 = vadd.xlane.f32.xlu0 %v704_v55  ;;  %v100_v54 = vld [vmem:[%s15998_s0 + $0x2a8] sm:$0xff]  ;;  %v99_v55 = vld [vmem:[%s15998_s0 + $0x2a0] sm:$0xff] }
  0x7b   :  { %714 = vadd.xlane.f32.xlu1 %v713_v58  ;;  %711 = vadd.xlane.f32.xlu0 %v710_v59  ;;  %v785_v58 = vsel %vm529_vm0, %v100_v54, 0.0  ;;  %v782_v59 = vsel %vm529_vm0, %v99_v55, 0.0 }
  0x7f   :  { %720 = vadd.xlane.f32.xlu1 %v719_v62  ;;  %717 = vadd.xlane.f32.xlu0 %v716_v63 }
  0x83   :  { %726 = vadd.xlane.f32.xlu1 %v725_v2  ;;  %723 = vadd.xlane.f32.xlu0 %v722_v3  ;;  %v104_v2 = vld [vmem:[%s15998_s0 + $0x2c8] sm:$0xff]  ;;  %v103_v3 = vld [vmem:[%s15998_s0 + $0x2c0] sm:$0xff] }
  0x87   :  { %732 = vadd.xlane.f32.xlu1 %v731_v6  ;;  %729 = vadd.xlane.f32.xlu0 %v728_v7  ;;  %v797_v6 = vsel %vm529_vm0, %v104_v2, 0.0  ;;  %v794_v7 = vsel %vm529_vm0, %v103_v3, 0.0  ;;  %v839_v2 = vsel %vm529_vm0, %v118_v60, 0.0  ;;  %v836_v3 = vsel %vm529_vm0, %v117_v61, 0.0 }
  0x8b   :  { %738 = vadd.xlane.f32.xlu1 %v737_v10  ;;  %735 = vadd.xlane.f32.xlu0 %v734_v11 }
  0x8c   :  { %v8914_v14 = vpop.xlane.xlu1 %537  ;;  %v8916_v15 = vpop.xlane.xlu0 %531 }
  0x8f   :  { %744 = vadd.xlane.f32.xlu1 %v743_v16  ;;  %741 = vadd.xlane.f32.xlu0 %v740_v17  ;;  %v108_v16 = vld [vmem:[%s15998_s0 + $0x2e8] sm:$0xff]  ;;  %v107_v17 = vld [vmem:[%s15998_s0 + $0x2e0] sm:$0xff] }
  0x90   :  { %v8926_v20 = vpop.xlane.xlu1 %540  ;;  %v8928_v21 = vpop.xlane.xlu0 %534 }
  0x93   :  { %750 = vadd.xlane.f32.xlu1 %v749_v22  ;;  %747 = vadd.xlane.f32.xlu0 %v746_v23  ;;  %v809_v22 = vsel %vm529_vm0, %v108_v16, 0.0  ;;  %v806_v23 = vsel %vm529_vm0, %v107_v17, 0.0  ;;  %v122_v16 = vld [vmem:[%s15998_s0 + $0x358] sm:$0xff]  ;;  %v121_v17 = vld [vmem:[%s15998_s0 + $0x350] sm:$0xff] }
  0x94   :  { %v8938_v26 = vpop.xlane.xlu1 %546  ;;  %v8940_v27 = vpop.xlane.xlu0 %543  ;;  %v851_v24 = vsel %vm529_vm0, %v122_v16, 0.0  ;;  %v848_v25 = vsel %vm529_vm0, %v121_v17, 0.0 }
  0x97   :  { %756 = vadd.xlane.f32.xlu1 %v755_v28  ;;  %753 = vadd.xlane.f32.xlu0 %v752_v29 }
  0x98   :  { %v8950_v32 = vpop.xlane.xlu1 %552  ;;  %v8952_v33 = vpop.xlane.xlu0 %549 }
  0x9b   :  { %762 = vadd.xlane.f32.xlu1 %v761_v34  ;;  %759 = vadd.xlane.f32.xlu0 %v758_v35  ;;  %v112_v34 = vld [vmem:[%s15998_s0 + $0x308] sm:$0xff]  ;;  %v111_v35 = vld [vmem:[%s15998_s0 + $0x300] sm:$0xff] }
  0x9c   :  { %v8962_v38 = vpop.xlane.xlu1 %558  ;;  %v8964_v39 = vpop.xlane.xlu0 %555 }
  0x9f   :  { %768 = vadd.xlane.f32.xlu1 %v767_v40  ;;  %765 = vadd.xlane.f32.xlu0 %v764_v41  ;;  %v821_v40 = vsel %vm529_vm0, %v112_v34, 0.0  ;;  %v818_v41 = vsel %vm529_vm0, %v111_v35, 0.0 }
  0xa0   :  { %v8974_v44 = vpop.xlane.xlu1 %564  ;;  %v8976_v45 = vpop.xlane.xlu0 %561 }
  0xa3   :  { %774 = vadd.xlane.f32.xlu1 %v773_v46  ;;  %771 = vadd.xlane.f32.xlu0 %v770_v47 }
  0xa4   :  { %v8986_v50 = vpop.xlane.xlu1 %570  ;;  %v8988_v51 = vpop.xlane.xlu0 %567 }
  0xa7   :  { %780 = vadd.xlane.f32.xlu1 %v779_v52  ;;  %777 = vadd.xlane.f32.xlu0 %v776_v53  ;;  %v116_v52 = vld [vmem:[%s15998_s0 + $0x328] sm:$0xff]  ;;  %v115_v53 = vld [vmem:[%s15998_s0 + $0x320] sm:$0xff] }
  0xa8   :  { %v8998_v56 = vpop.xlane.xlu1 %576  ;;  %v9000_v57 = vpop.xlane.xlu0 %573 }
  0xab   :  { %786 = vadd.xlane.f32.xlu1 %v785_v58  ;;  %783 = vadd.xlane.f32.xlu0 %v782_v59  ;;  %v833_v58 = vsel %vm529_vm0, %v116_v52, 0.0  ;;  %v830_v59 = vsel %vm529_vm0, %v115_v53, 0.0  ;;  %v863_v52 = vsel %vm529_vm0, %v126_v42, 0.0  ;;  %v860_v53 = vsel %vm529_vm0, %v125_v43, 0.0  ;;  %v134_v42 = vld [vmem:[%s15998_s0 + $0x3b8] sm:$0xff]  ;;  %v133_v43 = vld [vmem:[%s15998_s0 + $0x3b0] sm:$0xff] }
  0xac   :  { %v9010_v62 = vpop.xlane.xlu1 %582  ;;  %v9012_v63 = vpop.xlane.xlu0 %579 }
  0xaf   :  { %792 = vadd.xlane.f32.xlu1 %v791_v0  ;;  %789 = vadd.xlane.f32.xlu0 %v788_v1 }
  0xb0   :  { %v9022_v4 = vpop.xlane.xlu1 %588  ;;  %v9024_v5 = vpop.xlane.xlu0 %585 }
  0xb3   :  { %798 = vadd.xlane.f32.xlu1 %v797_v6  ;;  %795 = vadd.xlane.f32.xlu0 %v794_v7  ;;  %v120_v6 = vld [vmem:[%s15998_s0 + $0x348] sm:$0xff]  ;;  %v119_v7 = vld [vmem:[%s15998_s0 + $0x340] sm:$0xff] }
  0xb4   :  { %v9034_v10 = vpop.xlane.xlu1 %594  ;;  %v9036_v11 = vpop.xlane.xlu0 %591 }
  0xb7   :  { %804 = vadd.xlane.f32.xlu1 %v803_v12  ;;  %801 = vadd.xlane.f32.xlu0 %v800_v13  ;;  %v845_v12 = vsel %vm529_vm0, %v120_v6, 0.0  ;;  %v842_v13 = vsel %vm529_vm0, %v119_v7, 0.0  ;;  %v130_v6 = vld [vmem:[%s15998_s0 + $0x398] sm:$0xff]  ;;  %v129_v7 = vld [vmem:[%s15998_s0 + $0x390] sm:$0xff] }
  0xb8   :  { %v9046_v18 = vpop.xlane.xlu1 %600  ;;  %v9048_v19 = vpop.xlane.xlu0 %597  ;;  %v875_v16 = vsel %vm529_vm0, %v130_v6, 0.0  ;;  %v872_v17 = vsel %vm529_vm0, %v129_v7, 0.0 }
  0xbb   :  { %810 = vadd.xlane.f32.xlu1 %v809_v22  ;;  %807 = vadd.xlane.f32.xlu0 %v806_v23 }
  0xbc   :  { %v9058_v28 = vpop.xlane.xlu1 %606  ;;  %v9060_v29 = vpop.xlane.xlu0 %603 }
  0xbf   :  { %816 = vadd.xlane.f32.xlu1 %v815_v30  ;;  %813 = vadd.xlane.f32.xlu0 %v812_v31  ;;  %v124_v30 = vld [vmem:[%s15998_s0 + $0x368] sm:$0xff]  ;;  %v123_v31 = vld [vmem:[%s15998_s0 + $0x360] sm:$0xff] }
  0xc0   :  { %v9070_v36 = vpop.xlane.xlu1 %612  ;;  %v9072_v37 = vpop.xlane.xlu0 %609 }
  0xc1   :  { %16262 = vst [vmem:[#allocation3_spill] sm:$0xff] %v9070_v36  ;;  %16263 = vst [vmem:[#allocation4_spill] sm:$0xff] %v9072_v37 }
  0xc3   :  { %822 = vadd.xlane.f32.xlu1 %v821_v40  ;;  %819 = vadd.xlane.f32.xlu0 %v818_v41  ;;  %v857_v40 = vsel %vm529_vm0, %v124_v30, 0.0  ;;  %v854_v41 = vsel %vm529_vm0, %v123_v31, 0.0 }
  0xc4   :  { %v9082_v46 = vpop.xlane.xlu1 %618  ;;  %v9084_v47 = vpop.xlane.xlu0 %615 }
  0xc5   :  { %16264 = vst [vmem:[#allocation5_spill] sm:$0xff] %v9082_v46  ;;  %16265 = vst [vmem:[#allocation6_spill] sm:$0xff] %v9084_v47 }
  0xc7   :  { %828 = vadd.xlane.f32.xlu1 %v827_v48  ;;  %825 = vadd.xlane.f32.xlu0 %v824_v49 }
  0xc8   :  { %v9094_v54 = vpop.xlane.xlu1 %624  ;;  %v9096_v55 = vpop.xlane.xlu0 %621 }
  0xc9   :  { %16266 = vst [vmem:[#allocation7_spill] sm:$0xff] %v9094_v54  ;;  %16267 = vst [vmem:[#allocation8_spill] sm:$0xff] %v9096_v55 }
  0xcb   :  { %834 = vadd.xlane.f32.xlu1 %v833_v58  ;;  %831 = vadd.xlane.f32.xlu0 %v830_v59  ;;  %v128_v58 = vld [vmem:[%s15998_s0 + $0x388] sm:$0xff]  ;;  %v127_v59 = vld [vmem:[%s15998_s0 + $0x380] sm:$0xff] }
  0xcc   :  { %v9106_v0 = vpop.xlane.xlu1 %630  ;;  %v9108_v1 = vpop.xlane.xlu0 %627 }
  0xcd   :  { %16268 = vst [vmem:[#allocation9_spill] sm:$0xff] %v9106_v0  ;;  %16269 = vst [vmem:[#allocation10_spill] sm:$0xff] %v9108_v1 }
  0xcf   :  { %840 = vadd.xlane.f32.xlu1 %v839_v2  ;;  %837 = vadd.xlane.f32.xlu0 %v836_v3  ;;  %v869_v2 = vsel %vm529_vm0, %v128_v58, 0.0  ;;  %v866_v3 = vsel %vm529_vm0, %v127_v59, 0.0  ;;  %v887_v58 = vsel %vm529_vm0, %v134_v42, 0.0  ;;  %v884_v59 = vsel %vm529_vm0, %v133_v43, 0.0 }
  0xd0   :  { %v9118_v8 = vpop.xlane.xlu1 %636  ;;  %v9120_v9 = vpop.xlane.xlu0 %633 }
  0xd1   :  { %16270 = vst [vmem:[#allocation11_spill] sm:$0xff] %v9118_v8  ;;  %16271 = vst [vmem:[#allocation12_spill] sm:$0xff] %v9120_v9 }
  0xd3   :  { %846 = vadd.xlane.f32.xlu1 %v845_v12  ;;  %843 = vadd.xlane.f32.xlu0 %v842_v13 }
  0xd4   :  { %v9130_v22 = vpop.xlane.xlu1 %642  ;;  %v9132_v23 = vpop.xlane.xlu0 %639 }
  0xd5   :  { %16272 = vst [vmem:[#allocation13_spill] sm:$0xff] %v9130_v22  ;;  %16273 = vst [vmem:[#allocation14_spill] sm:$0xff] %v9132_v23 }
  0xd7   :  { %852 = vadd.xlane.f32.xlu1 %v851_v24  ;;  %849 = vadd.xlane.f32.xlu0 %v848_v25  ;;  %v132_v24 = vld [vmem:[%s15998_s0 + $0x3a8] sm:$0xff]  ;;  %v131_v25 = vld [vmem:[%s15998_s0 + $0x3a0] sm:$0xff] }
  0xd8   :  { %v9142_v34 = vpop.xlane.xlu1 %648  ;;  %v9144_v35 = vpop.xlane.xlu0 %645 }
  0xd9   :  { %16274 = vst [vmem:[#allocation15_spill] sm:$0xff] %v9142_v34  ;;  %16275 = vst [vmem:[#allocation16_spill] sm:$0xff] %v9144_v35 }
  0xdb   :  { %858 = vadd.xlane.f32.xlu1 %v857_v40  ;;  %855 = vadd.xlane.f32.xlu0 %v854_v41  ;;  %v881_v40 = vsel %vm529_vm0, %v132_v24, 0.0  ;;  %v878_v41 = vsel %vm529_vm0, %v131_v25, 0.0  ;;  %v138_v24 = vld [vmem:[%s15998_s0 + $0x3d8] sm:$0xff]  ;;  %v137_v25 = vld [vmem:[%s15998_s0 + $0x3d0] sm:$0xff] }
  0xdc   :  { %v9154_v48 = vpop.xlane.xlu1 %654  ;;  %v9156_v49 = vpop.xlane.xlu0 %651  ;;  %v899_v42 = vsel %vm529_vm0, %v138_v24, 0.0  ;;  %v896_v43 = vsel %vm529_vm0, %v137_v25, 0.0  ;;  %v142_v24 = vld [vmem:[%s15998_s0 + $0x3f8] sm:$0xff]  ;;  %v141_v25 = vld [vmem:[%s15998_s0 + $0x3f0] sm:$0xff] }
  0xdd   :  { %16276 = vst [vmem:[#allocation17_spill] sm:$0xff] %v9154_v48  ;;  %16277 = vst [vmem:[#allocation18_spill] sm:$0xff] %v9156_v49 }
  0xdf   :  { %864 = vadd.xlane.f32.xlu1 %v863_v52  ;;  %861 = vadd.xlane.f32.xlu0 %v860_v53 }
  0xe0   :  { %v9166_v60 = vpop.xlane.xlu1 %660  ;;  %v9168_v61 = vpop.xlane.xlu0 %657 }
  0xe1   :  { %16278 = vst [vmem:[#allocation19_spill] sm:$0xff] %v9166_v60  ;;  %16279 = vst [vmem:[#allocation20_spill] sm:$0xff] %v9168_v61 }
  0xe3   :  { %870 = vadd.xlane.f32.xlu1 %v869_v2  ;;  %867 = vadd.xlane.f32.xlu0 %v866_v3  ;;  %v136_v2 = vld [vmem:[%s15998_s0 + $0x3c8] sm:$0xff]  ;;  %v135_v3 = vld [vmem:[%s15998_s0 + $0x3c0] sm:$0xff] }
  0xe4   :  { %v9178_v12 = vpop.xlane.xlu1 %666  ;;  %v9180_v13 = vpop.xlane.xlu0 %663 }
  0xe5   :  { %16280 = vst [vmem:[#allocation21_spill] sm:$0xff] %v9178_v12  ;;  %16281 = vst [vmem:[#allocation22_spill] sm:$0xff] %v9180_v13 }
  0xe7   :  { %876 = vadd.xlane.f32.xlu1 %v875_v16  ;;  %873 = vadd.xlane.f32.xlu0 %v872_v17  ;;  %v893_v16 = vsel %vm529_vm0, %v136_v2, 0.0  ;;  %v890_v17 = vsel %vm529_vm0, %v135_v3, 0.0 }
  0xe8   :  { %v9190_v30 = vpop.xlane.xlu1 %672  ;;  %v9192_v31 = vpop.xlane.xlu0 %669 }
  0xe9   :  { %16282 = vst [vmem:[#allocation23_spill] sm:$0xff] %v9190_v30  ;;  %16283 = vst [vmem:[#allocation24_spill] sm:$0xff] %v9192_v31 }
  0xeb   :  { %882 = vadd.xlane.f32.xlu1 %v881_v40  ;;  %879 = vadd.xlane.f32.xlu0 %v878_v41 }
  0xec   :  { %v9202_v52 = vpop.xlane.xlu1 %678  ;;  %v9204_v53 = vpop.xlane.xlu0 %675 }
  0xed   :  { %16284 = vst [vmem:[#allocation25_spill] sm:$0xff] %v9202_v52  ;;  %16285 = vst [vmem:[#allocation26_spill] sm:$0xff] %v9204_v53 }
  0xef   :  { %888 = vadd.xlane.f32.xlu1 %v887_v58  ;;  %885 = vadd.xlane.f32.xlu0 %v884_v59  ;;  %v140_v58 = vld [vmem:[%s15998_s0 + $0x3e8] sm:$0xff]  ;;  %v139_v59 = vld [vmem:[%s15998_s0 + $0x3e0] sm:$0xff] }
  0xf0   :  { %v9214_v6 = vpop.xlane.xlu1 %684  ;;  %v9216_v7 = vpop.xlane.xlu0 %681 }
  0xf1   :  { %16286 = vst [vmem:[#allocation27_spill] sm:$0xff] %v9214_v6  ;;  %16287 = vst [vmem:[#allocation28_spill] sm:$0xff] %v9216_v7 }
  0xf3   :  { %894 = vadd.xlane.f32.xlu1 %v893_v16  ;;  %891 = vadd.xlane.f32.xlu0 %v890_v17  ;;  %v905_v16 = vsel %vm529_vm0, %v140_v58, 0.0  ;;  %v902_v17 = vsel %vm529_vm0, %v139_v59, 0.0  ;;  %v908_v58 = vsel %vm529_vm0, %v141_v25, 0.0  ;;  %v144_v59 = vld [vmem:[%s15998_s0 + $0x408] sm:$0xff]  ;;  %v146_v25 = vld [vmem:[%s15998_s0 + $0x418] sm:$0xff] }
  0xf4   :  { %v9226_v40 = vpop.xlane.xlu1 %690  ;;  %v9228_v41 = vpop.xlane.xlu0 %687 }
  0xf5   :  { %16288 = vst [vmem:[#allocation29_spill] sm:$0xff] %v9226_v40  ;;  %16289 = vst [vmem:[#allocation30_spill] sm:$0xff] %v9228_v41  ;;  %v16002_v41 = vlaneseq }
  0xf7   :  { %900 = vadd.xlane.f32.xlu1 %v899_v42  ;;  %897 = vadd.xlane.f32.xlu0 %v896_v43 }
  0xf8   :  { %v9238_v2 = vpop.xlane.xlu1 %696  ;;  %v9240_v3 = vpop.xlane.xlu0 %693 }
  0xf9   :  { %16290 = vst [vmem:[#allocation31_spill] sm:$0xff] %v9238_v2  ;;  %16291 = vst [vmem:[#allocation32_spill] sm:$0xff] %v9240_v3  ;;  %v911_v3 = vsel %vm529_vm0, %v142_v24, 0.0  ;;  %v143_v2 = vld [vmem:[%s15998_s0 + $0x400] sm:$0xff] }
  0xfa   :  { %v914_v24 = vsel %vm529_vm0, %v143_v2, 0.0  ;;  %v148_v2 = vld [vmem:[%s15998_s0 + $0x428] sm:$0xff] }
  0xfb   :  { %906 = vadd.xlane.f32.xlu1 %v905_v16  ;;  %903 = vadd.xlane.f32.xlu0 %v902_v17 }
  0xfc   :  { %v9250_v42 = vpop.xlane.xlu1 %702  ;;  %v9252_v43 = vpop.xlane.xlu0 %699 }
  0xfd   :  { %16292 = vst [vmem:[#allocation33_spill] sm:$0xff] %v9250_v42  ;;  %16293 = vst [vmem:[#allocation34_spill] sm:$0xff] %v9252_v43  ;;  %v917_v43 = vsel %vm529_vm0, %v144_v59, 0.0  ;;  %v145_v42 = vld [vmem:[%s15998_s0 + $0x410] sm:$0xff] }
  0xfe   :  { %v920_v59 = vsel %vm529_vm0, %v145_v42, 0.0  ;;  %v150_v42 = vld [vmem:[%s15998_s0 + $0x438] sm:$0xff] }
  0xff   :  { %912 = vadd.xlane.f32.xlu1 %v911_v3  ;;  %909 = vadd.xlane.f32.xlu0 %v908_v58 }
 0x100   :  { %v9262_v16 = vpop.xlane.xlu1 %708  ;;  %v9264_v17 = vpop.xlane.xlu0 %705 }
 0x101   :  { %16294 = vst [vmem:[#allocation35_spill] sm:$0xff] %v9262_v16  ;;  %16295 = vst [vmem:[#allocation36_spill] sm:$0xff] %v9264_v17  ;;  %v923_v17 = vsel %vm529_vm0, %v146_v25, 0.0  ;;  %v147_v16 = vld [vmem:[%s15998_s0 + $0x420] sm:$0xff] }
 0x102   :  { %v926_v25 = vsel %vm529_vm0, %v147_v16, 0.0  ;;  %v152_v16 = vld [vmem:[%s15998_s0 + $0x448] sm:$0xff] }
 0x103   :  { %918 = vadd.xlane.f32.xlu1 %v917_v43  ;;  %915 = vadd.xlane.f32.xlu0 %v914_v24 }
 0x104   :  { %v9274_v3 = vpop.xlane.xlu1 %714  ;;  %v9276_v58 = vpop.xlane.xlu0 %711 }
 0x105   :  { %16296 = vst [vmem:[#allocation37_spill] sm:$0xff] %v9274_v3  ;;  %16297 = vst [vmem:[#allocation38_spill] sm:$0xff] %v9276_v58  ;;  %v929_v58 = vsel %vm529_vm0, %v148_v2, 0.0  ;;  %v149_v3 = vld [vmem:[%s15998_s0 + $0x430] sm:$0xff] }
 0x106   :  { %v932_v2 = vsel %vm529_vm0, %v149_v3, 0.0  ;;  %v154_v3 = vld [vmem:[%s15998_s0 + $0x458] sm:$0xff] }
 0x107   :  { %924 = vadd.xlane.f32.xlu1 %v923_v17  ;;  %921 = vadd.xlane.f32.xlu0 %v920_v59 }
 0x108   :  { %v9286_v43 = vpop.xlane.xlu1 %720  ;;  %v9288_v24 = vpop.xlane.xlu0 %717 }
 0x109   :  { %16298 = vst [vmem:[#allocation39_spill] sm:$0xff] %v9286_v43  ;;  %16299 = vst [vmem:[#allocation40_spill] sm:$0xff] %v9288_v24  ;;  %v935_v24 = vsel %vm529_vm0, %v150_v42, 0.0  ;;  %v151_v43 = vld [vmem:[%s15998_s0 + $0x440] sm:$0xff] }
 0x10a   :  { %v938_v42 = vsel %vm529_vm0, %v151_v43, 0.0  ;;  %v156_v43 = vld [vmem:[%s15998_s0 + $0x468] sm:$0xff] }
 0x10b   :  { %930 = vadd.xlane.f32.xlu1 %v929_v58  ;;  %927 = vadd.xlane.f32.xlu0 %v926_v25 }
 0x10c   :  { %v9298_v17 = vpop.xlane.xlu1 %726  ;;  %v9300_v59 = vpop.xlane.xlu0 %723 }
 0x10d   :  { %16300 = vst [vmem:[#allocation41_spill] sm:$0xff] %v9298_v17  ;;  %16301 = vst [vmem:[#allocation42_spill] sm:$0xff] %v9300_v59  ;;  %v941_v59 = vsel %vm529_vm0, %v152_v16, 0.0  ;;  %v153_v17 = vld [vmem:[%s15998_s0 + $0x450] sm:$0xff] }
 0x10e   :  { %v944_v16 = vsel %vm529_vm0, %v153_v17, 0.0  ;;  %v158_v17 = vld [vmem:[%s15998_s0 + $0x478] sm:$0xff] }
 0x10f   :  { %936 = vadd.xlane.f32.xlu1 %v935_v24  ;;  %933 = vadd.xlane.f32.xlu0 %v932_v2 }
 0x110   :  { %v9310_v58 = vpop.xlane.xlu1 %732  ;;  %v9312_v25 = vpop.xlane.xlu0 %729 }
 0x111   :  { %16302 = vst [vmem:[#allocation43_spill] sm:$0xff] %v9310_v58  ;;  %16303 = vst [vmem:[#allocation44_spill] sm:$0xff] %v9312_v25  ;;  %v947_v25 = vsel %vm529_vm0, %v154_v3, 0.0  ;;  %v155_v58 = vld [vmem:[%s15998_s0 + $0x460] sm:$0xff] }
 0x112   :  { %v950_v3 = vsel %vm529_vm0, %v155_v58, 0.0  ;;  %v160_v58 = vld [vmem:[%s15998_s0 + $0x488] sm:$0xff] }
 0x113   :  { %942 = vadd.xlane.f32.xlu1 %v941_v59  ;;  %939 = vadd.xlane.f32.xlu0 %v938_v42 }
 0x114   :  { %v9322_v24 = vpop.xlane.xlu1 %738  ;;  %v9324_v2 = vpop.xlane.xlu0 %735 }
 0x115   :  { %16304 = vst [vmem:[#allocation45_spill] sm:$0xff] %v9322_v24  ;;  %16305 = vst [vmem:[#allocation46_spill] sm:$0xff] %v9324_v2  ;;  %v953_v2 = vsel %vm529_vm0, %v156_v43, 0.0  ;;  %v157_v24 = vld [vmem:[%s15998_s0 + $0x470] sm:$0xff] }
 0x116   :  { %v956_v43 = vsel %vm529_vm0, %v157_v24, 0.0  ;;  %v162_v24 = vld [vmem:[%s15998_s0 + $0x498] sm:$0xff] }
 0x117   :  { %948 = vadd.xlane.f32.xlu1 %v947_v25  ;;  %945 = vadd.xlane.f32.xlu0 %v944_v16 }
 0x118   :  { %v9334_v59 = vpop.xlane.xlu1 %744  ;;  %v9336_v42 = vpop.xlane.xlu0 %741 }
 0x119   :  { %16306 = vst [vmem:[#allocation47_spill] sm:$0xff] %v9334_v59  ;;  %16307 = vst [vmem:[#allocation48_spill] sm:$0xff] %v9336_v42  ;;  %v959_v42 = vsel %vm529_vm0, %v158_v17, 0.0  ;;  %v159_v59 = vld [vmem:[%s15998_s0 + $0x480] sm:$0xff] }
 0x11a   :  { %v962_v17 = vsel %vm529_vm0, %v159_v59, 0.0  ;;  %v164_v59 = vld [vmem:[%s15998_s0 + $0x4a8] sm:$0xff] }
 0x11b   :  { %954 = vadd.xlane.f32.xlu1 %v953_v2  ;;  %951 = vadd.xlane.f32.xlu0 %v950_v3 }
 0x11c   :  { %v9346_v25 = vpop.xlane.xlu1 %750  ;;  %v9348_v16 = vpop.xlane.xlu0 %747 }
 0x11d   :  { %16308 = vst [vmem:[#allocation49_spill] sm:$0xff] %v9346_v25  ;;  %16309 = vst [vmem:[#allocation50_spill] sm:$0xff] %v9348_v16  ;;  %v965_v16 = vsel %vm529_vm0, %v160_v58, 0.0  ;;  %v161_v25 = vld [vmem:[%s15998_s0 + $0x490] sm:$0xff] }
 0x11e   :  { %v968_v58 = vsel %vm529_vm0, %v161_v25, 0.0  ;;  %v166_v25 = vld [vmem:[%s15998_s0 + $0x4b8] sm:$0xff] }
 0x11f   :  { %960 = vadd.xlane.f32.xlu1 %v959_v42  ;;  %957 = vadd.xlane.f32.xlu0 %v956_v43 }
 0x120   :  { %v9358_v2 = vpop.xlane.xlu1 %756  ;;  %v9360_v3 = vpop.xlane.xlu0 %753 }
 0x121   :  { %16310 = vst [vmem:[#allocation51_spill] sm:$0xff] %v9358_v2  ;;  %16311 = vst [vmem:[#allocation52_spill] sm:$0xff] %v9360_v3  ;;  %v971_v3 = vsel %vm529_vm0, %v162_v24, 0.0  ;;  %v163_v2 = vld [vmem:[%s15998_s0 + $0x4a0] sm:$0xff] }
 0x122   :  { %v974_v24 = vsel %vm529_vm0, %v163_v2, 0.0  ;;  %v168_v2 = vld [vmem:[%s15998_s0 + $0x4c8] sm:$0xff] }
 0x123   :  { %966 = vadd.xlane.f32.xlu1 %v965_v16  ;;  %963 = vadd.xlane.f32.xlu0 %v962_v17 }
 0x124   :  { %v9370_v42 = vpop.xlane.xlu1 %762  ;;  %v9372_v43 = vpop.xlane.xlu0 %759 }
 0x125   :  { %16312 = vst [vmem:[#allocation53_spill] sm:$0xff] %v9370_v42  ;;  %16313 = vst [vmem:[#allocation54_spill] sm:$0xff] %v9372_v43  ;;  %v977_v43 = vsel %vm529_vm0, %v164_v59, 0.0  ;;  %v165_v42 = vld [vmem:[%s15998_s0 + $0x4b0] sm:$0xff] }
 0x126   :  { %v980_v59 = vsel %vm529_vm0, %v165_v42, 0.0  ;;  %v170_v42 = vld [vmem:[%s15998_s0 + $0x4d8] sm:$0xff] }
 0x127   :  { %972 = vadd.xlane.f32.xlu1 %v971_v3  ;;  %969 = vadd.xlane.f32.xlu0 %v968_v58 }
 0x128   :  { %v9382_v16 = vpop.xlane.xlu1 %768  ;;  %v9384_v17 = vpop.xlane.xlu0 %765 }
 0x129   :  { %16314 = vst [vmem:[#allocation55_spill] sm:$0xff] %v9382_v16  ;;  %16315 = vst [vmem:[#allocation56_spill] sm:$0xff] %v9384_v17  ;;  %v983_v17 = vsel %vm529_vm0, %v166_v25, 0.0  ;;  %v167_v16 = vld [vmem:[%s15998_s0 + $0x4c0] sm:$0xff] }
 0x12a   :  { %v986_v25 = vsel %vm529_vm0, %v167_v16, 0.0  ;;  %v172_v16 = vld [vmem:[%s15998_s0 + $0x4e8] sm:$0xff] }
 0x12b   :  { %978 = vadd.xlane.f32.xlu1 %v977_v43  ;;  %975 = vadd.xlane.f32.xlu0 %v974_v24 }
 0x12c   :  { %v9394_v3 = vpop.xlane.xlu1 %774  ;;  %v9396_v58 = vpop.xlane.xlu0 %771 }
 0x12d   :  { %16316 = vst [vmem:[#allocation57_spill] sm:$0xff] %v9394_v3  ;;  %16317 = vst [vmem:[#allocation58_spill] sm:$0xff] %v9396_v58  ;;  %v989_v58 = vsel %vm529_vm0, %v168_v2, 0.0  ;;  %v169_v3 = vld [vmem:[%s15998_s0 + $0x4d0] sm:$0xff] }
 0x12e   :  { %v992_v2 = vsel %vm529_vm0, %v169_v3, 0.0  ;;  %v174_v3 = vld [vmem:[%s15998_s0 + $0x4f8] sm:$0xff] }
 0x12f   :  { %984 = vadd.xlane.f32.xlu1 %v983_v17  ;;  %981 = vadd.xlane.f32.xlu0 %v980_v59 }
 0x130   :  { %v9406_v43 = vpop.xlane.xlu1 %780  ;;  %v9408_v24 = vpop.xlane.xlu0 %777 }
 0x131   :  { %16318 = vst [vmem:[#allocation59_spill] sm:$0xff] %v9406_v43  ;;  %16319 = vst [vmem:[#allocation60_spill] sm:$0xff] %v9408_v24  ;;  %v995_v24 = vsel %vm529_vm0, %v170_v42, 0.0  ;;  %v171_v43 = vld [vmem:[%s15998_s0 + $0x4e0] sm:$0xff] }
 0x132   :  { %v998_v42 = vsel %vm529_vm0, %v171_v43, 0.0  ;;  %v176_v43 = vld [vmem:[%s15998_s0 + $0x508] sm:$0xff] }
 0x133   :  { %990 = vadd.xlane.f32.xlu1 %v989_v58  ;;  %987 = vadd.xlane.f32.xlu0 %v986_v25 }
 0x134   :  { %v9418_v17 = vpop.xlane.xlu1 %786  ;;  %v9420_v59 = vpop.xlane.xlu0 %783 }
 0x135   :  { %16320 = vst [vmem:[#allocation61_spill] sm:$0xff] %v9418_v17  ;;  %16321 = vst [vmem:[#allocation62_spill] sm:$0xff] %v9420_v59  ;;  %v1001_v59 = vsel %vm529_vm0, %v172_v16, 0.0  ;;  %v173_v17 = vld [vmem:[%s15998_s0 + $0x4f0] sm:$0xff] }
 0x136   :  { %v1004_v16 = vsel %vm529_vm0, %v173_v17, 0.0  ;;  %v178_v17 = vld [vmem:[%s15998_s0 + $0x518] sm:$0xff] }
 0x137   :  { %996 = vadd.xlane.f32.xlu1 %v995_v24  ;;  %993 = vadd.xlane.f32.xlu0 %v992_v2 }
 0x138   :  { %v9430_v58 = vpop.xlane.xlu1 %792  ;;  %v9432_v25 = vpop.xlane.xlu0 %789 }
 0x139   :  { %16322 = vst [vmem:[#allocation63_spill] sm:$0xff] %v9430_v58  ;;  %16323 = vst [vmem:[#allocation64_spill] sm:$0xff] %v9432_v25  ;;  %v1007_v25 = vsel %vm529_vm0, %v174_v3, 0.0  ;;  %v175_v58 = vld [vmem:[%s15998_s0 + $0x500] sm:$0xff] }
 0x13a   :  { %v1010_v3 = vsel %vm529_vm0, %v175_v58, 0.0  ;;  %v180_v58 = vld [vmem:[%s15998_s0 + $0x528] sm:$0xff] }
 0x13b   :  { %1002 = vadd.xlane.f32.xlu1 %v1001_v59  ;;  %999 = vadd.xlane.f32.xlu0 %v998_v42 }
 0x13c   :  { %v9442_v24 = vpop.xlane.xlu1 %798  ;;  %v9444_v2 = vpop.xlane.xlu0 %795 }
 0x13d   :  { %16324 = vst [vmem:[#allocation65_spill] sm:$0xff] %v9442_v24  ;;  %16325 = vst [vmem:[#allocation66_spill] sm:$0xff] %v9444_v2  ;;  %v1013_v2 = vsel %vm529_vm0, %v176_v43, 0.0  ;;  %v177_v24 = vld [vmem:[%s15998_s0 + $0x510] sm:$0xff] }
 0x13e   :  { %v1016_v43 = vsel %vm529_vm0, %v177_v24, 0.0  ;;  %v182_v24 = vld [vmem:[%s15998_s0 + $0x538] sm:$0xff] }
 0x13f   :  { %1008 = vadd.xlane.f32.xlu1 %v1007_v25  ;;  %1005 = vadd.xlane.f32.xlu0 %v1004_v16 }
 0x140   :  { %v9454_v59 = vpop.xlane.xlu1 %804  ;;  %v9456_v42 = vpop.xlane.xlu0 %801 }
 0x141   :  { %16326 = vst [vmem:[#allocation67_spill] sm:$0xff] %v9454_v59  ;;  %16327 = vst [vmem:[#allocation68_spill] sm:$0xff] %v9456_v42  ;;  %v1019_v42 = vsel %vm529_vm0, %v178_v17, 0.0  ;;  %v179_v59 = vld [vmem:[%s15998_s0 + $0x520] sm:$0xff] }
 0x142   :  { %v1022_v17 = vsel %vm529_vm0, %v179_v59, 0.0  ;;  %v184_v59 = vld [vmem:[%s15998_s0 + $0x548] sm:$0xff] }
 0x143   :  { %1014 = vadd.xlane.f32.xlu1 %v1013_v2  ;;  %1011 = vadd.xlane.f32.xlu0 %v1010_v3 }
 0x144   :  { %v9466_v25 = vpop.xlane.xlu1 %810  ;;  %v9468_v16 = vpop.xlane.xlu0 %807 }
 0x145   :  { %16328 = vst [vmem:[#allocation69_spill] sm:$0xff] %v9466_v25  ;;  %16329 = vst [vmem:[#allocation70_spill] sm:$0xff] %v9468_v16  ;;  %v1025_v16 = vsel %vm529_vm0, %v180_v58, 0.0  ;;  %v181_v25 = vld [vmem:[%s15998_s0 + $0x530] sm:$0xff] }
 0x146   :  { %v1028_v58 = vsel %vm529_vm0, %v181_v25, 0.0  ;;  %v186_v25 = vld [vmem:[%s15998_s0 + $0x558] sm:$0xff] }
 0x147   :  { %1020 = vadd.xlane.f32.xlu1 %v1019_v42  ;;  %1017 = vadd.xlane.f32.xlu0 %v1016_v43 }
 0x148   :  { %v9478_v2 = vpop.xlane.xlu1 %816  ;;  %v9480_v3 = vpop.xlane.xlu0 %813 }
 0x149   :  { %16330 = vst [vmem:[#allocation71_spill] sm:$0xff] %v9478_v2  ;;  %16331 = vst [vmem:[#allocation72_spill] sm:$0xff] %v9480_v3  ;;  %v1031_v3 = vsel %vm529_vm0, %v182_v24, 0.0  ;;  %v183_v2 = vld [vmem:[%s15998_s0 + $0x540] sm:$0xff] }
 0x14a   :  { %v1034_v24 = vsel %vm529_vm0, %v183_v2, 0.0  ;;  %v188_v2 = vld [vmem:[%s15998_s0 + $0x568] sm:$0xff] }
 0x14b   :  { %1026 = vadd.xlane.f32.xlu1 %v1025_v16  ;;  %1023 = vadd.xlane.f32.xlu0 %v1022_v17 }
 0x14c   :  { %v9490_v42 = vpop.xlane.xlu1 %822  ;;  %v9492_v43 = vpop.xlane.xlu0 %819 }
 0x14d   :  { %16332 = vst [vmem:[#allocation73_spill] sm:$0xff] %v9490_v42  ;;  %16333 = vst [vmem:[#allocation74_spill] sm:$0xff] %v9492_v43  ;;  %v1037_v43 = vsel %vm529_vm0, %v184_v59, 0.0  ;;  %v185_v42 = vld [vmem:[%s15998_s0 + $0x550] sm:$0xff] }
 0x14e   :  { %v1040_v59 = vsel %vm529_vm0, %v185_v42, 0.0  ;;  %v190_v42 = vld [vmem:[%s15998_s0 + $0x578] sm:$0xff] }
 0x14f   :  { %1032 = vadd.xlane.f32.xlu1 %v1031_v3  ;;  %1029 = vadd.xlane.f32.xlu0 %v1028_v58 }
 0x150   :  { %v9502_v16 = vpop.xlane.xlu1 %828  ;;  %v9504_v17 = vpop.xlane.xlu0 %825 }
 0x151   :  { %16334 = vst [vmem:[#allocation75_spill] sm:$0xff] %v9502_v16  ;;  %16335 = vst [vmem:[#allocation76_spill] sm:$0xff] %v9504_v17  ;;  %v1043_v17 = vsel %vm529_vm0, %v186_v25, 0.0  ;;  %v187_v16 = vld [vmem:[%s15998_s0 + $0x560] sm:$0xff] }
 0x152   :  { %v1046_v25 = vsel %vm529_vm0, %v187_v16, 0.0  ;;  %v192_v16 = vld [vmem:[%s15998_s0 + $0x588] sm:$0xff] }
 0x153   :  { %1038 = vadd.xlane.f32.xlu1 %v1037_v43  ;;  %1035 = vadd.xlane.f32.xlu0 %v1034_v24 }
 0x154   :  { %v9514_v3 = vpop.xlane.xlu1 %834  ;;  %v9516_v58 = vpop.xlane.xlu0 %831 }
 0x155   :  { %16336 = vst [vmem:[#allocation77_spill] sm:$0xff] %v9514_v3  ;;  %16337 = vst [vmem:[#allocation78_spill] sm:$0xff] %v9516_v58  ;;  %v1049_v58 = vsel %vm529_vm0, %v188_v2, 0.0  ;;  %v189_v3 = vld [vmem:[%s15998_s0 + $0x570] sm:$0xff] }
 0x156   :  { %v1052_v2 = vsel %vm529_vm0, %v189_v3, 0.0  ;;  %v194_v3 = vld [vmem:[%s15998_s0 + $0x598] sm:$0xff] }
 0x157   :  { %1044 = vadd.xlane.f32.xlu1 %v1043_v17  ;;  %1041 = vadd.xlane.f32.xlu0 %v1040_v59 }
 0x158   :  { %v9526_v43 = vpop.xlane.xlu1 %840  ;;  %v9528_v24 = vpop.xlane.xlu0 %837 }
 0x159   :  { %16338 = vst [vmem:[#allocation79_spill] sm:$0xff] %v9526_v43  ;;  %16339 = vst [vmem:[#allocation80_spill] sm:$0xff] %v9528_v24  ;;  %v1055_v24 = vsel %vm529_vm0, %v190_v42, 0.0  ;;  %v191_v43 = vld [vmem:[%s15998_s0 + $0x580] sm:$0xff] }
 0x15a   :  { %v1058_v42 = vsel %vm529_vm0, %v191_v43, 0.0  ;;  %v196_v43 = vld [vmem:[%s15998_s0 + $0x5a8] sm:$0xff] }
 0x15b   :  { %1050 = vadd.xlane.f32.xlu1 %v1049_v58  ;;  %1047 = vadd.xlane.f32.xlu0 %v1046_v25 }
 0x15c   :  { %v9538_v17 = vpop.xlane.xlu1 %846  ;;  %v9540_v59 = vpop.xlane.xlu0 %843 }
 0x15d   :  { %16340 = vst [vmem:[#allocation81_spill] sm:$0xff] %v9538_v17  ;;  %16341 = vst [vmem:[#allocation82_spill] sm:$0xff] %v9540_v59  ;;  %v1061_v59 = vsel %vm529_vm0, %v192_v16, 0.0  ;;  %v193_v17 = vld [vmem:[%s15998_s0 + $0x590] sm:$0xff] }
 0x15e   :  { %v1064_v16 = vsel %vm529_vm0, %v193_v17, 0.0  ;;  %v198_v17 = vld [vmem:[%s15998_s0 + $0x5b8] sm:$0xff] }
 0x15f   :  { %1056 = vadd.xlane.f32.xlu1 %v1055_v24  ;;  %1053 = vadd.xlane.f32.xlu0 %v1052_v2 }
 0x160   :  { %v9550_v58 = vpop.xlane.xlu1 %852  ;;  %v9552_v25 = vpop.xlane.xlu0 %849 }
 0x161   :  { %16342 = vst [vmem:[#allocation83_spill] sm:$0xff] %v9550_v58  ;;  %16343 = vst [vmem:[#allocation84_spill] sm:$0xff] %v9552_v25  ;;  %v1067_v25 = vsel %vm529_vm0, %v194_v3, 0.0  ;;  %v195_v58 = vld [vmem:[%s15998_s0 + $0x5a0] sm:$0xff] }
 0x162   :  { %v1070_v3 = vsel %vm529_vm0, %v195_v58, 0.0  ;;  %v200_v58 = vld [vmem:[%s15998_s0 + $0x5c8] sm:$0xff] }
 0x163   :  { %1062 = vadd.xlane.f32.xlu1 %v1061_v59  ;;  %1059 = vadd.xlane.f32.xlu0 %v1058_v42 }
 0x164   :  { %v9562_v24 = vpop.xlane.xlu1 %858  ;;  %v9564_v2 = vpop.xlane.xlu0 %855 }
 0x165   :  { %16344 = vst [vmem:[#allocation85_spill] sm:$0xff] %v9562_v24  ;;  %16345 = vst [vmem:[#allocation86_spill] sm:$0xff] %v9564_v2  ;;  %v1073_v2 = vsel %vm529_vm0, %v196_v43, 0.0  ;;  %v197_v24 = vld [vmem:[%s15998_s0 + $0x5b0] sm:$0xff] }
 0x166   :  { %v1076_v43 = vsel %vm529_vm0, %v197_v24, 0.0  ;;  %v202_v24 = vld [vmem:[%s15998_s0 + $0x5d8] sm:$0xff] }
 0x167   :  { %1068 = vadd.xlane.f32.xlu1 %v1067_v25  ;;  %1065 = vadd.xlane.f32.xlu0 %v1064_v16 }
 0x168   :  { %v9574_v59 = vpop.xlane.xlu1 %864  ;;  %v9576_v42 = vpop.xlane.xlu0 %861 }
 0x169   :  { %16346 = vst [vmem:[#allocation87_spill] sm:$0xff] %v9574_v59  ;;  %16347 = vst [vmem:[#allocation88_spill] sm:$0xff] %v9576_v42  ;;  %v1079_v42 = vsel %vm529_vm0, %v198_v17, 0.0  ;;  %v199_v59 = vld [vmem:[%s15998_s0 + $0x5c0] sm:$0xff] }
 0x16a   :  { %v1082_v17 = vsel %vm529_vm0, %v199_v59, 0.0  ;;  %v204_v59 = vld [vmem:[%s15998_s0 + $0x5e8] sm:$0xff] }
 0x16b   :  { %1074 = vadd.xlane.f32.xlu1 %v1073_v2  ;;  %1071 = vadd.xlane.f32.xlu0 %v1070_v3 }
 0x16c   :  { %v9586_v25 = vpop.xlane.xlu1 %870  ;;  %v9588_v16 = vpop.xlane.xlu0 %867 }
 0x16d   :  { %16348 = vst [vmem:[#allocation89_spill] sm:$0xff] %v9586_v25  ;;  %16349 = vst [vmem:[#allocation90_spill] sm:$0xff] %v9588_v16  ;;  %v1085_v16 = vsel %vm529_vm0, %v200_v58, 0.0  ;;  %v201_v25 = vld [vmem:[%s15998_s0 + $0x5d0] sm:$0xff] }
 0x16e   :  { %v1088_v58 = vsel %vm529_vm0, %v201_v25, 0.0  ;;  %v206_v25 = vld [vmem:[%s15998_s0 + $0x5f8] sm:$0xff] }
 0x16f   :  { %1080 = vadd.xlane.f32.xlu1 %v1079_v42  ;;  %1077 = vadd.xlane.f32.xlu0 %v1076_v43 }
 0x170   :  { %v9598_v2 = vpop.xlane.xlu1 %876  ;;  %v9600_v3 = vpop.xlane.xlu0 %873 }
 0x171   :  { %16350 = vst [vmem:[#allocation91_spill] sm:$0xff] %v9598_v2  ;;  %16351 = vst [vmem:[#allocation92_spill] sm:$0xff] %v9600_v3  ;;  %v1091_v3 = vsel %vm529_vm0, %v202_v24, 0.0  ;;  %v203_v2 = vld [vmem:[%s15998_s0 + $0x5e0] sm:$0xff] }
 0x172   :  { %v1094_v24 = vsel %vm529_vm0, %v203_v2, 0.0  ;;  %v208_v2 = vld [vmem:[%s15998_s0 + $0x608] sm:$0xff] }
 0x173   :  { %1086 = vadd.xlane.f32.xlu1 %v1085_v16  ;;  %1083 = vadd.xlane.f32.xlu0 %v1082_v17 }
 0x174   :  { %v9610_v42 = vpop.xlane.xlu1 %882  ;;  %v9612_v43 = vpop.xlane.xlu0 %879 }
 0x175   :  { %16352 = vst [vmem:[#allocation93_spill] sm:$0xff] %v9610_v42  ;;  %16353 = vst [vmem:[#allocation94_spill] sm:$0xff] %v9612_v43  ;;  %v1097_v43 = vsel %vm529_vm0, %v204_v59, 0.0  ;;  %v205_v42 = vld [vmem:[%s15998_s0 + $0x5f0] sm:$0xff] }
 0x176   :  { %v1100_v59 = vsel %vm529_vm0, %v205_v42, 0.0  ;;  %v210_v42 = vld [vmem:[%s15998_s0 + $0x618] sm:$0xff] }
 0x177   :  { %1092 = vadd.xlane.f32.xlu1 %v1091_v3  ;;  %1089 = vadd.xlane.f32.xlu0 %v1088_v58 }
 0x178   :  { %v9622_v16 = vpop.xlane.xlu1 %888  ;;  %v9624_v17 = vpop.xlane.xlu0 %885 }
 0x179   :  { %16354 = vst [vmem:[#allocation95_spill] sm:$0xff] %v9622_v16  ;;  %16355 = vst [vmem:[#allocation96_spill] sm:$0xff] %v9624_v17  ;;  %v1103_v17 = vsel %vm529_vm0, %v206_v25, 0.0  ;;  %v207_v16 = vld [vmem:[%s15998_s0 + $0x600] sm:$0xff] }
 0x17a   :  { %v1106_v25 = vsel %vm529_vm0, %v207_v16, 0.0  ;;  %v212_v16 = vld [vmem:[%s15998_s0 + $0x628] sm:$0xff] }
 0x17b   :  { %1098 = vadd.xlane.f32.xlu1 %v1097_v43  ;;  %1095 = vadd.xlane.f32.xlu0 %v1094_v24 }
 0x17c   :  { %v9634_v3 = vpop.xlane.xlu1 %894  ;;  %v9636_v58 = vpop.xlane.xlu0 %891 }
 0x17d   :  { %16356 = vst [vmem:[#allocation97_spill] sm:$0xff] %v9634_v3  ;;  %16357 = vst [vmem:[#allocation98_spill] sm:$0xff] %v9636_v58  ;;  %v1109_v58 = vsel %vm529_vm0, %v208_v2, 0.0  ;;  %v209_v3 = vld [vmem:[%s15998_s0 + $0x610] sm:$0xff] }
 0x17e   :  { %v1112_v2 = vsel %vm529_vm0, %v209_v3, 0.0  ;;  %v214_v3 = vld [vmem:[%s15998_s0 + $0x638] sm:$0xff] }
 0x17f   :  { %1104 = vadd.xlane.f32.xlu1 %v1103_v17  ;;  %1101 = vadd.xlane.f32.xlu0 %v1100_v59 }
 0x180   :  { %v9646_v43 = vpop.xlane.xlu1 %900  ;;  %v9648_v24 = vpop.xlane.xlu0 %897 }
 0x181   :  { %16358 = vst [vmem:[#allocation99_spill] sm:$0xff] %v9646_v43  ;;  %16359 = vst [vmem:[#allocation100_spill] sm:$0xff] %v9648_v24  ;;  %v1115_v24 = vsel %vm529_vm0, %v210_v42, 0.0  ;;  %v211_v43 = vld [vmem:[%s15998_s0 + $0x620] sm:$0xff] }
 0x182   :  { %v1118_v42 = vsel %vm529_vm0, %v211_v43, 0.0  ;;  %v216_v43 = vld [vmem:[%s15998_s0 + $0x648] sm:$0xff] }
 0x183   :  { %1110 = vadd.xlane.f32.xlu1 %v1109_v58  ;;  %1107 = vadd.xlane.f32.xlu0 %v1106_v25 }
 0x184   :  { %v9658_v17 = vpop.xlane.xlu1 %906  ;;  %v9660_v59 = vpop.xlane.xlu0 %903 }
 0x185   :  { %16360 = vst [vmem:[#allocation101_spill] sm:$0xff] %v9658_v17  ;;  %16361 = vst [vmem:[#allocation102_spill] sm:$0xff] %v9660_v59  ;;  %v1121_v59 = vsel %vm529_vm0, %v212_v16, 0.0  ;;  %v213_v17 = vld [vmem:[%s15998_s0 + $0x630] sm:$0xff] }
 0x186   :  { %v1124_v16 = vsel %vm529_vm0, %v213_v17, 0.0  ;;  %v218_v17 = vld [vmem:[%s15998_s0 + $0x658] sm:$0xff] }
 0x187   :  { %1116 = vadd.xlane.f32.xlu1 %v1115_v24  ;;  %1113 = vadd.xlane.f32.xlu0 %v1112_v2 }
 0x188   :  { %v9670_v58 = vpop.xlane.xlu1 %912  ;;  %v9672_v25 = vpop.xlane.xlu0 %909 }
 0x189   :  { %16362 = vst [vmem:[#allocation103_spill] sm:$0xff] %v9670_v58  ;;  %16363 = vst [vmem:[#allocation104_spill] sm:$0xff] %v9672_v25  ;;  %v1127_v25 = vsel %vm529_vm0, %v214_v3, 0.0  ;;  %v215_v58 = vld [vmem:[%s15998_s0 + $0x640] sm:$0xff] }
 0x18a   :  { %v1130_v3 = vsel %vm529_vm0, %v215_v58, 0.0  ;;  %v220_v58 = vld [vmem:[%s15998_s0 + $0x668] sm:$0xff] }
 0x18b   :  { %1122 = vadd.xlane.f32.xlu1 %v1121_v59  ;;  %1119 = vadd.xlane.f32.xlu0 %v1118_v42 }
 0x18c   :  { %v9682_v24 = vpop.xlane.xlu1 %918  ;;  %v9684_v2 = vpop.xlane.xlu0 %915 }
 0x18d   :  { %16364 = vst [vmem:[#allocation105_spill] sm:$0xff] %v9682_v24  ;;  %16365 = vst [vmem:[#allocation106_spill] sm:$0xff] %v9684_v2  ;;  %v1133_v2 = vsel %vm529_vm0, %v216_v43, 0.0  ;;  %v217_v24 = vld [vmem:[%s15998_s0 + $0x650] sm:$0xff] }
 0x18e   :  { %v1136_v43 = vsel %vm529_vm0, %v217_v24, 0.0  ;;  %v222_v24 = vld [vmem:[%s15998_s0 + $0x678] sm:$0xff] }
 0x18f   :  { %1128 = vadd.xlane.f32.xlu1 %v1127_v25  ;;  %1125 = vadd.xlane.f32.xlu0 %v1124_v16 }
 0x190   :  { %v9694_v59 = vpop.xlane.xlu1 %924  ;;  %v9696_v42 = vpop.xlane.xlu0 %921 }
 0x191   :  { %16366 = vst [vmem:[#allocation107_spill] sm:$0xff] %v9694_v59  ;;  %16367 = vst [vmem:[#allocation108_spill] sm:$0xff] %v9696_v42  ;;  %v1139_v42 = vsel %vm529_vm0, %v218_v17, 0.0  ;;  %v219_v59 = vld [vmem:[%s15998_s0 + $0x660] sm:$0xff] }
 0x192   :  { %v1142_v17 = vsel %vm529_vm0, %v219_v59, 0.0  ;;  %v224_v59 = vld [vmem:[%s15998_s0 + $0x688] sm:$0xff] }
 0x193   :  { %1134 = vadd.xlane.f32.xlu1 %v1133_v2  ;;  %1131 = vadd.xlane.f32.xlu0 %v1130_v3 }
 0x194   :  { %v9706_v25 = vpop.xlane.xlu1 %930  ;;  %v9708_v16 = vpop.xlane.xlu0 %927 }
 0x195   :  { %16368 = vst [vmem:[#allocation109_spill] sm:$0xff] %v9706_v25  ;;  %16369 = vst [vmem:[#allocation110_spill] sm:$0xff] %v9708_v16  ;;  %v1145_v16 = vsel %vm529_vm0, %v220_v58, 0.0  ;;  %v221_v25 = vld [vmem:[%s15998_s0 + $0x670] sm:$0xff] }
 0x196   :  { %v1148_v58 = vsel %vm529_vm0, %v221_v25, 0.0  ;;  %v226_v25 = vld [vmem:[%s15998_s0 + $0x698] sm:$0xff] }
 0x197   :  { %1140 = vadd.xlane.f32.xlu1 %v1139_v42  ;;  %1137 = vadd.xlane.f32.xlu0 %v1136_v43 }
 0x198   :  { %v9718_v2 = vpop.xlane.xlu1 %936  ;;  %v9720_v3 = vpop.xlane.xlu0 %933 }
 0x199   :  { %16370 = vst [vmem:[#allocation111_spill] sm:$0xff] %v9718_v2  ;;  %16371 = vst [vmem:[#allocation112_spill] sm:$0xff] %v9720_v3  ;;  %v1151_v3 = vsel %vm529_vm0, %v222_v24, 0.0  ;;  %v223_v2 = vld [vmem:[%s15998_s0 + $0x680] sm:$0xff] }
 0x19a   :  { %v1154_v24 = vsel %vm529_vm0, %v223_v2, 0.0  ;;  %v228_v2 = vld [vmem:[%s15998_s0 + $0x6a8] sm:$0xff] }
 0x19b   :  { %1146 = vadd.xlane.f32.xlu1 %v1145_v16  ;;  %1143 = vadd.xlane.f32.xlu0 %v1142_v17 }
 0x19c   :  { %v9730_v42 = vpop.xlane.xlu1 %942  ;;  %v9732_v43 = vpop.xlane.xlu0 %939 }
 0x19d   :  { %16372 = vst [vmem:[#allocation113_spill] sm:$0xff] %v9730_v42  ;;  %16373 = vst [vmem:[#allocation114_spill] sm:$0xff] %v9732_v43  ;;  %v1157_v43 = vsel %vm529_vm0, %v224_v59, 0.0  ;;  %v225_v42 = vld [vmem:[%s15998_s0 + $0x690] sm:$0xff] }
 0x19e   :  { %v1160_v59 = vsel %vm529_vm0, %v225_v42, 0.0  ;;  %v230_v42 = vld [vmem:[%s15998_s0 + $0x6b8] sm:$0xff] }
 0x19f   :  { %1152 = vadd.xlane.f32.xlu1 %v1151_v3  ;;  %1149 = vadd.xlane.f32.xlu0 %v1148_v58 }
 0x1a0   :  { %v9742_v16 = vpop.xlane.xlu1 %948  ;;  %v9744_v17 = vpop.xlane.xlu0 %945 }
 0x1a1   :  { %16374 = vst [vmem:[#allocation115_spill] sm:$0xff] %v9742_v16  ;;  %16375 = vst [vmem:[#allocation116_spill] sm:$0xff] %v9744_v17  ;;  %v1163_v17 = vsel %vm529_vm0, %v226_v25, 0.0  ;;  %v227_v16 = vld [vmem:[%s15998_s0 + $0x6a0] sm:$0xff] }
 0x1a2   :  { %v1166_v25 = vsel %vm529_vm0, %v227_v16, 0.0  ;;  %v232_v16 = vld [vmem:[%s15998_s0 + $0x6c8] sm:$0xff] }
 0x1a3   :  { %1158 = vadd.xlane.f32.xlu1 %v1157_v43  ;;  %1155 = vadd.xlane.f32.xlu0 %v1154_v24 }
 0x1a4   :  { %v9754_v3 = vpop.xlane.xlu1 %954  ;;  %v9756_v58 = vpop.xlane.xlu0 %951 }
 0x1a5   :  { %16376 = vst [vmem:[#allocation117_spill] sm:$0xff] %v9754_v3  ;;  %16377 = vst [vmem:[#allocation118_spill] sm:$0xff] %v9756_v58  ;;  %v1169_v58 = vsel %vm529_vm0, %v228_v2, 0.0  ;;  %v229_v3 = vld [vmem:[%s15998_s0 + $0x6b0] sm:$0xff] }
 0x1a6   :  { %v1172_v2 = vsel %vm529_vm0, %v229_v3, 0.0  ;;  %v234_v3 = vld [vmem:[%s15998_s0 + $0x6d8] sm:$0xff] }
 0x1a7   :  { %1164 = vadd.xlane.f32.xlu1 %v1163_v17  ;;  %1161 = vadd.xlane.f32.xlu0 %v1160_v59 }
 0x1a8   :  { %v9766_v43 = vpop.xlane.xlu1 %960  ;;  %v9768_v24 = vpop.xlane.xlu0 %957 }
 0x1a9   :  { %16378 = vst [vmem:[#allocation119_spill] sm:$0xff] %v9766_v43  ;;  %16379 = vst [vmem:[#allocation120_spill] sm:$0xff] %v9768_v24  ;;  %v1175_v24 = vsel %vm529_vm0, %v230_v42, 0.0  ;;  %v231_v43 = vld [vmem:[%s15998_s0 + $0x6c0] sm:$0xff] }
 0x1aa   :  { %v1178_v42 = vsel %vm529_vm0, %v231_v43, 0.0  ;;  %v236_v43 = vld [vmem:[%s15998_s0 + $0x6e8] sm:$0xff] }
 0x1ab   :  { %1170 = vadd.xlane.f32.xlu1 %v1169_v58  ;;  %1167 = vadd.xlane.f32.xlu0 %v1166_v25 }
 0x1ac   :  { %v9778_v17 = vpop.xlane.xlu1 %966  ;;  %v9780_v59 = vpop.xlane.xlu0 %963 }
 0x1ad   :  { %16380 = vst [vmem:[#allocation121_spill] sm:$0xff] %v9778_v17  ;;  %16381 = vst [vmem:[#allocation122_spill] sm:$0xff] %v9780_v59  ;;  %v1181_v59 = vsel %vm529_vm0, %v232_v16, 0.0  ;;  %v233_v17 = vld [vmem:[%s15998_s0 + $0x6d0] sm:$0xff] }
 0x1ae   :  { %v1184_v16 = vsel %vm529_vm0, %v233_v17, 0.0  ;;  %v238_v17 = vld [vmem:[%s15998_s0 + $0x6f8] sm:$0xff] }
 0x1af   :  { %1176 = vadd.xlane.f32.xlu1 %v1175_v24  ;;  %1173 = vadd.xlane.f32.xlu0 %v1172_v2 }
 0x1b0   :  { %v9790_v58 = vpop.xlane.xlu1 %972  ;;  %v9792_v25 = vpop.xlane.xlu0 %969 }
 0x1b1   :  { %16382 = vst [vmem:[#allocation123_spill] sm:$0xff] %v9790_v58  ;;  %16383 = vst [vmem:[#allocation124_spill] sm:$0xff] %v9792_v25  ;;  %v1187_v25 = vsel %vm529_vm0, %v234_v3, 0.0  ;;  %v235_v58 = vld [vmem:[%s15998_s0 + $0x6e0] sm:$0xff] }
 0x1b2   :  { %v1190_v3 = vsel %vm529_vm0, %v235_v58, 0.0  ;;  %v240_v58 = vld [vmem:[%s15998_s0 + $0x708] sm:$0xff] }
 0x1b3   :  { %1182 = vadd.xlane.f32.xlu1 %v1181_v59  ;;  %1179 = vadd.xlane.f32.xlu0 %v1178_v42 }
 0x1b4   :  { %v9802_v24 = vpop.xlane.xlu1 %978  ;;  %v9804_v2 = vpop.xlane.xlu0 %975 }
 0x1b5   :  { %16384 = vst [vmem:[#allocation125_spill] sm:$0xff] %v9802_v24  ;;  %16385 = vst [vmem:[#allocation126_spill] sm:$0xff] %v9804_v2  ;;  %v1193_v2 = vsel %vm529_vm0, %v236_v43, 0.0  ;;  %v237_v24 = vld [vmem:[%s15998_s0 + $0x6f0] sm:$0xff] }
 0x1b6   :  { %v1196_v43 = vsel %vm529_vm0, %v237_v24, 0.0  ;;  %v242_v24 = vld [vmem:[%s15998_s0 + $0x718] sm:$0xff] }
 0x1b7   :  { %1188 = vadd.xlane.f32.xlu1 %v1187_v25  ;;  %1185 = vadd.xlane.f32.xlu0 %v1184_v16 }
 0x1b8   :  { %v9814_v59 = vpop.xlane.xlu1 %984  ;;  %v9816_v42 = vpop.xlane.xlu0 %981 }
 0x1b9   :  { %16386 = vst [vmem:[#allocation127_spill] sm:$0xff] %v9814_v59  ;;  %16387 = vst [vmem:[#allocation128_spill] sm:$0xff] %v9816_v42  ;;  %v1199_v42 = vsel %vm529_vm0, %v238_v17, 0.0  ;;  %v239_v59 = vld [vmem:[%s15998_s0 + $0x700] sm:$0xff] }
 0x1ba   :  { %v1202_v17 = vsel %vm529_vm0, %v239_v59, 0.0  ;;  %v244_v59 = vld [vmem:[%s15998_s0 + $0x728] sm:$0xff] }
 0x1bb   :  { %1194 = vadd.xlane.f32.xlu1 %v1193_v2  ;;  %1191 = vadd.xlane.f32.xlu0 %v1190_v3 }
 0x1bc   :  { %v9826_v25 = vpop.xlane.xlu1 %990  ;;  %v9828_v16 = vpop.xlane.xlu0 %987 }
 0x1bd   :  { %16388 = vst [vmem:[#allocation129_spill] sm:$0xff] %v9826_v25  ;;  %16389 = vst [vmem:[#allocation130_spill] sm:$0xff] %v9828_v16  ;;  %v1205_v16 = vsel %vm529_vm0, %v240_v58, 0.0  ;;  %v241_v25 = vld [vmem:[%s15998_s0 + $0x710] sm:$0xff] }
 0x1be   :  { %v1208_v58 = vsel %vm529_vm0, %v241_v25, 0.0  ;;  %v246_v25 = vld [vmem:[%s15998_s0 + $0x738] sm:$0xff] }
 0x1bf   :  { %1200 = vadd.xlane.f32.xlu1 %v1199_v42  ;;  %1197 = vadd.xlane.f32.xlu0 %v1196_v43 }
 0x1c0   :  { %v9838_v2 = vpop.xlane.xlu1 %996  ;;  %v9840_v3 = vpop.xlane.xlu0 %993 }
 0x1c1   :  { %16390 = vst [vmem:[#allocation131_spill] sm:$0xff] %v9838_v2  ;;  %16391 = vst [vmem:[#allocation132_spill] sm:$0xff] %v9840_v3  ;;  %v1211_v3 = vsel %vm529_vm0, %v242_v24, 0.0  ;;  %v243_v2 = vld [vmem:[%s15998_s0 + $0x720] sm:$0xff] }
 0x1c2   :  { %v1214_v24 = vsel %vm529_vm0, %v243_v2, 0.0  ;;  %v248_v2 = vld [vmem:[%s15998_s0 + $0x748] sm:$0xff] }
 0x1c3   :  { %1206 = vadd.xlane.f32.xlu1 %v1205_v16  ;;  %1203 = vadd.xlane.f32.xlu0 %v1202_v17 }
 0x1c4   :  { %v9850_v42 = vpop.xlane.xlu1 %1002  ;;  %v9852_v43 = vpop.xlane.xlu0 %999 }
 0x1c5   :  { %16392 = vst [vmem:[#allocation133_spill] sm:$0xff] %v9850_v42  ;;  %16393 = vst [vmem:[#allocation134_spill] sm:$0xff] %v9852_v43  ;;  %v1217_v43 = vsel %vm529_vm0, %v244_v59, 0.0  ;;  %v245_v42 = vld [vmem:[%s15998_s0 + $0x730] sm:$0xff] }
 0x1c6   :  { %v1220_v59 = vsel %vm529_vm0, %v245_v42, 0.0  ;;  %v250_v42 = vld [vmem:[%s15998_s0 + $0x758] sm:$0xff] }
 0x1c7   :  { %1212 = vadd.xlane.f32.xlu1 %v1211_v3  ;;  %1209 = vadd.xlane.f32.xlu0 %v1208_v58 }
 0x1c8   :  { %v9862_v16 = vpop.xlane.xlu1 %1008  ;;  %v9864_v17 = vpop.xlane.xlu0 %1005 }
 0x1c9   :  { %16394 = vst [vmem:[#allocation135_spill] sm:$0xff] %v9862_v16  ;;  %16395 = vst [vmem:[#allocation136_spill] sm:$0xff] %v9864_v17  ;;  %v1223_v17 = vsel %vm529_vm0, %v246_v25, 0.0  ;;  %v247_v16 = vld [vmem:[%s15998_s0 + $0x740] sm:$0xff] }
 0x1ca   :  { %v1226_v25 = vsel %vm529_vm0, %v247_v16, 0.0  ;;  %v252_v16 = vld [vmem:[%s15998_s0 + $0x768] sm:$0xff] }
 0x1cb   :  { %1218 = vadd.xlane.f32.xlu1 %v1217_v43  ;;  %1215 = vadd.xlane.f32.xlu0 %v1214_v24 }
 0x1cc   :  { %v9874_v3 = vpop.xlane.xlu1 %1014  ;;  %v9876_v58 = vpop.xlane.xlu0 %1011 }
 0x1cd   :  { %16396 = vst [vmem:[#allocation137_spill] sm:$0xff] %v9874_v3  ;;  %16397 = vst [vmem:[#allocation138_spill] sm:$0xff] %v9876_v58  ;;  %v1229_v58 = vsel %vm529_vm0, %v248_v2, 0.0  ;;  %v249_v3 = vld [vmem:[%s15998_s0 + $0x750] sm:$0xff] }
 0x1ce   :  { %v1232_v2 = vsel %vm529_vm0, %v249_v3, 0.0  ;;  %v254_v3 = vld [vmem:[%s15998_s0 + $0x778] sm:$0xff] }
 0x1cf   :  { %1224 = vadd.xlane.f32.xlu1 %v1223_v17  ;;  %1221 = vadd.xlane.f32.xlu0 %v1220_v59 }
 0x1d0   :  { %v9886_v43 = vpop.xlane.xlu1 %1020  ;;  %v9888_v24 = vpop.xlane.xlu0 %1017 }
 0x1d1   :  { %16398 = vst [vmem:[#allocation139_spill] sm:$0xff] %v9886_v43  ;;  %16399 = vst [vmem:[#allocation140_spill] sm:$0xff] %v9888_v24  ;;  %v1235_v24 = vsel %vm529_vm0, %v250_v42, 0.0  ;;  %v251_v43 = vld [vmem:[%s15998_s0 + $0x760] sm:$0xff] }
 0x1d2   :  { %v1238_v42 = vsel %vm529_vm0, %v251_v43, 0.0  ;;  %v256_v43 = vld [vmem:[%s15998_s0 + $0x788] sm:$0xff] }
 0x1d3   :  { %1230 = vadd.xlane.f32.xlu1 %v1229_v58  ;;  %1227 = vadd.xlane.f32.xlu0 %v1226_v25 }
 0x1d4   :  { %v9898_v17 = vpop.xlane.xlu1 %1026  ;;  %v9900_v59 = vpop.xlane.xlu0 %1023 }
 0x1d5   :  { %16400 = vst [vmem:[#allocation141_spill] sm:$0xff] %v9898_v17  ;;  %16401 = vst [vmem:[#allocation142_spill] sm:$0xff] %v9900_v59  ;;  %v1241_v59 = vsel %vm529_vm0, %v252_v16, 0.0  ;;  %v253_v17 = vld [vmem:[%s15998_s0 + $0x770] sm:$0xff] }
 0x1d6   :  { %v1244_v16 = vsel %vm529_vm0, %v253_v17, 0.0  ;;  %v258_v17 = vld [vmem:[%s15998_s0 + $0x798] sm:$0xff] }
 0x1d7   :  { %1236 = vadd.xlane.f32.xlu1 %v1235_v24  ;;  %1233 = vadd.xlane.f32.xlu0 %v1232_v2 }
 0x1d8   :  { %v9910_v58 = vpop.xlane.xlu1 %1032  ;;  %v9912_v25 = vpop.xlane.xlu0 %1029 }
 0x1d9   :  { %16402 = vst [vmem:[#allocation143_spill] sm:$0xff] %v9910_v58  ;;  %16403 = vst [vmem:[#allocation144_spill] sm:$0xff] %v9912_v25  ;;  %v1247_v25 = vsel %vm529_vm0, %v254_v3, 0.0  ;;  %v255_v58 = vld [vmem:[%s15998_s0 + $0x780] sm:$0xff] }
 0x1da   :  { %v1250_v3 = vsel %vm529_vm0, %v255_v58, 0.0  ;;  %v260_v58 = vld [vmem:[%s15998_s0 + $0x7a8] sm:$0xff] }
 0x1db   :  { %1242 = vadd.xlane.f32.xlu1 %v1241_v59  ;;  %1239 = vadd.xlane.f32.xlu0 %v1238_v42 }
 0x1dc   :  { %v9922_v24 = vpop.xlane.xlu1 %1038  ;;  %v9924_v2 = vpop.xlane.xlu0 %1035 }
 0x1dd   :  { %16404 = vst [vmem:[#allocation145_spill] sm:$0xff] %v9922_v24  ;;  %16405 = vst [vmem:[#allocation146_spill] sm:$0xff] %v9924_v2  ;;  %v1253_v2 = vsel %vm529_vm0, %v256_v43, 0.0  ;;  %v257_v24 = vld [vmem:[%s15998_s0 + $0x790] sm:$0xff] }
 0x1de   :  { %v1256_v43 = vsel %vm529_vm0, %v257_v24, 0.0  ;;  %v262_v24 = vld [vmem:[%s15998_s0 + $0x7b8] sm:$0xff] }
 0x1df   :  { %1248 = vadd.xlane.f32.xlu1 %v1247_v25  ;;  %1245 = vadd.xlane.f32.xlu0 %v1244_v16 }
 0x1e0   :  { %v9934_v59 = vpop.xlane.xlu1 %1044  ;;  %v9936_v42 = vpop.xlane.xlu0 %1041 }
 0x1e1   :  { %16406 = vst [vmem:[#allocation147_spill] sm:$0xff] %v9934_v59  ;;  %16407 = vst [vmem:[#allocation148_spill] sm:$0xff] %v9936_v42  ;;  %v1259_v42 = vsel %vm529_vm0, %v258_v17, 0.0  ;;  %v259_v59 = vld [vmem:[%s15998_s0 + $0x7a0] sm:$0xff] }
 0x1e2   :  { %v1262_v17 = vsel %vm529_vm0, %v259_v59, 0.0  ;;  %v264_v59 = vld [vmem:[%s15998_s0 + $0x7c8] sm:$0xff] }
 0x1e3   :  { %1254 = vadd.xlane.f32.xlu1 %v1253_v2  ;;  %1251 = vadd.xlane.f32.xlu0 %v1250_v3 }
 0x1e4   :  { %v9946_v25 = vpop.xlane.xlu1 %1050  ;;  %v9948_v16 = vpop.xlane.xlu0 %1047 }
 0x1e5   :  { %16408 = vst [vmem:[#allocation149_spill] sm:$0xff] %v9946_v25  ;;  %16409 = vst [vmem:[#allocation150_spill] sm:$0xff] %v9948_v16  ;;  %v1265_v16 = vsel %vm529_vm0, %v260_v58, 0.0  ;;  %v261_v25 = vld [vmem:[%s15998_s0 + $0x7b0] sm:$0xff] }
 0x1e6   :  { %v1268_v58 = vsel %vm529_vm0, %v261_v25, 0.0  ;;  %v266_v25 = vld [vmem:[%s15998_s0 + $0x7d8] sm:$0xff] }
 0x1e7   :  { %1260 = vadd.xlane.f32.xlu1 %v1259_v42  ;;  %1257 = vadd.xlane.f32.xlu0 %v1256_v43 }
 0x1e8   :  { %v9958_v2 = vpop.xlane.xlu1 %1056  ;;  %v9960_v3 = vpop.xlane.xlu0 %1053 }
 0x1e9   :  { %16410 = vst [vmem:[#allocation151_spill] sm:$0xff] %v9958_v2  ;;  %16411 = vst [vmem:[#allocation152_spill] sm:$0xff] %v9960_v3  ;;  %v1271_v3 = vsel %vm529_vm0, %v262_v24, 0.0  ;;  %v263_v2 = vld [vmem:[%s15998_s0 + $0x7c0] sm:$0xff] }
 0x1ea   :  { %v1274_v24 = vsel %vm529_vm0, %v263_v2, 0.0  ;;  %v268_v2 = vld [vmem:[%s15998_s0 + $0x7e8] sm:$0xff] }
 0x1eb   :  { %1266 = vadd.xlane.f32.xlu1 %v1265_v16  ;;  %1263 = vadd.xlane.f32.xlu0 %v1262_v17 }
 0x1ec   :  { %v9970_v42 = vpop.xlane.xlu1 %1062  ;;  %v9972_v43 = vpop.xlane.xlu0 %1059 }
 0x1ed   :  { %16412 = vst [vmem:[#allocation153_spill] sm:$0xff] %v9970_v42  ;;  %16413 = vst [vmem:[#allocation154_spill] sm:$0xff] %v9972_v43  ;;  %v1277_v43 = vsel %vm529_vm0, %v264_v59, 0.0  ;;  %v265_v42 = vld [vmem:[%s15998_s0 + $0x7d0] sm:$0xff] }
 0x1ee   :  { %v1280_v59 = vsel %vm529_vm0, %v265_v42, 0.0  ;;  %v270_v42 = vld [vmem:[%s15998_s0 + $0x7f8] sm:$0xff] }
 0x1ef   :  { %1272 = vadd.xlane.f32.xlu1 %v1271_v3  ;;  %1269 = vadd.xlane.f32.xlu0 %v1268_v58 }
 0x1f0   :  { %v9982_v16 = vpop.xlane.xlu1 %1068  ;;  %v9984_v17 = vpop.xlane.xlu0 %1065 }
 0x1f1   :  { %16414 = vst [vmem:[#allocation155_spill] sm:$0xff] %v9982_v16  ;;  %16415 = vst [vmem:[#allocation156_spill] sm:$0xff] %v9984_v17  ;;  %v1283_v17 = vsel %vm529_vm0, %v266_v25, 0.0  ;;  %v267_v16 = vld [vmem:[%s15998_s0 + $0x7e0] sm:$0xff] }
 0x1f2   :  { %v1286_v25 = vsel %vm529_vm0, %v267_v16, 0.0  ;;  %v272_v16 = vld [vmem:[%s15998_s0 + $0x808] sm:$0xff] }
 0x1f3   :  { %1278 = vadd.xlane.f32.xlu1 %v1277_v43  ;;  %1275 = vadd.xlane.f32.xlu0 %v1274_v24 }
 0x1f4   :  { %v9994_v3 = vpop.xlane.xlu1 %1074  ;;  %v9996_v58 = vpop.xlane.xlu0 %1071 }
 0x1f5   :  { %16416 = vst [vmem:[#allocation157_spill] sm:$0xff] %v9994_v3  ;;  %16417 = vst [vmem:[#allocation158_spill] sm:$0xff] %v9996_v58  ;;  %v1289_v58 = vsel %vm529_vm0, %v268_v2, 0.0  ;;  %v269_v3 = vld [vmem:[%s15998_s0 + $0x7f0] sm:$0xff] }
 0x1f6   :  { %v1292_v2 = vsel %vm529_vm0, %v269_v3, 0.0  ;;  %v274_v3 = vld [vmem:[%s15998_s0 + $0x818] sm:$0xff] }
 0x1f7   :  { %1284 = vadd.xlane.f32.xlu1 %v1283_v17  ;;  %1281 = vadd.xlane.f32.xlu0 %v1280_v59 }
 0x1f8   :  { %v10006_v43 = vpop.xlane.xlu1 %1080  ;;  %v10008_v24 = vpop.xlane.xlu0 %1077 }
 0x1f9   :  { %16418 = vst [vmem:[#allocation159_spill] sm:$0xff] %v10006_v43  ;;  %16419 = vst [vmem:[#allocation160_spill] sm:$0xff] %v10008_v24  ;;  %v1295_v24 = vsel %vm529_vm0, %v270_v42, 0.0  ;;  %v271_v43 = vld [vmem:[%s15998_s0 + $0x800] sm:$0xff] }
 0x1fa   :  { %v1298_v42 = vsel %vm529_vm0, %v271_v43, 0.0  ;;  %v276_v43 = vld [vmem:[%s15998_s0 + $0x828] sm:$0xff] }
 0x1fb   :  { %1290 = vadd.xlane.f32.xlu1 %v1289_v58  ;;  %1287 = vadd.xlane.f32.xlu0 %v1286_v25 }
 0x1fc   :  { %v10018_v17 = vpop.xlane.xlu1 %1086  ;;  %v10020_v59 = vpop.xlane.xlu0 %1083 }
 0x1fd   :  { %16420 = vst [vmem:[#allocation161_spill] sm:$0xff] %v10018_v17  ;;  %16421 = vst [vmem:[#allocation162_spill] sm:$0xff] %v10020_v59  ;;  %v1301_v59 = vsel %vm529_vm0, %v272_v16, 0.0  ;;  %v273_v17 = vld [vmem:[%s15998_s0 + $0x810] sm:$0xff] }
 0x1fe   :  { %v1304_v16 = vsel %vm529_vm0, %v273_v17, 0.0  ;;  %v278_v17 = vld [vmem:[%s15998_s0 + $0x838] sm:$0xff] }
 0x1ff   :  { %1296 = vadd.xlane.f32.xlu1 %v1295_v24  ;;  %1293 = vadd.xlane.f32.xlu0 %v1292_v2 }
 0x200   :  { %v10030_v58 = vpop.xlane.xlu1 %1092  ;;  %v10032_v25 = vpop.xlane.xlu0 %1089 }
 0x201   :  { %16422 = vst [vmem:[#allocation163_spill] sm:$0xff] %v10030_v58  ;;  %16423 = vst [vmem:[#allocation164_spill] sm:$0xff] %v10032_v25  ;;  %v1307_v25 = vsel %vm529_vm0, %v274_v3, 0.0  ;;  %v275_v58 = vld [vmem:[%s15998_s0 + $0x820] sm:$0xff] }
 0x202   :  { %v1310_v3 = vsel %vm529_vm0, %v275_v58, 0.0  ;;  %v280_v58 = vld [vmem:[%s15998_s0 + $0x848] sm:$0xff] }
 0x203   :  { %1302 = vadd.xlane.f32.xlu1 %v1301_v59  ;;  %1299 = vadd.xlane.f32.xlu0 %v1298_v42 }
 0x204   :  { %v10042_v24 = vpop.xlane.xlu1 %1098  ;;  %v10044_v2 = vpop.xlane.xlu0 %1095 }
 0x205   :  { %16424 = vst [vmem:[#allocation165_spill] sm:$0xff] %v10042_v24  ;;  %16425 = vst [vmem:[#allocation166_spill] sm:$0xff] %v10044_v2  ;;  %v1313_v2 = vsel %vm529_vm0, %v276_v43, 0.0  ;;  %v277_v24 = vld [vmem:[%s15998_s0 + $0x830] sm:$0xff] }
 0x206   :  { %v1316_v43 = vsel %vm529_vm0, %v277_v24, 0.0  ;;  %v282_v24 = vld [vmem:[%s15998_s0 + $0x858] sm:$0xff] }
 0x207   :  { %1308 = vadd.xlane.f32.xlu1 %v1307_v25  ;;  %1305 = vadd.xlane.f32.xlu0 %v1304_v16 }
 0x208   :  { %v10054_v59 = vpop.xlane.xlu1 %1104  ;;  %v10056_v42 = vpop.xlane.xlu0 %1101 }
 0x209   :  { %16426 = vst [vmem:[#allocation167_spill] sm:$0xff] %v10054_v59  ;;  %16427 = vst [vmem:[#allocation168_spill] sm:$0xff] %v10056_v42  ;;  %v1319_v42 = vsel %vm529_vm0, %v278_v17, 0.0  ;;  %v279_v59 = vld [vmem:[%s15998_s0 + $0x840] sm:$0xff] }
 0x20a   :  { %v1322_v17 = vsel %vm529_vm0, %v279_v59, 0.0  ;;  %v284_v59 = vld [vmem:[%s15998_s0 + $0x868] sm:$0xff] }
 0x20b   :  { %1314 = vadd.xlane.f32.xlu1 %v1313_v2  ;;  %1311 = vadd.xlane.f32.xlu0 %v1310_v3 }
 0x20c   :  { %v10066_v25 = vpop.xlane.xlu1 %1110  ;;  %v10068_v16 = vpop.xlane.xlu0 %1107 }
 0x20d   :  { %16428 = vst [vmem:[#allocation169_spill] sm:$0xff] %v10066_v25  ;;  %16429 = vst [vmem:[#allocation170_spill] sm:$0xff] %v10068_v16  ;;  %v1325_v16 = vsel %vm529_vm0, %v280_v58, 0.0  ;;  %v281_v25 = vld [vmem:[%s15998_s0 + $0x850] sm:$0xff] }
 0x20e   :  { %v1328_v58 = vsel %vm529_vm0, %v281_v25, 0.0  ;;  %v286_v25 = vld [vmem:[%s15998_s0 + $0x878] sm:$0xff] }
 0x20f   :  { %1320 = vadd.xlane.f32.xlu1 %v1319_v42  ;;  %1317 = vadd.xlane.f32.xlu0 %v1316_v43 }
 0x210   :  { %v10078_v2 = vpop.xlane.xlu1 %1116  ;;  %v10080_v3 = vpop.xlane.xlu0 %1113 }
 0x211   :  { %16430 = vst [vmem:[#allocation171_spill] sm:$0xff] %v10078_v2  ;;  %16431 = vst [vmem:[#allocation172_spill] sm:$0xff] %v10080_v3  ;;  %v1331_v3 = vsel %vm529_vm0, %v282_v24, 0.0  ;;  %v283_v2 = vld [vmem:[%s15998_s0 + $0x860] sm:$0xff] }
 0x212   :  { %v1334_v24 = vsel %vm529_vm0, %v283_v2, 0.0  ;;  %v288_v2 = vld [vmem:[%s15998_s0 + $0x888] sm:$0xff] }
 0x213   :  { %1326 = vadd.xlane.f32.xlu1 %v1325_v16  ;;  %1323 = vadd.xlane.f32.xlu0 %v1322_v17 }
 0x214   :  { %v10090_v42 = vpop.xlane.xlu1 %1122  ;;  %v10092_v43 = vpop.xlane.xlu0 %1119 }
 0x215   :  { %16432 = vst [vmem:[#allocation173_spill] sm:$0xff] %v10090_v42  ;;  %16433 = vst [vmem:[#allocation174_spill] sm:$0xff] %v10092_v43  ;;  %v1337_v43 = vsel %vm529_vm0, %v284_v59, 0.0  ;;  %v285_v42 = vld [vmem:[%s15998_s0 + $0x870] sm:$0xff] }
 0x216   :  { %v1340_v59 = vsel %vm529_vm0, %v285_v42, 0.0  ;;  %v290_v42 = vld [vmem:[%s15998_s0 + $0x898] sm:$0xff] }
 0x217   :  { %1332 = vadd.xlane.f32.xlu1 %v1331_v3  ;;  %1329 = vadd.xlane.f32.xlu0 %v1328_v58 }
 0x218   :  { %v10102_v16 = vpop.xlane.xlu1 %1128  ;;  %v10104_v17 = vpop.xlane.xlu0 %1125 }
 0x219   :  { %16434 = vst [vmem:[#allocation175_spill] sm:$0xff] %v10102_v16  ;;  %16435 = vst [vmem:[#allocation176_spill] sm:$0xff] %v10104_v17  ;;  %v1343_v17 = vsel %vm529_vm0, %v286_v25, 0.0  ;;  %v287_v16 = vld [vmem:[%s15998_s0 + $0x880] sm:$0xff] }
 0x21a   :  { %v1346_v25 = vsel %vm529_vm0, %v287_v16, 0.0  ;;  %v292_v16 = vld [vmem:[%s15998_s0 + $0x8a8] sm:$0xff] }
 0x21b   :  { %1338 = vadd.xlane.f32.xlu1 %v1337_v43  ;;  %1335 = vadd.xlane.f32.xlu0 %v1334_v24 }
 0x21c   :  { %v10114_v3 = vpop.xlane.xlu1 %1134  ;;  %v10116_v58 = vpop.xlane.xlu0 %1131 }
 0x21d   :  { %16436 = vst [vmem:[#allocation177_spill] sm:$0xff] %v10114_v3  ;;  %16437 = vst [vmem:[#allocation178_spill] sm:$0xff] %v10116_v58  ;;  %v1349_v58 = vsel %vm529_vm0, %v288_v2, 0.0  ;;  %v289_v3 = vld [vmem:[%s15998_s0 + $0x890] sm:$0xff] }
 0x21e   :  { %v1352_v2 = vsel %vm529_vm0, %v289_v3, 0.0  ;;  %v294_v3 = vld [vmem:[%s15998_s0 + $0x8b8] sm:$0xff] }
 0x21f   :  { %1344 = vadd.xlane.f32.xlu1 %v1343_v17  ;;  %1341 = vadd.xlane.f32.xlu0 %v1340_v59 }
 0x220   :  { %v10126_v43 = vpop.xlane.xlu1 %1140  ;;  %v10128_v24 = vpop.xlane.xlu0 %1137 }
 0x221   :  { %16438 = vst [vmem:[#allocation179_spill] sm:$0xff] %v10126_v43  ;;  %16439 = vst [vmem:[#allocation180_spill] sm:$0xff] %v10128_v24  ;;  %v1355_v24 = vsel %vm529_vm0, %v290_v42, 0.0  ;;  %v291_v43 = vld [vmem:[%s15998_s0 + $0x8a0] sm:$0xff] }
 0x222   :  { %v1358_v42 = vsel %vm529_vm0, %v291_v43, 0.0  ;;  %v296_v43 = vld [vmem:[%s15998_s0 + $0x8c8] sm:$0xff] }
 0x223   :  { %1350 = vadd.xlane.f32.xlu1 %v1349_v58  ;;  %1347 = vadd.xlane.f32.xlu0 %v1346_v25 }
 0x224   :  { %v10138_v17 = vpop.xlane.xlu1 %1146  ;;  %v10140_v59 = vpop.xlane.xlu0 %1143 }
 0x225   :  { %16440 = vst [vmem:[#allocation181_spill] sm:$0xff] %v10138_v17  ;;  %16441 = vst [vmem:[#allocation182_spill] sm:$0xff] %v10140_v59  ;;  %v1361_v59 = vsel %vm529_vm0, %v292_v16, 0.0  ;;  %v293_v17 = vld [vmem:[%s15998_s0 + $0x8b0] sm:$0xff] }
 0x226   :  { %v1364_v16 = vsel %vm529_vm0, %v293_v17, 0.0  ;;  %v298_v17 = vld [vmem:[%s15998_s0 + $0x8d8] sm:$0xff] }
 0x227   :  { %1356 = vadd.xlane.f32.xlu1 %v1355_v24  ;;  %1353 = vadd.xlane.f32.xlu0 %v1352_v2 }
 0x228   :  { %v10150_v58 = vpop.xlane.xlu1 %1152  ;;  %v10152_v25 = vpop.xlane.xlu0 %1149 }
 0x229   :  { %16442 = vst [vmem:[#allocation183_spill] sm:$0xff] %v10150_v58  ;;  %16443 = vst [vmem:[#allocation184_spill] sm:$0xff] %v10152_v25  ;;  %v1367_v25 = vsel %vm529_vm0, %v294_v3, 0.0  ;;  %v295_v58 = vld [vmem:[%s15998_s0 + $0x8c0] sm:$0xff] }
 0x22a   :  { %v1370_v3 = vsel %vm529_vm0, %v295_v58, 0.0  ;;  %v300_v58 = vld [vmem:[%s15998_s0 + $0x8e8] sm:$0xff] }
 0x22b   :  { %1362 = vadd.xlane.f32.xlu1 %v1361_v59  ;;  %1359 = vadd.xlane.f32.xlu0 %v1358_v42 }
 0x22c   :  { %v10162_v24 = vpop.xlane.xlu1 %1158  ;;  %v10164_v2 = vpop.xlane.xlu0 %1155 }
 0x22d   :  { %16444 = vst [vmem:[#allocation185_spill] sm:$0xff] %v10162_v24  ;;  %16445 = vst [vmem:[#allocation186_spill] sm:$0xff] %v10164_v2  ;;  %v1373_v2 = vsel %vm529_vm0, %v296_v43, 0.0  ;;  %v297_v24 = vld [vmem:[%s15998_s0 + $0x8d0] sm:$0xff] }
 0x22e   :  { %v1376_v43 = vsel %vm529_vm0, %v297_v24, 0.0  ;;  %v302_v24 = vld [vmem:[%s15998_s0 + $0x8f8] sm:$0xff] }
 0x22f   :  { %1368 = vadd.xlane.f32.xlu1 %v1367_v25  ;;  %1365 = vadd.xlane.f32.xlu0 %v1364_v16 }
 0x230   :  { %v10174_v59 = vpop.xlane.xlu1 %1164  ;;  %v10176_v42 = vpop.xlane.xlu0 %1161 }
 0x231   :  { %16446 = vst [vmem:[#allocation187_spill] sm:$0xff] %v10174_v59  ;;  %16447 = vst [vmem:[#allocation188_spill] sm:$0xff] %v10176_v42  ;;  %v1379_v42 = vsel %vm529_vm0, %v298_v17, 0.0  ;;  %v299_v59 = vld [vmem:[%s15998_s0 + $0x8e0] sm:$0xff] }
 0x232   :  { %v1382_v17 = vsel %vm529_vm0, %v299_v59, 0.0  ;;  %v304_v59 = vld [vmem:[%s15998_s0 + $0x908] sm:$0xff] }
 0x233   :  { %1374 = vadd.xlane.f32.xlu1 %v1373_v2  ;;  %1371 = vadd.xlane.f32.xlu0 %v1370_v3 }
 0x234   :  { %v10186_v25 = vpop.xlane.xlu1 %1170  ;;  %v10188_v16 = vpop.xlane.xlu0 %1167 }
 0x235   :  { %16448 = vst [vmem:[#allocation189_spill] sm:$0xff] %v10186_v25  ;;  %16449 = vst [vmem:[#allocation190_spill] sm:$0xff] %v10188_v16  ;;  %v1385_v16 = vsel %vm529_vm0, %v300_v58, 0.0  ;;  %v301_v25 = vld [vmem:[%s15998_s0 + $0x8f0] sm:$0xff] }
 0x236   :  { %v1388_v58 = vsel %vm529_vm0, %v301_v25, 0.0  ;;  %v306_v25 = vld [vmem:[%s15998_s0 + $0x918] sm:$0xff] }
 0x237   :  { %1380 = vadd.xlane.f32.xlu1 %v1379_v42  ;;  %1377 = vadd.xlane.f32.xlu0 %v1376_v43 }
 0x238   :  { %v10198_v2 = vpop.xlane.xlu1 %1176  ;;  %v10200_v3 = vpop.xlane.xlu0 %1173 }
 0x239   :  { %16450 = vst [vmem:[#allocation191_spill] sm:$0xff] %v10198_v2  ;;  %16451 = vst [vmem:[#allocation192_spill] sm:$0xff] %v10200_v3  ;;  %v1391_v3 = vsel %vm529_vm0, %v302_v24, 0.0  ;;  %v303_v2 = vld [vmem:[%s15998_s0 + $0x900] sm:$0xff] }
 0x23a   :  { %v1394_v24 = vsel %vm529_vm0, %v303_v2, 0.0  ;;  %v308_v2 = vld [vmem:[%s15998_s0 + $0x928] sm:$0xff] }
 0x23b   :  { %1386 = vadd.xlane.f32.xlu1 %v1385_v16  ;;  %1383 = vadd.xlane.f32.xlu0 %v1382_v17 }
 0x23c   :  { %v10210_v42 = vpop.xlane.xlu1 %1182  ;;  %v10212_v43 = vpop.xlane.xlu0 %1179 }
 0x23d   :  { %16452 = vst [vmem:[#allocation193_spill] sm:$0xff] %v10210_v42  ;;  %16453 = vst [vmem:[#allocation194_spill] sm:$0xff] %v10212_v43  ;;  %v1397_v43 = vsel %vm529_vm0, %v304_v59, 0.0  ;;  %v305_v42 = vld [vmem:[%s15998_s0 + $0x910] sm:$0xff] }
 0x23e   :  { %v1400_v59 = vsel %vm529_vm0, %v305_v42, 0.0  ;;  %v310_v42 = vld [vmem:[%s15998_s0 + $0x938] sm:$0xff] }
 0x23f   :  { %1392 = vadd.xlane.f32.xlu1 %v1391_v3  ;;  %1389 = vadd.xlane.f32.xlu0 %v1388_v58 }
 0x240   :  { %v10222_v16 = vpop.xlane.xlu1 %1188  ;;  %v10224_v17 = vpop.xlane.xlu0 %1185 }
 0x241   :  { %16454 = vst [vmem:[#allocation195_spill] sm:$0xff] %v10222_v16  ;;  %16455 = vst [vmem:[#allocation196_spill] sm:$0xff] %v10224_v17  ;;  %v1403_v17 = vsel %vm529_vm0, %v306_v25, 0.0  ;;  %v307_v16 = vld [vmem:[%s15998_s0 + $0x920] sm:$0xff] }
 0x242   :  { %v1406_v25 = vsel %vm529_vm0, %v307_v16, 0.0  ;;  %v312_v16 = vld [vmem:[%s15998_s0 + $0x948] sm:$0xff] }
 0x243   :  { %1398 = vadd.xlane.f32.xlu1 %v1397_v43  ;;  %1395 = vadd.xlane.f32.xlu0 %v1394_v24 }
 0x244   :  { %v10234_v3 = vpop.xlane.xlu1 %1194  ;;  %v10236_v58 = vpop.xlane.xlu0 %1191 }
 0x245   :  { %16456 = vst [vmem:[#allocation197_spill] sm:$0xff] %v10234_v3  ;;  %16457 = vst [vmem:[#allocation198_spill] sm:$0xff] %v10236_v58  ;;  %v1409_v58 = vsel %vm529_vm0, %v308_v2, 0.0  ;;  %v309_v3 = vld [vmem:[%s15998_s0 + $0x930] sm:$0xff] }
 0x246   :  { %v1412_v2 = vsel %vm529_vm0, %v309_v3, 0.0  ;;  %v314_v3 = vld [vmem:[%s15998_s0 + $0x958] sm:$0xff] }
 0x247   :  { %1404 = vadd.xlane.f32.xlu1 %v1403_v17  ;;  %1401 = vadd.xlane.f32.xlu0 %v1400_v59 }
 0x248   :  { %v10246_v43 = vpop.xlane.xlu1 %1200  ;;  %v10248_v24 = vpop.xlane.xlu0 %1197 }
 0x249   :  { %16458 = vst [vmem:[#allocation199_spill] sm:$0xff] %v10246_v43  ;;  %16459 = vst [vmem:[#allocation200_spill] sm:$0xff] %v10248_v24  ;;  %v1415_v24 = vsel %vm529_vm0, %v310_v42, 0.0  ;;  %v311_v43 = vld [vmem:[%s15998_s0 + $0x940] sm:$0xff] }
 0x24a   :  { %v1418_v42 = vsel %vm529_vm0, %v311_v43, 0.0  ;;  %v316_v43 = vld [vmem:[%s15998_s0 + $0x968] sm:$0xff] }
 0x24b   :  { %1410 = vadd.xlane.f32.xlu1 %v1409_v58  ;;  %1407 = vadd.xlane.f32.xlu0 %v1406_v25 }
 0x24c   :  { %v10258_v17 = vpop.xlane.xlu1 %1206  ;;  %v10260_v59 = vpop.xlane.xlu0 %1203 }
 0x24d   :  { %16460 = vst [vmem:[#allocation201_spill] sm:$0xff] %v10258_v17  ;;  %16461 = vst [vmem:[#allocation202_spill] sm:$0xff] %v10260_v59  ;;  %v1421_v59 = vsel %vm529_vm0, %v312_v16, 0.0  ;;  %v313_v17 = vld [vmem:[%s15998_s0 + $0x950] sm:$0xff] }
 0x24e   :  { %v1424_v16 = vsel %vm529_vm0, %v313_v17, 0.0  ;;  %v318_v17 = vld [vmem:[%s15998_s0 + $0x978] sm:$0xff] }
 0x24f   :  { %1416 = vadd.xlane.f32.xlu1 %v1415_v24  ;;  %1413 = vadd.xlane.f32.xlu0 %v1412_v2 }
 0x250   :  { %v10270_v58 = vpop.xlane.xlu1 %1212  ;;  %v10272_v25 = vpop.xlane.xlu0 %1209 }
 0x251   :  { %16462 = vst [vmem:[#allocation203_spill] sm:$0xff] %v10270_v58  ;;  %16463 = vst [vmem:[#allocation204_spill] sm:$0xff] %v10272_v25  ;;  %v1427_v25 = vsel %vm529_vm0, %v314_v3, 0.0  ;;  %v315_v58 = vld [vmem:[%s15998_s0 + $0x960] sm:$0xff] }
 0x252   :  { %v1430_v3 = vsel %vm529_vm0, %v315_v58, 0.0  ;;  %v320_v58 = vld [vmem:[%s15998_s0 + $0x988] sm:$0xff] }
 0x253   :  { %1422 = vadd.xlane.f32.xlu1 %v1421_v59  ;;  %1419 = vadd.xlane.f32.xlu0 %v1418_v42 }
 0x254   :  { %v10282_v24 = vpop.xlane.xlu1 %1218  ;;  %v10284_v2 = vpop.xlane.xlu0 %1215 }
 0x255   :  { %16464 = vst [vmem:[#allocation205_spill] sm:$0xff] %v10282_v24  ;;  %16465 = vst [vmem:[#allocation206_spill] sm:$0xff] %v10284_v2  ;;  %v1433_v2 = vsel %vm529_vm0, %v316_v43, 0.0  ;;  %v317_v24 = vld [vmem:[%s15998_s0 + $0x970] sm:$0xff] }
 0x256   :  { %v1436_v43 = vsel %vm529_vm0, %v317_v24, 0.0  ;;  %v322_v24 = vld [vmem:[%s15998_s0 + $0x998] sm:$0xff] }
 0x257   :  { %1428 = vadd.xlane.f32.xlu1 %v1427_v25  ;;  %1425 = vadd.xlane.f32.xlu0 %v1424_v16 }
 0x258   :  { %v10294_v59 = vpop.xlane.xlu1 %1224  ;;  %v10296_v42 = vpop.xlane.xlu0 %1221 }
 0x259   :  { %16466 = vst [vmem:[#allocation207_spill] sm:$0xff] %v10294_v59  ;;  %16467 = vst [vmem:[#allocation208_spill] sm:$0xff] %v10296_v42  ;;  %v1439_v42 = vsel %vm529_vm0, %v318_v17, 0.0  ;;  %v319_v59 = vld [vmem:[%s15998_s0 + $0x980] sm:$0xff] }
 0x25a   :  { %v1442_v17 = vsel %vm529_vm0, %v319_v59, 0.0  ;;  %v324_v59 = vld [vmem:[%s15998_s0 + $0x9a8] sm:$0xff] }
 0x25b   :  { %1434 = vadd.xlane.f32.xlu1 %v1433_v2  ;;  %1431 = vadd.xlane.f32.xlu0 %v1430_v3 }
 0x25c   :  { %v10306_v25 = vpop.xlane.xlu1 %1230  ;;  %v10308_v16 = vpop.xlane.xlu0 %1227 }
 0x25d   :  { %16468 = vst [vmem:[#allocation209_spill] sm:$0xff] %v10306_v25  ;;  %16469 = vst [vmem:[#allocation210_spill] sm:$0xff] %v10308_v16  ;;  %v1445_v16 = vsel %vm529_vm0, %v320_v58, 0.0  ;;  %v321_v25 = vld [vmem:[%s15998_s0 + $0x990] sm:$0xff] }
 0x25e   :  { %v1448_v58 = vsel %vm529_vm0, %v321_v25, 0.0  ;;  %v326_v25 = vld [vmem:[%s15998_s0 + $0x9b8] sm:$0xff] }
 0x25f   :  { %1440 = vadd.xlane.f32.xlu1 %v1439_v42  ;;  %1437 = vadd.xlane.f32.xlu0 %v1436_v43 }
 0x260   :  { %v10318_v2 = vpop.xlane.xlu1 %1236  ;;  %v10320_v3 = vpop.xlane.xlu0 %1233 }
 0x261   :  { %16470 = vst [vmem:[#allocation211_spill] sm:$0xff] %v10318_v2  ;;  %16471 = vst [vmem:[#allocation212_spill] sm:$0xff] %v10320_v3  ;;  %v1451_v3 = vsel %vm529_vm0, %v322_v24, 0.0  ;;  %v323_v2 = vld [vmem:[%s15998_s0 + $0x9a0] sm:$0xff] }
 0x262   :  { %v1454_v24 = vsel %vm529_vm0, %v323_v2, 0.0  ;;  %v328_v2 = vld [vmem:[%s15998_s0 + $0x9c8] sm:$0xff] }
 0x263   :  { %1446 = vadd.xlane.f32.xlu1 %v1445_v16  ;;  %1443 = vadd.xlane.f32.xlu0 %v1442_v17 }
 0x264   :  { %v10330_v42 = vpop.xlane.xlu1 %1242  ;;  %v10332_v43 = vpop.xlane.xlu0 %1239 }
 0x265   :  { %16472 = vst [vmem:[#allocation213_spill] sm:$0xff] %v10330_v42  ;;  %16473 = vst [vmem:[#allocation214_spill] sm:$0xff] %v10332_v43  ;;  %v1457_v43 = vsel %vm529_vm0, %v324_v59, 0.0  ;;  %v325_v42 = vld [vmem:[%s15998_s0 + $0x9b0] sm:$0xff] }
 0x266   :  { %v1460_v59 = vsel %vm529_vm0, %v325_v42, 0.0  ;;  %v330_v42 = vld [vmem:[%s15998_s0 + $0x9d8] sm:$0xff] }
 0x267   :  { %1452 = vadd.xlane.f32.xlu1 %v1451_v3  ;;  %1449 = vadd.xlane.f32.xlu0 %v1448_v58 }
 0x268   :  { %v10342_v16 = vpop.xlane.xlu1 %1248  ;;  %v10344_v17 = vpop.xlane.xlu0 %1245 }
 0x269   :  { %16474 = vst [vmem:[#allocation215_spill] sm:$0xff] %v10342_v16  ;;  %16475 = vst [vmem:[#allocation216_spill] sm:$0xff] %v10344_v17  ;;  %v1463_v17 = vsel %vm529_vm0, %v326_v25, 0.0  ;;  %v327_v16 = vld [vmem:[%s15998_s0 + $0x9c0] sm:$0xff] }
 0x26a   :  { %v1466_v25 = vsel %vm529_vm0, %v327_v16, 0.0  ;;  %v332_v16 = vld [vmem:[%s15998_s0 + $0x9e8] sm:$0xff] }
 0x26b   :  { %1458 = vadd.xlane.f32.xlu1 %v1457_v43  ;;  %1455 = vadd.xlane.f32.xlu0 %v1454_v24 }
 0x26c   :  { %v10354_v3 = vpop.xlane.xlu1 %1254  ;;  %v10356_v58 = vpop.xlane.xlu0 %1251 }
 0x26d   :  { %16476 = vst [vmem:[#allocation217_spill] sm:$0xff] %v10354_v3  ;;  %16477 = vst [vmem:[#allocation218_spill] sm:$0xff] %v10356_v58  ;;  %v1469_v58 = vsel %vm529_vm0, %v328_v2, 0.0  ;;  %v329_v3 = vld [vmem:[%s15998_s0 + $0x9d0] sm:$0xff] }
 0x26e   :  { %v1472_v2 = vsel %vm529_vm0, %v329_v3, 0.0  ;;  %v334_v3 = vld [vmem:[%s15998_s0 + $0x9f8] sm:$0xff] }
 0x26f   :  { %1464 = vadd.xlane.f32.xlu1 %v1463_v17  ;;  %1461 = vadd.xlane.f32.xlu0 %v1460_v59 }
 0x270   :  { %v10366_v43 = vpop.xlane.xlu1 %1260  ;;  %v10368_v24 = vpop.xlane.xlu0 %1257 }
 0x271   :  { %16478 = vst [vmem:[#allocation219_spill] sm:$0xff] %v10366_v43  ;;  %16479 = vst [vmem:[#allocation220_spill] sm:$0xff] %v10368_v24  ;;  %v1475_v24 = vsel %vm529_vm0, %v330_v42, 0.0  ;;  %v331_v43 = vld [vmem:[%s15998_s0 + $0x9e0] sm:$0xff] }
 0x272   :  { %v1478_v42 = vsel %vm529_vm0, %v331_v43, 0.0  ;;  %v336_v43 = vld [vmem:[%s15998_s0 + $0xa08] sm:$0xff] }
 0x273   :  { %1470 = vadd.xlane.f32.xlu1 %v1469_v58  ;;  %1467 = vadd.xlane.f32.xlu0 %v1466_v25 }
 0x274   :  { %v10378_v17 = vpop.xlane.xlu1 %1266  ;;  %v10380_v59 = vpop.xlane.xlu0 %1263 }
 0x275   :  { %16480 = vst [vmem:[#allocation221_spill] sm:$0xff] %v10378_v17  ;;  %16481 = vst [vmem:[#allocation222_spill] sm:$0xff] %v10380_v59  ;;  %v1481_v59 = vsel %vm529_vm0, %v332_v16, 0.0  ;;  %v333_v17 = vld [vmem:[%s15998_s0 + $0x9f0] sm:$0xff] }
 0x276   :  { %v1484_v16 = vsel %vm529_vm0, %v333_v17, 0.0  ;;  %v338_v17 = vld [vmem:[%s15998_s0 + $0xa18] sm:$0xff] }
 0x277   :  { %1476 = vadd.xlane.f32.xlu1 %v1475_v24  ;;  %1473 = vadd.xlane.f32.xlu0 %v1472_v2 }
 0x278   :  { %v10390_v58 = vpop.xlane.xlu1 %1272  ;;  %v10392_v25 = vpop.xlane.xlu0 %1269 }
 0x279   :  { %16482 = vst [vmem:[#allocation223_spill] sm:$0xff] %v10390_v58  ;;  %16483 = vst [vmem:[#allocation224_spill] sm:$0xff] %v10392_v25  ;;  %v1487_v25 = vsel %vm529_vm0, %v334_v3, 0.0  ;;  %v335_v58 = vld [vmem:[%s15998_s0 + $0xa00] sm:$0xff] }
 0x27a   :  { %v1490_v3 = vsel %vm529_vm0, %v335_v58, 0.0  ;;  %v340_v58 = vld [vmem:[%s15998_s0 + $0xa28] sm:$0xff] }
 0x27b   :  { %1482 = vadd.xlane.f32.xlu1 %v1481_v59  ;;  %1479 = vadd.xlane.f32.xlu0 %v1478_v42 }
 0x27c   :  { %v10402_v24 = vpop.xlane.xlu1 %1278  ;;  %v10404_v2 = vpop.xlane.xlu0 %1275 }
 0x27d   :  { %16484 = vst [vmem:[#allocation225_spill] sm:$0xff] %v10402_v24  ;;  %16485 = vst [vmem:[#allocation226_spill] sm:$0xff] %v10404_v2  ;;  %v1493_v2 = vsel %vm529_vm0, %v336_v43, 0.0  ;;  %v337_v24 = vld [vmem:[%s15998_s0 + $0xa10] sm:$0xff] }
 0x27e   :  { %v1496_v43 = vsel %vm529_vm0, %v337_v24, 0.0  ;;  %v342_v24 = vld [vmem:[%s15998_s0 + $0xa38] sm:$0xff] }
 0x27f   :  { %1488 = vadd.xlane.f32.xlu1 %v1487_v25  ;;  %1485 = vadd.xlane.f32.xlu0 %v1484_v16 }
 0x280   :  { %v10414_v59 = vpop.xlane.xlu1 %1284  ;;  %v10416_v42 = vpop.xlane.xlu0 %1281 }
 0x281   :  { %16486 = vst [vmem:[#allocation227_spill] sm:$0xff] %v10414_v59  ;;  %16487 = vst [vmem:[#allocation228_spill] sm:$0xff] %v10416_v42  ;;  %v1499_v42 = vsel %vm529_vm0, %v338_v17, 0.0  ;;  %v339_v59 = vld [vmem:[%s15998_s0 + $0xa20] sm:$0xff] }
 0x282   :  { %v1502_v17 = vsel %vm529_vm0, %v339_v59, 0.0  ;;  %v344_v59 = vld [vmem:[%s15998_s0 + $0xa48] sm:$0xff] }
 0x283   :  { %1494 = vadd.xlane.f32.xlu1 %v1493_v2  ;;  %1491 = vadd.xlane.f32.xlu0 %v1490_v3 }
 0x284   :  { %v10426_v25 = vpop.xlane.xlu1 %1290  ;;  %v10428_v16 = vpop.xlane.xlu0 %1287 }
 0x285   :  { %16488 = vst [vmem:[#allocation229_spill] sm:$0xff] %v10426_v25  ;;  %16489 = vst [vmem:[#allocation230_spill] sm:$0xff] %v10428_v16  ;;  %v1505_v16 = vsel %vm529_vm0, %v340_v58, 0.0  ;;  %v341_v25 = vld [vmem:[%s15998_s0 + $0xa30] sm:$0xff] }
 0x286   :  { %v1508_v58 = vsel %vm529_vm0, %v341_v25, 0.0  ;;  %v346_v25 = vld [vmem:[%s15998_s0 + $0xa58] sm:$0xff] }
 0x287   :  { %1500 = vadd.xlane.f32.xlu1 %v1499_v42  ;;  %1497 = vadd.xlane.f32.xlu0 %v1496_v43 }
 0x288   :  { %v10438_v2 = vpop.xlane.xlu1 %1296  ;;  %v10440_v3 = vpop.xlane.xlu0 %1293 }
 0x289   :  { %16490 = vst [vmem:[#allocation231_spill] sm:$0xff] %v10438_v2  ;;  %16491 = vst [vmem:[#allocation232_spill] sm:$0xff] %v10440_v3  ;;  %v1511_v3 = vsel %vm529_vm0, %v342_v24, 0.0  ;;  %v343_v2 = vld [vmem:[%s15998_s0 + $0xa40] sm:$0xff] }
 0x28a   :  { %v1514_v24 = vsel %vm529_vm0, %v343_v2, 0.0  ;;  %v348_v2 = vld [vmem:[%s15998_s0 + $0xa68] sm:$0xff] }
 0x28b   :  { %1506 = vadd.xlane.f32.xlu1 %v1505_v16  ;;  %1503 = vadd.xlane.f32.xlu0 %v1502_v17 }
 0x28c   :  { %v10450_v42 = vpop.xlane.xlu1 %1302  ;;  %v10452_v43 = vpop.xlane.xlu0 %1299 }
 0x28d   :  { %16492 = vst [vmem:[#allocation233_spill] sm:$0xff] %v10450_v42  ;;  %16493 = vst [vmem:[#allocation234_spill] sm:$0xff] %v10452_v43  ;;  %v1517_v43 = vsel %vm529_vm0, %v344_v59, 0.0  ;;  %v345_v42 = vld [vmem:[%s15998_s0 + $0xa50] sm:$0xff] }
 0x28e   :  { %v1520_v59 = vsel %vm529_vm0, %v345_v42, 0.0  ;;  %v350_v42 = vld [vmem:[%s15998_s0 + $0xa78] sm:$0xff] }
 0x28f   :  { %1512 = vadd.xlane.f32.xlu1 %v1511_v3  ;;  %1509 = vadd.xlane.f32.xlu0 %v1508_v58 }
 0x290   :  { %v10462_v16 = vpop.xlane.xlu1 %1308  ;;  %v10464_v17 = vpop.xlane.xlu0 %1305 }
 0x291   :  { %16494 = vst [vmem:[#allocation235_spill] sm:$0xff] %v10462_v16  ;;  %16495 = vst [vmem:[#allocation236_spill] sm:$0xff] %v10464_v17  ;;  %v1523_v17 = vsel %vm529_vm0, %v346_v25, 0.0  ;;  %v347_v16 = vld [vmem:[%s15998_s0 + $0xa60] sm:$0xff] }
 0x292   :  { %v1526_v25 = vsel %vm529_vm0, %v347_v16, 0.0  ;;  %v352_v16 = vld [vmem:[%s15998_s0 + $0xa88] sm:$0xff] }
 0x293   :  { %1518 = vadd.xlane.f32.xlu1 %v1517_v43  ;;  %1515 = vadd.xlane.f32.xlu0 %v1514_v24 }
 0x294   :  { %v10474_v3 = vpop.xlane.xlu1 %1314  ;;  %v10476_v58 = vpop.xlane.xlu0 %1311 }
 0x295   :  { %16496 = vst [vmem:[#allocation237_spill] sm:$0xff] %v10474_v3  ;;  %16497 = vst [vmem:[#allocation238_spill] sm:$0xff] %v10476_v58  ;;  %v1529_v58 = vsel %vm529_vm0, %v348_v2, 0.0  ;;  %v349_v3 = vld [vmem:[%s15998_s0 + $0xa70] sm:$0xff] }
 0x296   :  { %v1532_v2 = vsel %vm529_vm0, %v349_v3, 0.0  ;;  %v354_v3 = vld [vmem:[%s15998_s0 + $0xa98] sm:$0xff] }
 0x297   :  { %1524 = vadd.xlane.f32.xlu1 %v1523_v17  ;;  %1521 = vadd.xlane.f32.xlu0 %v1520_v59 }
 0x298   :  { %v10486_v43 = vpop.xlane.xlu1 %1320  ;;  %v10488_v24 = vpop.xlane.xlu0 %1317 }
 0x299   :  { %16498 = vst [vmem:[#allocation239_spill] sm:$0xff] %v10486_v43  ;;  %16499 = vst [vmem:[#allocation240_spill] sm:$0xff] %v10488_v24  ;;  %v1535_v24 = vsel %vm529_vm0, %v350_v42, 0.0  ;;  %v351_v43 = vld [vmem:[%s15998_s0 + $0xa80] sm:$0xff] }
 0x29a   :  { %v1538_v42 = vsel %vm529_vm0, %v351_v43, 0.0  ;;  %v356_v43 = vld [vmem:[%s15998_s0 + $0xaa8] sm:$0xff] }
 0x29b   :  { %1530 = vadd.xlane.f32.xlu1 %v1529_v58  ;;  %1527 = vadd.xlane.f32.xlu0 %v1526_v25 }
 0x29c   :  { %v10498_v17 = vpop.xlane.xlu1 %1326  ;;  %v10500_v59 = vpop.xlane.xlu0 %1323 }
 0x29d   :  { %16500 = vst [vmem:[#allocation241_spill] sm:$0xff] %v10498_v17  ;;  %16501 = vst [vmem:[#allocation242_spill] sm:$0xff] %v10500_v59  ;;  %v1541_v59 = vsel %vm529_vm0, %v352_v16, 0.0  ;;  %v353_v17 = vld [vmem:[%s15998_s0 + $0xa90] sm:$0xff] }
 0x29e   :  { %v1544_v16 = vsel %vm529_vm0, %v353_v17, 0.0  ;;  %v358_v17 = vld [vmem:[%s15998_s0 + $0xab8] sm:$0xff] }
 0x29f   :  { %1536 = vadd.xlane.f32.xlu1 %v1535_v24  ;;  %1533 = vadd.xlane.f32.xlu0 %v1532_v2 }
 0x2a0   :  { %v10510_v58 = vpop.xlane.xlu1 %1332  ;;  %v10512_v25 = vpop.xlane.xlu0 %1329 }
 0x2a1   :  { %16502 = vst [vmem:[#allocation243_spill] sm:$0xff] %v10510_v58  ;;  %16503 = vst [vmem:[#allocation244_spill] sm:$0xff] %v10512_v25  ;;  %v1547_v25 = vsel %vm529_vm0, %v354_v3, 0.0  ;;  %v355_v58 = vld [vmem:[%s15998_s0 + $0xaa0] sm:$0xff] }
 0x2a2   :  { %v1550_v3 = vsel %vm529_vm0, %v355_v58, 0.0  ;;  %v360_v58 = vld [vmem:[%s15998_s0 + $0xac8] sm:$0xff] }
 0x2a3   :  { %1542 = vadd.xlane.f32.xlu1 %v1541_v59  ;;  %1539 = vadd.xlane.f32.xlu0 %v1538_v42 }
 0x2a4   :  { %v10522_v24 = vpop.xlane.xlu1 %1338  ;;  %v10524_v2 = vpop.xlane.xlu0 %1335 }
 0x2a5   :  { %16504 = vst [vmem:[#allocation245_spill] sm:$0xff] %v10522_v24  ;;  %16505 = vst [vmem:[#allocation246_spill] sm:$0xff] %v10524_v2  ;;  %v1553_v2 = vsel %vm529_vm0, %v356_v43, 0.0  ;;  %v357_v24 = vld [vmem:[%s15998_s0 + $0xab0] sm:$0xff] }
 0x2a6   :  { %v1556_v43 = vsel %vm529_vm0, %v357_v24, 0.0  ;;  %v362_v24 = vld [vmem:[%s15998_s0 + $0xad8] sm:$0xff] }
 0x2a7   :  { %1548 = vadd.xlane.f32.xlu1 %v1547_v25  ;;  %1545 = vadd.xlane.f32.xlu0 %v1544_v16 }
 0x2a8   :  { %v10534_v59 = vpop.xlane.xlu1 %1344  ;;  %v10536_v42 = vpop.xlane.xlu0 %1341 }
 0x2a9   :  { %16506 = vst [vmem:[#allocation247_spill] sm:$0xff] %v10534_v59  ;;  %16507 = vst [vmem:[#allocation248_spill] sm:$0xff] %v10536_v42  ;;  %v1559_v42 = vsel %vm529_vm0, %v358_v17, 0.0  ;;  %v359_v59 = vld [vmem:[%s15998_s0 + $0xac0] sm:$0xff] }
 0x2aa   :  { %v1562_v17 = vsel %vm529_vm0, %v359_v59, 0.0  ;;  %v364_v59 = vld [vmem:[%s15998_s0 + $0xae8] sm:$0xff] }
 0x2ab   :  { %1554 = vadd.xlane.f32.xlu1 %v1553_v2  ;;  %1551 = vadd.xlane.f32.xlu0 %v1550_v3 }
 0x2ac   :  { %v10546_v25 = vpop.xlane.xlu1 %1350  ;;  %v10548_v16 = vpop.xlane.xlu0 %1347 }
 0x2ad   :  { %16508 = vst [vmem:[#allocation249_spill] sm:$0xff] %v10546_v25  ;;  %16509 = vst [vmem:[#allocation250_spill] sm:$0xff] %v10548_v16  ;;  %v1565_v16 = vsel %vm529_vm0, %v360_v58, 0.0  ;;  %v361_v25 = vld [vmem:[%s15998_s0 + $0xad0] sm:$0xff] }
 0x2ae   :  { %v1568_v58 = vsel %vm529_vm0, %v361_v25, 0.0  ;;  %v366_v25 = vld [vmem:[%s15998_s0 + $0xaf8] sm:$0xff] }
 0x2af   :  { %1560 = vadd.xlane.f32.xlu1 %v1559_v42  ;;  %1557 = vadd.xlane.f32.xlu0 %v1556_v43 }
 0x2b0   :  { %v10558_v2 = vpop.xlane.xlu1 %1356  ;;  %v10560_v3 = vpop.xlane.xlu0 %1353 }
 0x2b1   :  { %16510 = vst [vmem:[#allocation251_spill] sm:$0xff] %v10558_v2  ;;  %16511 = vst [vmem:[#allocation252_spill] sm:$0xff] %v10560_v3  ;;  %v1571_v3 = vsel %vm529_vm0, %v362_v24, 0.0  ;;  %v363_v2 = vld [vmem:[%s15998_s0 + $0xae0] sm:$0xff] }
 0x2b2   :  { %v1574_v24 = vsel %vm529_vm0, %v363_v2, 0.0  ;;  %v368_v2 = vld [vmem:[%s15998_s0 + $0xb08] sm:$0xff] }
 0x2b3   :  { %1566 = vadd.xlane.f32.xlu1 %v1565_v16  ;;  %1563 = vadd.xlane.f32.xlu0 %v1562_v17 }
 0x2b4   :  { %v10570_v42 = vpop.xlane.xlu1 %1362  ;;  %v10572_v43 = vpop.xlane.xlu0 %1359 }
 0x2b5   :  { %16512 = vst [vmem:[#allocation253_spill] sm:$0xff] %v10570_v42  ;;  %16513 = vst [vmem:[#allocation254_spill] sm:$0xff] %v10572_v43  ;;  %v1577_v43 = vsel %vm529_vm0, %v364_v59, 0.0  ;;  %v365_v42 = vld [vmem:[%s15998_s0 + $0xaf0] sm:$0xff] }
 0x2b6   :  { %v1580_v59 = vsel %vm529_vm0, %v365_v42, 0.0  ;;  %v370_v42 = vld [vmem:[%s15998_s0 + $0xb18] sm:$0xff] }
 0x2b7   :  { %1572 = vadd.xlane.f32.xlu1 %v1571_v3  ;;  %1569 = vadd.xlane.f32.xlu0 %v1568_v58 }
 0x2b8   :  { %v10582_v16 = vpop.xlane.xlu1 %1368  ;;  %v10584_v17 = vpop.xlane.xlu0 %1365 }
 0x2b9   :  { %16514 = vst [vmem:[#allocation255_spill] sm:$0xff] %v10582_v16  ;;  %16515 = vst [vmem:[#allocation256_spill] sm:$0xff] %v10584_v17  ;;  %v1583_v17 = vsel %vm529_vm0, %v366_v25, 0.0  ;;  %v367_v16 = vld [vmem:[%s15998_s0 + $0xb00] sm:$0xff] }
 0x2ba   :  { %v1586_v25 = vsel %vm529_vm0, %v367_v16, 0.0  ;;  %v372_v16 = vld [vmem:[%s15998_s0 + $0xb28] sm:$0xff] }
 0x2bb   :  { %1578 = vadd.xlane.f32.xlu1 %v1577_v43  ;;  %1575 = vadd.xlane.f32.xlu0 %v1574_v24 }
 0x2bc   :  { %v10594_v3 = vpop.xlane.xlu1 %1374  ;;  %v10596_v58 = vpop.xlane.xlu0 %1371 }
 0x2bd   :  { %16516 = vst [vmem:[#allocation257_spill] sm:$0xff] %v10594_v3  ;;  %16517 = vst [vmem:[#allocation258_spill] sm:$0xff] %v10596_v58  ;;  %v1589_v58 = vsel %vm529_vm0, %v368_v2, 0.0  ;;  %v369_v3 = vld [vmem:[%s15998_s0 + $0xb10] sm:$0xff] }
 0x2be   :  { %v1592_v2 = vsel %vm529_vm0, %v369_v3, 0.0  ;;  %v374_v3 = vld [vmem:[%s15998_s0 + $0xb38] sm:$0xff] }
 0x2bf   :  { %1584 = vadd.xlane.f32.xlu1 %v1583_v17  ;;  %1581 = vadd.xlane.f32.xlu0 %v1580_v59 }
 0x2c0   :  { %v10606_v43 = vpop.xlane.xlu1 %1380  ;;  %v10608_v24 = vpop.xlane.xlu0 %1377 }
 0x2c1   :  { %16518 = vst [vmem:[#allocation259_spill] sm:$0xff] %v10606_v43  ;;  %16519 = vst [vmem:[#allocation260_spill] sm:$0xff] %v10608_v24  ;;  %v1595_v24 = vsel %vm529_vm0, %v370_v42, 0.0  ;;  %v371_v43 = vld [vmem:[%s15998_s0 + $0xb20] sm:$0xff] }
 0x2c2   :  { %v1598_v42 = vsel %vm529_vm0, %v371_v43, 0.0  ;;  %v376_v43 = vld [vmem:[%s15998_s0 + $0xb48] sm:$0xff] }
 0x2c3   :  { %1590 = vadd.xlane.f32.xlu1 %v1589_v58  ;;  %1587 = vadd.xlane.f32.xlu0 %v1586_v25 }
 0x2c4   :  { %v10618_v17 = vpop.xlane.xlu1 %1386  ;;  %v10620_v59 = vpop.xlane.xlu0 %1383 }
 0x2c5   :  { %16520 = vst [vmem:[#allocation261_spill] sm:$0xff] %v10618_v17  ;;  %16521 = vst [vmem:[#allocation262_spill] sm:$0xff] %v10620_v59  ;;  %v1601_v59 = vsel %vm529_vm0, %v372_v16, 0.0  ;;  %v373_v17 = vld [vmem:[%s15998_s0 + $0xb30] sm:$0xff] }
 0x2c6   :  { %v1604_v16 = vsel %vm529_vm0, %v373_v17, 0.0  ;;  %v378_v17 = vld [vmem:[%s15998_s0 + $0xb58] sm:$0xff] }
 0x2c7   :  { %1596 = vadd.xlane.f32.xlu1 %v1595_v24  ;;  %1593 = vadd.xlane.f32.xlu0 %v1592_v2 }
 0x2c8   :  { %v10630_v58 = vpop.xlane.xlu1 %1392  ;;  %v10632_v25 = vpop.xlane.xlu0 %1389 }
 0x2c9   :  { %16522 = vst [vmem:[#allocation263_spill] sm:$0xff] %v10630_v58  ;;  %16523 = vst [vmem:[#allocation264_spill] sm:$0xff] %v10632_v25  ;;  %v1607_v25 = vsel %vm529_vm0, %v374_v3, 0.0  ;;  %v375_v58 = vld [vmem:[%s15998_s0 + $0xb40] sm:$0xff] }
 0x2ca   :  { %v1610_v3 = vsel %vm529_vm0, %v375_v58, 0.0  ;;  %v380_v58 = vld [vmem:[%s15998_s0 + $0xb68] sm:$0xff] }
 0x2cb   :  { %1602 = vadd.xlane.f32.xlu1 %v1601_v59  ;;  %1599 = vadd.xlane.f32.xlu0 %v1598_v42 }
 0x2cc   :  { %v10642_v24 = vpop.xlane.xlu1 %1398  ;;  %v10644_v2 = vpop.xlane.xlu0 %1395 }
 0x2cd   :  { %16524 = vst [vmem:[#allocation265_spill] sm:$0xff] %v10642_v24  ;;  %16525 = vst [vmem:[#allocation266_spill] sm:$0xff] %v10644_v2  ;;  %v1613_v2 = vsel %vm529_vm0, %v376_v43, 0.0  ;;  %v377_v24 = vld [vmem:[%s15998_s0 + $0xb50] sm:$0xff] }
 0x2ce   :  { %v1616_v43 = vsel %vm529_vm0, %v377_v24, 0.0  ;;  %v382_v24 = vld [vmem:[%s15998_s0 + $0xb78] sm:$0xff] }
 0x2cf   :  { %1608 = vadd.xlane.f32.xlu1 %v1607_v25  ;;  %1605 = vadd.xlane.f32.xlu0 %v1604_v16 }
 0x2d0   :  { %v10654_v59 = vpop.xlane.xlu1 %1404  ;;  %v10656_v42 = vpop.xlane.xlu0 %1401 }
 0x2d1   :  { %16526 = vst [vmem:[#allocation267_spill] sm:$0xff] %v10654_v59  ;;  %16527 = vst [vmem:[#allocation268_spill] sm:$0xff] %v10656_v42  ;;  %v1619_v42 = vsel %vm529_vm0, %v378_v17, 0.0  ;;  %v379_v59 = vld [vmem:[%s15998_s0 + $0xb60] sm:$0xff] }
 0x2d2   :  { %v1622_v17 = vsel %vm529_vm0, %v379_v59, 0.0  ;;  %v384_v59 = vld [vmem:[%s15998_s0 + $0xb88] sm:$0xff] }
 0x2d3   :  { %1614 = vadd.xlane.f32.xlu1 %v1613_v2  ;;  %1611 = vadd.xlane.f32.xlu0 %v1610_v3 }
 0x2d4   :  { %v10666_v25 = vpop.xlane.xlu1 %1410  ;;  %v10668_v16 = vpop.xlane.xlu0 %1407 }
 0x2d5   :  { %16528 = vst [vmem:[#allocation269_spill] sm:$0xff] %v10666_v25  ;;  %16529 = vst [vmem:[#allocation270_spill] sm:$0xff] %v10668_v16  ;;  %v1625_v16 = vsel %vm529_vm0, %v380_v58, 0.0  ;;  %v381_v25 = vld [vmem:[%s15998_s0 + $0xb70] sm:$0xff] }
 0x2d6   :  { %v1628_v58 = vsel %vm529_vm0, %v381_v25, 0.0  ;;  %v386_v25 = vld [vmem:[%s15998_s0 + $0xb98] sm:$0xff] }
 0x2d7   :  { %1620 = vadd.xlane.f32.xlu1 %v1619_v42  ;;  %1617 = vadd.xlane.f32.xlu0 %v1616_v43 }
 0x2d8   :  { %v10678_v2 = vpop.xlane.xlu1 %1416  ;;  %v10680_v3 = vpop.xlane.xlu0 %1413 }
 0x2d9   :  { %16530 = vst [vmem:[#allocation271_spill] sm:$0xff] %v10678_v2  ;;  %16531 = vst [vmem:[#allocation272_spill] sm:$0xff] %v10680_v3  ;;  %v1631_v3 = vsel %vm529_vm0, %v382_v24, 0.0  ;;  %v383_v2 = vld [vmem:[%s15998_s0 + $0xb80] sm:$0xff] }
 0x2da   :  { %v1634_v24 = vsel %vm529_vm0, %v383_v2, 0.0  ;;  %v388_v2 = vld [vmem:[%s15998_s0 + $0xba8] sm:$0xff] }
 0x2db   :  { %1626 = vadd.xlane.f32.xlu1 %v1625_v16  ;;  %1623 = vadd.xlane.f32.xlu0 %v1622_v17 }
 0x2dc   :  { %v10690_v42 = vpop.xlane.xlu1 %1422  ;;  %v10692_v43 = vpop.xlane.xlu0 %1419 }
 0x2dd   :  { %16532 = vst [vmem:[#allocation273_spill] sm:$0xff] %v10690_v42  ;;  %16533 = vst [vmem:[#allocation274_spill] sm:$0xff] %v10692_v43  ;;  %v1637_v43 = vsel %vm529_vm0, %v384_v59, 0.0  ;;  %v385_v42 = vld [vmem:[%s15998_s0 + $0xb90] sm:$0xff] }
 0x2de   :  { %v1640_v59 = vsel %vm529_vm0, %v385_v42, 0.0  ;;  %v390_v42 = vld [vmem:[%s15998_s0 + $0xbb8] sm:$0xff] }
 0x2df   :  { %1632 = vadd.xlane.f32.xlu1 %v1631_v3  ;;  %1629 = vadd.xlane.f32.xlu0 %v1628_v58 }
 0x2e0   :  { %v10702_v16 = vpop.xlane.xlu1 %1428  ;;  %v10704_v17 = vpop.xlane.xlu0 %1425 }
 0x2e1   :  { %16534 = vst [vmem:[#allocation275_spill] sm:$0xff] %v10702_v16  ;;  %16535 = vst [vmem:[#allocation276_spill] sm:$0xff] %v10704_v17  ;;  %v1643_v17 = vsel %vm529_vm0, %v386_v25, 0.0  ;;  %v387_v16 = vld [vmem:[%s15998_s0 + $0xba0] sm:$0xff] }
 0x2e2   :  { %v1646_v25 = vsel %vm529_vm0, %v387_v16, 0.0  ;;  %v392_v16 = vld [vmem:[%s15998_s0 + $0xbc8] sm:$0xff] }
 0x2e3   :  { %1638 = vadd.xlane.f32.xlu1 %v1637_v43  ;;  %1635 = vadd.xlane.f32.xlu0 %v1634_v24 }
 0x2e4   :  { %v10714_v3 = vpop.xlane.xlu1 %1434  ;;  %v10716_v58 = vpop.xlane.xlu0 %1431 }
 0x2e5   :  { %16536 = vst [vmem:[#allocation277_spill] sm:$0xff] %v10714_v3  ;;  %16537 = vst [vmem:[#allocation278_spill] sm:$0xff] %v10716_v58  ;;  %v1649_v58 = vsel %vm529_vm0, %v388_v2, 0.0  ;;  %v389_v3 = vld [vmem:[%s15998_s0 + $0xbb0] sm:$0xff] }
 0x2e6   :  { %v1652_v2 = vsel %vm529_vm0, %v389_v3, 0.0  ;;  %v394_v3 = vld [vmem:[%s15998_s0 + $0xbd8] sm:$0xff] }
 0x2e7   :  { %1644 = vadd.xlane.f32.xlu1 %v1643_v17  ;;  %1641 = vadd.xlane.f32.xlu0 %v1640_v59 }
 0x2e8   :  { %v10726_v43 = vpop.xlane.xlu1 %1440  ;;  %v10728_v24 = vpop.xlane.xlu0 %1437 }
 0x2e9   :  { %16538 = vst [vmem:[#allocation279_spill] sm:$0xff] %v10726_v43  ;;  %16539 = vst [vmem:[#allocation280_spill] sm:$0xff] %v10728_v24  ;;  %v1655_v24 = vsel %vm529_vm0, %v390_v42, 0.0  ;;  %v391_v43 = vld [vmem:[%s15998_s0 + $0xbc0] sm:$0xff] }
 0x2ea   :  { %v1658_v42 = vsel %vm529_vm0, %v391_v43, 0.0  ;;  %v396_v43 = vld [vmem:[%s15998_s0 + $0xbe8] sm:$0xff] }
 0x2eb   :  { %1650 = vadd.xlane.f32.xlu1 %v1649_v58  ;;  %1647 = vadd.xlane.f32.xlu0 %v1646_v25 }
 0x2ec   :  { %v10738_v17 = vpop.xlane.xlu1 %1446  ;;  %v10740_v59 = vpop.xlane.xlu0 %1443 }
 0x2ed   :  { %16540 = vst [vmem:[#allocation281_spill] sm:$0xff] %v10738_v17  ;;  %16541 = vst [vmem:[#allocation282_spill] sm:$0xff] %v10740_v59  ;;  %v1661_v59 = vsel %vm529_vm0, %v392_v16, 0.0  ;;  %v393_v17 = vld [vmem:[%s15998_s0 + $0xbd0] sm:$0xff] }
 0x2ee   :  { %v1664_v16 = vsel %vm529_vm0, %v393_v17, 0.0  ;;  %v398_v17 = vld [vmem:[%s15998_s0 + $0xbf8] sm:$0xff] }
 0x2ef   :  { %1656 = vadd.xlane.f32.xlu1 %v1655_v24  ;;  %1653 = vadd.xlane.f32.xlu0 %v1652_v2 }
 0x2f0   :  { %v10750_v58 = vpop.xlane.xlu1 %1452  ;;  %v10752_v25 = vpop.xlane.xlu0 %1449 }
 0x2f1   :  { %16542 = vst [vmem:[#allocation283_spill] sm:$0xff] %v10750_v58  ;;  %16543 = vst [vmem:[#allocation284_spill] sm:$0xff] %v10752_v25  ;;  %v1667_v25 = vsel %vm529_vm0, %v394_v3, 0.0  ;;  %v395_v58 = vld [vmem:[%s15998_s0 + $0xbe0] sm:$0xff] }
 0x2f2   :  { %v1670_v3 = vsel %vm529_vm0, %v395_v58, 0.0  ;;  %v400_v58 = vld [vmem:[%s15998_s0 + $0xc08] sm:$0xff] }
 0x2f3   :  { %1662 = vadd.xlane.f32.xlu1 %v1661_v59  ;;  %1659 = vadd.xlane.f32.xlu0 %v1658_v42 }
 0x2f4   :  { %v10762_v24 = vpop.xlane.xlu1 %1458  ;;  %v10764_v2 = vpop.xlane.xlu0 %1455 }
 0x2f5   :  { %16544 = vst [vmem:[#allocation285_spill] sm:$0xff] %v10762_v24  ;;  %16545 = vst [vmem:[#allocation286_spill] sm:$0xff] %v10764_v2  ;;  %v1673_v2 = vsel %vm529_vm0, %v396_v43, 0.0  ;;  %v397_v24 = vld [vmem:[%s15998_s0 + $0xbf0] sm:$0xff] }
 0x2f6   :  { %v1676_v43 = vsel %vm529_vm0, %v397_v24, 0.0  ;;  %v402_v24 = vld [vmem:[%s15998_s0 + $0xc18] sm:$0xff] }
 0x2f7   :  { %1668 = vadd.xlane.f32.xlu1 %v1667_v25  ;;  %1665 = vadd.xlane.f32.xlu0 %v1664_v16 }
 0x2f8   :  { %v10774_v59 = vpop.xlane.xlu1 %1464  ;;  %v10776_v42 = vpop.xlane.xlu0 %1461 }
 0x2f9   :  { %16546 = vst [vmem:[#allocation287_spill] sm:$0xff] %v10774_v59  ;;  %16547 = vst [vmem:[#allocation288_spill] sm:$0xff] %v10776_v42  ;;  %v1679_v42 = vsel %vm529_vm0, %v398_v17, 0.0  ;;  %v399_v59 = vld [vmem:[%s15998_s0 + $0xc00] sm:$0xff] }
 0x2fa   :  { %v1682_v17 = vsel %vm529_vm0, %v399_v59, 0.0  ;;  %v404_v59 = vld [vmem:[%s15998_s0 + $0xc28] sm:$0xff] }
 0x2fb   :  { %1674 = vadd.xlane.f32.xlu1 %v1673_v2  ;;  %1671 = vadd.xlane.f32.xlu0 %v1670_v3 }
 0x2fc   :  { %v10786_v25 = vpop.xlane.xlu1 %1470  ;;  %v10788_v16 = vpop.xlane.xlu0 %1467 }
 0x2fd   :  { %16548 = vst [vmem:[#allocation289_spill] sm:$0xff] %v10786_v25  ;;  %16549 = vst [vmem:[#allocation290_spill] sm:$0xff] %v10788_v16  ;;  %v1685_v16 = vsel %vm529_vm0, %v400_v58, 0.0  ;;  %v401_v25 = vld [vmem:[%s15998_s0 + $0xc10] sm:$0xff] }
 0x2fe   :  { %v1688_v58 = vsel %vm529_vm0, %v401_v25, 0.0  ;;  %v406_v25 = vld [vmem:[%s15998_s0 + $0xc38] sm:$0xff] }
 0x2ff   :  { %1680 = vadd.xlane.f32.xlu1 %v1679_v42  ;;  %1677 = vadd.xlane.f32.xlu0 %v1676_v43 }
 0x300   :  { %v10798_v2 = vpop.xlane.xlu1 %1476  ;;  %v10800_v3 = vpop.xlane.xlu0 %1473 }
 0x301   :  { %16550 = vst [vmem:[#allocation291_spill] sm:$0xff] %v10798_v2  ;;  %16551 = vst [vmem:[#allocation292_spill] sm:$0xff] %v10800_v3  ;;  %v1691_v3 = vsel %vm529_vm0, %v402_v24, 0.0  ;;  %v403_v2 = vld [vmem:[%s15998_s0 + $0xc20] sm:$0xff] }
 0x302   :  { %v1694_v24 = vsel %vm529_vm0, %v403_v2, 0.0  ;;  %v408_v2 = vld [vmem:[%s15998_s0 + $0xc48] sm:$0xff] }
 0x303   :  { %1686 = vadd.xlane.f32.xlu1 %v1685_v16  ;;  %1683 = vadd.xlane.f32.xlu0 %v1682_v17 }
 0x304   :  { %v10810_v42 = vpop.xlane.xlu1 %1482  ;;  %v10812_v43 = vpop.xlane.xlu0 %1479 }
 0x305   :  { %16552 = vst [vmem:[#allocation293_spill] sm:$0xff] %v10810_v42  ;;  %16553 = vst [vmem:[#allocation294_spill] sm:$0xff] %v10812_v43  ;;  %v1697_v43 = vsel %vm529_vm0, %v404_v59, 0.0  ;;  %v405_v42 = vld [vmem:[%s15998_s0 + $0xc30] sm:$0xff] }
 0x306   :  { %v1700_v59 = vsel %vm529_vm0, %v405_v42, 0.0  ;;  %v410_v42 = vld [vmem:[%s15998_s0 + $0xc58] sm:$0xff] }
 0x307   :  { %1692 = vadd.xlane.f32.xlu1 %v1691_v3  ;;  %1689 = vadd.xlane.f32.xlu0 %v1688_v58 }
 0x308   :  { %v10822_v16 = vpop.xlane.xlu1 %1488  ;;  %v10824_v17 = vpop.xlane.xlu0 %1485 }
 0x309   :  { %16554 = vst [vmem:[#allocation295_spill] sm:$0xff] %v10822_v16  ;;  %16555 = vst [vmem:[#allocation296_spill] sm:$0xff] %v10824_v17  ;;  %v1703_v17 = vsel %vm529_vm0, %v406_v25, 0.0  ;;  %v407_v16 = vld [vmem:[%s15998_s0 + $0xc40] sm:$0xff] }
 0x30a   :  { %v1706_v25 = vsel %vm529_vm0, %v407_v16, 0.0  ;;  %v412_v16 = vld [vmem:[%s15998_s0 + $0xc68] sm:$0xff] }
 0x30b   :  { %1698 = vadd.xlane.f32.xlu1 %v1697_v43  ;;  %1695 = vadd.xlane.f32.xlu0 %v1694_v24 }
 0x30c   :  { %v10834_v3 = vpop.xlane.xlu1 %1494  ;;  %v10836_v58 = vpop.xlane.xlu0 %1491 }
 0x30d   :  { %16556 = vst [vmem:[#allocation297_spill] sm:$0xff] %v10834_v3  ;;  %16557 = vst [vmem:[#allocation298_spill] sm:$0xff] %v10836_v58  ;;  %v1709_v58 = vsel %vm529_vm0, %v408_v2, 0.0  ;;  %v409_v3 = vld [vmem:[%s15998_s0 + $0xc50] sm:$0xff] }
 0x30e   :  { %v1712_v2 = vsel %vm529_vm0, %v409_v3, 0.0  ;;  %v414_v3 = vld [vmem:[%s15998_s0 + $0xc78] sm:$0xff] }
 0x30f   :  { %1704 = vadd.xlane.f32.xlu1 %v1703_v17  ;;  %1701 = vadd.xlane.f32.xlu0 %v1700_v59 }
 0x310   :  { %v10846_v43 = vpop.xlane.xlu1 %1500  ;;  %v10848_v24 = vpop.xlane.xlu0 %1497 }
 0x311   :  { %16558 = vst [vmem:[#allocation299_spill] sm:$0xff] %v10846_v43  ;;  %16559 = vst [vmem:[#allocation300_spill] sm:$0xff] %v10848_v24  ;;  %v1715_v24 = vsel %vm529_vm0, %v410_v42, 0.0  ;;  %v411_v43 = vld [vmem:[%s15998_s0 + $0xc60] sm:$0xff] }
 0x312   :  { %v1718_v42 = vsel %vm529_vm0, %v411_v43, 0.0  ;;  %v416_v43 = vld [vmem:[%s15998_s0 + $0xc88] sm:$0xff] }
 0x313   :  { %1710 = vadd.xlane.f32.xlu1 %v1709_v58  ;;  %1707 = vadd.xlane.f32.xlu0 %v1706_v25 }
 0x314   :  { %v10858_v17 = vpop.xlane.xlu1 %1506  ;;  %v10860_v59 = vpop.xlane.xlu0 %1503 }
 0x315   :  { %16560 = vst [vmem:[#allocation301_spill] sm:$0xff] %v10858_v17  ;;  %16561 = vst [vmem:[#allocation302_spill] sm:$0xff] %v10860_v59  ;;  %v1721_v59 = vsel %vm529_vm0, %v412_v16, 0.0  ;;  %v413_v17 = vld [vmem:[%s15998_s0 + $0xc70] sm:$0xff] }
 0x316   :  { %v1724_v16 = vsel %vm529_vm0, %v413_v17, 0.0  ;;  %v418_v17 = vld [vmem:[%s15998_s0 + $0xc98] sm:$0xff] }
 0x317   :  { %1716 = vadd.xlane.f32.xlu1 %v1715_v24  ;;  %1713 = vadd.xlane.f32.xlu0 %v1712_v2 }
 0x318   :  { %v10870_v58 = vpop.xlane.xlu1 %1512  ;;  %v10872_v25 = vpop.xlane.xlu0 %1509 }
 0x319   :  { %16562 = vst [vmem:[#allocation303_spill] sm:$0xff] %v10870_v58  ;;  %16563 = vst [vmem:[#allocation304_spill] sm:$0xff] %v10872_v25  ;;  %v1727_v25 = vsel %vm529_vm0, %v414_v3, 0.0  ;;  %v415_v58 = vld [vmem:[%s15998_s0 + $0xc80] sm:$0xff] }
 0x31a   :  { %v1730_v3 = vsel %vm529_vm0, %v415_v58, 0.0  ;;  %v420_v58 = vld [vmem:[%s15998_s0 + $0xca8] sm:$0xff] }
 0x31b   :  { %1722 = vadd.xlane.f32.xlu1 %v1721_v59  ;;  %1719 = vadd.xlane.f32.xlu0 %v1718_v42 }
 0x31c   :  { %v10882_v24 = vpop.xlane.xlu1 %1518  ;;  %v10884_v2 = vpop.xlane.xlu0 %1515 }
 0x31d   :  { %16564 = vst [vmem:[#allocation305_spill] sm:$0xff] %v10882_v24  ;;  %16565 = vst [vmem:[#allocation306_spill] sm:$0xff] %v10884_v2  ;;  %v1733_v2 = vsel %vm529_vm0, %v416_v43, 0.0  ;;  %v417_v24 = vld [vmem:[%s15998_s0 + $0xc90] sm:$0xff] }
 0x31e   :  { %v1736_v43 = vsel %vm529_vm0, %v417_v24, 0.0  ;;  %v422_v24 = vld [vmem:[%s15998_s0 + $0xcb8] sm:$0xff] }
 0x31f   :  { %1728 = vadd.xlane.f32.xlu1 %v1727_v25  ;;  %1725 = vadd.xlane.f32.xlu0 %v1724_v16 }
 0x320   :  { %v10894_v59 = vpop.xlane.xlu1 %1524  ;;  %v10896_v42 = vpop.xlane.xlu0 %1521 }
 0x321   :  { %16566 = vst [vmem:[#allocation307_spill] sm:$0xff] %v10894_v59  ;;  %16567 = vst [vmem:[#allocation308_spill] sm:$0xff] %v10896_v42  ;;  %v1739_v42 = vsel %vm529_vm0, %v418_v17, 0.0  ;;  %v419_v59 = vld [vmem:[%s15998_s0 + $0xca0] sm:$0xff] }
 0x322   :  { %v1742_v17 = vsel %vm529_vm0, %v419_v59, 0.0  ;;  %v424_v59 = vld [vmem:[%s15998_s0 + $0xcc8] sm:$0xff] }
 0x323   :  { %1734 = vadd.xlane.f32.xlu1 %v1733_v2  ;;  %1731 = vadd.xlane.f32.xlu0 %v1730_v3 }
 0x324   :  { %v10906_v25 = vpop.xlane.xlu1 %1530  ;;  %v10908_v16 = vpop.xlane.xlu0 %1527 }
 0x325   :  { %16568 = vst [vmem:[#allocation309_spill] sm:$0xff] %v10906_v25  ;;  %16569 = vst [vmem:[#allocation310_spill] sm:$0xff] %v10908_v16  ;;  %v1745_v16 = vsel %vm529_vm0, %v420_v58, 0.0  ;;  %v421_v25 = vld [vmem:[%s15998_s0 + $0xcb0] sm:$0xff] }
 0x326   :  { %v1748_v58 = vsel %vm529_vm0, %v421_v25, 0.0  ;;  %v426_v25 = vld [vmem:[%s15998_s0 + $0xcd8] sm:$0xff] }
 0x327   :  { %1740 = vadd.xlane.f32.xlu1 %v1739_v42  ;;  %1737 = vadd.xlane.f32.xlu0 %v1736_v43 }
 0x328   :  { %v10918_v2 = vpop.xlane.xlu1 %1536  ;;  %v10920_v3 = vpop.xlane.xlu0 %1533 }
 0x329   :  { %16570 = vst [vmem:[#allocation311_spill] sm:$0xff] %v10918_v2  ;;  %16571 = vst [vmem:[#allocation312_spill] sm:$0xff] %v10920_v3  ;;  %v1751_v3 = vsel %vm529_vm0, %v422_v24, 0.0  ;;  %v423_v2 = vld [vmem:[%s15998_s0 + $0xcc0] sm:$0xff] }
 0x32a   :  { %v1754_v24 = vsel %vm529_vm0, %v423_v2, 0.0  ;;  %v428_v2 = vld [vmem:[%s15998_s0 + $0xce8] sm:$0xff] }
 0x32b   :  { %1746 = vadd.xlane.f32.xlu1 %v1745_v16  ;;  %1743 = vadd.xlane.f32.xlu0 %v1742_v17 }
 0x32c   :  { %v10930_v42 = vpop.xlane.xlu1 %1542  ;;  %v10932_v43 = vpop.xlane.xlu0 %1539 }
 0x32d   :  { %16572 = vst [vmem:[#allocation313_spill] sm:$0xff] %v10930_v42  ;;  %16573 = vst [vmem:[#allocation314_spill] sm:$0xff] %v10932_v43  ;;  %v1757_v43 = vsel %vm529_vm0, %v424_v59, 0.0  ;;  %v425_v42 = vld [vmem:[%s15998_s0 + $0xcd0] sm:$0xff] }
 0x32e   :  { %v1760_v59 = vsel %vm529_vm0, %v425_v42, 0.0  ;;  %v430_v42 = vld [vmem:[%s15998_s0 + $0xcf8] sm:$0xff] }
 0x32f   :  { %1752 = vadd.xlane.f32.xlu1 %v1751_v3  ;;  %1749 = vadd.xlane.f32.xlu0 %v1748_v58 }
 0x330   :  { %v10942_v16 = vpop.xlane.xlu1 %1548  ;;  %v10944_v17 = vpop.xlane.xlu0 %1545 }
 0x331   :  { %16574 = vst [vmem:[#allocation315_spill] sm:$0xff] %v10942_v16  ;;  %16575 = vst [vmem:[#allocation316_spill] sm:$0xff] %v10944_v17  ;;  %v1763_v17 = vsel %vm529_vm0, %v426_v25, 0.0  ;;  %v427_v16 = vld [vmem:[%s15998_s0 + $0xce0] sm:$0xff] }
 0x332   :  { %v1766_v25 = vsel %vm529_vm0, %v427_v16, 0.0  ;;  %v432_v16 = vld [vmem:[%s15998_s0 + $0xd08] sm:$0xff] }
 0x333   :  { %1758 = vadd.xlane.f32.xlu1 %v1757_v43  ;;  %1755 = vadd.xlane.f32.xlu0 %v1754_v24 }
 0x334   :  { %v10954_v3 = vpop.xlane.xlu1 %1554  ;;  %v10956_v58 = vpop.xlane.xlu0 %1551 }
 0x335   :  { %16576 = vst [vmem:[#allocation317_spill] sm:$0xff] %v10954_v3  ;;  %16577 = vst [vmem:[#allocation318_spill] sm:$0xff] %v10956_v58  ;;  %v1769_v58 = vsel %vm529_vm0, %v428_v2, 0.0  ;;  %v429_v3 = vld [vmem:[%s15998_s0 + $0xcf0] sm:$0xff] }
 0x336   :  { %v1772_v2 = vsel %vm529_vm0, %v429_v3, 0.0  ;;  %v434_v3 = vld [vmem:[%s15998_s0 + $0xd18] sm:$0xff] }
 0x337   :  { %1764 = vadd.xlane.f32.xlu1 %v1763_v17  ;;  %1761 = vadd.xlane.f32.xlu0 %v1760_v59 }
 0x338   :  { %v10966_v43 = vpop.xlane.xlu1 %1560  ;;  %v10968_v24 = vpop.xlane.xlu0 %1557 }
 0x339   :  { %16578 = vst [vmem:[#allocation319_spill] sm:$0xff] %v10966_v43  ;;  %16579 = vst [vmem:[#allocation320_spill] sm:$0xff] %v10968_v24  ;;  %v1775_v24 = vsel %vm529_vm0, %v430_v42, 0.0  ;;  %v431_v43 = vld [vmem:[%s15998_s0 + $0xd00] sm:$0xff] }
 0x33a   :  { %v1778_v42 = vsel %vm529_vm0, %v431_v43, 0.0  ;;  %v436_v43 = vld [vmem:[%s15998_s0 + $0xd28] sm:$0xff] }
 0x33b   :  { %1770 = vadd.xlane.f32.xlu1 %v1769_v58  ;;  %1767 = vadd.xlane.f32.xlu0 %v1766_v25 }
 0x33c   :  { %v10978_v17 = vpop.xlane.xlu1 %1566  ;;  %v10980_v59 = vpop.xlane.xlu0 %1563 }
 0x33d   :  { %16580 = vst [vmem:[#allocation321_spill] sm:$0xff] %v10978_v17  ;;  %16581 = vst [vmem:[#allocation322_spill] sm:$0xff] %v10980_v59  ;;  %v1781_v59 = vsel %vm529_vm0, %v432_v16, 0.0  ;;  %v433_v17 = vld [vmem:[%s15998_s0 + $0xd10] sm:$0xff] }
 0x33e   :  { %v1784_v16 = vsel %vm529_vm0, %v433_v17, 0.0  ;;  %v438_v17 = vld [vmem:[%s15998_s0 + $0xd38] sm:$0xff] }
 0x33f   :  { %1776 = vadd.xlane.f32.xlu1 %v1775_v24  ;;  %1773 = vadd.xlane.f32.xlu0 %v1772_v2 }
 0x340   :  { %v10990_v58 = vpop.xlane.xlu1 %1572  ;;  %v10992_v25 = vpop.xlane.xlu0 %1569 }
 0x341   :  { %16582 = vst [vmem:[#allocation323_spill] sm:$0xff] %v10990_v58  ;;  %16583 = vst [vmem:[#allocation324_spill] sm:$0xff] %v10992_v25  ;;  %v1787_v25 = vsel %vm529_vm0, %v434_v3, 0.0  ;;  %v435_v58 = vld [vmem:[%s15998_s0 + $0xd20] sm:$0xff] }
 0x342   :  { %v1790_v3 = vsel %vm529_vm0, %v435_v58, 0.0  ;;  %v440_v58 = vld [vmem:[%s15998_s0 + $0xd48] sm:$0xff] }
 0x343   :  { %1782 = vadd.xlane.f32.xlu1 %v1781_v59  ;;  %1779 = vadd.xlane.f32.xlu0 %v1778_v42 }
 0x344   :  { %v11002_v24 = vpop.xlane.xlu1 %1578  ;;  %v11004_v2 = vpop.xlane.xlu0 %1575 }
 0x345   :  { %16584 = vst [vmem:[#allocation325_spill] sm:$0xff] %v11002_v24  ;;  %16585 = vst [vmem:[#allocation326_spill] sm:$0xff] %v11004_v2  ;;  %v1793_v2 = vsel %vm529_vm0, %v436_v43, 0.0  ;;  %v437_v24 = vld [vmem:[%s15998_s0 + $0xd30] sm:$0xff] }
 0x346   :  { %v1796_v43 = vsel %vm529_vm0, %v437_v24, 0.0  ;;  %v442_v24 = vld [vmem:[%s15998_s0 + $0xd58] sm:$0xff] }
 0x347   :  { %1788 = vadd.xlane.f32.xlu1 %v1787_v25  ;;  %1785 = vadd.xlane.f32.xlu0 %v1784_v16 }
 0x348   :  { %v11014_v59 = vpop.xlane.xlu1 %1584  ;;  %v11016_v42 = vpop.xlane.xlu0 %1581 }
 0x349   :  { %16586 = vst [vmem:[#allocation327_spill] sm:$0xff] %v11014_v59  ;;  %16587 = vst [vmem:[#allocation328_spill] sm:$0xff] %v11016_v42  ;;  %v1799_v42 = vsel %vm529_vm0, %v438_v17, 0.0  ;;  %v439_v59 = vld [vmem:[%s15998_s0 + $0xd40] sm:$0xff] }
 0x34a   :  { %v1802_v17 = vsel %vm529_vm0, %v439_v59, 0.0  ;;  %v444_v59 = vld [vmem:[%s15998_s0 + $0xd68] sm:$0xff] }
 0x34b   :  { %1794 = vadd.xlane.f32.xlu1 %v1793_v2  ;;  %1791 = vadd.xlane.f32.xlu0 %v1790_v3 }
 0x34c   :  { %v11026_v25 = vpop.xlane.xlu1 %1590  ;;  %v11028_v16 = vpop.xlane.xlu0 %1587 }
 0x34d   :  { %16588 = vst [vmem:[#allocation329_spill] sm:$0xff] %v11026_v25  ;;  %16589 = vst [vmem:[#allocation330_spill] sm:$0xff] %v11028_v16  ;;  %v1805_v16 = vsel %vm529_vm0, %v440_v58, 0.0  ;;  %v441_v25 = vld [vmem:[%s15998_s0 + $0xd50] sm:$0xff] }
 0x34e   :  { %v1808_v58 = vsel %vm529_vm0, %v441_v25, 0.0  ;;  %v446_v25 = vld [vmem:[%s15998_s0 + $0xd78] sm:$0xff] }
 0x34f   :  { %1800 = vadd.xlane.f32.xlu1 %v1799_v42  ;;  %1797 = vadd.xlane.f32.xlu0 %v1796_v43 }
 0x350   :  { %v11038_v2 = vpop.xlane.xlu1 %1596  ;;  %v11040_v3 = vpop.xlane.xlu0 %1593 }
 0x351   :  { %16590 = vst [vmem:[#allocation331_spill] sm:$0xff] %v11038_v2  ;;  %16591 = vst [vmem:[#allocation332_spill] sm:$0xff] %v11040_v3  ;;  %v1811_v3 = vsel %vm529_vm0, %v442_v24, 0.0  ;;  %v443_v2 = vld [vmem:[%s15998_s0 + $0xd60] sm:$0xff] }
 0x352   :  { %v1814_v24 = vsel %vm529_vm0, %v443_v2, 0.0  ;;  %v448_v2 = vld [vmem:[%s15998_s0 + $0xd88] sm:$0xff] }
 0x353   :  { %1806 = vadd.xlane.f32.xlu1 %v1805_v16  ;;  %1803 = vadd.xlane.f32.xlu0 %v1802_v17 }
 0x354   :  { %v11050_v42 = vpop.xlane.xlu1 %1602  ;;  %v11052_v43 = vpop.xlane.xlu0 %1599 }
 0x355   :  { %16592 = vst [vmem:[#allocation333_spill] sm:$0xff] %v11050_v42  ;;  %16593 = vst [vmem:[#allocation334_spill] sm:$0xff] %v11052_v43  ;;  %v1817_v43 = vsel %vm529_vm0, %v444_v59, 0.0  ;;  %v445_v42 = vld [vmem:[%s15998_s0 + $0xd70] sm:$0xff] }
 0x356   :  { %v1820_v59 = vsel %vm529_vm0, %v445_v42, 0.0  ;;  %v450_v42 = vld [vmem:[%s15998_s0 + $0xd98] sm:$0xff] }
 0x357   :  { %1812 = vadd.xlane.f32.xlu1 %v1811_v3  ;;  %1809 = vadd.xlane.f32.xlu0 %v1808_v58 }
 0x358   :  { %v11062_v16 = vpop.xlane.xlu1 %1608  ;;  %v11064_v17 = vpop.xlane.xlu0 %1605 }
 0x359   :  { %16594 = vst [vmem:[#allocation335_spill] sm:$0xff] %v11062_v16  ;;  %16595 = vst [vmem:[#allocation336_spill] sm:$0xff] %v11064_v17  ;;  %v1823_v17 = vsel %vm529_vm0, %v446_v25, 0.0  ;;  %v447_v16 = vld [vmem:[%s15998_s0 + $0xd80] sm:$0xff] }
 0x35a   :  { %v1826_v25 = vsel %vm529_vm0, %v447_v16, 0.0  ;;  %v452_v16 = vld [vmem:[%s15998_s0 + $0xda8] sm:$0xff] }
 0x35b   :  { %1818 = vadd.xlane.f32.xlu1 %v1817_v43  ;;  %1815 = vadd.xlane.f32.xlu0 %v1814_v24 }
 0x35c   :  { %v11074_v3 = vpop.xlane.xlu1 %1614  ;;  %v11076_v58 = vpop.xlane.xlu0 %1611 }
 0x35d   :  { %16596 = vst [vmem:[#allocation337_spill] sm:$0xff] %v11074_v3  ;;  %16597 = vst [vmem:[#allocation338_spill] sm:$0xff] %v11076_v58  ;;  %v1829_v58 = vsel %vm529_vm0, %v448_v2, 0.0  ;;  %v449_v3 = vld [vmem:[%s15998_s0 + $0xd90] sm:$0xff] }
 0x35e   :  { %v1832_v2 = vsel %vm529_vm0, %v449_v3, 0.0  ;;  %v454_v3 = vld [vmem:[%s15998_s0 + $0xdb8] sm:$0xff] }
 0x35f   :  { %1824 = vadd.xlane.f32.xlu1 %v1823_v17  ;;  %1821 = vadd.xlane.f32.xlu0 %v1820_v59 }
 0x360   :  { %v11086_v43 = vpop.xlane.xlu1 %1620  ;;  %v11088_v24 = vpop.xlane.xlu0 %1617 }
 0x361   :  { %16598 = vst [vmem:[#allocation339_spill] sm:$0xff] %v11086_v43  ;;  %16599 = vst [vmem:[#allocation340_spill] sm:$0xff] %v11088_v24  ;;  %v1835_v24 = vsel %vm529_vm0, %v450_v42, 0.0  ;;  %v451_v43 = vld [vmem:[%s15998_s0 + $0xda0] sm:$0xff] }
 0x362   :  { %v1838_v42 = vsel %vm529_vm0, %v451_v43, 0.0  ;;  %v456_v43 = vld [vmem:[%s15998_s0 + $0xdc8] sm:$0xff] }
 0x363   :  { %1830 = vadd.xlane.f32.xlu1 %v1829_v58  ;;  %1827 = vadd.xlane.f32.xlu0 %v1826_v25 }
 0x364   :  { %v11098_v17 = vpop.xlane.xlu1 %1626  ;;  %v11100_v59 = vpop.xlane.xlu0 %1623 }
 0x365   :  { %16600 = vst [vmem:[#allocation341_spill] sm:$0xff] %v11098_v17  ;;  %16601 = vst [vmem:[#allocation342_spill] sm:$0xff] %v11100_v59  ;;  %v1841_v59 = vsel %vm529_vm0, %v452_v16, 0.0  ;;  %v453_v17 = vld [vmem:[%s15998_s0 + $0xdb0] sm:$0xff] }
 0x366   :  { %v1844_v16 = vsel %vm529_vm0, %v453_v17, 0.0  ;;  %v458_v17 = vld [vmem:[%s15998_s0 + $0xdd8] sm:$0xff] }
 0x367   :  { %1836 = vadd.xlane.f32.xlu1 %v1835_v24  ;;  %1833 = vadd.xlane.f32.xlu0 %v1832_v2 }
 0x368   :  { %v11110_v58 = vpop.xlane.xlu1 %1632  ;;  %v11112_v25 = vpop.xlane.xlu0 %1629 }
 0x369   :  { %16602 = vst [vmem:[#allocation343_spill] sm:$0xff] %v11110_v58  ;;  %16603 = vst [vmem:[#allocation344_spill] sm:$0xff] %v11112_v25  ;;  %v1847_v25 = vsel %vm529_vm0, %v454_v3, 0.0  ;;  %v455_v58 = vld [vmem:[%s15998_s0 + $0xdc0] sm:$0xff] }
 0x36a   :  { %v1850_v3 = vsel %vm529_vm0, %v455_v58, 0.0  ;;  %v460_v58 = vld [vmem:[%s15998_s0 + $0xde8] sm:$0xff] }
 0x36b   :  { %1842 = vadd.xlane.f32.xlu1 %v1841_v59  ;;  %1839 = vadd.xlane.f32.xlu0 %v1838_v42 }
 0x36c   :  { %v11122_v24 = vpop.xlane.xlu1 %1638  ;;  %v11124_v2 = vpop.xlane.xlu0 %1635 }
 0x36d   :  { %16604 = vst [vmem:[#allocation345_spill] sm:$0xff] %v11122_v24  ;;  %16605 = vst [vmem:[#allocation346_spill] sm:$0xff] %v11124_v2  ;;  %v1853_v2 = vsel %vm529_vm0, %v456_v43, 0.0  ;;  %v457_v24 = vld [vmem:[%s15998_s0 + $0xdd0] sm:$0xff] }
 0x36e   :  { %v1856_v43 = vsel %vm529_vm0, %v457_v24, 0.0  ;;  %v462_v24 = vld [vmem:[%s15998_s0 + $0xdf8] sm:$0xff] }
 0x36f   :  { %1848 = vadd.xlane.f32.xlu1 %v1847_v25  ;;  %1845 = vadd.xlane.f32.xlu0 %v1844_v16 }
 0x370   :  { %v11134_v59 = vpop.xlane.xlu1 %1644  ;;  %v11136_v42 = vpop.xlane.xlu0 %1641 }
 0x371   :  { %16606 = vst [vmem:[#allocation347_spill] sm:$0xff] %v11134_v59  ;;  %16607 = vst [vmem:[#allocation348_spill] sm:$0xff] %v11136_v42  ;;  %v1859_v42 = vsel %vm529_vm0, %v458_v17, 0.0  ;;  %v459_v59 = vld [vmem:[%s15998_s0 + $0xde0] sm:$0xff] }
 0x372   :  { %v1862_v17 = vsel %vm529_vm0, %v459_v59, 0.0  ;;  %v464_v59 = vld [vmem:[%s15998_s0 + $0xe08] sm:$0xff] }
 0x373   :  { %1854 = vadd.xlane.f32.xlu1 %v1853_v2  ;;  %1851 = vadd.xlane.f32.xlu0 %v1850_v3 }
 0x374   :  { %v11146_v25 = vpop.xlane.xlu1 %1650  ;;  %v11148_v16 = vpop.xlane.xlu0 %1647 }
 0x375   :  { %16608 = vst [vmem:[#allocation349_spill] sm:$0xff] %v11146_v25  ;;  %16609 = vst [vmem:[#allocation350_spill] sm:$0xff] %v11148_v16  ;;  %v1865_v16 = vsel %vm529_vm0, %v460_v58, 0.0  ;;  %v461_v25 = vld [vmem:[%s15998_s0 + $0xdf0] sm:$0xff] }
 0x376   :  { %v1868_v58 = vsel %vm529_vm0, %v461_v25, 0.0  ;;  %v466_v25 = vld [vmem:[%s15998_s0 + $0xe18] sm:$0xff] }
 0x377   :  { %1860 = vadd.xlane.f32.xlu1 %v1859_v42  ;;  %1857 = vadd.xlane.f32.xlu0 %v1856_v43 }
 0x378   :  { %v11158_v2 = vpop.xlane.xlu1 %1656  ;;  %v11160_v3 = vpop.xlane.xlu0 %1653 }
 0x379   :  { %16610 = vst [vmem:[#allocation351_spill] sm:$0xff] %v11158_v2  ;;  %16611 = vst [vmem:[#allocation352_spill] sm:$0xff] %v11160_v3  ;;  %v1871_v3 = vsel %vm529_vm0, %v462_v24, 0.0  ;;  %v463_v2 = vld [vmem:[%s15998_s0 + $0xe00] sm:$0xff] }
 0x37a   :  { %v1874_v24 = vsel %vm529_vm0, %v463_v2, 0.0  ;;  %v468_v2 = vld [vmem:[%s15998_s0 + $0xe28] sm:$0xff] }
 0x37b   :  { %1866 = vadd.xlane.f32.xlu1 %v1865_v16  ;;  %1863 = vadd.xlane.f32.xlu0 %v1862_v17 }
 0x37c   :  { %v11170_v42 = vpop.xlane.xlu1 %1662  ;;  %v11172_v43 = vpop.xlane.xlu0 %1659 }
 0x37d   :  { %16612 = vst [vmem:[#allocation353_spill] sm:$0xff] %v11170_v42  ;;  %16613 = vst [vmem:[#allocation354_spill] sm:$0xff] %v11172_v43  ;;  %v1877_v43 = vsel %vm529_vm0, %v464_v59, 0.0  ;;  %v465_v42 = vld [vmem:[%s15998_s0 + $0xe10] sm:$0xff] }
 0x37e   :  { %v1880_v59 = vsel %vm529_vm0, %v465_v42, 0.0  ;;  %v470_v42 = vld [vmem:[%s15998_s0 + $0xe38] sm:$0xff] }
 0x37f   :  { %1872 = vadd.xlane.f32.xlu1 %v1871_v3  ;;  %1869 = vadd.xlane.f32.xlu0 %v1868_v58 }
 0x380   :  { %v11182_v16 = vpop.xlane.xlu1 %1668  ;;  %v11184_v17 = vpop.xlane.xlu0 %1665 }
 0x381   :  { %16614 = vst [vmem:[#allocation355_spill] sm:$0xff] %v11182_v16  ;;  %16615 = vst [vmem:[#allocation356_spill] sm:$0xff] %v11184_v17  ;;  %v1883_v17 = vsel %vm529_vm0, %v466_v25, 0.0  ;;  %v467_v16 = vld [vmem:[%s15998_s0 + $0xe20] sm:$0xff] }
 0x382   :  { %v1886_v25 = vsel %vm529_vm0, %v467_v16, 0.0  ;;  %v472_v16 = vld [vmem:[%s15998_s0 + $0xe48] sm:$0xff] }
 0x383   :  { %1878 = vadd.xlane.f32.xlu1 %v1877_v43  ;;  %1875 = vadd.xlane.f32.xlu0 %v1874_v24 }
 0x384   :  { %v11194_v3 = vpop.xlane.xlu1 %1674  ;;  %v11196_v58 = vpop.xlane.xlu0 %1671 }
 0x385   :  { %16616 = vst [vmem:[#allocation357_spill] sm:$0xff] %v11194_v3  ;;  %16617 = vst [vmem:[#allocation358_spill] sm:$0xff] %v11196_v58  ;;  %v1889_v58 = vsel %vm529_vm0, %v468_v2, 0.0  ;;  %v469_v3 = vld [vmem:[%s15998_s0 + $0xe30] sm:$0xff] }
 0x386   :  { %v1892_v2 = vsel %vm529_vm0, %v469_v3, 0.0  ;;  %v474_v3 = vld [vmem:[%s15998_s0 + $0xe58] sm:$0xff] }
 0x387   :  { %1884 = vadd.xlane.f32.xlu1 %v1883_v17  ;;  %1881 = vadd.xlane.f32.xlu0 %v1880_v59 }
 0x388   :  { %v11206_v43 = vpop.xlane.xlu1 %1680  ;;  %v11208_v24 = vpop.xlane.xlu0 %1677 }
 0x389   :  { %16618 = vst [vmem:[#allocation359_spill] sm:$0xff] %v11206_v43  ;;  %16619 = vst [vmem:[#allocation360_spill] sm:$0xff] %v11208_v24  ;;  %v1895_v24 = vsel %vm529_vm0, %v470_v42, 0.0  ;;  %v471_v43 = vld [vmem:[%s15998_s0 + $0xe40] sm:$0xff] }
 0x38a   :  { %v1898_v42 = vsel %vm529_vm0, %v471_v43, 0.0  ;;  %v476_v43 = vld [vmem:[%s15998_s0 + $0xe68] sm:$0xff] }
 0x38b   :  { %1890 = vadd.xlane.f32.xlu1 %v1889_v58  ;;  %1887 = vadd.xlane.f32.xlu0 %v1886_v25 }
 0x38c   :  { %v11218_v17 = vpop.xlane.xlu1 %1686  ;;  %v11220_v59 = vpop.xlane.xlu0 %1683 }
 0x38d   :  { %16620 = vst [vmem:[#allocation361_spill] sm:$0xff] %v11218_v17  ;;  %16621 = vst [vmem:[#allocation362_spill] sm:$0xff] %v11220_v59  ;;  %v1901_v17 = vsel %vm529_vm0, %v472_v16, 0.0  ;;  %v473_v59 = vld [vmem:[%s15998_s0 + $0xe50] sm:$0xff] }
 0x38e   :  { %v1904_v16 = vsel %vm529_vm0, %v473_v59, 0.0  ;;  %v478_v59 = vld [vmem:[%s15998_s0 + $0xe78] sm:$0xff] }
 0x38f   :  { %1896 = vadd.xlane.f32.xlu1 %v1895_v24  ;;  %1893 = vadd.xlane.f32.xlu0 %v1892_v2 }
 0x390   :  { %v11230_v58 = vpop.xlane.xlu1 %1692  ;;  %v11232_v25 = vpop.xlane.xlu0 %1689 }
 0x391   :  { %16622 = vst [vmem:[#allocation363_spill] sm:$0xff] %v11230_v58  ;;  %16623 = vst [vmem:[#allocation364_spill] sm:$0xff] %v11232_v25  ;;  %v1907_v58 = vsel %vm529_vm0, %v474_v3, 0.0  ;;  %v475_v25 = vld [vmem:[%s15998_s0 + $0xe60] sm:$0xff] }
 0x392   :  { %v1910_v3 = vsel %vm529_vm0, %v475_v25, 0.0  ;;  %v480_v25 = vld [vmem:[%s15998_s0 + $0xe88] sm:$0xff] }
 0x393   :  { %1902 = vadd.xlane.f32.xlu1 %v1901_v17  ;;  %1899 = vadd.xlane.f32.xlu0 %v1898_v42 }
 0x394   :  { %v11242_v24 = vpop.xlane.xlu1 %1698  ;;  %v11244_v2 = vpop.xlane.xlu0 %1695 }
 0x395   :  { %16624 = vst [vmem:[#allocation365_spill] sm:$0xff] %v11242_v24  ;;  %16625 = vst [vmem:[#allocation366_spill] sm:$0xff] %v11244_v2  ;;  %v1913_v24 = vsel %vm529_vm0, %v476_v43, 0.0  ;;  %v477_v2 = vld [vmem:[%s15998_s0 + $0xe70] sm:$0xff] }
 0x396   :  { %v1916_v43 = vsel %vm529_vm0, %v477_v2, 0.0  ;;  %v482_v2 = vld [vmem:[%s15998_s0 + $0xe98] sm:$0xff] }
 0x397   :  { %1908 = vadd.xlane.f32.xlu1 %v1907_v58  ;;  %1905 = vadd.xlane.f32.xlu0 %v1904_v16 }
 0x398   :  { %v11254_v17 = vpop.xlane.xlu1 %1704  ;;  %v11256_v42 = vpop.xlane.xlu0 %1701 }
 0x399   :  { %16626 = vst [vmem:[#allocation367_spill] sm:$0xff] %v11254_v17  ;;  %16627 = vst [vmem:[#allocation368_spill] sm:$0xff] %v11256_v42  ;;  %v1919_v17 = vsel %vm529_vm0, %v478_v59, 0.0  ;;  %v479_v42 = vld [vmem:[%s15998_s0 + $0xe80] sm:$0xff] }
 0x39a   :  { %v1922_v59 = vsel %vm529_vm0, %v479_v42, 0.0  ;;  %v484_v42 = vld [vmem:[%s15998_s0 + $0xea8] sm:$0xff] }
 0x39b   :  { %1914 = vadd.xlane.f32.xlu1 %v1913_v24  ;;  %1911 = vadd.xlane.f32.xlu0 %v1910_v3 }
 0x39c   :  { %v11266_v58 = vpop.xlane.xlu1 %1710  ;;  %v11268_v16 = vpop.xlane.xlu0 %1707 }
 0x39d   :  { %16628 = vst [vmem:[#allocation369_spill] sm:$0xff] %v11266_v58  ;;  %16629 = vst [vmem:[#allocation370_spill] sm:$0xff] %v11268_v16  ;;  %v1925_v58 = vsel %vm529_vm0, %v480_v25, 0.0  ;;  %v481_v16 = vld [vmem:[%s15998_s0 + $0xe90] sm:$0xff] }
 0x39e   :  { %v1928_v25 = vsel %vm529_vm0, %v481_v16, 0.0  ;;  %v486_v16 = vld [vmem:[%s15998_s0 + $0xeb8] sm:$0xff] }
 0x39f   :  { %1920 = vadd.xlane.f32.xlu1 %v1919_v17  ;;  %1917 = vadd.xlane.f32.xlu0 %v1916_v43 }
 0x3a0   :  { %v11278_v24 = vpop.xlane.xlu1 %1716  ;;  %v11280_v3 = vpop.xlane.xlu0 %1713 }
 0x3a1   :  { %16630 = vst [vmem:[#allocation371_spill] sm:$0xff] %v11278_v24  ;;  %16631 = vst [vmem:[#allocation372_spill] sm:$0xff] %v11280_v3  ;;  %v1931_v24 = vsel %vm529_vm0, %v482_v2, 0.0  ;;  %v483_v3 = vld [vmem:[%s15998_s0 + $0xea0] sm:$0xff] }
 0x3a2   :  { %v1934_v2 = vsel %vm529_vm0, %v483_v3, 0.0  ;;  %v488_v3 = vld [vmem:[%s15998_s0 + $0xec8] sm:$0xff] }
 0x3a3   :  { %1926 = vadd.xlane.f32.xlu1 %v1925_v58  ;;  %1923 = vadd.xlane.f32.xlu0 %v1922_v59 }
 0x3a4   :  { %v11290_v17 = vpop.xlane.xlu1 %1722  ;;  %v11292_v43 = vpop.xlane.xlu0 %1719 }
 0x3a5   :  { %16632 = vst [vmem:[#allocation373_spill] sm:$0xff] %v11290_v17  ;;  %16633 = vst [vmem:[#allocation374_spill] sm:$0xff] %v11292_v43  ;;  %v1937_v17 = vsel %vm529_vm0, %v484_v42, 0.0  ;;  %v485_v43 = vld [vmem:[%s15998_s0 + $0xeb0] sm:$0xff] }
 0x3a6   :  { %v1940_v42 = vsel %vm529_vm0, %v485_v43, 0.0  ;;  %v490_v43 = vld [vmem:[%s15998_s0 + $0xed8] sm:$0xff] }
 0x3a7   :  { %1932 = vadd.xlane.f32.xlu1 %v1931_v24  ;;  %1929 = vadd.xlane.f32.xlu0 %v1928_v25 }
 0x3a8   :  { %v11302_v58 = vpop.xlane.xlu1 %1728  ;;  %v11304_v59 = vpop.xlane.xlu0 %1725 }
 0x3a9   :  { %16634 = vst [vmem:[#allocation375_spill] sm:$0xff] %v11302_v58  ;;  %16635 = vst [vmem:[#allocation376_spill] sm:$0xff] %v11304_v59  ;;  %v1943_v58 = vsel %vm529_vm0, %v486_v16, 0.0  ;;  %v487_v59 = vld [vmem:[%s15998_s0 + $0xec0] sm:$0xff] }
 0x3aa   :  { %v1946_v16 = vsel %vm529_vm0, %v487_v59, 0.0  ;;  %v492_v59 = vld [vmem:[%s15998_s0 + $0xee8] sm:$0xff] }
 0x3ab   :  { %1938 = vadd.xlane.f32.xlu1 %v1937_v17  ;;  %1935 = vadd.xlane.f32.xlu0 %v1934_v2 }
 0x3ac   :  { %v11314_v24 = vpop.xlane.xlu1 %1734  ;;  %v11316_v25 = vpop.xlane.xlu0 %1731 }
 0x3ad   :  { %16636 = vst [vmem:[#allocation377_spill] sm:$0xff] %v11314_v24  ;;  %16637 = vst [vmem:[#allocation378_spill] sm:$0xff] %v11316_v25  ;;  %v1949_v24 = vsel %vm529_vm0, %v488_v3, 0.0  ;;  %v489_v25 = vld [vmem:[%s15998_s0 + $0xed0] sm:$0xff] }
 0x3ae   :  { %v1952_v3 = vsel %vm529_vm0, %v489_v25, 0.0  ;;  %v494_v25 = vld [vmem:[%s15998_s0 + $0xef8] sm:$0xff] }
 0x3af   :  { %1944 = vadd.xlane.f32.xlu1 %v1943_v58  ;;  %1941 = vadd.xlane.f32.xlu0 %v1940_v42 }
 0x3b0   :  { %v11326_v17 = vpop.xlane.xlu1 %1740  ;;  %v11328_v2 = vpop.xlane.xlu0 %1737 }
 0x3b1   :  { %16638 = vst [vmem:[#allocation379_spill] sm:$0xff] %v11326_v17  ;;  %16639 = vst [vmem:[#allocation380_spill] sm:$0xff] %v11328_v2  ;;  %v1955_v17 = vsel %vm529_vm0, %v490_v43, 0.0  ;;  %v491_v2 = vld [vmem:[%s15998_s0 + $0xee0] sm:$0xff] }
 0x3b2   :  { %v1958_v43 = vsel %vm529_vm0, %v491_v2, 0.0  ;;  %v496_v2 = vld [vmem:[%s15998_s0 + $0xf08] sm:$0xff] }
 0x3b3   :  { %1950 = vadd.xlane.f32.xlu1 %v1949_v24  ;;  %1947 = vadd.xlane.f32.xlu0 %v1946_v16 }
 0x3b4   :  { %v11338_v58 = vpop.xlane.xlu1 %1746  ;;  %v11340_v42 = vpop.xlane.xlu0 %1743 }
 0x3b5   :  { %16640 = vst [vmem:[#allocation381_spill] sm:$0xff] %v11338_v58  ;;  %16641 = vst [vmem:[#allocation382_spill] sm:$0xff] %v11340_v42  ;;  %v1961_v58 = vsel %vm529_vm0, %v492_v59, 0.0  ;;  %v493_v42 = vld [vmem:[%s15998_s0 + $0xef0] sm:$0xff] }
 0x3b6   :  { %v1964_v59 = vsel %vm529_vm0, %v493_v42, 0.0  ;;  %v498_v42 = vld [vmem:[%s15998_s0 + $0xf18] sm:$0xff] }
 0x3b7   :  { %1956 = vadd.xlane.f32.xlu1 %v1955_v17  ;;  %1953 = vadd.xlane.f32.xlu0 %v1952_v3 }
 0x3b8   :  { %v11350_v24 = vpop.xlane.xlu1 %1752  ;;  %v11352_v16 = vpop.xlane.xlu0 %1749 }
 0x3b9   :  { %16642 = vst [vmem:[#allocation383_spill] sm:$0xff] %v11350_v24  ;;  %16643 = vst [vmem:[#allocation384_spill] sm:$0xff] %v11352_v16  ;;  %v1967_v24 = vsel %vm529_vm0, %v494_v25, 0.0  ;;  %v495_v16 = vld [vmem:[%s15998_s0 + $0xf00] sm:$0xff] }
 0x3ba   :  { %v1970_v25 = vsel %vm529_vm0, %v495_v16, 0.0  ;;  %v500_v16 = vld [vmem:[%s15998_s0 + $0xf28] sm:$0xff] }
 0x3bb   :  { %1962 = vadd.xlane.f32.xlu1 %v1961_v58  ;;  %1959 = vadd.xlane.f32.xlu0 %v1958_v43 }
 0x3bc   :  { %v11362_v17 = vpop.xlane.xlu1 %1758  ;;  %v11364_v3 = vpop.xlane.xlu0 %1755 }
 0x3bd   :  { %16644 = vst [vmem:[#allocation385_spill] sm:$0xff] %v11362_v17  ;;  %16645 = vst [vmem:[#allocation386_spill] sm:$0xff] %v11364_v3  ;;  %v1973_v17 = vsel %vm529_vm0, %v496_v2, 0.0  ;;  %v497_v3 = vld [vmem:[%s15998_s0 + $0xf10] sm:$0xff] }
 0x3be   :  { %v1976_v2 = vsel %vm529_vm0, %v497_v3, 0.0  ;;  %v502_v3 = vld [vmem:[%s15998_s0 + $0xf38] sm:$0xff] }
 0x3bf   :  { %1968 = vadd.xlane.f32.xlu1 %v1967_v24  ;;  %1965 = vadd.xlane.f32.xlu0 %v1964_v59 }
 0x3c0   :  { %v11374_v58 = vpop.xlane.xlu1 %1764  ;;  %v11376_v43 = vpop.xlane.xlu0 %1761 }
 0x3c1   :  { %16646 = vst [vmem:[#allocation387_spill] sm:$0xff] %v11374_v58  ;;  %16647 = vst [vmem:[#allocation388_spill] sm:$0xff] %v11376_v43  ;;  %v1979_v58 = vsel %vm529_vm0, %v498_v42, 0.0  ;;  %v499_v43 = vld [vmem:[%s15998_s0 + $0xf20] sm:$0xff] }
 0x3c2   :  { %v1982_v42 = vsel %vm529_vm0, %v499_v43, 0.0  ;;  %v504_v43 = vld [vmem:[%s15998_s0 + $0xf48] sm:$0xff] }
 0x3c3   :  { %1974 = vadd.xlane.f32.xlu1 %v1973_v17  ;;  %1971 = vadd.xlane.f32.xlu0 %v1970_v25 }
 0x3c4   :  { %v11386_v24 = vpop.xlane.xlu1 %1770  ;;  %v11388_v59 = vpop.xlane.xlu0 %1767 }
 0x3c5   :  { %16648 = vst [vmem:[#allocation389_spill] sm:$0xff] %v11386_v24  ;;  %16649 = vst [vmem:[#allocation390_spill] sm:$0xff] %v11388_v59  ;;  %v1985_v24 = vsel %vm529_vm0, %v500_v16, 0.0  ;;  %v501_v59 = vld [vmem:[%s15998_s0 + $0xf30] sm:$0xff] }
 0x3c6   :  { %v1988_v16 = vsel %vm529_vm0, %v501_v59, 0.0  ;;  %v506_v59 = vld [vmem:[%s15998_s0 + $0xf58] sm:$0xff] }
 0x3c7   :  { %1980 = vadd.xlane.f32.xlu1 %v1979_v58  ;;  %1977 = vadd.xlane.f32.xlu0 %v1976_v2 }
 0x3c8   :  { %v11398_v17 = vpop.xlane.xlu1 %1776  ;;  %v11400_v25 = vpop.xlane.xlu0 %1773 }
 0x3c9   :  { %16650 = vst [vmem:[#allocation391_spill] sm:$0xff] %v11398_v17  ;;  %16651 = vst [vmem:[#allocation392_spill] sm:$0xff] %v11400_v25  ;;  %v1991_v17 = vsel %vm529_vm0, %v502_v3, 0.0  ;;  %v503_v25 = vld [vmem:[%s15998_s0 + $0xf40] sm:$0xff] }
 0x3ca   :  { %v1994_v3 = vsel %vm529_vm0, %v503_v25, 0.0  ;;  %v508_v25 = vld [vmem:[%s15998_s0 + $0xf68] sm:$0xff] }
 0x3cb   :  { %1986 = vadd.xlane.f32.xlu1 %v1985_v24  ;;  %1983 = vadd.xlane.f32.xlu0 %v1982_v42 }
 0x3cc   :  { %v11410_v58 = vpop.xlane.xlu1 %1782  ;;  %v11412_v2 = vpop.xlane.xlu0 %1779 }
 0x3cd   :  { %16652 = vst [vmem:[#allocation393_spill] sm:$0xff] %v11410_v58  ;;  %16653 = vst [vmem:[#allocation394_spill] sm:$0xff] %v11412_v2  ;;  %v1997_v58 = vsel %vm529_vm0, %v504_v43, 0.0  ;;  %v505_v2 = vld [vmem:[%s15998_s0 + $0xf50] sm:$0xff] }
 0x3ce   :  { %v2000_v43 = vsel %vm529_vm0, %v505_v2, 0.0  ;;  %v510_v2 = vld [vmem:[%s15998_s0 + $0xf78] sm:$0xff] }
 0x3cf   :  { %1992 = vadd.xlane.f32.xlu1 %v1991_v17  ;;  %1989 = vadd.xlane.f32.xlu0 %v1988_v16 }
 0x3d0   :  { %v11422_v24 = vpop.xlane.xlu1 %1788  ;;  %v11424_v42 = vpop.xlane.xlu0 %1785 }
 0x3d1   :  { %16654 = vst [vmem:[#allocation395_spill] sm:$0xff] %v11422_v24  ;;  %16655 = vst [vmem:[#allocation396_spill] sm:$0xff] %v11424_v42  ;;  %v2003_v24 = vsel %vm529_vm0, %v506_v59, 0.0  ;;  %v507_v42 = vld [vmem:[%s15998_s0 + $0xf60] sm:$0xff] }
 0x3d2   :  { %v2006_v59 = vsel %vm529_vm0, %v507_v42, 0.0  ;;  %v512_v42 = vld [vmem:[%s15998_s0 + $0xf88] sm:$0xff] }
 0x3d3   :  { %1998 = vadd.xlane.f32.xlu1 %v1997_v58  ;;  %1995 = vadd.xlane.f32.xlu0 %v1994_v3 }
 0x3d4   :  { %v11434_v17 = vpop.xlane.xlu1 %1794  ;;  %v11436_v16 = vpop.xlane.xlu0 %1791 }
 0x3d5   :  { %16656 = vst [vmem:[#allocation397_spill] sm:$0xff] %v11434_v17  ;;  %16657 = vst [vmem:[#allocation398_spill] sm:$0xff] %v11436_v16  ;;  %v2009_v17 = vsel %vm529_vm0, %v508_v25, 0.0  ;;  %v509_v16 = vld [vmem:[%s15998_s0 + $0xf70] sm:$0xff] }
 0x3d6   :  { %v2012_v25 = vsel %vm529_vm0, %v509_v16, 0.0  ;;  %v514_v16 = vld [vmem:[%s15998_s0 + $0xf98] sm:$0xff] }
 0x3d7   :  { %2004 = vadd.xlane.f32.xlu1 %v2003_v24  ;;  %2001 = vadd.xlane.f32.xlu0 %v2000_v43 }
 0x3d8   :  { %v11446_v58 = vpop.xlane.xlu1 %1800  ;;  %v11448_v3 = vpop.xlane.xlu0 %1797 }
 0x3d9   :  { %16658 = vst [vmem:[#allocation399_spill] sm:$0xff] %v11446_v58  ;;  %16659 = vst [vmem:[#allocation400_spill] sm:$0xff] %v11448_v3  ;;  %v2015_v58 = vsel %vm529_vm0, %v510_v2, 0.0  ;;  %v511_v3 = vld [vmem:[%s15998_s0 + $0xf80] sm:$0xff] }
 0x3da   :  { %v2018_v2 = vsel %vm529_vm0, %v511_v3, 0.0  ;;  %v516_v3 = vld [vmem:[%s15998_s0 + $0xfa8] sm:$0xff] }
 0x3db   :  { %2010 = vadd.xlane.f32.xlu1 %v2009_v17  ;;  %2007 = vadd.xlane.f32.xlu0 %v2006_v59 }
 0x3dc   :  { %v11458_v24 = vpop.xlane.xlu1 %1806  ;;  %v11460_v43 = vpop.xlane.xlu0 %1803 }
 0x3dd   :  { %16660 = vst [vmem:[#allocation401_spill] sm:$0xff] %v11458_v24  ;;  %16661 = vst [vmem:[#allocation402_spill] sm:$0xff] %v11460_v43  ;;  %v2021_v24 = vsel %vm529_vm0, %v512_v42, 0.0  ;;  %v513_v43 = vld [vmem:[%s15998_s0 + $0xf90] sm:$0xff] }
 0x3de   :  { %v2024_v42 = vsel %vm529_vm0, %v513_v43, 0.0  ;;  %v518_v43 = vld [vmem:[%s15998_s0 + $0xfb8] sm:$0xff] }
 0x3df   :  { %2016 = vadd.xlane.f32.xlu1 %v2015_v58  ;;  %2013 = vadd.xlane.f32.xlu0 %v2012_v25 }
 0x3e0   :  { %v11470_v17 = vpop.xlane.xlu1 %1812  ;;  %v11472_v59 = vpop.xlane.xlu0 %1809 }
 0x3e1   :  { %16662 = vst [vmem:[#allocation403_spill] sm:$0xff] %v11470_v17  ;;  %16663 = vst [vmem:[#allocation404_spill] sm:$0xff] %v11472_v59  ;;  %v2027_v17 = vsel %vm529_vm0, %v514_v16, 0.0  ;;  %v515_v59 = vld [vmem:[%s15998_s0 + $0xfa0] sm:$0xff] }
 0x3e2   :  { %v2030_v16 = vsel %vm529_vm0, %v515_v59, 0.0  ;;  %v520_v59 = vld [vmem:[%s15998_s0 + $0xfc8] sm:$0xff] }
 0x3e3   :  { %2022 = vadd.xlane.f32.xlu1 %v2021_v24  ;;  %2019 = vadd.xlane.f32.xlu0 %v2018_v2 }
 0x3e4   :  { %v11482_v58 = vpop.xlane.xlu1 %1818  ;;  %v11484_v25 = vpop.xlane.xlu0 %1815 }
 0x3e5   :  { %16664 = vst [vmem:[#allocation405_spill] sm:$0xff] %v11482_v58  ;;  %16665 = vst [vmem:[#allocation406_spill] sm:$0xff] %v11484_v25  ;;  %v2033_v58 = vsel %vm529_vm0, %v516_v3, 0.0  ;;  %v517_v25 = vld [vmem:[%s15998_s0 + $0xfb0] sm:$0xff] }
 0x3e6   :  { %v2036_v3 = vsel %vm529_vm0, %v517_v25, 0.0  ;;  %v522_v25 = vld [vmem:[%s15998_s0 + $0xfd8] sm:$0xff] }
 0x3e7   :  { %2028 = vadd.xlane.f32.xlu1 %v2027_v17  ;;  %2025 = vadd.xlane.f32.xlu0 %v2024_v42 }
 0x3e8   :  { %v11494_v24 = vpop.xlane.xlu1 %1824  ;;  %v11496_v2 = vpop.xlane.xlu0 %1821 }
 0x3e9   :  { %16666 = vst [vmem:[#allocation407_spill] sm:$0xff] %v11494_v24  ;;  %16667 = vst [vmem:[#allocation408_spill] sm:$0xff] %v11496_v2  ;;  %v2039_v24 = vsel %vm529_vm0, %v518_v43, 0.0  ;;  %v519_v2 = vld [vmem:[%s15998_s0 + $0xfc0] sm:$0xff] }
 0x3ea   :  { %v2042_v43 = vsel %vm529_vm0, %v519_v2, 0.0  ;;  %v524_v2 = vld [vmem:[%s15998_s0 + $0xfe8] sm:$0xff] }
 0x3eb   :  { %2034 = vadd.xlane.f32.xlu1 %v2033_v58  ;;  %2031 = vadd.xlane.f32.xlu0 %v2030_v16 }
 0x3ec   :  { %v11506_v17 = vpop.xlane.xlu1 %1830  ;;  %v11508_v42 = vpop.xlane.xlu0 %1827 }
 0x3ed   :  { %16668 = vst [vmem:[#allocation409_spill] sm:$0xff] %v11506_v17  ;;  %16669 = vst [vmem:[#allocation410_spill] sm:$0xff] %v11508_v42  ;;  %v2045_v17 = vsel %vm529_vm0, %v520_v59, 0.0  ;;  %v521_v42 = vld [vmem:[%s15998_s0 + $0xfd0] sm:$0xff] }
 0x3ee   :  { %v2048_v59 = vsel %vm529_vm0, %v521_v42, 0.0  ;;  %v526_v42 = vld [vmem:[%s15998_s0 + $0xff8] sm:$0xff] }
 0x3ef   :  { %2040 = vadd.xlane.f32.xlu1 %v2039_v24  ;;  %2037 = vadd.xlane.f32.xlu0 %v2036_v3 }
 0x3f0   :  { %v11518_v58 = vpop.xlane.xlu1 %1836  ;;  %v11520_v16 = vpop.xlane.xlu0 %1833 }
 0x3f1   :  { %16670 = vst [vmem:[#allocation411_spill] sm:$0xff] %v11518_v58  ;;  %16671 = vst [vmem:[#allocation412_spill] sm:$0xff] %v11520_v16  ;;  %v2051_v58 = vsel %vm529_vm0, %v522_v25, 0.0  ;;  %v523_v16 = vld [vmem:[%s15998_s0 + $0xfe0] sm:$0xff] }
 0x3f2   :  { %v2054_v25 = vsel %vm529_vm0, %v523_v16, 0.0 }
 0x3f3   :  { %2046 = vadd.xlane.f32.xlu1 %v2045_v17  ;;  %2043 = vadd.xlane.f32.xlu0 %v2042_v43 }
 0x3f4   :  { %v11530_v24 = vpop.xlane.xlu1 %1842  ;;  %v11532_v3 = vpop.xlane.xlu0 %1839 }
 0x3f5   :  { %16672 = vst [vmem:[#allocation413_spill] sm:$0xff] %v11530_v24  ;;  %16673 = vst [vmem:[#allocation414_spill] sm:$0xff] %v11532_v3  ;;  %v2057_v24 = vsel %vm529_vm0, %v524_v2, 0.0  ;;  %v525_v3 = vld [vmem:[%s15998_s0 + $0xff0] sm:$0xff] }
 0x3f6   :  { %v2060_v2 = vsel %vm529_vm0, %v525_v3, 0.0 }
 0x3f7   :  { %2052 = vadd.xlane.f32.xlu1 %v2051_v58  ;;  %2049 = vadd.xlane.f32.xlu0 %v2048_v59 }
 0x3f8   :  { %v11542_v17 = vpop.xlane.xlu1 %1848  ;;  %v11544_v43 = vpop.xlane.xlu0 %1845 }
 0x3f9   :  { %16674 = vst [vmem:[#allocation415_spill] sm:$0xff] %v11542_v17  ;;  %16675 = vst [vmem:[#allocation416_spill] sm:$0xff] %v11544_v43  ;;  %v2063_v17 = vsel %vm529_vm0, %v526_v42, 0.0  ;;  %vm16260_vm0 = vcmask 1041409  }
 0x3fb   :  { %2058 = vadd.xlane.f32.xlu1 %v2057_v24  ;;  %2055 = vadd.xlane.f32.xlu0 %v2054_v25  ;;  %v11569_v24 = vshrl.u32 %v16002_v41, 7 }
 0x3fc   :  { %v11554_v58 = vpop.xlane.xlu1 %1854  ;;  %v11556_v59 = vpop.xlane.xlu0 %1851 }
 0x3fd   :  { %16676 = vst [vmem:[#allocation417_spill] sm:$0xff] %v11554_v58  ;;  %16677 = vst [vmem:[#allocation418_spill] sm:$0xff] %v11556_v59  ;;  %v16003_v3 = vsub.s32 0, %v11569_v24  ;;  %v16008_v12 = vsub.s32 5, %v11569_v24  ;;  %v16017_v46 = vsub.s32 6, %v11569_v24 }
 0x3fe   :  { %16682 = vst [vmem:[#allocation423_spill] sm:$0xff] %v11569_v24 }
 0x3ff   :  { %2064 = vadd.xlane.f32.xlu1 %v2063_v17  ;;  %2061 = vadd.xlane.f32.xlu0 %v2060_v2  ;;  %v11579_v17 = vld [vmem:[%s15999_s1] sm:$0xff] }
 0x400   :  { %v11560_v16 = vpop.xlane.xlu1 %1860  ;;  %v11562_v43 = vpop.xlane.xlu0 %1857  ;;  %v2071_v41 = vrot.slane %v11579_v17, %v16003_v3  ;;  %v2091_v49 = vrot.slane %v11579_v17, %v16008_v12 }
 0x401   :  { %16678 = vst [vmem:[#allocation419_spill] sm:$0xff] %v11560_v16  ;;  %16679 = vst [vmem:[#allocation420_spill] sm:$0xff] %v11562_v43 }
 0x404   :  { %v11564_v40 = vpop.xlane.xlu1 %1866  ;;  %v11566_v7 = vpop.xlane.xlu0 %1863 }
 0x405   :  { %16680 = vst [vmem:[#allocation421_spill] sm:$0xff] %v11564_v40  ;;  %16681 = vst [vmem:[#allocation422_spill] sm:$0xff] %v11566_v7 }
 0x408   :  { %v11571_v25 = vpop.xlane.xlu1 %1872  ;;  %v11573_v58 = vpop.xlane.xlu0 %1869 }
 0x409   :  { %16683 = vst [vmem:[#allocation424_spill] sm:$0xff] %v11571_v25  ;;  %16684 = vst [vmem:[#allocation425_spill] sm:$0xff] %v11573_v58 }
 0x40c   :  { %v11581_v42 = vpop.xlane.xlu1 %1878  ;;  %v11583_v2 = vpop.xlane.xlu0 %1875 }
 0x40d   :  { %16685 = vst [vmem:[#allocation426_spill] sm:$0xff] %v11581_v42  ;;  %16686 = vst [vmem:[#allocation427_spill] sm:$0xff] %v11583_v2 }
 0x410   :  { %2137 = vbcast.lane.b32.xlu1 %v2071_v41, 264  ;;  %v11588_v40 = vpop.xlane.xlu1 %1884  ;;  %v11590_v25 = vpop.xlane.xlu0 %1881 }
 0x411   :  { %16687 = vst [vmem:[#allocation428_spill] sm:$0xff] %v11588_v40  ;;  %16688 = vst [vmem:[#allocation429_spill] sm:$0xff] %v11590_v25 }
 0x414   :  { %2141 = vbcast.lane.b32.xlu1 %v2071_v41, 272  ;;  %v11592_v58 = vpop.xlane.xlu1 %1890  ;;  %v11594_v16 = vpop.xlane.xlu0 %1887 }
 0x415   :  { %16689 = vst [vmem:[#allocation430_spill] sm:$0xff] %v11592_v58  ;;  %16690 = vst [vmem:[#allocation431_spill] sm:$0xff] %v11594_v16  ;;  %2133 = vbcast.lane.b32.xlu0 %v2071_v41, 256 }
 0x418   :  { %2145 = vbcast.lane.b32.xlu1 %v2071_v41, 280  ;;  %v11596_v7 = vpop.xlane.xlu1 %1896  ;;  %v11598_v42 = vpop.xlane.xlu0 %1893 }
 0x419   :  { %16691 = vst [vmem:[#allocation432_spill] sm:$0xff] %v11596_v7  ;;  %16692 = vst [vmem:[#allocation433_spill] sm:$0xff] %v11598_v42  ;;  %2149 = vbcast.lane.b32.xlu0 %v2071_v41, 288 }
 0x41c   :  { %2153 = vbcast.lane.b32.xlu1 %v2071_v41, 296  ;;  %v11600_v2 = vpop.xlane.xlu1 %1902  ;;  %v11602_v3 = vpop.xlane.xlu0 %1899 }
 0x41d   :  { %16693 = vst [vmem:[#allocation434_spill] sm:$0xff] %v11600_v2  ;;  %16694 = vst [vmem:[#allocation435_spill] sm:$0xff] %v11602_v3  ;;  %2157 = vbcast.lane.b32.xlu0 %v2071_v41, 304  ;;  %v16004_v2 = vsub.s32 1, %v11569_v24 }
 0x420   :  { %2161 = vbcast.lane.b32.xlu1 %v2071_v41, 312  ;;  %v11604_v40 = vpop.xlane.xlu1 %1908  ;;  %v11606_v25 = vpop.xlane.xlu0 %1905 }
 0x421   :  { %16695 = vst [vmem:[#allocation436_spill] sm:$0xff] %v11604_v40  ;;  %16696 = vst [vmem:[#allocation437_spill] sm:$0xff] %v11606_v25  ;;  %2165 = vbcast.lane.b32.xlu0 %v2071_v41, 320 }
 0x424   :  { %2169 = vbcast.lane.b32.xlu1 %v2071_v41, 328  ;;  %v11608_v58 = vpop.xlane.xlu1 %1914  ;;  %v11610_v16 = vpop.xlane.xlu0 %1911 }
 0x425   :  { %16697 = vst [vmem:[#allocation438_spill] sm:$0xff] %v11608_v58  ;;  %16698 = vst [vmem:[#allocation439_spill] sm:$0xff] %v11610_v16  ;;  %2173 = vbcast.lane.b32.xlu0 %v2071_v41, 336  ;;  %v2075_v58 = vrot.slane %v11579_v17, %v16004_v2 }
 0x428   :  { %2177 = vbcast.lane.b32.xlu1 %v2071_v41, 344  ;;  %v11612_v7 = vpop.xlane.xlu1 %1920  ;;  %v11614_v42 = vpop.xlane.xlu0 %1917 }
 0x429   :  { %16699 = vst [vmem:[#allocation440_spill] sm:$0xff] %v11612_v7  ;;  %16700 = vst [vmem:[#allocation441_spill] sm:$0xff] %v11614_v42  ;;  %2181 = vbcast.lane.b32.xlu0 %v2071_v41, 352 }
 0x42c   :  { %2185 = vbcast.lane.b32.xlu1 %v2071_v41, 360  ;;  %v11617_v3 = vpop.xlane.xlu1 %1926  ;;  %v11619_v40 = vpop.xlane.xlu0 %1923 }
 0x42d   :  { %16701 = vst [vmem:[#allocation442_spill] sm:$0xff] %v11617_v3  ;;  %16702 = vst [vmem:[#allocation443_spill] sm:$0xff] %v11619_v40  ;;  %2189 = vbcast.lane.b32.xlu0 %v2071_v41, 368 }
 0x430   :  { %2193 = vbcast.lane.b32.xlu1 %v2071_v41, 376  ;;  %v11624_v16 = vpop.xlane.xlu1 %1932  ;;  %v11626_v25 = vpop.xlane.xlu0 %1929 }
 0x431   :  { %16703 = vst [vmem:[#allocation444_spill] sm:$0xff] %v11624_v16  ;;  %16704 = vst [vmem:[#allocation445_spill] sm:$0xff] %v11626_v25  ;;  %2196 = vbcast.lane.b32.xlu0 %v2075_v58, 256 }
 0x434   :  { %2200 = vbcast.lane.b32.xlu1 %v2075_v58, 264  ;;  %v11628_v7 = vpop.xlane.xlu1 %1938  ;;  %v11630_v42 = vpop.xlane.xlu0 %1935 }
 0x435   :  { %16705 = vst [vmem:[#allocation446_spill] sm:$0xff] %v11628_v7  ;;  %16706 = vst [vmem:[#allocation447_spill] sm:$0xff] %v11630_v42  ;;  %2204 = vbcast.lane.b32.xlu0 %v2075_v58, 272 }
 0x438   :  { %2208 = vbcast.lane.b32.xlu1 %v2075_v58, 280  ;;  %v11632_v3 = vpop.xlane.xlu1 %1944  ;;  %v11634_v40 = vpop.xlane.xlu0 %1941 }
 0x439   :  { %16707 = vst [vmem:[#allocation448_spill] sm:$0xff] %v11632_v3  ;;  %16708 = vst [vmem:[#allocation449_spill] sm:$0xff] %v11634_v40  ;;  %2212 = vbcast.lane.b32.xlu0 %v2075_v58, 288 }
 0x43c   :  { %2216 = vbcast.lane.b32.xlu1 %v2075_v58, 296  ;;  %v11636_v2 = vpop.xlane.xlu1 %1950  ;;  %v11638_v41 = vpop.xlane.xlu0 %1947 }
 0x43d   :  { %16709 = vst [vmem:[#allocation450_spill] sm:$0xff] %v11636_v2  ;;  %16710 = vst [vmem:[#allocation451_spill] sm:$0xff] %v11638_v41  ;;  %2220 = vbcast.lane.b32.xlu0 %v2075_v58, 304  ;;  %v16005_v2 = vsub.s32 2, %v11569_v24 }
 0x440   :  { %2224 = vbcast.lane.b32.xlu1 %v2075_v58, 312  ;;  %v11640_v16 = vpop.xlane.xlu1 %1956  ;;  %v11642_v25 = vpop.xlane.xlu0 %1953 }
 0x441   :  { %16711 = vst [vmem:[#allocation452_spill] sm:$0xff] %v11640_v16  ;;  %16712 = vst [vmem:[#allocation453_spill] sm:$0xff] %v11642_v25  ;;  %2228 = vbcast.lane.b32.xlu0 %v2075_v58, 320 }
 0x444   :  { %2232 = vbcast.lane.b32.xlu1 %v2075_v58, 328  ;;  %v11644_v7 = vpop.xlane.xlu1 %1962  ;;  %v11646_v42 = vpop.xlane.xlu0 %1959 }
 0x445   :  { %16713 = vst [vmem:[#allocation454_spill] sm:$0xff] %v11644_v7  ;;  %16714 = vst [vmem:[#allocation455_spill] sm:$0xff] %v11646_v42  ;;  %2236 = vbcast.lane.b32.xlu0 %v2075_v58, 336  ;;  %v2079_v7 = vrot.slane %v11579_v17, %v16005_v2 }
 0x448   :  { %2240 = vbcast.lane.b32.xlu1 %v2075_v58, 344  ;;  %v11648_v3 = vpop.xlane.xlu1 %1968  ;;  %v11650_v40 = vpop.xlane.xlu0 %1965 }
 0x449   :  { %16715 = vst [vmem:[#allocation456_spill] sm:$0xff] %v11648_v3  ;;  %16716 = vst [vmem:[#allocation457_spill] sm:$0xff] %v11650_v40  ;;  %2244 = vbcast.lane.b32.xlu0 %v2075_v58, 352 }
 0x44c   :  { %2248 = vbcast.lane.b32.xlu1 %v2075_v58, 360  ;;  %v11653_v41 = vpop.xlane.xlu1 %1974  ;;  %v11655_v16 = vpop.xlane.xlu0 %1971 }
 0x44d   :  { %16717 = vst [vmem:[#allocation458_spill] sm:$0xff] %v11653_v41  ;;  %16718 = vst [vmem:[#allocation459_spill] sm:$0xff] %v11655_v16  ;;  %2252 = vbcast.lane.b32.xlu0 %v2075_v58, 368 }
 0x450   :  { %2256 = vbcast.lane.b32.xlu1 %v2075_v58, 376  ;;  %v11660_v42 = vpop.xlane.xlu1 %1980  ;;  %v11662_v25 = vpop.xlane.xlu0 %1977 }
 0x451   :  { %16719 = vst [vmem:[#allocation460_spill] sm:$0xff] %v11660_v42  ;;  %16720 = vst [vmem:[#allocation461_spill] sm:$0xff] %v11662_v25  ;;  %2259 = vbcast.lane.b32.xlu0 %v2079_v7, 256 }
 0x454   :  { %2263 = vbcast.lane.b32.xlu1 %v2079_v7, 264  ;;  %v11664_v3 = vpop.xlane.xlu1 %1986  ;;  %v11666_v40 = vpop.xlane.xlu0 %1983 }
 0x455   :  { %16721 = vst [vmem:[#allocation462_spill] sm:$0xff] %v11664_v3  ;;  %16722 = vst [vmem:[#allocation463_spill] sm:$0xff] %v11666_v40  ;;  %2267 = vbcast.lane.b32.xlu0 %v2079_v7, 272 }
 0x458   :  { %2271 = vbcast.lane.b32.xlu1 %v2079_v7, 280  ;;  %v11668_v41 = vpop.xlane.xlu1 %1992  ;;  %v11670_v16 = vpop.xlane.xlu0 %1989 }
 0x459   :  { %16723 = vst [vmem:[#allocation464_spill] sm:$0xff] %v11668_v41  ;;  %16724 = vst [vmem:[#allocation465_spill] sm:$0xff] %v11670_v16  ;;  %2275 = vbcast.lane.b32.xlu0 %v2079_v7, 288 }
 0x45c   :  { %2279 = vbcast.lane.b32.xlu1 %v2079_v7, 296  ;;  %v11672_v2 = vpop.xlane.xlu1 %1998  ;;  %v11674_v58 = vpop.xlane.xlu0 %1995 }
 0x45d   :  { %16725 = vst [vmem:[#allocation466_spill] sm:$0xff] %v11672_v2  ;;  %16726 = vst [vmem:[#allocation467_spill] sm:$0xff] %v11674_v58  ;;  %2283 = vbcast.lane.b32.xlu0 %v2079_v7, 304  ;;  %v16006_v2 = vsub.s32 3, %v11569_v24 }
 0x460   :  { %2287 = vbcast.lane.b32.xlu1 %v2079_v7, 312  ;;  %v11676_v42 = vpop.xlane.xlu1 %2004  ;;  %v11678_v25 = vpop.xlane.xlu0 %2001 }
 0x461   :  { %16727 = vst [vmem:[#allocation468_spill] sm:$0xff] %v11676_v42  ;;  %16728 = vst [vmem:[#allocation469_spill] sm:$0xff] %v11678_v25  ;;  %2291 = vbcast.lane.b32.xlu0 %v2079_v7, 320 }
 0x464   :  { %2295 = vbcast.lane.b32.xlu1 %v2079_v7, 328  ;;  %v11680_v3 = vpop.xlane.xlu1 %2010  ;;  %v11682_v40 = vpop.xlane.xlu0 %2007 }
 0x465   :  { %16729 = vst [vmem:[#allocation470_spill] sm:$0xff] %v11680_v3  ;;  %16730 = vst [vmem:[#allocation471_spill] sm:$0xff] %v11682_v40  ;;  %2299 = vbcast.lane.b32.xlu0 %v2079_v7, 336  ;;  %v2083_v3 = vrot.slane %v11579_v17, %v16006_v2 }
 0x468   :  { %2303 = vbcast.lane.b32.xlu1 %v2079_v7, 344  ;;  %v11684_v41 = vpop.xlane.xlu1 %2016  ;;  %v11686_v16 = vpop.xlane.xlu0 %2013 }
 0x469   :  { %16731 = vst [vmem:[#allocation472_spill] sm:$0xff] %v11684_v41  ;;  %16732 = vst [vmem:[#allocation473_spill] sm:$0xff] %v11686_v16  ;;  %2307 = vbcast.lane.b32.xlu0 %v2079_v7, 352 }
 0x46c   :  { %2311 = vbcast.lane.b32.xlu1 %v2079_v7, 360  ;;  %v11689_v58 = vpop.xlane.xlu1 %2022  ;;  %v11691_v42 = vpop.xlane.xlu0 %2019 }
 0x46d   :  { %16733 = vst [vmem:[#allocation474_spill] sm:$0xff] %v11689_v58  ;;  %16734 = vst [vmem:[#allocation475_spill] sm:$0xff] %v11691_v42  ;;  %2315 = vbcast.lane.b32.xlu0 %v2079_v7, 368 }
 0x470   :  { %2319 = vbcast.lane.b32.xlu1 %v2079_v7, 376  ;;  %v11696_v40 = vpop.xlane.xlu1 %2028  ;;  %v11698_v25 = vpop.xlane.xlu0 %2025 }
 0x471   :  { %16735 = vst [vmem:[#allocation476_spill] sm:$0xff] %v11696_v40  ;;  %16736 = vst [vmem:[#allocation477_spill] sm:$0xff] %v11698_v25  ;;  %2322 = vbcast.lane.b32.xlu0 %v2083_v3, 256 }
 0x474   :  { %2326 = vbcast.lane.b32.xlu1 %v2083_v3, 264  ;;  %v11700_v41 = vpop.xlane.xlu1 %2034  ;;  %v11702_v16 = vpop.xlane.xlu0 %2031 }
 0x475   :  { %16737 = vst [vmem:[#allocation478_spill] sm:$0xff] %v11700_v41  ;;  %16738 = vst [vmem:[#allocation479_spill] sm:$0xff] %v11702_v16  ;;  %2330 = vbcast.lane.b32.xlu0 %v2083_v3, 272 }
 0x478   :  { %2334 = vbcast.lane.b32.xlu1 %v2083_v3, 280  ;;  %v11704_v58 = vpop.xlane.xlu1 %2040  ;;  %v11706_v42 = vpop.xlane.xlu0 %2037 }
 0x479   :  { %16739 = vst [vmem:[#allocation480_spill] sm:$0xff] %v11704_v58  ;;  %16740 = vst [vmem:[#allocation481_spill] sm:$0xff] %v11706_v42  ;;  %2338 = vbcast.lane.b32.xlu0 %v2083_v3, 288 }
 0x47c   :  { %2342 = vbcast.lane.b32.xlu1 %v2083_v3, 296  ;;  %v11708_v2 = vpop.xlane.xlu1 %2046  ;;  %v11710_v7 = vpop.xlane.xlu0 %2043 }
 0x47d   :  { %16741 = vst [vmem:[#allocation482_spill] sm:$0xff] %v11708_v2  ;;  %16742 = vst [vmem:[#allocation483_spill] sm:$0xff] %v11710_v7  ;;  %2346 = vbcast.lane.b32.xlu0 %v2083_v3, 304  ;;  %v16007_v2 = vsub.s32 4, %v11569_v24 }
 0x480   :  { %2350 = vbcast.lane.b32.xlu1 %v2083_v3, 312  ;;  %v11712_v40 = vpop.xlane.xlu1 %2052  ;;  %v11714_v25 = vpop.xlane.xlu0 %2049 }
 0x481   :  { %16743 = vst [vmem:[#allocation484_spill] sm:$0xff] %v11712_v40  ;;  %16744 = vst [vmem:[#allocation485_spill] sm:$0xff] %v11714_v25  ;;  %2354 = vbcast.lane.b32.xlu0 %v2083_v3, 320 }
 0x484   :  { %2358 = vbcast.lane.b32.xlu1 %v2083_v3, 328  ;;  %v11716_v41 = vpop.xlane.xlu1 %2058  ;;  %v11718_v16 = vpop.xlane.xlu0 %2055 }
 0x485   :  { %16745 = vst [vmem:[#allocation486_spill] sm:$0xff] %v11716_v41  ;;  %16746 = vst [vmem:[#allocation487_spill] sm:$0xff] %v11718_v16  ;;  %2362 = vbcast.lane.b32.xlu0 %v2083_v3, 336  ;;  %v2087_v41 = vrot.slane %v11579_v17, %v16007_v2 }
 0x488   :  { %2366 = vbcast.lane.b32.xlu1 %v2083_v3, 344  ;;  %v11720_v58 = vpop.xlane.xlu1 %2064  ;;  %v11722_v42 = vpop.xlane.xlu0 %2061 }
 0x489   :  { %16747 = vst [vmem:[#allocation488_spill] sm:$0xff] %v11720_v58  ;;  %16748 = vst [vmem:[#allocation489_spill] sm:$0xff] %v11722_v42  ;;  %2370 = vbcast.lane.b32.xlu0 %v2083_v3, 352 }
 0x48c   :  { %2374 = vbcast.lane.b32.xlu1 %v2083_v3, 360  ;;  %v11725_v7 = vpop.permute.xlu1 %2137  ;;  %v11727_v40 = vpop.permute.xlu0 %2133 }
 0x48d   :  { %16749 = vst [vmem:[#allocation490_spill] sm:$0xff] %v11725_v7  ;;  %16750 = vst [vmem:[#allocation491_spill] sm:$0xff] %v11727_v40  ;;  %2378 = vbcast.lane.b32.xlu0 %v2083_v3, 368 }
 0x490   :  { %2382 = vbcast.lane.b32.xlu1 %v2083_v3, 376  ;;  %v11732_v16 = vpop.permute.xlu1 %2141  ;;  %v11734_v25 = vpop.permute.xlu0 %2149 }
 0x491   :  { %16751 = vst [vmem:[#allocation492_spill] sm:$0xff] %v11732_v16  ;;  %16752 = vst [vmem:[#allocation493_spill] sm:$0xff] %v11734_v25  ;;  %2385 = vbcast.lane.b32.xlu0 %v2087_v41, 256 }
 0x494   :  { %2389 = vbcast.lane.b32.xlu1 %v2087_v41, 264  ;;  %v11736_v42 = vpop.permute.xlu1 %2145  ;;  %v11738_v58 = vpop.permute.xlu0 %2157 }
 0x495   :  { %16753 = vst [vmem:[#allocation494_spill] sm:$0xff] %v11736_v42  ;;  %16754 = vst [vmem:[#allocation495_spill] sm:$0xff] %v11738_v58  ;;  %2393 = vbcast.lane.b32.xlu0 %v2087_v41, 272 }
 0x498   :  { %2397 = vbcast.lane.b32.xlu1 %v2087_v41, 280  ;;  %v11740_v43 = vpop.permute.xlu1 %2153  ;;  %v11742_v59 = vpop.permute.xlu0 %2165 }
 0x499   :  { %16755 = vst [vmem:[#allocation496_spill] sm:$0xff] %v11740_v43  ;;  %16756 = vst [vmem:[#allocation497_spill] sm:$0xff] %v11742_v59  ;;  %2401 = vbcast.lane.b32.xlu0 %v2087_v41, 288 }
 0x49c   :  { %2405 = vbcast.lane.b32.xlu1 %v2087_v41, 296  ;;  %v11744_v2 = vpop.permute.xlu1 %2161  ;;  %v11746_v3 = vpop.permute.xlu0 %2173 }
 0x49d   :  { %16757 = vst [vmem:[#allocation498_spill] sm:$0xff] %v11744_v2  ;;  %16758 = vst [vmem:[#allocation499_spill] sm:$0xff] %v11746_v3  ;;  %2409 = vbcast.lane.b32.xlu0 %v2087_v41, 304 }
 0x4a0   :  { %2413 = vbcast.lane.b32.xlu1 %v2087_v41, 312  ;;  %v11748_v6 = vpop.permute.xlu1 %2169  ;;  %v11750_v53 = vpop.permute.xlu0 %2181 }
 0x4a1   :  { %16759 = vst [vmem:[#allocation500_spill] sm:$0xff] %v11748_v6  ;;  %16760 = vst [vmem:[#allocation501_spill] sm:$0xff] %v11750_v53  ;;  %2417 = vbcast.lane.b32.xlu0 %v2087_v41, 320 }
 0x4a4   :  { %2421 = vbcast.lane.b32.xlu1 %v2087_v41, 328  ;;  %v11752_v52 = vpop.permute.xlu1 %2177  ;;  %v11754_v31 = vpop.permute.xlu0 %2189 }
 0x4a5   :  { %16761 = vst [vmem:[#allocation502_spill] sm:$0xff] %v11752_v52  ;;  %16762 = vst [vmem:[#allocation503_spill] sm:$0xff] %v11754_v31  ;;  %2425 = vbcast.lane.b32.xlu0 %v2087_v41, 336 }
 0x4a8   :  { %2429 = vbcast.lane.b32.xlu1 %v2087_v41, 344  ;;  %v11756_v30 = vpop.permute.xlu1 %2185  ;;  %v11758_v13 = vpop.permute.xlu0 %2196 }
 0x4a9   :  { %16763 = vst [vmem:[#allocation504_spill] sm:$0xff] %v11756_v30  ;;  %16764 = vst [vmem:[#allocation505_spill] sm:$0xff] %v11758_v13  ;;  %2433 = vbcast.lane.b32.xlu0 %v2087_v41, 352 }
 0x4ac   :  { %2437 = vbcast.lane.b32.xlu1 %v2087_v41, 360  ;;  %v11761_v61 = vpop.permute.xlu1 %2193  ;;  %v11763_v60 = vpop.permute.xlu0 %2204 }
 0x4ad   :  { %16765 = vst [vmem:[#allocation506_spill] sm:$0xff] %v11761_v61  ;;  %16766 = vst [vmem:[#allocation507_spill] sm:$0xff] %v11763_v60  ;;  %2441 = vbcast.lane.b32.xlu0 %v2087_v41, 368 }
 0x4b0   :  { %2445 = vbcast.lane.b32.xlu1 %v2087_v41, 376  ;;  %v11768_v48 = vpop.permute.xlu1 %2200  ;;  %v11770_v35 = vpop.permute.xlu0 %2212 }
 0x4b1   :  { %16767 = vst [vmem:[#allocation508_spill] sm:$0xff] %v11768_v48  ;;  %16768 = vst [vmem:[#allocation509_spill] sm:$0xff] %v11770_v35  ;;  %2448 = vbcast.lane.b32.xlu0 %v2091_v49, 256 }
 0x4b4   :  { %2452 = vbcast.lane.b32.xlu1 %v2091_v49, 264  ;;  %v11772_v34 = vpop.permute.xlu1 %2208  ;;  %v11774_v23 = vpop.permute.xlu0 %2220 }
 0x4b5   :  { %16769 = vst [vmem:[#allocation510_spill] sm:$0xff] %v11772_v34  ;;  %16770 = vst [vmem:[#allocation511_spill] sm:$0xff] %v11774_v23  ;;  %2456 = vbcast.lane.b32.xlu0 %v2091_v49, 272 }
 0x4b8   :  { %2460 = vbcast.lane.b32.xlu1 %v2091_v49, 280  ;;  %v11776_v22 = vpop.permute.xlu1 %2216  ;;  %v11778_v9 = vpop.permute.xlu0 %2228 }
 0x4b9   :  { %16771 = vst [vmem:[#allocation512_spill] sm:$0xff] %v11776_v22  ;;  %16772 = vst [vmem:[#allocation513_spill] sm:$0xff] %v11778_v9  ;;  %2464 = vbcast.lane.b32.xlu0 %v2091_v49, 288 }
 0x4bc   :  { %2468 = vbcast.lane.b32.xlu1 %v2091_v49, 296  ;;  %v11780_v12 = vpop.permute.xlu1 %2224  ;;  %v11782_v41 = vpop.permute.xlu0 %2236 }
 0x4bd   :  { %16773 = vst [vmem:[#allocation514_spill] sm:$0xff] %v11780_v12  ;;  %16774 = vst [vmem:[#allocation515_spill] sm:$0xff] %v11782_v41  ;;  %2472 = vbcast.lane.b32.xlu0 %v2091_v49, 304 }
 0x4c0   :  { %2476 = vbcast.lane.b32.xlu1 %v2091_v49, 312  ;;  %v11784_v8 = vpop.permute.xlu1 %2232  ;;  %v11786_v1 = vpop.permute.xlu0 %2244 }
 0x4c1   :  { %16775 = vst [vmem:[#allocation516_spill] sm:$0xff] %v11784_v8  ;;  %16776 = vst [vmem:[#allocation517_spill] sm:$0xff] %v11786_v1  ;;  %2480 = vbcast.lane.b32.xlu0 %v2091_v49, 320  ;;  %v2095_v1 = vrot.slane %v11579_v17, %v16017_v46 }
 0x4c4   :  { %2484 = vbcast.lane.b32.xlu1 %v2091_v49, 328  ;;  %v11788_v0 = vpop.permute.xlu1 %2240  ;;  %v11790_v55 = vpop.permute.xlu0 %2252 }
 0x4c5   :  { %16777 = vst [vmem:[#allocation518_spill] sm:$0xff] %v11788_v0  ;;  %16778 = vst [vmem:[#allocation519_spill] sm:$0xff] %v11790_v55  ;;  %2488 = vbcast.lane.b32.xlu0 %v2091_v49, 336 }
 0x4c8   :  { %2492 = vbcast.lane.b32.xlu1 %v2091_v49, 344  ;;  %v11792_v54 = vpop.permute.xlu1 %2248  ;;  %v11794_v47 = vpop.permute.xlu0 %2259 }
 0x4c9   :  { %16779 = vst [vmem:[#allocation520_spill] sm:$0xff] %v11792_v54  ;;  %16780 = vst [vmem:[#allocation521_spill] sm:$0xff] %v11794_v47  ;;  %2496 = vbcast.lane.b32.xlu0 %v2091_v49, 352 }
 0x4cc   :  { %2500 = vbcast.lane.b32.xlu1 %v2091_v49, 360  ;;  %v11797_v41 = vpop.permute.xlu1 %2256  ;;  %v11799_v37 = vpop.permute.xlu0 %2267 }
 0x4cd   :  { %16781 = vst [vmem:[#allocation522_spill] sm:$0xff] %v11797_v41  ;;  %16782 = vst [vmem:[#allocation523_spill] sm:$0xff] %v11799_v37  ;;  %2504 = vbcast.lane.b32.xlu0 %v2091_v49, 368 }
 0x4d0   :  { %2508 = vbcast.lane.b32.xlu1 %v2091_v49, 376  ;;  %v11804_v55 = vpop.permute.xlu1 %2263  ;;  %v11806_v0 = vpop.permute.xlu0 %2275 }
 0x4d1   :  { %16783 = vst [vmem:[#allocation524_spill] sm:$0xff] %v11804_v55  ;;  %16784 = vst [vmem:[#allocation525_spill] sm:$0xff] %v11806_v0  ;;  %2511 = vbcast.lane.b32.xlu0 %v2095_v1, 256 }
 0x4d4   :  { %2515 = vbcast.lane.b32.xlu1 %v2095_v1, 264  ;;  %v11808_v47 = vpop.permute.xlu1 %2271  ;;  %v11810_v54 = vpop.permute.xlu0 %2283 }
 0x4d5   :  { %16785 = vst [vmem:[#allocation526_spill] sm:$0xff] %v11808_v47  ;;  %16786 = vst [vmem:[#allocation527_spill] sm:$0xff] %v11810_v54  ;;  %2519 = vbcast.lane.b32.xlu0 %v2095_v1, 272 }
 0x4d8   :  { %2523 = vbcast.lane.b32.xlu1 %v2095_v1, 280  ;;  %v11812_v41 = vpop.permute.xlu1 %2279  ;;  %v11814_v37 = vpop.permute.xlu0 %2291 }
 0x4d9   :  { %16787 = vst [vmem:[#allocation528_spill] sm:$0xff] %v11812_v41  ;;  %16788 = vst [vmem:[#allocation529_spill] sm:$0xff] %v11814_v37  ;;  %2527 = vbcast.lane.b32.xlu0 %v2095_v1, 288 }
 0x4dc   :  { %2531 = vbcast.lane.b32.xlu1 %v2095_v1, 296  ;;  %v11816_v46 = vpop.permute.xlu1 %2287  ;;  %v11818_v49 = vpop.permute.xlu0 %2299 }
 0x4dd   :  { %16789 = vst [vmem:[#allocation530_spill] sm:$0xff] %v11816_v46  ;;  %16790 = vst [vmem:[#allocation531_spill] sm:$0xff] %v11818_v49  ;;  %2535 = vbcast.lane.b32.xlu0 %v2095_v1, 304  ;;  %v16034_v49 = vsub.s32 7, %v11569_v24 }
 0x4e0   :  { %2539 = vbcast.lane.b32.xlu1 %v2095_v1, 312  ;;  %v11820_v0 = vpop.permute.xlu1 %2295  ;;  %v11822_v55 = vpop.permute.xlu0 %2307 }
 0x4e1   :  { %16791 = vst [vmem:[#allocation532_spill] sm:$0xff] %v11820_v0  ;;  %16792 = vst [vmem:[#allocation533_spill] sm:$0xff] %v11822_v55  ;;  %2543 = vbcast.lane.b32.xlu0 %v2095_v1, 320  ;;  %v2099_v55 = vrot.slane %v11579_v17, %v16034_v49 }
 0x4e4   :  { %2547 = vbcast.lane.b32.xlu1 %v2095_v1, 328  ;;  %v11824_v54 = vpop.permute.xlu1 %2303  ;;  %v11826_v47 = vpop.permute.xlu0 %2315 }
 0x4e5   :  { %16793 = vst [vmem:[#allocation534_spill] sm:$0xff] %v11824_v54  ;;  %16794 = vst [vmem:[#allocation535_spill] sm:$0xff] %v11826_v47  ;;  %2551 = vbcast.lane.b32.xlu0 %v2095_v1, 336 }
 0x4e8   :  { %2555 = vbcast.lane.b32.xlu1 %v2095_v1, 344  ;;  %v11828_v37 = vpop.permute.xlu1 %2311  ;;  %v11830_v41 = vpop.permute.xlu0 %2322 }
 0x4e9   :  { %16795 = vst [vmem:[#allocation536_spill] sm:$0xff] %v11828_v37  ;;  %16796 = vst [vmem:[#allocation537_spill] sm:$0xff] %v11830_v41  ;;  %2559 = vbcast.lane.b32.xlu0 %v2095_v1, 352 }
 0x4ec   :  { %2563 = vbcast.lane.b32.xlu1 %v2095_v1, 360  ;;  %v11833_v46 = vpop.permute.xlu1 %2319  ;;  %v11835_v0 = vpop.permute.xlu0 %2330 }
 0x4ed   :  { %16797 = vst [vmem:[#allocation538_spill] sm:$0xff] %v11833_v46  ;;  %16798 = vst [vmem:[#allocation539_spill] sm:$0xff] %v11835_v0  ;;  %2567 = vbcast.lane.b32.xlu0 %v2095_v1, 368 }
 0x4f0   :  { %2571 = vbcast.lane.b32.xlu1 %v2095_v1, 376  ;;  %v11840_v47 = vpop.permute.xlu1 %2326  ;;  %v11842_v54 = vpop.permute.xlu0 %2338 }
 0x4f1   :  { %16799 = vst [vmem:[#allocation540_spill] sm:$0xff] %v11840_v47  ;;  %16800 = vst [vmem:[#allocation541_spill] sm:$0xff] %v11842_v54  ;;  %2574 = vbcast.lane.b32.xlu0 %v2099_v55, 256 }
 0x4f4   :  { %2578 = vbcast.lane.b32.xlu1 %v2099_v55, 264  ;;  %v11844_v41 = vpop.permute.xlu1 %2334  ;;  %v11846_v37 = vpop.permute.xlu0 %2346 }
 0x4f5   :  { %16801 = vst [vmem:[#allocation542_spill] sm:$0xff] %v11844_v41  ;;  %16802 = vst [vmem:[#allocation543_spill] sm:$0xff] %v11846_v37  ;;  %2582 = vbcast.lane.b32.xlu0 %v2099_v55, 272 }
 0x4f8   :  { %2586 = vbcast.lane.b32.xlu1 %v2099_v55, 280  ;;  %v11848_v46 = vpop.permute.xlu1 %2342  ;;  %v11850_v0 = vpop.permute.xlu0 %2354 }
 0x4f9   :  { %16803 = vst [vmem:[#allocation544_spill] sm:$0xff] %v11848_v46  ;;  %16804 = vst [vmem:[#allocation545_spill] sm:$0xff] %v11850_v0  ;;  %2590 = vbcast.lane.b32.xlu0 %v2099_v55, 288 }
 0x4fc   :  { %2594 = vbcast.lane.b32.xlu1 %v2099_v55, 296  ;;  %v11852_v17 = vpop.permute.xlu1 %2350  ;;  %v11854_v1 = vpop.permute.xlu0 %2362 }
 0x4fd   :  { %16805 = vst [vmem:[#allocation546_spill] sm:$0xff] %v11852_v17  ;;  %16806 = vst [vmem:[#allocation547_spill] sm:$0xff] %v11854_v1  ;;  %2598 = vbcast.lane.b32.xlu0 %v2099_v55, 304  ;;  %v11871_v1 = vld [vmem:[%s15999_s1 + $0x8] sm:$0xff] }
 0x500   :  { %2602 = vbcast.lane.b32.xlu1 %v2099_v55, 312  ;;  %v11856_v49 = vpop.permute.xlu1 %2358  ;;  %v11858_v54 = vpop.permute.xlu0 %2370 }
 0x501   :  { %16807 = vst [vmem:[#allocation548_spill] sm:$0xff] %v11856_v49  ;;  %16808 = vst [vmem:[#allocation549_spill] sm:$0xff] %v11858_v54  ;;  %2606 = vbcast.lane.b32.xlu0 %v2099_v55, 320 }
 0x504   :  { %2610 = vbcast.lane.b32.xlu1 %v2099_v55, 328  ;;  %v11860_v37 = vpop.permute.xlu1 %2366  ;;  %v11862_v41 = vpop.permute.xlu0 %2378 }
 0x505   :  { %16809 = vst [vmem:[#allocation550_spill] sm:$0xff] %v11860_v37  ;;  %16810 = vst [vmem:[#allocation551_spill] sm:$0xff] %v11862_v41  ;;  %2614 = vbcast.lane.b32.xlu0 %v2099_v55, 336  ;;  %v16815_v41 = vsub.s32 0, %v11569_v24 }
 0x507   :  { %v2103_v37 = vrot.slane %v11871_v1, %v16815_v41 }
 0x508   :  { %2618 = vbcast.lane.b32.xlu1 %v2099_v55, 344  ;;  %v11864_v0 = vpop.permute.xlu1 %2374  ;;  %v11866_v46 = vpop.permute.xlu0 %2385 }
 0x509   :  { %16811 = vst [vmem:[#allocation552_spill] sm:$0xff] %v11864_v0  ;;  %16812 = vst [vmem:[#allocation553_spill] sm:$0xff] %v11866_v46  ;;  %2622 = vbcast.lane.b32.xlu0 %v2099_v55, 352 }
 0x50c   :  { %2626 = vbcast.lane.b32.xlu1 %v2099_v55, 360  ;;  %v11873_v54 = vpop.permute.xlu1 %2382  ;;  %v11875_v49 = vpop.permute.xlu0 %2393 }
 0x50d   :  { %16813 = vst [vmem:[#allocation554_spill] sm:$0xff] %v11873_v54  ;;  %16814 = vst [vmem:[#allocation555_spill] sm:$0xff] %v11875_v49  ;;  %2630 = vbcast.lane.b32.xlu0 %v2099_v55, 368 }
 0x510   :  { %2634 = vbcast.lane.b32.xlu1 %v2099_v55, 376  ;;  %v11880_v0 = vpop.permute.xlu1 %2389  ;;  %v11882_v46 = vpop.permute.xlu0 %2401 }
 0x511   :  { %16816 = vst [vmem:[#allocation556_spill] sm:$0xff] %v11880_v0  ;;  %16817 = vst [vmem:[#allocation557_spill] sm:$0xff] %v11882_v46  ;;  %2637 = vbcast.lane.b32.xlu0 %v2103_v37, 256 }
 0x514   :  { %2641 = vbcast.lane.b32.xlu1 %v2103_v37, 264  ;;  %v11884_v17 = vpop.permute.xlu1 %2397  ;;  %v11886_v47 = vpop.permute.xlu0 %2409 }
 0x515   :  { %16818 = vst [vmem:[#allocation558_spill] sm:$0xff] %v11884_v17  ;;  %16819 = vst [vmem:[#allocation559_spill] sm:$0xff] %v11886_v47  ;;  %2645 = vbcast.lane.b32.xlu0 %v2103_v37, 272 }
 0x518   :  { %2649 = vbcast.lane.b32.xlu1 %v2103_v37, 280  ;;  %v11888_v54 = vpop.permute.xlu1 %2405  ;;  %v11890_v49 = vpop.permute.xlu0 %2417 }
 0x519   :  { %16820 = vst [vmem:[#allocation560_spill] sm:$0xff] %v11888_v54  ;;  %16821 = vst [vmem:[#allocation561_spill] sm:$0xff] %v11890_v49  ;;  %2653 = vbcast.lane.b32.xlu0 %v2103_v37, 288 }
 0x51c   :  { %2657 = vbcast.lane.b32.xlu1 %v2103_v37, 296  ;;  %v11892_v41 = vpop.permute.xlu1 %2413  ;;  %v11894_v55 = vpop.permute.xlu0 %2425 }
 0x51d   :  { %16822 = vst [vmem:[#allocation562_spill] sm:$0xff] %v11892_v41  ;;  %16823 = vst [vmem:[#allocation563_spill] sm:$0xff] %v11894_v55  ;;  %2661 = vbcast.lane.b32.xlu0 %v2103_v37, 304 }
 0x520   :  { %2665 = vbcast.lane.b32.xlu1 %v2103_v37, 312  ;;  %v11896_v46 = vpop.permute.xlu1 %2421  ;;  %v11898_v0 = vpop.permute.xlu0 %2433 }
 0x521   :  { %16824 = vst [vmem:[#allocation564_spill] sm:$0xff] %v11896_v46  ;;  %16825 = vst [vmem:[#allocation565_spill] sm:$0xff] %v11898_v0  ;;  %2669 = vbcast.lane.b32.xlu0 %v2103_v37, 320  ;;  %v16832_v0 = vsub.s32 1, %v11569_v24 }
 0x523   :  { %v2107_v46 = vrot.slane %v11871_v1, %v16832_v0 }
 0x524   :  { %2673 = vbcast.lane.b32.xlu1 %v2103_v37, 328  ;;  %v11900_v47 = vpop.permute.xlu1 %2429  ;;  %v11902_v17 = vpop.permute.xlu0 %2441 }
 0x525   :  { %16826 = vst [vmem:[#allocation566_spill] sm:$0xff] %v11900_v47  ;;  %16827 = vst [vmem:[#allocation567_spill] sm:$0xff] %v11902_v17  ;;  %2677 = vbcast.lane.b32.xlu0 %v2103_v37, 336 }
 0x528   :  { %2681 = vbcast.lane.b32.xlu1 %v2103_v37, 344  ;;  %v11904_v49 = vpop.permute.xlu1 %2437  ;;  %v11906_v54 = vpop.permute.xlu0 %2448 }
 0x529   :  { %16828 = vst [vmem:[#allocation568_spill] sm:$0xff] %v11904_v49  ;;  %16829 = vst [vmem:[#allocation569_spill] sm:$0xff] %v11906_v54  ;;  %2685 = vbcast.lane.b32.xlu0 %v2103_v37, 352 }
 0x52c   :  { %2689 = vbcast.lane.b32.xlu1 %v2103_v37, 360  ;;  %v11908_v55 = vpop.permute.xlu1 %2445  ;;  %v11910_v41 = vpop.permute.xlu0 %2456 }
 0x52d   :  { %16830 = vst [vmem:[#allocation570_spill] sm:$0xff] %v11908_v55  ;;  %16831 = vst [vmem:[#allocation571_spill] sm:$0xff] %v11910_v41  ;;  %2693 = vbcast.lane.b32.xlu0 %v2103_v37, 368 }
 0x530   :  { %2697 = vbcast.lane.b32.xlu1 %v2103_v37, 376  ;;  %v11915_v47 = vpop.permute.xlu1 %2452  ;;  %v11917_v17 = vpop.permute.xlu0 %2464 }
 0x531   :  { %16833 = vst [vmem:[#allocation572_spill] sm:$0xff] %v11915_v47  ;;  %16834 = vst [vmem:[#allocation573_spill] sm:$0xff] %v11917_v17  ;;  %2700 = vbcast.lane.b32.xlu0 %v2107_v46, 256 }
 0x534   :  { %2704 = vbcast.lane.b32.xlu1 %v2107_v46, 264  ;;  %v11919_v49 = vpop.permute.xlu1 %2460  ;;  %v11921_v54 = vpop.permute.xlu0 %2472 }
 0x535   :  { %16835 = vst [vmem:[#allocation574_spill] sm:$0xff] %v11919_v49  ;;  %16836 = vst [vmem:[#allocation575_spill] sm:$0xff] %v11921_v54  ;;  %2708 = vbcast.lane.b32.xlu0 %v2107_v46, 272 }
 0x538   :  { %2712 = vbcast.lane.b32.xlu1 %v2107_v46, 280  ;;  %v11923_v55 = vpop.permute.xlu1 %2468  ;;  %v11925_v41 = vpop.permute.xlu0 %2480 }
 0x539   :  { %16837 = vst [vmem:[#allocation576_spill] sm:$0xff] %v11923_v55  ;;  %16838 = vst [vmem:[#allocation577_spill] sm:$0xff] %v11925_v41  ;;  %2716 = vbcast.lane.b32.xlu0 %v2107_v46, 288 }
 0x53c   :  { %2720 = vbcast.lane.b32.xlu1 %v2107_v46, 296  ;;  %v11927_v0 = vpop.permute.xlu1 %2476  ;;  %v11929_v37 = vpop.permute.xlu0 %2488 }
 0x53d   :  { %16839 = vst [vmem:[#allocation578_spill] sm:$0xff] %v11927_v0  ;;  %16840 = vst [vmem:[#allocation579_spill] sm:$0xff] %v11929_v37  ;;  %2724 = vbcast.lane.b32.xlu0 %v2107_v46, 304 }
 0x540   :  { %2728 = vbcast.lane.b32.xlu1 %v2107_v46, 312  ;;  %v11931_v17 = vpop.permute.xlu1 %2484  ;;  %v11933_v47 = vpop.permute.xlu0 %2496 }
 0x541   :  { %16841 = vst [vmem:[#allocation580_spill] sm:$0xff] %v11931_v17  ;;  %16842 = vst [vmem:[#allocation581_spill] sm:$0xff] %v11933_v47  ;;  %2732 = vbcast.lane.b32.xlu0 %v2107_v46, 320  ;;  %v16849_v47 = vsub.s32 2, %v11569_v24 }
 0x543   :  { %v2111_v17 = vrot.slane %v11871_v1, %v16849_v47 }
 0x544   :  { %2736 = vbcast.lane.b32.xlu1 %v2107_v46, 328  ;;  %v11935_v54 = vpop.permute.xlu1 %2492  ;;  %v11937_v49 = vpop.permute.xlu0 %2504 }
 0x545   :  { %16843 = vst [vmem:[#allocation582_spill] sm:$0xff] %v11935_v54  ;;  %16844 = vst [vmem:[#allocation583_spill] sm:$0xff] %v11937_v49  ;;  %2740 = vbcast.lane.b32.xlu0 %v2107_v46, 336 }
 0x548   :  { %2744 = vbcast.lane.b32.xlu1 %v2107_v46, 344  ;;  %v11939_v41 = vpop.permute.xlu1 %2500  ;;  %v11941_v55 = vpop.permute.xlu0 %2511 }
 0x549   :  { %16845 = vst [vmem:[#allocation584_spill] sm:$0xff] %v11939_v41  ;;  %16846 = vst [vmem:[#allocation585_spill] sm:$0xff] %v11941_v55  ;;  %2748 = vbcast.lane.b32.xlu0 %v2107_v46, 352 }
 0x54c   :  { %2752 = vbcast.lane.b32.xlu1 %v2107_v46, 360  ;;  %v11943_v37 = vpop.permute.xlu1 %2508  ;;  %v11945_v0 = vpop.permute.xlu0 %2519 }
 0x54d   :  { %16847 = vst [vmem:[#allocation586_spill] sm:$0xff] %v11943_v37  ;;  %16848 = vst [vmem:[#allocation587_spill] sm:$0xff] %v11945_v0  ;;  %2756 = vbcast.lane.b32.xlu0 %v2107_v46, 368 }
 0x550   :  { %2760 = vbcast.lane.b32.xlu1 %v2107_v46, 376  ;;  %v11950_v54 = vpop.permute.xlu1 %2515  ;;  %v11952_v49 = vpop.permute.xlu0 %2527 }
 0x551   :  { %16850 = vst [vmem:[#allocation588_spill] sm:$0xff] %v11950_v54  ;;  %16851 = vst [vmem:[#allocation589_spill] sm:$0xff] %v11952_v49  ;;  %2763 = vbcast.lane.b32.xlu0 %v2111_v17, 256 }
 0x554   :  { %2767 = vbcast.lane.b32.xlu1 %v2111_v17, 264  ;;  %v11954_v41 = vpop.permute.xlu1 %2523  ;;  %v11956_v55 = vpop.permute.xlu0 %2535 }
 0x555   :  { %16852 = vst [vmem:[#allocation590_spill] sm:$0xff] %v11954_v41  ;;  %16853 = vst [vmem:[#allocation591_spill] sm:$0xff] %v11956_v55  ;;  %2771 = vbcast.lane.b32.xlu0 %v2111_v17, 272 }
 0x558   :  { %2775 = vbcast.lane.b32.xlu1 %v2111_v17, 280  ;;  %v11958_v37 = vpop.permute.xlu1 %2531  ;;  %v11960_v0 = vpop.permute.xlu0 %2543 }
 0x559   :  { %16854 = vst [vmem:[#allocation592_spill] sm:$0xff] %v11958_v37  ;;  %16855 = vst [vmem:[#allocation593_spill] sm:$0xff] %v11960_v0  ;;  %2779 = vbcast.lane.b32.xlu0 %v2111_v17, 288 }
 0x55c   :  { %2783 = vbcast.lane.b32.xlu1 %v2111_v17, 296  ;;  %v11962_v47 = vpop.permute.xlu1 %2539  ;;  %v11964_v46 = vpop.permute.xlu0 %2551 }
 0x55d   :  { %16856 = vst [vmem:[#allocation594_spill] sm:$0xff] %v11962_v47  ;;  %16857 = vst [vmem:[#allocation595_spill] sm:$0xff] %v11964_v46  ;;  %2787 = vbcast.lane.b32.xlu0 %v2111_v17, 304 }
 0x560   :  { %2791 = vbcast.lane.b32.xlu1 %v2111_v17, 312  ;;  %v11966_v49 = vpop.permute.xlu1 %2547  ;;  %v11968_v54 = vpop.permute.xlu0 %2559 }
 0x561   :  { %16858 = vst [vmem:[#allocation596_spill] sm:$0xff] %v11966_v49  ;;  %16859 = vst [vmem:[#allocation597_spill] sm:$0xff] %v11968_v54  ;;  %2795 = vbcast.lane.b32.xlu0 %v2111_v17, 320  ;;  %v16866_v54 = vsub.s32 3, %v11569_v24 }
 0x563   :  { %v2115_v49 = vrot.slane %v11871_v1, %v16866_v54 }
 0x564   :  { %2799 = vbcast.lane.b32.xlu1 %v2111_v17, 328  ;;  %v11970_v55 = vpop.permute.xlu1 %2555  ;;  %v11972_v41 = vpop.permute.xlu0 %2567 }
 0x565   :  { %16860 = vst [vmem:[#allocation598_spill] sm:$0xff] %v11970_v55  ;;  %16861 = vst [vmem:[#allocation599_spill] sm:$0xff] %v11972_v41  ;;  %2803 = vbcast.lane.b32.xlu0 %v2111_v17, 336 }
 0x568   :  { %2807 = vbcast.lane.b32.xlu1 %v2111_v17, 344  ;;  %v11974_v0 = vpop.permute.xlu1 %2563  ;;  %v11976_v37 = vpop.permute.xlu0 %2574 }
 0x569   :  { %16862 = vst [vmem:[#allocation600_spill] sm:$0xff] %v11974_v0  ;;  %16863 = vst [vmem:[#allocation601_spill] sm:$0xff] %v11976_v37  ;;  %2811 = vbcast.lane.b32.xlu0 %v2111_v17, 352 }
 0x56c   :  { %2815 = vbcast.lane.b32.xlu1 %v2111_v17, 360  ;;  %v11978_v46 = vpop.permute.xlu1 %2571  ;;  %v11980_v47 = vpop.permute.xlu0 %2582 }
 0x56d   :  { %16864 = vst [vmem:[#allocation602_spill] sm:$0xff] %v11978_v46  ;;  %16865 = vst [vmem:[#allocation603_spill] sm:$0xff] %v11980_v47  ;;  %2819 = vbcast.lane.b32.xlu0 %v2111_v17, 368 }
 0x570   :  { %2823 = vbcast.lane.b32.xlu1 %v2111_v17, 376  ;;  %v11985_v55 = vpop.permute.xlu1 %2578  ;;  %v11987_v41 = vpop.permute.xlu0 %2590 }
 0x571   :  { %16867 = vst [vmem:[#allocation604_spill] sm:$0xff] %v11985_v55  ;;  %16868 = vst [vmem:[#allocation605_spill] sm:$0xff] %v11987_v41  ;;  %2826 = vbcast.lane.b32.xlu0 %v2115_v49, 256 }
 0x574   :  { %2830 = vbcast.lane.b32.xlu1 %v2115_v49, 264  ;;  %v11989_v0 = vpop.permute.xlu1 %2586  ;;  %v11991_v37 = vpop.permute.xlu0 %2598 }
 0x575   :  { %16869 = vst [vmem:[#allocation606_spill] sm:$0xff] %v11989_v0  ;;  %16870 = vst [vmem:[#allocation607_spill] sm:$0xff] %v11991_v37  ;;  %2834 = vbcast.lane.b32.xlu0 %v2115_v49, 272 }
 0x578   :  { %2838 = vbcast.lane.b32.xlu1 %v2115_v49, 280  ;;  %v11993_v46 = vpop.permute.xlu1 %2594  ;;  %v11995_v47 = vpop.permute.xlu0 %2606 }
 0x579   :  { %16871 = vst [vmem:[#allocation608_spill] sm:$0xff] %v11993_v46  ;;  %16872 = vst [vmem:[#allocation609_spill] sm:$0xff] %v11995_v47  ;;  %2842 = vbcast.lane.b32.xlu0 %v2115_v49, 288 }
 0x57c   :  { %2846 = vbcast.lane.b32.xlu1 %v2115_v49, 296  ;;  %v11997_v54 = vpop.permute.xlu1 %2602  ;;  %v11999_v17 = vpop.permute.xlu0 %2614 }
 0x57d   :  { %16873 = vst [vmem:[#allocation610_spill] sm:$0xff] %v11997_v54  ;;  %16874 = vst [vmem:[#allocation611_spill] sm:$0xff] %v11999_v17  ;;  %2850 = vbcast.lane.b32.xlu0 %v2115_v49, 304 }
 0x580   :  { %2854 = vbcast.lane.b32.xlu1 %v2115_v49, 312  ;;  %v12001_v41 = vpop.permute.xlu1 %2610  ;;  %v12003_v55 = vpop.permute.xlu0 %2622 }
 0x581   :  { %16875 = vst [vmem:[#allocation612_spill] sm:$0xff] %v12001_v41  ;;  %16876 = vst [vmem:[#allocation613_spill] sm:$0xff] %v12003_v55  ;;  %2858 = vbcast.lane.b32.xlu0 %v2115_v49, 320  ;;  %v16883_v55 = vsub.s32 4, %v11569_v24 }
 0x583   :  { %v2119_v41 = vrot.slane %v11871_v1, %v16883_v55 }
 0x584   :  { %2862 = vbcast.lane.b32.xlu1 %v2115_v49, 328  ;;  %v12005_v37 = vpop.permute.xlu1 %2618  ;;  %v12007_v0 = vpop.permute.xlu0 %2630 }
 0x585   :  { %16877 = vst [vmem:[#allocation614_spill] sm:$0xff] %v12005_v37  ;;  %16878 = vst [vmem:[#allocation615_spill] sm:$0xff] %v12007_v0  ;;  %2866 = vbcast.lane.b32.xlu0 %v2115_v49, 336  ;;  %v8607_v37 = vmov 0  }
 0x586   :  { %8601 = vset.pattern.permute.xlu0 %v8607_v37  ;;  %8602 = vset.pattern.permute.xlu1 %v8607_v37 }
 0x588   :  { %2870 = vbcast.lane.b32.xlu1 %v2115_v49, 344  ;;  %v12009_v47 = vpop.permute.xlu1 %2626  ;;  %v12011_v46 = vpop.permute.xlu0 %2637 }
 0x589   :  { %16879 = vst [vmem:[#allocation616_spill] sm:$0xff] %v12009_v47  ;;  %16880 = vst [vmem:[#allocation617_spill] sm:$0xff] %v12011_v46  ;;  %2874 = vbcast.lane.b32.xlu0 %v2115_v49, 352 }
 0x58c   :  { %2878 = vbcast.lane.b32.xlu1 %v2115_v49, 360  ;;  %v12013_v17 = vpop.permute.xlu1 %2634  ;;  %v12015_v54 = vpop.permute.xlu0 %2645 }
 0x58d   :  { %16881 = vst [vmem:[#allocation618_spill] sm:$0xff] %v12013_v17  ;;  %16882 = vst [vmem:[#allocation619_spill] sm:$0xff] %v12015_v54  ;;  %2882 = vbcast.lane.b32.xlu0 %v2115_v49, 368 }
 0x590   :  { %2886 = vbcast.lane.b32.xlu1 %v2115_v49, 376  ;;  %v12020_v0 = vpop.permute.xlu1 %2641  ;;  %v12022_v47 = vpop.permute.xlu0 %2653 }
 0x591   :  { %16884 = vst [vmem:[#allocation620_spill] sm:$0xff] %v12020_v0  ;;  %16885 = vst [vmem:[#allocation621_spill] sm:$0xff] %v12022_v47  ;;  %2889 = vbcast.lane.b32.xlu0 %v2119_v41, 256 }
 0x594   :  { %2893 = vbcast.lane.b32.xlu1 %v2119_v41, 264  ;;  %v12024_v46 = vpop.permute.xlu1 %2649  ;;  %v12026_v17 = vpop.permute.xlu0 %2661 }
 0x595   :  { %16886 = vst [vmem:[#allocation622_spill] sm:$0xff] %v12024_v46  ;;  %16887 = vst [vmem:[#allocation623_spill] sm:$0xff] %v12026_v17  ;;  %2897 = vbcast.lane.b32.xlu0 %v2119_v41, 272 }
 0x598   :  { %2901 = vbcast.lane.b32.xlu1 %v2119_v41, 280  ;;  %v12028_v54 = vpop.permute.xlu1 %2657  ;;  %v12030_v36 = vpop.permute.xlu0 %2669 }
 0x599   :  { %16888 = vst [vmem:[#allocation624_spill] sm:$0xff] %v12028_v54  ;;  %16889 = vst [vmem:[#allocation625_spill] sm:$0xff] %v12030_v36  ;;  %2905 = vbcast.lane.b32.xlu0 %v2119_v41, 288 }
 0x59c   :  { %2909 = vbcast.lane.b32.xlu1 %v2119_v41, 296  ;;  %v12032_v55 = vpop.permute.xlu1 %2665  ;;  %v12034_v49 = vpop.permute.xlu0 %2677 }
 0x59d   :  { %16890 = vst [vmem:[#allocation626_spill] sm:$0xff] %v12032_v55  ;;  %16891 = vst [vmem:[#allocation627_spill] sm:$0xff] %v12034_v49  ;;  %2913 = vbcast.lane.b32.xlu0 %v2119_v41, 304 }
 0x5a0   :  { %2917 = vbcast.lane.b32.xlu1 %v2119_v41, 312  ;;  %v12036_v37 = vpop.permute.xlu1 %2673  ;;  %v12038_v47 = vpop.permute.xlu0 %2685 }
 0x5a1   :  { %16892 = vst [vmem:[#allocation628_spill] sm:$0xff] %v12036_v37  ;;  %16893 = vst [vmem:[#allocation629_spill] sm:$0xff] %v12038_v47  ;;  %2921 = vbcast.lane.b32.xlu0 %v2119_v41, 320  ;;  %v16900_v47 = vsub.s32 5, %v11569_v24 }
 0x5a3   :  { %v2123_v37 = vrot.slane %v11871_v1, %v16900_v47 }
 0x5a4   :  { %2925 = vbcast.lane.b32.xlu1 %v2119_v41, 328  ;;  %v12040_v17 = vpop.permute.xlu1 %2681  ;;  %v12042_v46 = vpop.permute.xlu0 %2693 }
 0x5a5   :  { %16894 = vst [vmem:[#allocation630_spill] sm:$0xff] %v12040_v17  ;;  %16895 = vst [vmem:[#allocation631_spill] sm:$0xff] %v12042_v46  ;;  %2929 = vbcast.lane.b32.xlu0 %v2119_v41, 336 }
 0x5a8   :  { %2933 = vbcast.lane.b32.xlu1 %v2119_v41, 344  ;;  %v12044_v36 = vpop.permute.xlu1 %2689  ;;  %v12046_v54 = vpop.permute.xlu0 %2700 }
 0x5a9   :  { %16896 = vst [vmem:[#allocation632_spill] sm:$0xff] %v12044_v36  ;;  %16897 = vst [vmem:[#allocation633_spill] sm:$0xff] %v12046_v54  ;;  %2937 = vbcast.lane.b32.xlu0 %v2119_v41, 352 }
 0x5ac   :  { %2941 = vbcast.lane.b32.xlu1 %v2119_v41, 360  ;;  %v12048_v49 = vpop.permute.xlu1 %2697  ;;  %v12050_v55 = vpop.permute.xlu0 %2708 }
 0x5ad   :  { %16898 = vst [vmem:[#allocation634_spill] sm:$0xff] %v12048_v49  ;;  %16899 = vst [vmem:[#allocation635_spill] sm:$0xff] %v12050_v55  ;;  %2945 = vbcast.lane.b32.xlu0 %v2119_v41, 368 }
 0x5b0   :  { %2949 = vbcast.lane.b32.xlu1 %v2119_v41, 376  ;;  %v12055_v17 = vpop.permute.xlu1 %2704  ;;  %v12057_v46 = vpop.permute.xlu0 %2716 }
 0x5b1   :  { %16901 = vst [vmem:[#allocation636_spill] sm:$0xff] %v12055_v17  ;;  %16902 = vst [vmem:[#allocation637_spill] sm:$0xff] %v12057_v46  ;;  %2952 = vbcast.lane.b32.xlu0 %v2123_v37, 256 }
 0x5b4   :  { %2956 = vbcast.lane.b32.xlu1 %v2123_v37, 264  ;;  %v12059_v36 = vpop.permute.xlu1 %2712  ;;  %v12061_v54 = vpop.permute.xlu0 %2724 }
 0x5b5   :  { %16903 = vst [vmem:[#allocation638_spill] sm:$0xff] %v12059_v36  ;;  %16904 = vst [vmem:[#allocation639_spill] sm:$0xff] %v12061_v54  ;;  %2960 = vbcast.lane.b32.xlu0 %v2123_v37, 272 }
 0x5b8   :  { %2964 = vbcast.lane.b32.xlu1 %v2123_v37, 280  ;;  %v12063_v49 = vpop.permute.xlu1 %2720  ;;  %v12065_v55 = vpop.permute.xlu0 %2732 }
 0x5b9   :  { %16905 = vst [vmem:[#allocation640_spill] sm:$0xff] %v12063_v49  ;;  %16906 = vst [vmem:[#allocation641_spill] sm:$0xff] %v12065_v55  ;;  %2968 = vbcast.lane.b32.xlu0 %v2123_v37, 288 }
 0x5bc   :  { %2972 = vbcast.lane.b32.xlu1 %v2123_v37, 296  ;;  %v12067_v47 = vpop.permute.xlu1 %2728  ;;  %v12069_v41 = vpop.permute.xlu0 %2740 }
 0x5bd   :  { %16907 = vst [vmem:[#allocation642_spill] sm:$0xff] %v12067_v47  ;;  %16908 = vst [vmem:[#allocation643_spill] sm:$0xff] %v12069_v41  ;;  %2976 = vbcast.lane.b32.xlu0 %v2123_v37, 304 }
 0x5c0   :  { %2980 = vbcast.lane.b32.xlu1 %v2123_v37, 312  ;;  %v12071_v46 = vpop.permute.xlu1 %2736  ;;  %v12073_v17 = vpop.permute.xlu0 %2748 }
 0x5c1   :  { %16909 = vst [vmem:[#allocation644_spill] sm:$0xff] %v12071_v46  ;;  %16910 = vst [vmem:[#allocation645_spill] sm:$0xff] %v12073_v17  ;;  %2984 = vbcast.lane.b32.xlu0 %v2123_v37, 320  ;;  %v16917_v17 = vsub.s32 6, %v11569_v24 }
 0x5c3   :  { %v2127_v46 = vrot.slane %v11871_v1, %v16917_v17 }
 0x5c4   :  { %2988 = vbcast.lane.b32.xlu1 %v2123_v37, 328  ;;  %v12075_v54 = vpop.permute.xlu1 %2744  ;;  %v12077_v36 = vpop.permute.xlu0 %2756 }
 0x5c5   :  { %16911 = vst [vmem:[#allocation646_spill] sm:$0xff] %v12075_v54  ;;  %16912 = vst [vmem:[#allocation647_spill] sm:$0xff] %v12077_v36  ;;  %2992 = vbcast.lane.b32.xlu0 %v2123_v37, 336 }
 0x5c8   :  { %2996 = vbcast.lane.b32.xlu1 %v2123_v37, 344  ;;  %v12079_v55 = vpop.permute.xlu1 %2752  ;;  %v12081_v49 = vpop.permute.xlu0 %2763 }
 0x5c9   :  { %16913 = vst [vmem:[#allocation648_spill] sm:$0xff] %v12079_v55  ;;  %16914 = vst [vmem:[#allocation649_spill] sm:$0xff] %v12081_v49  ;;  %3000 = vbcast.lane.b32.xlu0 %v2123_v37, 352 }
 0x5cc   :  { %3004 = vbcast.lane.b32.xlu1 %v2123_v37, 360  ;;  %v12083_v41 = vpop.permute.xlu1 %2760  ;;  %v12085_v47 = vpop.permute.xlu0 %2771 }
 0x5cd   :  { %16915 = vst [vmem:[#allocation650_spill] sm:$0xff] %v12083_v41  ;;  %16916 = vst [vmem:[#allocation651_spill] sm:$0xff] %v12085_v47  ;;  %3008 = vbcast.lane.b32.xlu0 %v2123_v37, 368 }
 0x5d0   :  { %3012 = vbcast.lane.b32.xlu1 %v2123_v37, 376  ;;  %v12090_v54 = vpop.permute.xlu1 %2767  ;;  %v12092_v36 = vpop.permute.xlu0 %2779 }
 0x5d1   :  { %16918 = vst [vmem:[#allocation652_spill] sm:$0xff] %v12090_v54  ;;  %16919 = vst [vmem:[#allocation653_spill] sm:$0xff] %v12092_v36  ;;  %3015 = vbcast.lane.b32.xlu0 %v2127_v46, 256 }
 0x5d4   :  { %3019 = vbcast.lane.b32.xlu1 %v2127_v46, 264  ;;  %v12094_v55 = vpop.permute.xlu1 %2775  ;;  %v12096_v49 = vpop.permute.xlu0 %2787 }
 0x5d5   :  { %16920 = vst [vmem:[#allocation654_spill] sm:$0xff] %v12094_v55  ;;  %16921 = vst [vmem:[#allocation655_spill] sm:$0xff] %v12096_v49  ;;  %3023 = vbcast.lane.b32.xlu0 %v2127_v46, 272 }
 0x5d8   :  { %3027 = vbcast.lane.b32.xlu1 %v2127_v46, 280  ;;  %v12098_v41 = vpop.permute.xlu1 %2783  ;;  %v12100_v47 = vpop.permute.xlu0 %2795 }
 0x5d9   :  { %16922 = vst [vmem:[#allocation656_spill] sm:$0xff] %v12098_v41  ;;  %16923 = vst [vmem:[#allocation657_spill] sm:$0xff] %v12100_v47  ;;  %3031 = vbcast.lane.b32.xlu0 %v2127_v46, 288 }
 0x5dc   :  { %3035 = vbcast.lane.b32.xlu1 %v2127_v46, 296  ;;  %v12102_v17 = vpop.permute.xlu1 %2791  ;;  %v12104_v37 = vpop.permute.xlu0 %2803 }
 0x5dd   :  { %16924 = vst [vmem:[#allocation658_spill] sm:$0xff] %v12102_v17  ;;  %16925 = vst [vmem:[#allocation659_spill] sm:$0xff] %v12104_v37  ;;  %3039 = vbcast.lane.b32.xlu0 %v2127_v46, 304 }
 0x5e0   :  { %3043 = vbcast.lane.b32.xlu1 %v2127_v46, 312  ;;  %v12106_v36 = vpop.permute.xlu1 %2799  ;;  %v12108_v54 = vpop.permute.xlu0 %2811 }
 0x5e1   :  { %16926 = vst [vmem:[#allocation660_spill] sm:$0xff] %v12106_v36  ;;  %16927 = vst [vmem:[#allocation661_spill] sm:$0xff] %v12108_v54  ;;  %3047 = vbcast.lane.b32.xlu0 %v2127_v46, 320  ;;  %v16934_v54 = vsub.s32 7, %v11569_v24 }
 0x5e3   :  { %v2131_v36 = vrot.slane %v11871_v1, %v16934_v54 }
 0x5e4   :  { %3051 = vbcast.lane.b32.xlu1 %v2127_v46, 328  ;;  %v12110_v49 = vpop.permute.xlu1 %2807  ;;  %v12112_v55 = vpop.permute.xlu0 %2819 }
 0x5e5   :  { %16928 = vst [vmem:[#allocation662_spill] sm:$0xff] %v12110_v49  ;;  %16929 = vst [vmem:[#allocation663_spill] sm:$0xff] %v12112_v55  ;;  %3055 = vbcast.lane.b32.xlu0 %v2127_v46, 336 }
 0x5e8   :  { %3059 = vbcast.lane.b32.xlu1 %v2127_v46, 344  ;;  %v12114_v47 = vpop.permute.xlu1 %2815  ;;  %v12116_v41 = vpop.permute.xlu0 %2826 }
 0x5e9   :  { %16930 = vst [vmem:[#allocation664_spill] sm:$0xff] %v12114_v47  ;;  %16931 = vst [vmem:[#allocation665_spill] sm:$0xff] %v12116_v41  ;;  %3063 = vbcast.lane.b32.xlu0 %v2127_v46, 352 }
 0x5ec   :  { %3067 = vbcast.lane.b32.xlu1 %v2127_v46, 360  ;;  %v12118_v37 = vpop.permute.xlu1 %2823  ;;  %v12120_v17 = vpop.permute.xlu0 %2834 }
 0x5ed   :  { %16932 = vst [vmem:[#allocation666_spill] sm:$0xff] %v12118_v37  ;;  %16933 = vst [vmem:[#allocation667_spill] sm:$0xff] %v12120_v17  ;;  %3071 = vbcast.lane.b32.xlu0 %v2127_v46, 368 }
 0x5f0   :  { %3075 = vbcast.lane.b32.xlu1 %v2127_v46, 376  ;;  %v12125_v49 = vpop.permute.xlu1 %2830  ;;  %v12127_v55 = vpop.permute.xlu0 %2842 }
 0x5f1   :  { %16935 = vst [vmem:[#allocation668_spill] sm:$0xff] %v12125_v49  ;;  %16936 = vst [vmem:[#allocation669_spill] sm:$0xff] %v12127_v55  ;;  %3078 = vbcast.lane.b32.xlu0 %v2131_v36, 256 }
 0x5f4   :  { %3082 = vbcast.lane.b32.xlu1 %v2131_v36, 264  ;;  %v12129_v47 = vpop.permute.xlu1 %2838  ;;  %v12131_v41 = vpop.permute.xlu0 %2850 }
 0x5f5   :  { %16937 = vst [vmem:[#allocation670_spill] sm:$0xff] %v12129_v47  ;;  %16938 = vst [vmem:[#allocation671_spill] sm:$0xff] %v12131_v41  ;;  %3086 = vbcast.lane.b32.xlu0 %v2131_v36, 272 }
 0x5f8   :  { %3090 = vbcast.lane.b32.xlu1 %v2131_v36, 280  ;;  %v12133_v37 = vpop.permute.xlu1 %2846  ;;  %v12135_v17 = vpop.permute.xlu0 %2858 }
 0x5f9   :  { %16939 = vst [vmem:[#allocation672_spill] sm:$0xff] %v12133_v37  ;;  %16940 = vst [vmem:[#allocation673_spill] sm:$0xff] %v12135_v17  ;;  %3094 = vbcast.lane.b32.xlu0 %v2131_v36, 288 }
 0x5fc   :  { %3098 = vbcast.lane.b32.xlu1 %v2131_v36, 296  ;;  %v12137_v1 = vpop.permute.xlu1 %2854  ;;  %v12139_v46 = vpop.permute.xlu0 %2866 }
 0x5fd   :  { %16941 = vst [vmem:[#allocation674_spill] sm:$0xff] %v12137_v1  ;;  %16942 = vst [vmem:[#allocation675_spill] sm:$0xff] %v12139_v46  ;;  %3102 = vbcast.lane.b32.xlu0 %v2131_v36, 304 }
 0x600   :  { %3106 = vbcast.lane.b32.xlu1 %v2131_v36, 312  ;;  %v12141_v54 = vpop.permute.xlu1 %2862  ;;  %v12143_v24 = vpop.permute.xlu0 %2874 }
 0x601   :  { %16943 = vst [vmem:[#allocation676_spill] sm:$0xff] %v12141_v54  ;;  %16944 = vst [vmem:[#allocation677_spill] sm:$0xff] %v12143_v24  ;;  %3110 = vbcast.lane.b32.xlu0 %v2131_v36, 320  ;;  %v3396_v24 = vmul.f32 %v11727_v40, %v8916_v15  ;;  %v3398_v15 = vmul.f32 %v11732_v16, %v8914_v14  ;;  %v3402_v14 = vmul.f32 %v11738_v58, %v8952_v33 }
 0x602   :  { %v3406_v33 = vmul.f32 %v11746_v3, %v8976_v45  ;;  %v3410_v45 = vmul.f32 %v11754_v31, %v9000_v57  ;;  %v3414_v57 = vmul.f32 %v11763_v60, %v9024_v5  ;;  %v3418_v5 = vmul.f32 %v11774_v23, %v9048_v19  ;;  %v16962_v19 = vld [vmem:[#allocation4_spill] sm:$0xff]  ;;  %v16964_v23 = vld [vmem:[#allocation5_spill] sm:$0xff] }
 0x604   :  { %3114 = vbcast.lane.b32.xlu1 %v2131_v36, 328  ;;  %v12145_v41 = vpop.permute.xlu1 %2870  ;;  %v12147_v55 = vpop.permute.xlu0 %2882 }
 0x605   :  { %16945 = vst [vmem:[#allocation678_spill] sm:$0xff] %v12145_v41  ;;  %16946 = vst [vmem:[#allocation679_spill] sm:$0xff] %v12147_v55  ;;  %3118 = vbcast.lane.b32.xlu0 %v2131_v36, 336 }
 0x608   :  { %3122 = vbcast.lane.b32.xlu1 %v2131_v36, 344  ;;  %v12149_v17 = vpop.permute.xlu1 %2878  ;;  %v12151_v37 = vpop.permute.xlu0 %2889 }
 0x609   :  { %16947 = vst [vmem:[#allocation680_spill] sm:$0xff] %v12149_v17  ;;  %16948 = vst [vmem:[#allocation681_spill] sm:$0xff] %v12151_v37  ;;  %3126 = vbcast.lane.b32.xlu0 %v2131_v36, 352  ;;  %v3397_v17 = vmul.f32 %v11725_v7, %v8928_v21  ;;  %v3399_v37 = vmul.f32 %v11736_v42, %v8926_v20  ;;  %v3400_v20 = vmul.f32 %v11734_v25, %v8940_v27 }
 0x60a   :  { %v3403_v21 = vmul.f32 %v11744_v2, %v8950_v32  ;;  %v3404_v27 = vmul.f32 %v11742_v59, %v8964_v39  ;;  %v3407_v32 = vmul.f32 %v11752_v52, %v8974_v44  ;;  %v3408_v39 = vmul.f32 %v11750_v53, %v8988_v51 }
 0x60b   :  { %v3411_v44 = vmul.f32 %v11761_v61, %v8998_v56  ;;  %v3412_v51 = vmul.f32 %v11758_v13, %v9012_v63  ;;  %v3415_v56 = vmul.f32 %v11772_v34, %v9022_v4  ;;  %v3416_v63 = vmul.f32 %v11770_v35, %v9036_v11 }
 0x60c   :  { %3130 = vbcast.lane.b32.xlu1 %v2131_v36, 360  ;;  %v12153_v46 = vpop.permute.xlu1 %2886  ;;  %v12155_v1 = vpop.permute.xlu0 %2897  ;;  %v3419_v4 = vmul.f32 %v11780_v12, %v9046_v18  ;;  %v3420_v11 = vmul.f32 %v11778_v9, %v9060_v29  ;;  %v16958_v18 = vld [vmem:[#allocation3_spill] sm:$0xff]  ;;  %v16968_v29 = vld [vmem:[#allocation6_spill] sm:$0xff] }
 0x60d   :  { %16949 = vst [vmem:[#allocation682_spill] sm:$0xff] %v12153_v46  ;;  %16950 = vst [vmem:[#allocation683_spill] sm:$0xff] %v12155_v1  ;;  %3134 = vbcast.lane.b32.xlu0 %v2131_v36, 368  ;;  %v16970_v9 = vld [vmem:[#allocation7_spill] sm:$0xff] }
 0x610   :  { %3138 = vbcast.lane.b32.xlu1 %v2131_v36, 376  ;;  %v12159_v41 = vpop.permute.xlu1 %2893  ;;  %v12161_v55 = vpop.permute.xlu0 %2905  ;;  %v3401_v36 = vmul.f32 %v11740_v43, %v8938_v26  ;;  %v3405_v26 = vmul.f32 %v11748_v6, %v8962_v38  ;;  %v3409_v38 = vmul.f32 %v11756_v30, %v8986_v50  ;;  %v3413_v50 = vmul.f32 %v11768_v48, %v9010_v62 }
 0x611   :  { %16951 = vst [vmem:[#allocation684_spill] sm:$0xff] %v12159_v41  ;;  %4421 = vperm.xlu0 %8601, %v3396_v24   ;;  %v3417_v62 = vmul.f32 %v11776_v22, %v9034_v10  ;;  %v3421_v10 = vmul.f32 %v11784_v8, %v9058_v28  ;;  %v16963_v28 = vld [vmem:[#allocation515_spill] sm:$0xff] }
 0x612   :  { %v3422_v8 = vmul.f32 %v16963_v28, %v16962_v19  ;;  %v16974_v19 = vld [vmem:[#allocation8_spill] sm:$0xff]  ;;  %v16976_v28 = vld [vmem:[#allocation9_spill] sm:$0xff] }
 0x614   :  { %v12167_v54 = vpop.permute.xlu1 %2901  ;;  %4424 = vperm.xlu1 %8602, %v3397_v17   ;;  %v12169_v1 = vpop.permute.xlu0 %2913 }
 0x615   :  { %4430 = vperm.xlu0 %8601, %v3399_v37  }
 0x618   :  { %v12175_v40 = vpop.permute.xlu1 %2909  ;;  %4427 = vperm.xlu1 %8602, %v3398_v15   ;;  %v12177_v24 = vpop.permute.xlu0 %2921 }
 0x619   :  { %4436 = vperm.xlu0 %8601, %v3401_v36  }
 0x61c   :  { %v12183_v17 = vpop.permute.xlu1 %2917  ;;  %4433 = vperm.xlu1 %8602, %v3400_v20   ;;  %v12185_v37 = vpop.permute.xlu0 %2929 }
 0x61d   :  { %4442 = vperm.xlu0 %8601, %v3403_v21  }
 0x620   :  { %v12191_v15 = vpop.permute.xlu1 %2925  ;;  %4439 = vperm.xlu1 %8602, %v3402_v14   ;;  %v12193_v36 = vpop.permute.xlu0 %2937 }
 0x621   :  { %4448 = vperm.xlu0 %8601, %v3405_v26  }
 0x624   :  { %v12199_v20 = vpop.permute.xlu1 %2933  ;;  %4445 = vperm.xlu1 %8602, %v3404_v27   ;;  %v12201_v21 = vpop.permute.xlu0 %2945 }
 0x625   :  { %4454 = vperm.xlu0 %8601, %v3407_v32  }
 0x628   :  { %v12207_v14 = vpop.permute.xlu1 %2941  ;;  %4451 = vperm.xlu1 %8602, %v3406_v33   ;;  %v12209_v26 = vpop.permute.xlu0 %2952 }
 0x629   :  { %4460 = vperm.xlu0 %8601, %v3409_v38  }
 0x62c   :  { %v12215_v27 = vpop.permute.xlu1 %2949  ;;  %4457 = vperm.xlu1 %8602, %v3408_v39   ;;  %v12217_v32 = vpop.permute.xlu0 %2960 }
 0x62d   :  { %4466 = vperm.xlu0 %8601, %v3411_v44  }
 0x630   :  { %v12223_v33 = vpop.permute.xlu1 %2956  ;;  %4463 = vperm.xlu1 %8602, %v3410_v45   ;;  %v12225_v38 = vpop.permute.xlu0 %2968 }
 0x631   :  { %4472 = vperm.xlu0 %8601, %v3413_v50  }
 0x634   :  { %v12231_v39 = vpop.permute.xlu1 %2964  ;;  %4469 = vperm.xlu1 %8602, %v3412_v51   ;;  %v12233_v44 = vpop.permute.xlu0 %2976 }
 0x635   :  { %4478 = vperm.xlu0 %8601, %v3415_v56  }
 0x638   :  { %v12239_v45 = vpop.permute.xlu1 %2972  ;;  %4475 = vperm.xlu1 %8602, %v3414_v57   ;;  %v12241_v50 = vpop.permute.xlu0 %2984 }
 0x639   :  { %16952 = vst [vmem:[#allocation685_spill] sm:$0xff] %v12239_v45  ;;  %16953 = vst [vmem:[#allocation686_spill] sm:$0xff] %v12241_v50  ;;  %4484 = vperm.xlu0 %8601, %v3417_v62  }
 0x63c   :  { %v12247_v51 = vpop.permute.xlu1 %2980  ;;  %4481 = vperm.xlu1 %8602, %v3416_v63   ;;  %v12249_v56 = vpop.permute.xlu0 %2992  ;;  %v16959_v63 = vld [vmem:[#allocation518_spill] sm:$0xff] }
 0x63d   :  { %16954 = vst [vmem:[#allocation687_spill] sm:$0xff] %v12247_v51  ;;  %16955 = vst [vmem:[#allocation688_spill] sm:$0xff] %v12249_v56  ;;  %4490 = vperm.xlu0 %8601, %v3419_v4   ;;  %v3423_v12 = vmul.f32 %v16959_v63, %v16958_v18  ;;  %v16969_v18 = vld [vmem:[#allocation517_spill] sm:$0xff] }
 0x63e   :  { %v3424_v63 = vmul.f32 %v16969_v18, %v16968_v29  ;;  %v16980_v29 = vld [vmem:[#allocation10_spill] sm:$0xff]  ;;  %v16982_v18 = vld [vmem:[#allocation11_spill] sm:$0xff] }
 0x640   :  { %v12255_v57 = vpop.permute.xlu1 %2988  ;;  %4487 = vperm.xlu1 %8602, %v3418_v5   ;;  %v12257_v62 = vpop.permute.xlu0 %3000  ;;  %v16965_v5 = vld [vmem:[#allocation520_spill] sm:$0xff] }
 0x641   :  { %16956 = vst [vmem:[#allocation689_spill] sm:$0xff] %v12255_v57  ;;  %16957 = vst [vmem:[#allocation690_spill] sm:$0xff] %v12257_v62  ;;  %4496 = vperm.xlu0 %8601, %v3421_v10   ;;  %v3425_v22 = vmul.f32 %v16965_v5, %v16964_v23  ;;  %v16975_v23 = vld [vmem:[#allocation519_spill] sm:$0xff] }
 0x642   :  { %v3426_v5 = vmul.f32 %v16975_v23, %v16974_v19  ;;  %v16986_v19 = vld [vmem:[#allocation12_spill] sm:$0xff]  ;;  %v16988_v23 = vld [vmem:[#allocation13_spill] sm:$0xff] }
 0x644   :  { %v12263_v35 = vpop.permute.xlu1 %2996  ;;  %4493 = vperm.xlu1 %8602, %v3420_v11   ;;  %v12265_v4 = vpop.permute.xlu0 %3008  ;;  %v16971_v11 = vld [vmem:[#allocation522_spill] sm:$0xff] }
 0x645   :  { %16960 = vst [vmem:[#allocation3_spill] sm:$0xff] %v12263_v35  ;;  %16961 = vst [vmem:[#allocation691_spill] sm:$0xff] %v12265_v4  ;;  %4502 = vperm.xlu0 %8601, %v3423_v12   ;;  %v3427_v34 = vmul.f32 %v16971_v11, %v16970_v9  ;;  %v16981_v9 = vld [vmem:[#allocation521_spill] sm:$0xff] }
 0x646   :  { %v3428_v11 = vmul.f32 %v16981_v9, %v16980_v29  ;;  %v16992_v29 = vld [vmem:[#allocation14_spill] sm:$0xff]  ;;  %v16994_v9 = vld [vmem:[#allocation15_spill] sm:$0xff] }
 0x648   :  { %v12271_v60 = vpop.permute.xlu1 %3004  ;;  %4499 = vperm.xlu1 %8602, %v3422_v8   ;;  %v12273_v10 = vpop.permute.xlu0 %3015  ;;  %v16977_v8 = vld [vmem:[#allocation524_spill] sm:$0xff] }
 0x649   :  { %16966 = vst [vmem:[#allocation4_spill] sm:$0xff] %v12271_v60  ;;  %16967 = vst [vmem:[#allocation5_spill] sm:$0xff] %v12273_v10  ;;  %4508 = vperm.xlu0 %8601, %v3425_v22   ;;  %v3429_v48 = vmul.f32 %v16977_v8, %v16976_v28  ;;  %v16987_v28 = vld [vmem:[#allocation523_spill] sm:$0xff] }
 0x64a   :  { %v3430_v8 = vmul.f32 %v16987_v28, %v16986_v19  ;;  %v16998_v19 = vld [vmem:[#allocation16_spill] sm:$0xff]  ;;  %v17000_v28 = vld [vmem:[#allocation17_spill] sm:$0xff] }
 0x64c   :  { %v12279_v13 = vpop.permute.xlu1 %3012  ;;  %4505 = vperm.xlu1 %8602, %v3424_v63   ;;  %v12281_v12 = vpop.permute.xlu0 %3023  ;;  %v16983_v63 = vld [vmem:[#allocation526_spill] sm:$0xff] }
 0x64d   :  { %16972 = vst [vmem:[#allocation6_spill] sm:$0xff] %v12279_v13  ;;  %16973 = vst [vmem:[#allocation7_spill] sm:$0xff] %v12281_v12  ;;  %4514 = vperm.xlu0 %8601, %v3427_v34   ;;  %v3431_v61 = vmul.f32 %v16983_v63, %v16982_v18  ;;  %v16993_v18 = vld [vmem:[#allocation525_spill] sm:$0xff] }
 0x64e   :  { %v3432_v63 = vmul.f32 %v16993_v18, %v16992_v29  ;;  %v17004_v29 = vld [vmem:[#allocation18_spill] sm:$0xff]  ;;  %v17006_v18 = vld [vmem:[#allocation19_spill] sm:$0xff] }
 0x650   :  { %v12287_v31 = vpop.permute.xlu1 %3019  ;;  %4511 = vperm.xlu1 %8602, %v3426_v5   ;;  %v12289_v22 = vpop.permute.xlu0 %3031  ;;  %v16989_v5 = vld [vmem:[#allocation528_spill] sm:$0xff] }
 0x651   :  { %16978 = vst [vmem:[#allocation8_spill] sm:$0xff] %v12287_v31  ;;  %16979 = vst [vmem:[#allocation9_spill] sm:$0xff] %v12289_v22  ;;  %4520 = vperm.xlu0 %8601, %v3429_v48   ;;  %v3433_v30 = vmul.f32 %v16989_v5, %v16988_v23  ;;  %v16999_v23 = vld [vmem:[#allocation527_spill] sm:$0xff] }
 0x652   :  { %v3434_v5 = vmul.f32 %v16999_v23, %v16998_v19  ;;  %v17010_v19 = vld [vmem:[#allocation20_spill] sm:$0xff]  ;;  %v17012_v23 = vld [vmem:[#allocation21_spill] sm:$0xff] }
 0x654   :  { %v12295_v53 = vpop.permute.xlu1 %3027  ;;  %4517 = vperm.xlu1 %8602, %v3428_v11   ;;  %v12297_v34 = vpop.permute.xlu0 %3039  ;;  %v16995_v11 = vld [vmem:[#allocation530_spill] sm:$0xff] }
 0x655   :  { %16984 = vst [vmem:[#allocation10_spill] sm:$0xff] %v12295_v53  ;;  %16985 = vst [vmem:[#allocation11_spill] sm:$0xff] %v12297_v34  ;;  %4526 = vperm.xlu0 %8601, %v3431_v61   ;;  %v3435_v52 = vmul.f32 %v16995_v11, %v16994_v9  ;;  %v17005_v9 = vld [vmem:[#allocation529_spill] sm:$0xff] }
 0x656   :  { %v3436_v11 = vmul.f32 %v17005_v9, %v17004_v29  ;;  %v17016_v29 = vld [vmem:[#allocation22_spill] sm:$0xff]  ;;  %v17018_v9 = vld [vmem:[#allocation23_spill] sm:$0xff] }
 0x658   :  { %v12303_v3 = vpop.permute.xlu1 %3035  ;;  %4523 = vperm.xlu1 %8602, %v3430_v8   ;;  %v12305_v48 = vpop.permute.xlu0 %3047  ;;  %v17001_v8 = vld [vmem:[#allocation532_spill] sm:$0xff] }
 0x659   :  { %16990 = vst [vmem:[#allocation12_spill] sm:$0xff] %v12303_v3  ;;  %16991 = vst [vmem:[#allocation13_spill] sm:$0xff] %v12305_v48  ;;  %4532 = vperm.xlu0 %8601, %v3433_v30   ;;  %v3437_v6 = vmul.f32 %v17001_v8, %v17000_v28  ;;  %v17011_v28 = vld [vmem:[#allocation531_spill] sm:$0xff] }
 0x65a   :  { %v3438_v8 = vmul.f32 %v17011_v28, %v17010_v19  ;;  %v17022_v19 = vld [vmem:[#allocation24_spill] sm:$0xff]  ;;  %v17024_v28 = vld [vmem:[#allocation25_spill] sm:$0xff] }
 0x65c   :  { %v12311_v59 = vpop.permute.xlu1 %3043  ;;  %4529 = vperm.xlu1 %8602, %v3432_v63   ;;  %v12313_v61 = vpop.permute.xlu0 %3055  ;;  %v17007_v63 = vld [vmem:[#allocation534_spill] sm:$0xff] }
 0x65d   :  { %16996 = vst [vmem:[#allocation14_spill] sm:$0xff] %v12311_v59  ;;  %16997 = vst [vmem:[#allocation15_spill] sm:$0xff] %v12313_v61  ;;  %4538 = vperm.xlu0 %8601, %v3435_v52   ;;  %v3439_v2 = vmul.f32 %v17007_v63, %v17006_v18  ;;  %v17017_v18 = vld [vmem:[#allocation533_spill] sm:$0xff] }
 0x65e   :  { %v3440_v63 = vmul.f32 %v17017_v18, %v17016_v29  ;;  %v17028_v29 = vld [vmem:[#allocation26_spill] sm:$0xff]  ;;  %v17030_v18 = vld [vmem:[#allocation27_spill] sm:$0xff] }
 0x660   :  { %v12319_v58 = vpop.permute.xlu1 %3051  ;;  %4535 = vperm.xlu1 %8602, %v3434_v5   ;;  %v12321_v30 = vpop.permute.xlu0 %3063  ;;  %v17013_v5 = vld [vmem:[#allocation536_spill] sm:$0xff] }
 0x661   :  { %17002 = vst [vmem:[#allocation16_spill] sm:$0xff] %v12319_v58  ;;  %17003 = vst [vmem:[#allocation17_spill] sm:$0xff] %v12321_v30  ;;  %4544 = vperm.xlu0 %8601, %v3437_v6   ;;  %v3441_v43 = vmul.f32 %v17013_v5, %v17012_v23  ;;  %v17023_v23 = vld [vmem:[#allocation535_spill] sm:$0xff] }
 0x662   :  { %v3442_v5 = vmul.f32 %v17023_v23, %v17022_v19  ;;  %v17034_v19 = vld [vmem:[#allocation28_spill] sm:$0xff]  ;;  %v17036_v23 = vld [vmem:[#allocation29_spill] sm:$0xff] }
 0x664   :  { %v12327_v25 = vpop.permute.xlu1 %3059  ;;  %4541 = vperm.xlu1 %8602, %v3436_v11   ;;  %v12329_v52 = vpop.permute.xlu0 %3071  ;;  %v17019_v11 = vld [vmem:[#allocation538_spill] sm:$0xff] }
 0x665   :  { %17008 = vst [vmem:[#allocation18_spill] sm:$0xff] %v12327_v25  ;;  %17009 = vst [vmem:[#allocation19_spill] sm:$0xff] %v12329_v52  ;;  %4550 = vperm.xlu0 %8601, %v3439_v2   ;;  %v3443_v42 = vmul.f32 %v17019_v11, %v17018_v9  ;;  %v17029_v9 = vld [vmem:[#allocation537_spill] sm:$0xff] }
 0x666   :  { %v3444_v11 = vmul.f32 %v17029_v9, %v17028_v29  ;;  %v17040_v29 = vld [vmem:[#allocation30_spill] sm:$0xff]  ;;  %v17042_v9 = vld [vmem:[#allocation31_spill] sm:$0xff] }
 0x668   :  { %v12335_v16 = vpop.permute.xlu1 %3067  ;;  %4547 = vperm.xlu1 %8602, %v3438_v8   ;;  %v12337_v6 = vpop.permute.xlu0 %3078  ;;  %v17025_v8 = vld [vmem:[#allocation540_spill] sm:$0xff] }
 0x669   :  { %17014 = vst [vmem:[#allocation20_spill] sm:$0xff] %v12335_v16  ;;  %17015 = vst [vmem:[#allocation21_spill] sm:$0xff] %v12337_v6  ;;  %4556 = vperm.xlu0 %8601, %v3441_v43   ;;  %v3445_v52 = vmul.f32 %v17025_v8, %v17024_v28  ;;  %v17035_v28 = vld [vmem:[#allocation539_spill] sm:$0xff] }
 0x66a   :  { %v3446_v8 = vmul.f32 %v17035_v28, %v17034_v19  ;;  %v17046_v19 = vld [vmem:[#allocation32_spill] sm:$0xff]  ;;  %v17048_v28 = vld [vmem:[#allocation33_spill] sm:$0xff] }
 0x66c   :  { %v12343_v7 = vpop.permute.xlu1 %3075  ;;  %4553 = vperm.xlu1 %8602, %v3440_v63   ;;  %v12345_v2 = vpop.permute.xlu0 %3086  ;;  %v17031_v63 = vld [vmem:[#allocation542_spill] sm:$0xff] }
 0x66d   :  { %17020 = vst [vmem:[#allocation22_spill] sm:$0xff] %v12343_v7  ;;  %17021 = vst [vmem:[#allocation23_spill] sm:$0xff] %v12345_v2  ;;  %4562 = vperm.xlu0 %8601, %v3443_v42   ;;  %v3447_v7 = vmul.f32 %v17031_v63, %v17030_v18  ;;  %v17041_v18 = vld [vmem:[#allocation541_spill] sm:$0xff] }
 0x66e   :  { %v3448_v63 = vmul.f32 %v17041_v18, %v17040_v29  ;;  %v17052_v29 = vld [vmem:[#allocation545_spill] sm:$0xff] }
 0x670   :  { %v12351_v6 = vpop.permute.xlu1 %3082  ;;  %4559 = vperm.xlu1 %8602, %v3442_v5   ;;  %v12353_v43 = vpop.permute.xlu0 %3094  ;;  %v17037_v5 = vld [vmem:[#allocation544_spill] sm:$0xff] }
 0x671   :  { %17026 = vst [vmem:[#allocation24_spill] sm:$0xff] %v12351_v6  ;;  %17027 = vst [vmem:[#allocation25_spill] sm:$0xff] %v12353_v43  ;;  %4568 = vperm.xlu0 %8601, %v3445_v52   ;;  %v3449_v6 = vmul.f32 %v17037_v5, %v17036_v23  ;;  %v17047_v23 = vld [vmem:[#allocation543_spill] sm:$0xff] }
 0x672   :  { %v3450_v5 = vmul.f32 %v17047_v23, %v17046_v19  ;;  %v17058_v19 = vld [vmem:[#allocation547_spill] sm:$0xff] }
 0x674   :  { %v12359_v2 = vpop.permute.xlu1 %3090  ;;  %4565 = vperm.xlu1 %8602, %v3444_v11   ;;  %v12361_v42 = vpop.permute.xlu0 %3102  ;;  %v17043_v11 = vld [vmem:[#allocation546_spill] sm:$0xff] }
 0x675   :  { %17032 = vst [vmem:[#allocation26_spill] sm:$0xff] %v12359_v2  ;;  %17033 = vst [vmem:[#allocation27_spill] sm:$0xff] %v12361_v42  ;;  %4574 = vperm.xlu0 %8601, %v3447_v7   ;;  %v3451_v2 = vmul.f32 %v17043_v11, %v17042_v9  ;;  %v17054_v11 = vld [vmem:[#allocation35_spill] sm:$0xff] }
 0x678   :  { %v12367_v43 = vpop.permute.xlu1 %3098  ;;  %4571 = vperm.xlu1 %8602, %v3446_v8   ;;  %v12369_v52 = vpop.permute.xlu0 %3110  ;;  %v17049_v8 = vld [vmem:[#allocation548_spill] sm:$0xff] }
 0x679   :  { %17038 = vst [vmem:[#allocation28_spill] sm:$0xff] %v12367_v43  ;;  %17039 = vst [vmem:[#allocation29_spill] sm:$0xff] %v12369_v52  ;;  %4580 = vperm.xlu0 %8601, %v3449_v6   ;;  %v3453_v43 = vmul.f32 %v17049_v8, %v17048_v28  ;;  %v17051_v6 = vld [vmem:[#allocation34_spill] sm:$0xff]  ;;  %v17059_v28 = vld [vmem:[#allocation37_spill] sm:$0xff] }
 0x67a   :  { %v3452_v18 = vmul.f32 %v17052_v29, %v17051_v6  ;;  %v17060_v8 = vld [vmem:[#allocation552_spill] sm:$0xff]  ;;  %v17063_v6 = vld [vmem:[#allocation38_spill] sm:$0xff]  ;;  %v17064_v29 = vld [vmem:[#allocation549_spill] sm:$0xff] }
 0x67c   :  { %v12375_v42 = vpop.permute.xlu1 %3106  ;;  %4577 = vperm.xlu1 %8602, %v3448_v63   ;;  %v12377_v7 = vpop.permute.xlu0 %3118  ;;  %v17055_v63 = vld [vmem:[#allocation550_spill] sm:$0xff] }
 0x67d   :  { %17044 = vst [vmem:[#allocation30_spill] sm:$0xff] %v12375_v42  ;;  %17045 = vst [vmem:[#allocation31_spill] sm:$0xff] %v12377_v7  ;;  %4586 = vperm.xlu0 %8601, %v3451_v2   ;;  %v3455_v42 = vmul.f32 %v17055_v63, %v17054_v11  ;;  %v17057_v2 = vld [vmem:[#allocation36_spill] sm:$0xff]  ;;  %v17065_v11 = vld [vmem:[#allocation39_spill] sm:$0xff] }
 0x67e   :  { %v3454_v23 = vmul.f32 %v17058_v19, %v17057_v2  ;;  %v17066_v63 = vld [vmem:[#allocation554_spill] sm:$0xff]  ;;  %v17069_v2 = vld [vmem:[#allocation40_spill] sm:$0xff]  ;;  %v17071_v19 = vld [vmem:[#allocation41_spill] sm:$0xff] }
 0x680   :  { %v12383_v52 = vpop.permute.xlu1 %3114  ;;  %4583 = vperm.xlu1 %8602, %v3450_v5   ;;  %v12387_v9 = vpop.permute.xlu0 %3126 }
 0x681   :  { %17050 = vst [vmem:[#allocation32_spill] sm:$0xff] %v12383_v52  ;;  %4592 = vperm.xlu0 %8601, %v3453_v43   ;;  %17053 = vst [vmem:[#allocation33_spill] sm:$0xff] %v12387_v9  ;;  %v3457_v52 = vmul.f32 %v17060_v8, %v17059_v28  ;;  %v3456_v9 = vmul.f32 %v17064_v29, %v17063_v6  ;;  %v17070_v28 = vld [vmem:[#allocation551_spill] sm:$0xff]  ;;  %v17075_v6 = vld [vmem:[#allocation42_spill] sm:$0xff] }
 0x682   :  { %v3458_v8 = vmul.f32 %v17070_v28, %v17069_v2  ;;  %v17077_v29 = vld [vmem:[#allocation43_spill] sm:$0xff]  ;;  %v17081_v2 = vld [vmem:[#allocation44_spill] sm:$0xff] }
 0x684   :  { %v12391_v7 = vpop.permute.xlu1 %3122  ;;  %4589 = vperm.xlu1 %8602, %v3452_v18   ;;  %v12397_v5 = vpop.permute.xlu0 %3134 }
 0x685   :  { %17056 = vst [vmem:[#allocation34_spill] sm:$0xff] %v12391_v7  ;;  %4598 = vperm.xlu0 %8601, %v3455_v42   ;;  %17061 = vst [vmem:[#allocation35_spill] sm:$0xff] %v12397_v5  ;;  %v3459_v7 = vmul.f32 %v17066_v63, %v17065_v11  ;;  %v17072_v5 = vld [vmem:[#allocation556_spill] sm:$0xff]  ;;  %v17076_v11 = vld [vmem:[#allocation553_spill] sm:$0xff] }
 0x686   :  { %v3460_v63 = vmul.f32 %v17076_v11, %v17075_v6  ;;  %v17087_v6 = vld [vmem:[#allocation46_spill] sm:$0xff] }
 0x688   :  { %v12399_v43 = vpop.permute.xlu1 %3130  ;;  %4595 = vperm.xlu1 %8602, %v3454_v23  }
 0x689   :  { %17062 = vst [vmem:[#allocation36_spill] sm:$0xff] %v12399_v43  ;;  %4604 = vperm.xlu0 %8601, %v3457_v52   ;;  %v3461_v43 = vmul.f32 %v17072_v5, %v17071_v19  ;;  %v17082_v19 = vld [vmem:[#allocation555_spill] sm:$0xff] }
 0x68a   :  { %v3462_v5 = vmul.f32 %v17082_v19, %v17081_v2  ;;  %v17093_v2 = vld [vmem:[#allocation48_spill] sm:$0xff] }
 0x68c   :  { %v12405_v18 = vpop.permute.xlu1 %3138  ;;  %4601 = vperm.xlu1 %8602, %v3456_v9   ;;  %v12407_v42 = vpop.permute.xlu0 %4421  ;;  %v17078_v9 = vld [vmem:[#allocation558_spill] sm:$0xff] }
 0x68d   :  { %17067 = vst [vmem:[#allocation37_spill] sm:$0xff] %v12405_v18  ;;  %17068 = vst [vmem:[#allocation38_spill] sm:$0xff] %v12407_v42  ;;  %4610 = vperm.xlu0 %8601, %v3459_v7   ;;  %v3463_v18 = vmul.f32 %v17078_v9, %v17077_v29  ;;  %v17088_v29 = vld [vmem:[#allocation557_spill] sm:$0xff] }
 0x68e   :  { %v3464_v9 = vmul.f32 %v17088_v29, %v17087_v6  ;;  %v17099_v6 = vld [vmem:[#allocation50_spill] sm:$0xff] }
 0x690   :  { %v12413_v23 = vpop.permute.xlu1 %4424  ;;  %4607 = vperm.xlu1 %8602, %v3458_v8   ;;  %v12415_v52 = vpop.permute.xlu0 %4430  ;;  %v17084_v8 = vld [vmem:[#allocation560_spill] sm:$0xff] }
 0x691   :  { %17073 = vst [vmem:[#allocation39_spill] sm:$0xff] %v12413_v23  ;;  %17074 = vst [vmem:[#allocation40_spill] sm:$0xff] %v12415_v52  ;;  %4616 = vperm.xlu0 %8601, %v3461_v43   ;;  %v17083_v23 = vld [vmem:[#allocation45_spill] sm:$0xff] }
 0x692   :  { %v3465_v28 = vmul.f32 %v17084_v8, %v17083_v23  ;;  %v17094_v23 = vld [vmem:[#allocation559_spill] sm:$0xff] }
 0x693   :  { %v3466_v8 = vmul.f32 %v17094_v23, %v17093_v2  ;;  %v17105_v2 = vld [vmem:[#allocation52_spill] sm:$0xff] }
 0x694   :  { %v12421_v42 = vpop.permute.xlu1 %4427  ;;  %4613 = vperm.xlu1 %8602, %v3460_v63   ;;  %v12423_v7 = vpop.permute.xlu0 %4436  ;;  %v17090_v63 = vld [vmem:[#allocation562_spill] sm:$0xff] }
 0x695   :  { %17079 = vst [vmem:[#allocation41_spill] sm:$0xff] %v12421_v42  ;;  %17080 = vst [vmem:[#allocation42_spill] sm:$0xff] %v12423_v7  ;;  %4622 = vperm.xlu0 %8601, %v3463_v18   ;;  %v17089_v42 = vld [vmem:[#allocation47_spill] sm:$0xff] }
 0x696   :  { %v3467_v11 = vmul.f32 %v17090_v63, %v17089_v42  ;;  %v17100_v42 = vld [vmem:[#allocation561_spill] sm:$0xff] }
 0x697   :  { %v3468_v63 = vmul.f32 %v17100_v42, %v17099_v6  ;;  %v17111_v6 = vld [vmem:[#allocation54_spill] sm:$0xff] }
 0x698   :  { %v12429_v52 = vpop.permute.xlu1 %4433  ;;  %4619 = vperm.xlu1 %8602, %v3462_v5   ;;  %v12431_v43 = vpop.permute.xlu0 %4442  ;;  %v17096_v5 = vld [vmem:[#allocation564_spill] sm:$0xff] }
 0x699   :  { %17085 = vst [vmem:[#allocation43_spill] sm:$0xff] %v12429_v52  ;;  %17086 = vst [vmem:[#allocation44_spill] sm:$0xff] %v12431_v43  ;;  %4628 = vperm.xlu0 %8601, %v3465_v28   ;;  %v17095_v52 = vld [vmem:[#allocation49_spill] sm:$0xff] }
 0x69a   :  { %v3469_v19 = vmul.f32 %v17096_v5, %v17095_v52  ;;  %v17106_v52 = vld [vmem:[#allocation563_spill] sm:$0xff] }
 0x69b   :  { %v3470_v5 = vmul.f32 %v17106_v52, %v17105_v2  ;;  %v17117_v2 = vld [vmem:[#allocation56_spill] sm:$0xff] }
 0x69c   :  { %v12437_v7 = vpop.permute.xlu1 %4439  ;;  %4625 = vperm.xlu1 %8602, %v3464_v9   ;;  %v12439_v18 = vpop.permute.xlu0 %4448  ;;  %v17102_v9 = vld [vmem:[#allocation566_spill] sm:$0xff] }
 0x69d   :  { %17091 = vst [vmem:[#allocation45_spill] sm:$0xff] %v12437_v7  ;;  %17092 = vst [vmem:[#allocation46_spill] sm:$0xff] %v12439_v18  ;;  %4634 = vperm.xlu0 %8601, %v3467_v11   ;;  %v17101_v7 = vld [vmem:[#allocation51_spill] sm:$0xff] }
 0x69e   :  { %v3471_v29 = vmul.f32 %v17102_v9, %v17101_v7  ;;  %v17112_v7 = vld [vmem:[#allocation565_spill] sm:$0xff] }
 0x69f   :  { %v3472_v9 = vmul.f32 %v17112_v7, %v17111_v6  ;;  %v17123_v6 = vld [vmem:[#allocation58_spill] sm:$0xff] }
 0x6a0   :  { %v12445_v43 = vpop.permute.xlu1 %4445  ;;  %4631 = vperm.xlu1 %8602, %v3466_v8   ;;  %v12447_v28 = vpop.permute.xlu0 %4454  ;;  %v17108_v8 = vld [vmem:[#allocation568_spill] sm:$0xff] }
 0x6a1   :  { %17097 = vst [vmem:[#allocation47_spill] sm:$0xff] %v12445_v43  ;;  %17098 = vst [vmem:[#allocation48_spill] sm:$0xff] %v12447_v28  ;;  %4640 = vperm.xlu0 %8601, %v3469_v19   ;;  %v17107_v43 = vld [vmem:[#allocation53_spill] sm:$0xff] }
 0x6a2   :  { %v3473_v23 = vmul.f32 %v17108_v8, %v17107_v43  ;;  %v17118_v43 = vld [vmem:[#allocation567_spill] sm:$0xff] }
 0x6a3   :  { %v3474_v8 = vmul.f32 %v17118_v43, %v17117_v2  ;;  %v17129_v2 = vld [vmem:[#allocation60_spill] sm:$0xff] }
 0x6a4   :  { %v12453_v18 = vpop.permute.xlu1 %4451  ;;  %4637 = vperm.xlu1 %8602, %v3468_v63   ;;  %v12455_v11 = vpop.permute.xlu0 %4460  ;;  %v17114_v63 = vld [vmem:[#allocation570_spill] sm:$0xff] }
 0x6a5   :  { %17103 = vst [vmem:[#allocation49_spill] sm:$0xff] %v12453_v18  ;;  %17104 = vst [vmem:[#allocation50_spill] sm:$0xff] %v12455_v11  ;;  %4646 = vperm.xlu0 %8601, %v3471_v29   ;;  %v17113_v18 = vld [vmem:[#allocation55_spill] sm:$0xff] }
 0x6a6   :  { %v3475_v42 = vmul.f32 %v17114_v63, %v17113_v18  ;;  %v17124_v18 = vld [vmem:[#allocation569_spill] sm:$0xff] }
 0x6a7   :  { %v3476_v63 = vmul.f32 %v17124_v18, %v17123_v6  ;;  %v17135_v6 = vld [vmem:[#allocation62_spill] sm:$0xff] }
 0x6a8   :  { %v12461_v28 = vpop.permute.xlu1 %4457  ;;  %4643 = vperm.xlu1 %8602, %v3470_v5   ;;  %v12463_v19 = vpop.permute.xlu0 %4466  ;;  %v17120_v5 = vld [vmem:[#allocation572_spill] sm:$0xff] }
 0x6a9   :  { %17109 = vst [vmem:[#allocation51_spill] sm:$0xff] %v12461_v28  ;;  %17110 = vst [vmem:[#allocation52_spill] sm:$0xff] %v12463_v19  ;;  %4652 = vperm.xlu0 %8601, %v3473_v23   ;;  %v17119_v28 = vld [vmem:[#allocation57_spill] sm:$0xff] }
 0x6aa   :  { %v3477_v52 = vmul.f32 %v17120_v5, %v17119_v28  ;;  %v17130_v28 = vld [vmem:[#allocation571_spill] sm:$0xff] }
 0x6ab   :  { %v3478_v5 = vmul.f32 %v17130_v28, %v17129_v2  ;;  %v17141_v2 = vld [vmem:[#allocation64_spill] sm:$0xff] }
 0x6ac   :  { %v12469_v11 = vpop.permute.xlu1 %4463  ;;  %4649 = vperm.xlu1 %8602, %v3472_v9   ;;  %v12471_v29 = vpop.permute.xlu0 %4472  ;;  %v17126_v9 = vld [vmem:[#allocation574_spill] sm:$0xff] }
 0x6ad   :  { %17115 = vst [vmem:[#allocation53_spill] sm:$0xff] %v12469_v11  ;;  %17116 = vst [vmem:[#allocation54_spill] sm:$0xff] %v12471_v29  ;;  %4658 = vperm.xlu0 %8601, %v3475_v42   ;;  %v17125_v11 = vld [vmem:[#allocation59_spill] sm:$0xff] }
 0x6ae   :  { %v3479_v7 = vmul.f32 %v17126_v9, %v17125_v11  ;;  %v17136_v11 = vld [vmem:[#allocation573_spill] sm:$0xff] }
 0x6af   :  { %v3480_v9 = vmul.f32 %v17136_v11, %v17135_v6  ;;  %v17147_v6 = vld [vmem:[#allocation66_spill] sm:$0xff] }
 0x6b0   :  { %v12477_v19 = vpop.permute.xlu1 %4469  ;;  %4655 = vperm.xlu1 %8602, %v3474_v8   ;;  %v12479_v23 = vpop.permute.xlu0 %4478  ;;  %v17132_v8 = vld [vmem:[#allocation576_spill] sm:$0xff] }
 0x6b1   :  { %17121 = vst [vmem:[#allocation55_spill] sm:$0xff] %v12477_v19  ;;  %17122 = vst [vmem:[#allocation56_spill] sm:$0xff] %v12479_v23  ;;  %4664 = vperm.xlu0 %8601, %v3477_v52   ;;  %v17131_v19 = vld [vmem:[#allocation61_spill] sm:$0xff] }
 0x6b2   :  { %v3481_v43 = vmul.f32 %v17132_v8, %v17131_v19  ;;  %v17142_v19 = vld [vmem:[#allocation575_spill] sm:$0xff] }
 0x6b3   :  { %v3482_v8 = vmul.f32 %v17142_v19, %v17141_v2  ;;  %v17153_v2 = vld [vmem:[#allocation68_spill] sm:$0xff] }
 0x6b4   :  { %v12485_v29 = vpop.permute.xlu1 %4475  ;;  %4661 = vperm.xlu1 %8602, %v3476_v63   ;;  %v12487_v42 = vpop.permute.xlu0 %4484  ;;  %v17138_v63 = vld [vmem:[#allocation578_spill] sm:$0xff] }
 0x6b5   :  { %17127 = vst [vmem:[#allocation57_spill] sm:$0xff] %v12485_v29  ;;  %17128 = vst [vmem:[#allocation58_spill] sm:$0xff] %v12487_v42  ;;  %4670 = vperm.xlu0 %8601, %v3479_v7   ;;  %v17137_v29 = vld [vmem:[#allocation63_spill] sm:$0xff] }
 0x6b6   :  { %v3483_v18 = vmul.f32 %v17138_v63, %v17137_v29  ;;  %v17148_v29 = vld [vmem:[#allocation577_spill] sm:$0xff] }
 0x6b7   :  { %v3484_v63 = vmul.f32 %v17148_v29, %v17147_v6  ;;  %v17159_v6 = vld [vmem:[#allocation70_spill] sm:$0xff] }
 0x6b8   :  { %v12493_v23 = vpop.permute.xlu1 %4481  ;;  %4667 = vperm.xlu1 %8602, %v3478_v5   ;;  %v12495_v52 = vpop.permute.xlu0 %4490  ;;  %v17144_v5 = vld [vmem:[#allocation580_spill] sm:$0xff] }
 0x6b9   :  { %17133 = vst [vmem:[#allocation59_spill] sm:$0xff] %v12493_v23  ;;  %17134 = vst [vmem:[#allocation60_spill] sm:$0xff] %v12495_v52  ;;  %4676 = vperm.xlu0 %8601, %v3481_v43   ;;  %v17143_v23 = vld [vmem:[#allocation65_spill] sm:$0xff] }
 0x6ba   :  { %v3485_v28 = vmul.f32 %v17144_v5, %v17143_v23  ;;  %v17154_v23 = vld [vmem:[#allocation579_spill] sm:$0xff] }
 0x6bb   :  { %v3486_v5 = vmul.f32 %v17154_v23, %v17153_v2  ;;  %v17165_v2 = vld [vmem:[#allocation72_spill] sm:$0xff] }
 0x6bc   :  { %v12501_v42 = vpop.permute.xlu1 %4487  ;;  %4673 = vperm.xlu1 %8602, %v3480_v9   ;;  %v12503_v7 = vpop.permute.xlu0 %4496  ;;  %v17150_v9 = vld [vmem:[#allocation582_spill] sm:$0xff] }
 0x6bd   :  { %17139 = vst [vmem:[#allocation61_spill] sm:$0xff] %v12501_v42  ;;  %17140 = vst [vmem:[#allocation62_spill] sm:$0xff] %v12503_v7  ;;  %4682 = vperm.xlu0 %8601, %v3483_v18   ;;  %v17149_v42 = vld [vmem:[#allocation67_spill] sm:$0xff] }
 0x6be   :  { %v3487_v11 = vmul.f32 %v17150_v9, %v17149_v42  ;;  %v17160_v42 = vld [vmem:[#allocation581_spill] sm:$0xff] }
 0x6bf   :  { %v3488_v9 = vmul.f32 %v17160_v42, %v17159_v6  ;;  %v17171_v6 = vld [vmem:[#allocation74_spill] sm:$0xff] }
 0x6c0   :  { %v12509_v52 = vpop.permute.xlu1 %4493  ;;  %4679 = vperm.xlu1 %8602, %v3482_v8   ;;  %v12511_v43 = vpop.permute.xlu0 %4502  ;;  %v17156_v8 = vld [vmem:[#allocation584_spill] sm:$0xff] }
 0x6c1   :  { %17145 = vst [vmem:[#allocation63_spill] sm:$0xff] %v12509_v52  ;;  %17146 = vst [vmem:[#allocation64_spill] sm:$0xff] %v12511_v43  ;;  %4688 = vperm.xlu0 %8601, %v3485_v28   ;;  %v17155_v52 = vld [vmem:[#allocation69_spill] sm:$0xff] }
 0x6c2   :  { %v3489_v19 = vmul.f32 %v17156_v8, %v17155_v52  ;;  %v17166_v52 = vld [vmem:[#allocation583_spill] sm:$0xff] }
 0x6c3   :  { %v3490_v8 = vmul.f32 %v17166_v52, %v17165_v2  ;;  %v17177_v2 = vld [vmem:[#allocation76_spill] sm:$0xff] }
 0x6c4   :  { %v12517_v7 = vpop.permute.xlu1 %4499  ;;  %4685 = vperm.xlu1 %8602, %v3484_v63   ;;  %v12519_v18 = vpop.permute.xlu0 %4508  ;;  %v17162_v63 = vld [vmem:[#allocation586_spill] sm:$0xff] }
 0x6c5   :  { %17151 = vst [vmem:[#allocation65_spill] sm:$0xff] %v12517_v7  ;;  %17152 = vst [vmem:[#allocation66_spill] sm:$0xff] %v12519_v18  ;;  %4694 = vperm.xlu0 %8601, %v3487_v11   ;;  %v17161_v7 = vld [vmem:[#allocation71_spill] sm:$0xff] }
 0x6c6   :  { %v3491_v29 = vmul.f32 %v17162_v63, %v17161_v7  ;;  %v17172_v7 = vld [vmem:[#allocation585_spill] sm:$0xff] }
 0x6c7   :  { %v3492_v63 = vmul.f32 %v17172_v7, %v17171_v6  ;;  %v17183_v6 = vld [vmem:[#allocation78_spill] sm:$0xff] }
 0x6c8   :  { %v12525_v43 = vpop.permute.xlu1 %4505  ;;  %4691 = vperm.xlu1 %8602, %v3486_v5   ;;  %v12527_v28 = vpop.permute.xlu0 %4514  ;;  %v17168_v5 = vld [vmem:[#allocation588_spill] sm:$0xff] }
 0x6c9   :  { %17157 = vst [vmem:[#allocation67_spill] sm:$0xff] %v12525_v43  ;;  %17158 = vst [vmem:[#allocation68_spill] sm:$0xff] %v12527_v28  ;;  %4700 = vperm.xlu0 %8601, %v3489_v19   ;;  %v17167_v43 = vld [vmem:[#allocation73_spill] sm:$0xff] }
 0x6ca   :  { %v3493_v23 = vmul.f32 %v17168_v5, %v17167_v43  ;;  %v17178_v43 = vld [vmem:[#allocation587_spill] sm:$0xff] }
 0x6cb   :  { %v3494_v5 = vmul.f32 %v17178_v43, %v17177_v2  ;;  %v17189_v2 = vld [vmem:[#allocation80_spill] sm:$0xff] }
 0x6cc   :  { %v12533_v18 = vpop.permute.xlu1 %4511  ;;  %4697 = vperm.xlu1 %8602, %v3488_v9   ;;  %v12535_v11 = vpop.permute.xlu0 %4520  ;;  %v17174_v9 = vld [vmem:[#allocation590_spill] sm:$0xff] }
 0x6cd   :  { %17163 = vst [vmem:[#allocation69_spill] sm:$0xff] %v12533_v18  ;;  %17164 = vst [vmem:[#allocation70_spill] sm:$0xff] %v12535_v11  ;;  %4706 = vperm.xlu0 %8601, %v3491_v29   ;;  %v17173_v18 = vld [vmem:[#allocation75_spill] sm:$0xff] }
 0x6ce   :  { %v3495_v42 = vmul.f32 %v17174_v9, %v17173_v18  ;;  %v17184_v18 = vld [vmem:[#allocation589_spill] sm:$0xff] }
 0x6cf   :  { %v3496_v9 = vmul.f32 %v17184_v18, %v17183_v6  ;;  %v17195_v6 = vld [vmem:[#allocation82_spill] sm:$0xff] }
 0x6d0   :  { %v12541_v28 = vpop.permute.xlu1 %4517  ;;  %4703 = vperm.xlu1 %8602, %v3490_v8   ;;  %v12543_v19 = vpop.permute.xlu0 %4526  ;;  %v17180_v8 = vld [vmem:[#allocation592_spill] sm:$0xff] }
 0x6d1   :  { %17169 = vst [vmem:[#allocation71_spill] sm:$0xff] %v12541_v28  ;;  %17170 = vst [vmem:[#allocation72_spill] sm:$0xff] %v12543_v19  ;;  %4712 = vperm.xlu0 %8601, %v3493_v23   ;;  %v17179_v28 = vld [vmem:[#allocation77_spill] sm:$0xff] }
 0x6d2   :  { %v3497_v52 = vmul.f32 %v17180_v8, %v17179_v28  ;;  %v17190_v28 = vld [vmem:[#allocation591_spill] sm:$0xff] }
 0x6d3   :  { %v3498_v8 = vmul.f32 %v17190_v28, %v17189_v2  ;;  %v17201_v2 = vld [vmem:[#allocation84_spill] sm:$0xff] }
 0x6d4   :  { %v12549_v11 = vpop.permute.xlu1 %4523  ;;  %4709 = vperm.xlu1 %8602, %v3492_v63   ;;  %v12551_v29 = vpop.permute.xlu0 %4532  ;;  %v17186_v63 = vld [vmem:[#allocation594_spill] sm:$0xff] }
 0x6d5   :  { %17175 = vst [vmem:[#allocation73_spill] sm:$0xff] %v12549_v11  ;;  %17176 = vst [vmem:[#allocation74_spill] sm:$0xff] %v12551_v29  ;;  %4718 = vperm.xlu0 %8601, %v3495_v42   ;;  %v17185_v11 = vld [vmem:[#allocation79_spill] sm:$0xff] }
 0x6d6   :  { %v3499_v7 = vmul.f32 %v17186_v63, %v17185_v11  ;;  %v17196_v11 = vld [vmem:[#allocation593_spill] sm:$0xff] }
 0x6d7   :  { %v3500_v63 = vmul.f32 %v17196_v11, %v17195_v6  ;;  %v17207_v6 = vld [vmem:[#allocation86_spill] sm:$0xff] }
 0x6d8   :  { %v12557_v19 = vpop.permute.xlu1 %4529  ;;  %4715 = vperm.xlu1 %8602, %v3494_v5   ;;  %v12559_v23 = vpop.permute.xlu0 %4538  ;;  %v17192_v5 = vld [vmem:[#allocation596_spill] sm:$0xff] }
 0x6d9   :  { %17181 = vst [vmem:[#allocation75_spill] sm:$0xff] %v12557_v19  ;;  %17182 = vst [vmem:[#allocation76_spill] sm:$0xff] %v12559_v23  ;;  %4724 = vperm.xlu0 %8601, %v3497_v52   ;;  %v17191_v19 = vld [vmem:[#allocation81_spill] sm:$0xff] }
 0x6da   :  { %v3501_v43 = vmul.f32 %v17192_v5, %v17191_v19  ;;  %v17202_v19 = vld [vmem:[#allocation595_spill] sm:$0xff] }
 0x6db   :  { %v3502_v5 = vmul.f32 %v17202_v19, %v17201_v2  ;;  %v17213_v2 = vld [vmem:[#allocation88_spill] sm:$0xff] }
 0x6dc   :  { %v12565_v29 = vpop.permute.xlu1 %4535  ;;  %4721 = vperm.xlu1 %8602, %v3496_v9   ;;  %v12567_v42 = vpop.permute.xlu0 %4544  ;;  %v17198_v9 = vld [vmem:[#allocation598_spill] sm:$0xff] }
 0x6dd   :  { %17187 = vst [vmem:[#allocation77_spill] sm:$0xff] %v12565_v29  ;;  %17188 = vst [vmem:[#allocation78_spill] sm:$0xff] %v12567_v42  ;;  %4730 = vperm.xlu0 %8601, %v3499_v7   ;;  %v17197_v29 = vld [vmem:[#allocation83_spill] sm:$0xff] }
 0x6de   :  { %v3503_v18 = vmul.f32 %v17198_v9, %v17197_v29  ;;  %v17208_v29 = vld [vmem:[#allocation597_spill] sm:$0xff] }
 0x6df   :  { %v3504_v9 = vmul.f32 %v17208_v29, %v17207_v6  ;;  %v17219_v6 = vld [vmem:[#allocation90_spill] sm:$0xff] }
 0x6e0   :  { %v12573_v23 = vpop.permute.xlu1 %4541  ;;  %4727 = vperm.xlu1 %8602, %v3498_v8   ;;  %v12575_v52 = vpop.permute.xlu0 %4550  ;;  %v17204_v8 = vld [vmem:[#allocation600_spill] sm:$0xff] }
 0x6e1   :  { %17193 = vst [vmem:[#allocation79_spill] sm:$0xff] %v12573_v23  ;;  %17194 = vst [vmem:[#allocation80_spill] sm:$0xff] %v12575_v52  ;;  %4736 = vperm.xlu0 %8601, %v3501_v43   ;;  %v17203_v23 = vld [vmem:[#allocation85_spill] sm:$0xff] }
 0x6e2   :  { %v3505_v28 = vmul.f32 %v17204_v8, %v17203_v23  ;;  %v17214_v23 = vld [vmem:[#allocation599_spill] sm:$0xff] }
 0x6e3   :  { %v3506_v8 = vmul.f32 %v17214_v23, %v17213_v2  ;;  %v17225_v2 = vld [vmem:[#allocation92_spill] sm:$0xff] }
 0x6e4   :  { %v12581_v42 = vpop.permute.xlu1 %4547  ;;  %4733 = vperm.xlu1 %8602, %v3500_v63   ;;  %v12583_v7 = vpop.permute.xlu0 %4556  ;;  %v17210_v63 = vld [vmem:[#allocation602_spill] sm:$0xff] }
 0x6e5   :  { %17199 = vst [vmem:[#allocation81_spill] sm:$0xff] %v12581_v42  ;;  %17200 = vst [vmem:[#allocation82_spill] sm:$0xff] %v12583_v7  ;;  %4742 = vperm.xlu0 %8601, %v3503_v18   ;;  %v17209_v42 = vld [vmem:[#allocation87_spill] sm:$0xff] }
 0x6e6   :  { %v3507_v11 = vmul.f32 %v17210_v63, %v17209_v42  ;;  %v17220_v42 = vld [vmem:[#allocation601_spill] sm:$0xff] }
 0x6e7   :  { %v3508_v63 = vmul.f32 %v17220_v42, %v17219_v6  ;;  %v17231_v6 = vld [vmem:[#allocation94_spill] sm:$0xff] }
 0x6e8   :  { %v12589_v52 = vpop.permute.xlu1 %4553  ;;  %4739 = vperm.xlu1 %8602, %v3502_v5   ;;  %v12591_v43 = vpop.permute.xlu0 %4562  ;;  %v17216_v5 = vld [vmem:[#allocation604_spill] sm:$0xff] }
 0x6e9   :  { %17205 = vst [vmem:[#allocation83_spill] sm:$0xff] %v12589_v52  ;;  %17206 = vst [vmem:[#allocation84_spill] sm:$0xff] %v12591_v43  ;;  %4748 = vperm.xlu0 %8601, %v3505_v28   ;;  %v17215_v52 = vld [vmem:[#allocation89_spill] sm:$0xff] }
 0x6ea   :  { %v3509_v19 = vmul.f32 %v17216_v5, %v17215_v52  ;;  %v17226_v52 = vld [vmem:[#allocation603_spill] sm:$0xff] }
 0x6eb   :  { %v3510_v5 = vmul.f32 %v17226_v52, %v17225_v2  ;;  %v17237_v2 = vld [vmem:[#allocation96_spill] sm:$0xff] }
 0x6ec   :  { %v12597_v7 = vpop.permute.xlu1 %4559  ;;  %4745 = vperm.xlu1 %8602, %v3504_v9   ;;  %v12599_v18 = vpop.permute.xlu0 %4568  ;;  %v17222_v9 = vld [vmem:[#allocation606_spill] sm:$0xff] }
 0x6ed   :  { %17211 = vst [vmem:[#allocation85_spill] sm:$0xff] %v12597_v7  ;;  %17212 = vst [vmem:[#allocation86_spill] sm:$0xff] %v12599_v18  ;;  %4754 = vperm.xlu0 %8601, %v3507_v11   ;;  %v17221_v7 = vld [vmem:[#allocation91_spill] sm:$0xff] }
 0x6ee   :  { %v3511_v29 = vmul.f32 %v17222_v9, %v17221_v7  ;;  %v17232_v7 = vld [vmem:[#allocation605_spill] sm:$0xff] }
 0x6ef   :  { %v3512_v9 = vmul.f32 %v17232_v7, %v17231_v6  ;;  %v17243_v6 = vld [vmem:[#allocation98_spill] sm:$0xff] }
 0x6f0   :  { %v12605_v43 = vpop.permute.xlu1 %4565  ;;  %4751 = vperm.xlu1 %8602, %v3506_v8   ;;  %v12607_v28 = vpop.permute.xlu0 %4574  ;;  %v17228_v8 = vld [vmem:[#allocation608_spill] sm:$0xff] }
 0x6f1   :  { %17217 = vst [vmem:[#allocation87_spill] sm:$0xff] %v12605_v43  ;;  %17218 = vst [vmem:[#allocation88_spill] sm:$0xff] %v12607_v28  ;;  %4760 = vperm.xlu0 %8601, %v3509_v19   ;;  %v17227_v43 = vld [vmem:[#allocation93_spill] sm:$0xff] }
 0x6f2   :  { %v3513_v23 = vmul.f32 %v17228_v8, %v17227_v43  ;;  %v17238_v43 = vld [vmem:[#allocation607_spill] sm:$0xff] }
 0x6f3   :  { %v3514_v8 = vmul.f32 %v17238_v43, %v17237_v2  ;;  %v17249_v2 = vld [vmem:[#allocation100_spill] sm:$0xff] }
 0x6f4   :  { %v12613_v18 = vpop.permute.xlu1 %4571  ;;  %4757 = vperm.xlu1 %8602, %v3508_v63   ;;  %v12615_v11 = vpop.permute.xlu0 %4580  ;;  %v17234_v63 = vld [vmem:[#allocation610_spill] sm:$0xff] }
 0x6f5   :  { %17223 = vst [vmem:[#allocation89_spill] sm:$0xff] %v12613_v18  ;;  %17224 = vst [vmem:[#allocation90_spill] sm:$0xff] %v12615_v11  ;;  %4766 = vperm.xlu0 %8601, %v3511_v29   ;;  %v17233_v18 = vld [vmem:[#allocation95_spill] sm:$0xff] }
 0x6f6   :  { %v3515_v42 = vmul.f32 %v17234_v63, %v17233_v18  ;;  %v17244_v18 = vld [vmem:[#allocation609_spill] sm:$0xff] }
 0x6f7   :  { %v3516_v63 = vmul.f32 %v17244_v18, %v17243_v6  ;;  %v17255_v6 = vld [vmem:[#allocation102_spill] sm:$0xff] }
 0x6f8   :  { %v12621_v28 = vpop.permute.xlu1 %4577  ;;  %4763 = vperm.xlu1 %8602, %v3510_v5   ;;  %v12623_v19 = vpop.permute.xlu0 %4586  ;;  %v17240_v5 = vld [vmem:[#allocation612_spill] sm:$0xff] }
 0x6f9   :  { %17229 = vst [vmem:[#allocation91_spill] sm:$0xff] %v12621_v28  ;;  %17230 = vst [vmem:[#allocation92_spill] sm:$0xff] %v12623_v19  ;;  %4772 = vperm.xlu0 %8601, %v3513_v23   ;;  %v17239_v28 = vld [vmem:[#allocation97_spill] sm:$0xff] }
 0x6fa   :  { %v3517_v52 = vmul.f32 %v17240_v5, %v17239_v28  ;;  %v17250_v28 = vld [vmem:[#allocation611_spill] sm:$0xff] }
 0x6fb   :  { %v3518_v5 = vmul.f32 %v17250_v28, %v17249_v2  ;;  %v17261_v2 = vld [vmem:[#allocation104_spill] sm:$0xff] }
 0x6fc   :  { %v12629_v11 = vpop.permute.xlu1 %4583  ;;  %4769 = vperm.xlu1 %8602, %v3512_v9   ;;  %v12631_v29 = vpop.permute.xlu0 %4592  ;;  %v17246_v9 = vld [vmem:[#allocation614_spill] sm:$0xff] }
 0x6fd   :  { %17235 = vst [vmem:[#allocation93_spill] sm:$0xff] %v12629_v11  ;;  %17236 = vst [vmem:[#allocation94_spill] sm:$0xff] %v12631_v29  ;;  %4778 = vperm.xlu0 %8601, %v3515_v42   ;;  %v17245_v11 = vld [vmem:[#allocation99_spill] sm:$0xff] }
 0x6fe   :  { %v3519_v7 = vmul.f32 %v17246_v9, %v17245_v11  ;;  %v17256_v11 = vld [vmem:[#allocation613_spill] sm:$0xff] }
 0x6ff   :  { %v3520_v9 = vmul.f32 %v17256_v11, %v17255_v6  ;;  %v17266_v6 = vld [vmem:[#allocation106_spill] sm:$0xff] }
 0x700   :  { %v12637_v19 = vpop.permute.xlu1 %4589  ;;  %4775 = vperm.xlu1 %8602, %v3514_v8   ;;  %v12639_v23 = vpop.permute.xlu0 %4598  ;;  %v17252_v8 = vld [vmem:[#allocation616_spill] sm:$0xff] }
 0x701   :  { %17241 = vst [vmem:[#allocation95_spill] sm:$0xff] %v12637_v19  ;;  %17242 = vst [vmem:[#allocation96_spill] sm:$0xff] %v12639_v23  ;;  %4784 = vperm.xlu0 %8601, %v3517_v52   ;;  %v17251_v19 = vld [vmem:[#allocation101_spill] sm:$0xff] }
 0x702   :  { %v3521_v43 = vmul.f32 %v17252_v8, %v17251_v19  ;;  %v17262_v19 = vld [vmem:[#allocation615_spill] sm:$0xff] }
 0x703   :  { %v3522_v8 = vmul.f32 %v17262_v19, %v17261_v2  ;;  %v17272_v2 = vld [vmem:[#allocation108_spill] sm:$0xff] }
 0x704   :  { %v12645_v29 = vpop.permute.xlu1 %4595  ;;  %4781 = vperm.xlu1 %8602, %v3516_v63   ;;  %v12647_v42 = vpop.permute.xlu0 %4604  ;;  %v17258_v63 = vld [vmem:[#allocation618_spill] sm:$0xff] }
 0x705   :  { %17247 = vst [vmem:[#allocation97_spill] sm:$0xff] %v12645_v29  ;;  %17248 = vst [vmem:[#allocation98_spill] sm:$0xff] %v12647_v42  ;;  %4790 = vperm.xlu0 %8601, %v3519_v7   ;;  %v17257_v29 = vld [vmem:[#allocation103_spill] sm:$0xff] }
 0x706   :  { %v3523_v18 = vmul.f32 %v17258_v63, %v17257_v29  ;;  %v17267_v29 = vld [vmem:[#allocation617_spill] sm:$0xff] }
 0x707   :  { %v3524_v63 = vmul.f32 %v17267_v29, %v17266_v6  ;;  %v17278_v6 = vld [vmem:[#allocation110_spill] sm:$0xff] }
 0x708   :  { %v12653_v23 = vpop.permute.xlu1 %4601  ;;  %4787 = vperm.xlu1 %8602, %v3518_v5   ;;  %v12655_v52 = vpop.permute.xlu0 %4610 }
 0x709   :  { %17253 = vst [vmem:[#allocation99_spill] sm:$0xff] %v12653_v23  ;;  %17254 = vst [vmem:[#allocation100_spill] sm:$0xff] %v12655_v52  ;;  %4796 = vperm.xlu0 %8601, %v3521_v43   ;;  %v17263_v23 = vld [vmem:[#allocation105_spill] sm:$0xff] }
 0x70a   :  { %v3525_v5 = vmul.f32 %v12020_v0, %v17263_v23  ;;  %v17273_v23 = vld [vmem:[#allocation619_spill] sm:$0xff] }
 0x70b   :  { %v3526_v0 = vmul.f32 %v17273_v23, %v17272_v2  ;;  %v17284_v2 = vld [vmem:[#allocation112_spill] sm:$0xff] }
 0x70c   :  { %v12661_v42 = vpop.permute.xlu1 %4607  ;;  %4793 = vperm.xlu1 %8602, %v3520_v9   ;;  %v12663_v7 = vpop.permute.xlu0 %4616  ;;  %v17269_v9 = vld [vmem:[#allocation622_spill] sm:$0xff] }
 0x70d   :  { %17259 = vst [vmem:[#allocation611_spill] sm:$0xff] %v12661_v42  ;;  %17260 = vst [vmem:[#allocation101_spill] sm:$0xff] %v12663_v7  ;;  %4802 = vperm.xlu0 %8601, %v3523_v18   ;;  %v17268_v42 = vld [vmem:[#allocation107_spill] sm:$0xff] }
 0x70e   :  { %v3527_v11 = vmul.f32 %v17269_v9, %v17268_v42  ;;  %v17279_v42 = vld [vmem:[#allocation621_spill] sm:$0xff] }
 0x70f   :  { %v3528_v9 = vmul.f32 %v17279_v42, %v17278_v6  ;;  %v17290_v6 = vld [vmem:[#allocation114_spill] sm:$0xff] }
 0x710   :  { %v12669_v52 = vpop.permute.xlu1 %4613  ;;  %4799 = vperm.xlu1 %8602, %v3522_v8   ;;  %v12671_v43 = vpop.permute.xlu0 %4622  ;;  %v17275_v8 = vld [vmem:[#allocation624_spill] sm:$0xff] }
 0x711   :  { %17264 = vst [vmem:[#allocation102_spill] sm:$0xff] %v12669_v52  ;;  %17265 = vst [vmem:[#allocation103_spill] sm:$0xff] %v12671_v43  ;;  %4808 = vperm.xlu0 %8601, %v3525_v5   ;;  %v17274_v52 = vld [vmem:[#allocation109_spill] sm:$0xff] }
 0x712   :  { %v3529_v19 = vmul.f32 %v17275_v8, %v17274_v52  ;;  %v17285_v52 = vld [vmem:[#allocation623_spill] sm:$0xff] }
 0x713   :  { %v3530_v8 = vmul.f32 %v17285_v52, %v17284_v2  ;;  %v17296_v2 = vld [vmem:[#allocation116_spill] sm:$0xff] }
 0x714   :  { %v12677_v7 = vpop.permute.xlu1 %4619  ;;  %4805 = vperm.xlu1 %8602, %v3524_v63   ;;  %v12679_v18 = vpop.permute.xlu0 %4628  ;;  %v17281_v63 = vld [vmem:[#allocation626_spill] sm:$0xff] }
 0x715   :  { %17270 = vst [vmem:[#allocation104_spill] sm:$0xff] %v12677_v7  ;;  %17271 = vst [vmem:[#allocation105_spill] sm:$0xff] %v12679_v18  ;;  %4814 = vperm.xlu0 %8601, %v3527_v11   ;;  %v17280_v7 = vld [vmem:[#allocation111_spill] sm:$0xff] }
 0x716   :  { %v3531_v29 = vmul.f32 %v17281_v63, %v17280_v7  ;;  %v17291_v7 = vld [vmem:[#allocation625_spill] sm:$0xff] }
 0x717   :  { %v3532_v63 = vmul.f32 %v17291_v7, %v17290_v6  ;;  %v17302_v6 = vld [vmem:[#allocation118_spill] sm:$0xff] }
 0x718   :  { %v12685_v43 = vpop.permute.xlu1 %4625  ;;  %4811 = vperm.xlu1 %8602, %v3526_v0   ;;  %v12687_v5 = vpop.permute.xlu0 %4634  ;;  %v17287_v0 = vld [vmem:[#allocation628_spill] sm:$0xff] }
 0x719   :  { %17276 = vst [vmem:[#allocation106_spill] sm:$0xff] %v12685_v43  ;;  %17277 = vst [vmem:[#allocation107_spill] sm:$0xff] %v12687_v5  ;;  %4820 = vperm.xlu0 %8601, %v3529_v19   ;;  %v17286_v43 = vld [vmem:[#allocation113_spill] sm:$0xff] }
 0x71a   :  { %v3533_v23 = vmul.f32 %v17287_v0, %v17286_v43  ;;  %v17297_v43 = vld [vmem:[#allocation627_spill] sm:$0xff] }
 0x71b   :  { %v3534_v0 = vmul.f32 %v17297_v43, %v17296_v2  ;;  %v17308_v2 = vld [vmem:[#allocation120_spill] sm:$0xff] }
 0x71c   :  { %v12693_v18 = vpop.permute.xlu1 %4631  ;;  %4817 = vperm.xlu1 %8602, %v3528_v9   ;;  %v12695_v11 = vpop.permute.xlu0 %4640  ;;  %v17293_v9 = vld [vmem:[#allocation630_spill] sm:$0xff] }
 0x71d   :  { %17282 = vst [vmem:[#allocation108_spill] sm:$0xff] %v12693_v18  ;;  %17283 = vst [vmem:[#allocation109_spill] sm:$0xff] %v12695_v11  ;;  %4826 = vperm.xlu0 %8601, %v3531_v29   ;;  %v17292_v18 = vld [vmem:[#allocation115_spill] sm:$0xff] }
 0x71e   :  { %v3535_v42 = vmul.f32 %v17293_v9, %v17292_v18  ;;  %v17303_v18 = vld [vmem:[#allocation629_spill] sm:$0xff] }
 0x71f   :  { %v3536_v9 = vmul.f32 %v17303_v18, %v17302_v6  ;;  %v17314_v6 = vld [vmem:[#allocation122_spill] sm:$0xff] }
 0x720   :  { %v12701_v5 = vpop.permute.xlu1 %4637  ;;  %4823 = vperm.xlu1 %8602, %v3530_v8   ;;  %v12703_v19 = vpop.permute.xlu0 %4646  ;;  %v17299_v8 = vld [vmem:[#allocation632_spill] sm:$0xff] }
 0x721   :  { %17288 = vst [vmem:[#allocation110_spill] sm:$0xff] %v12701_v5  ;;  %17289 = vst [vmem:[#allocation111_spill] sm:$0xff] %v12703_v19  ;;  %4832 = vperm.xlu0 %8601, %v3533_v23   ;;  %v17298_v5 = vld [vmem:[#allocation117_spill] sm:$0xff] }
 0x722   :  { %v3537_v52 = vmul.f32 %v17299_v8, %v17298_v5  ;;  %v17309_v5 = vld [vmem:[#allocation631_spill] sm:$0xff] }
 0x723   :  { %v3538_v8 = vmul.f32 %v17309_v5, %v17308_v2  ;;  %v17320_v2 = vld [vmem:[#allocation124_spill] sm:$0xff] }
 0x724   :  { %v12709_v11 = vpop.permute.xlu1 %4643  ;;  %4829 = vperm.xlu1 %8602, %v3532_v63   ;;  %v12711_v29 = vpop.permute.xlu0 %4652  ;;  %v17305_v63 = vld [vmem:[#allocation634_spill] sm:$0xff] }
 0x725   :  { %17294 = vst [vmem:[#allocation112_spill] sm:$0xff] %v12709_v11  ;;  %17295 = vst [vmem:[#allocation113_spill] sm:$0xff] %v12711_v29  ;;  %4838 = vperm.xlu0 %8601, %v3535_v42   ;;  %v17304_v11 = vld [vmem:[#allocation119_spill] sm:$0xff] }
 0x726   :  { %v3539_v7 = vmul.f32 %v17305_v63, %v17304_v11  ;;  %v17315_v11 = vld [vmem:[#allocation633_spill] sm:$0xff] }
 0x727   :  { %v3540_v63 = vmul.f32 %v17315_v11, %v17314_v6  ;;  %v17326_v6 = vld [vmem:[#allocation126_spill] sm:$0xff] }
 0x728   :  { %v12717_v19 = vpop.permute.xlu1 %4649  ;;  %4835 = vperm.xlu1 %8602, %v3534_v0   ;;  %v12719_v23 = vpop.permute.xlu0 %4658  ;;  %v17311_v0 = vld [vmem:[#allocation636_spill] sm:$0xff] }
 0x729   :  { %17300 = vst [vmem:[#allocation114_spill] sm:$0xff] %v12717_v19  ;;  %17301 = vst [vmem:[#allocation115_spill] sm:$0xff] %v12719_v23  ;;  %4844 = vperm.xlu0 %8601, %v3537_v52   ;;  %v17310_v19 = vld [vmem:[#allocation121_spill] sm:$0xff] }
 0x72a   :  { %v3541_v43 = vmul.f32 %v17311_v0, %v17310_v19  ;;  %v17321_v19 = vld [vmem:[#allocation635_spill] sm:$0xff] }
 0x72b   :  { %v3542_v0 = vmul.f32 %v17321_v19, %v17320_v2  ;;  %v17332_v2 = vld [vmem:[#allocation128_spill] sm:$0xff] }
 0x72c   :  { %v12725_v29 = vpop.permute.xlu1 %4655  ;;  %4841 = vperm.xlu1 %8602, %v3536_v9   ;;  %v12727_v42 = vpop.permute.xlu0 %4664  ;;  %v17317_v9 = vld [vmem:[#allocation638_spill] sm:$0xff] }
 0x72d   :  { %17306 = vst [vmem:[#allocation116_spill] sm:$0xff] %v12725_v29  ;;  %17307 = vst [vmem:[#allocation117_spill] sm:$0xff] %v12727_v42  ;;  %4850 = vperm.xlu0 %8601, %v3539_v7   ;;  %v17316_v29 = vld [vmem:[#allocation123_spill] sm:$0xff] }
 0x72e   :  { %v3543_v18 = vmul.f32 %v17317_v9, %v17316_v29  ;;  %v17327_v29 = vld [vmem:[#allocation637_spill] sm:$0xff] }
 0x72f   :  { %v3544_v9 = vmul.f32 %v17327_v29, %v17326_v6  ;;  %v17338_v6 = vld [vmem:[#allocation130_spill] sm:$0xff] }
 0x730   :  { %v12733_v23 = vpop.permute.xlu1 %4661  ;;  %4847 = vperm.xlu1 %8602, %v3538_v8   ;;  %v12735_v52 = vpop.permute.xlu0 %4670  ;;  %v17323_v8 = vld [vmem:[#allocation640_spill] sm:$0xff] }
 0x731   :  { %17312 = vst [vmem:[#allocation118_spill] sm:$0xff] %v12733_v23  ;;  %17313 = vst [vmem:[#allocation119_spill] sm:$0xff] %v12735_v52  ;;  %4856 = vperm.xlu0 %8601, %v3541_v43   ;;  %v17322_v23 = vld [vmem:[#allocation125_spill] sm:$0xff] }
 0x732   :  { %v3545_v5 = vmul.f32 %v17323_v8, %v17322_v23  ;;  %v17333_v23 = vld [vmem:[#allocation639_spill] sm:$0xff] }
 0x733   :  { %v3546_v8 = vmul.f32 %v17333_v23, %v17332_v2  ;;  %v17344_v2 = vld [vmem:[#allocation132_spill] sm:$0xff] }
 0x734   :  { %v12741_v42 = vpop.permute.xlu1 %4667  ;;  %4853 = vperm.xlu1 %8602, %v3540_v63   ;;  %v12743_v7 = vpop.permute.xlu0 %4676  ;;  %v17329_v63 = vld [vmem:[#allocation642_spill] sm:$0xff] }
 0x735   :  { %17318 = vst [vmem:[#allocation120_spill] sm:$0xff] %v12741_v42  ;;  %17319 = vst [vmem:[#allocation121_spill] sm:$0xff] %v12743_v7  ;;  %4862 = vperm.xlu0 %8601, %v3543_v18   ;;  %v17328_v42 = vld [vmem:[#allocation127_spill] sm:$0xff] }
 0x736   :  { %v3547_v11 = vmul.f32 %v17329_v63, %v17328_v42  ;;  %v17339_v42 = vld [vmem:[#allocation641_spill] sm:$0xff] }
 0x737   :  { %v3548_v63 = vmul.f32 %v17339_v42, %v17338_v6  ;;  %v17350_v6 = vld [vmem:[#allocation134_spill] sm:$0xff] }
 0x738   :  { %v12749_v52 = vpop.permute.xlu1 %4673  ;;  %4859 = vperm.xlu1 %8602, %v3542_v0   ;;  %v12751_v43 = vpop.permute.xlu0 %4682  ;;  %v17335_v0 = vld [vmem:[#allocation644_spill] sm:$0xff] }
 0x739   :  { %17324 = vst [vmem:[#allocation122_spill] sm:$0xff] %v12749_v52  ;;  %17325 = vst [vmem:[#allocation123_spill] sm:$0xff] %v12751_v43  ;;  %4868 = vperm.xlu0 %8601, %v3545_v5   ;;  %v17334_v52 = vld [vmem:[#allocation129_spill] sm:$0xff] }
 0x73a   :  { %v3549_v19 = vmul.f32 %v17335_v0, %v17334_v52  ;;  %v17345_v52 = vld [vmem:[#allocation643_spill] sm:$0xff] }
 0x73b   :  { %v3550_v0 = vmul.f32 %v17345_v52, %v17344_v2  ;;  %v17356_v2 = vld [vmem:[#allocation136_spill] sm:$0xff] }
 0x73c   :  { %v12757_v7 = vpop.permute.xlu1 %4679  ;;  %4865 = vperm.xlu1 %8602, %v3544_v9   ;;  %v12759_v18 = vpop.permute.xlu0 %4688  ;;  %v17341_v9 = vld [vmem:[#allocation646_spill] sm:$0xff] }
 0x73d   :  { %17330 = vst [vmem:[#allocation124_spill] sm:$0xff] %v12757_v7  ;;  %17331 = vst [vmem:[#allocation125_spill] sm:$0xff] %v12759_v18  ;;  %4874 = vperm.xlu0 %8601, %v3547_v11   ;;  %v17340_v7 = vld [vmem:[#allocation131_spill] sm:$0xff] }
 0x73e   :  { %v3551_v29 = vmul.f32 %v17341_v9, %v17340_v7  ;;  %v17351_v7 = vld [vmem:[#allocation645_spill] sm:$0xff] }
 0x73f   :  { %v3552_v9 = vmul.f32 %v17351_v7, %v17350_v6  ;;  %v17362_v6 = vld [vmem:[#allocation138_spill] sm:$0xff] }
 0x740   :  { %v12765_v43 = vpop.permute.xlu1 %4685  ;;  %4871 = vperm.xlu1 %8602, %v3546_v8   ;;  %v12767_v5 = vpop.permute.xlu0 %4694  ;;  %v17347_v8 = vld [vmem:[#allocation648_spill] sm:$0xff] }
 0x741   :  { %17336 = vst [vmem:[#allocation126_spill] sm:$0xff] %v12765_v43  ;;  %17337 = vst [vmem:[#allocation127_spill] sm:$0xff] %v12767_v5  ;;  %4880 = vperm.xlu0 %8601, %v3549_v19   ;;  %v17346_v43 = vld [vmem:[#allocation133_spill] sm:$0xff] }
 0x742   :  { %v3553_v23 = vmul.f32 %v17347_v8, %v17346_v43  ;;  %v17357_v43 = vld [vmem:[#allocation647_spill] sm:$0xff] }
 0x743   :  { %v3554_v8 = vmul.f32 %v17357_v43, %v17356_v2  ;;  %v17368_v2 = vld [vmem:[#allocation140_spill] sm:$0xff] }
 0x744   :  { %v12773_v18 = vpop.permute.xlu1 %4691  ;;  %4877 = vperm.xlu1 %8602, %v3548_v63   ;;  %v12775_v11 = vpop.permute.xlu0 %4700  ;;  %v17353_v63 = vld [vmem:[#allocation650_spill] sm:$0xff] }
 0x745   :  { %17342 = vst [vmem:[#allocation128_spill] sm:$0xff] %v12773_v18  ;;  %17343 = vst [vmem:[#allocation129_spill] sm:$0xff] %v12775_v11  ;;  %4886 = vperm.xlu0 %8601, %v3551_v29   ;;  %v17352_v18 = vld [vmem:[#allocation135_spill] sm:$0xff] }
 0x746   :  { %v3555_v42 = vmul.f32 %v17353_v63, %v17352_v18  ;;  %v17363_v18 = vld [vmem:[#allocation649_spill] sm:$0xff] }
 0x747   :  { %v3556_v63 = vmul.f32 %v17363_v18, %v17362_v6  ;;  %v17374_v6 = vld [vmem:[#allocation142_spill] sm:$0xff] }
 0x748   :  { %v12781_v5 = vpop.permute.xlu1 %4697  ;;  %4883 = vperm.xlu1 %8602, %v3550_v0   ;;  %v12783_v19 = vpop.permute.xlu0 %4706  ;;  %v17359_v0 = vld [vmem:[#allocation652_spill] sm:$0xff] }
 0x749   :  { %17348 = vst [vmem:[#allocation130_spill] sm:$0xff] %v12781_v5  ;;  %17349 = vst [vmem:[#allocation131_spill] sm:$0xff] %v12783_v19  ;;  %4892 = vperm.xlu0 %8601, %v3553_v23   ;;  %v17358_v5 = vld [vmem:[#allocation137_spill] sm:$0xff] }
 0x74a   :  { %v3557_v52 = vmul.f32 %v17359_v0, %v17358_v5  ;;  %v17369_v5 = vld [vmem:[#allocation651_spill] sm:$0xff] }
 0x74b   :  { %v3558_v0 = vmul.f32 %v17369_v5, %v17368_v2  ;;  %v17380_v2 = vld [vmem:[#allocation144_spill] sm:$0xff] }
 0x74c   :  { %v12789_v11 = vpop.permute.xlu1 %4703  ;;  %4889 = vperm.xlu1 %8602, %v3552_v9   ;;  %v12791_v29 = vpop.permute.xlu0 %4712  ;;  %v17365_v9 = vld [vmem:[#allocation654_spill] sm:$0xff] }
 0x74d   :  { %17354 = vst [vmem:[#allocation132_spill] sm:$0xff] %v12789_v11  ;;  %17355 = vst [vmem:[#allocation133_spill] sm:$0xff] %v12791_v29  ;;  %4898 = vperm.xlu0 %8601, %v3555_v42   ;;  %v17364_v11 = vld [vmem:[#allocation139_spill] sm:$0xff] }
 0x74e   :  { %v3559_v7 = vmul.f32 %v17365_v9, %v17364_v11  ;;  %v17375_v11 = vld [vmem:[#allocation653_spill] sm:$0xff] }
 0x74f   :  { %v3560_v9 = vmul.f32 %v17375_v11, %v17374_v6  ;;  %v17386_v6 = vld [vmem:[#allocation146_spill] sm:$0xff] }
 0x750   :  { %v12797_v19 = vpop.permute.xlu1 %4709  ;;  %4895 = vperm.xlu1 %8602, %v3554_v8   ;;  %v12799_v23 = vpop.permute.xlu0 %4718  ;;  %v17371_v8 = vld [vmem:[#allocation656_spill] sm:$0xff] }
 0x751   :  { %17360 = vst [vmem:[#allocation134_spill] sm:$0xff] %v12797_v19  ;;  %17361 = vst [vmem:[#allocation135_spill] sm:$0xff] %v12799_v23  ;;  %4904 = vperm.xlu0 %8601, %v3557_v52   ;;  %v17370_v19 = vld [vmem:[#allocation141_spill] sm:$0xff] }
 0x752   :  { %v3561_v43 = vmul.f32 %v17371_v8, %v17370_v19  ;;  %v17381_v19 = vld [vmem:[#allocation655_spill] sm:$0xff] }
 0x753   :  { %v3562_v8 = vmul.f32 %v17381_v19, %v17380_v2  ;;  %v17392_v2 = vld [vmem:[#allocation148_spill] sm:$0xff] }
 0x754   :  { %v12805_v29 = vpop.permute.xlu1 %4715  ;;  %4901 = vperm.xlu1 %8602, %v3556_v63   ;;  %v12807_v42 = vpop.permute.xlu0 %4724  ;;  %v17377_v63 = vld [vmem:[#allocation658_spill] sm:$0xff] }
 0x755   :  { %17366 = vst [vmem:[#allocation136_spill] sm:$0xff] %v12805_v29  ;;  %17367 = vst [vmem:[#allocation137_spill] sm:$0xff] %v12807_v42  ;;  %4910 = vperm.xlu0 %8601, %v3559_v7   ;;  %v17376_v29 = vld [vmem:[#allocation143_spill] sm:$0xff] }
 0x756   :  { %v3563_v18 = vmul.f32 %v17377_v63, %v17376_v29  ;;  %v17387_v29 = vld [vmem:[#allocation657_spill] sm:$0xff] }
 0x757   :  { %v3564_v63 = vmul.f32 %v17387_v29, %v17386_v6  ;;  %v17398_v6 = vld [vmem:[#allocation150_spill] sm:$0xff] }
 0x758   :  { %v12813_v23 = vpop.permute.xlu1 %4721  ;;  %4907 = vperm.xlu1 %8602, %v3558_v0   ;;  %v12815_v52 = vpop.permute.xlu0 %4730  ;;  %v17383_v0 = vld [vmem:[#allocation660_spill] sm:$0xff] }
 0x759   :  { %17372 = vst [vmem:[#allocation138_spill] sm:$0xff] %v12813_v23  ;;  %17373 = vst [vmem:[#allocation139_spill] sm:$0xff] %v12815_v52  ;;  %4916 = vperm.xlu0 %8601, %v3561_v43   ;;  %v17382_v23 = vld [vmem:[#allocation145_spill] sm:$0xff] }
 0x75a   :  { %v3565_v5 = vmul.f32 %v17383_v0, %v17382_v23  ;;  %v17393_v23 = vld [vmem:[#allocation659_spill] sm:$0xff] }
 0x75b   :  { %v3566_v0 = vmul.f32 %v17393_v23, %v17392_v2  ;;  %v17404_v2 = vld [vmem:[#allocation152_spill] sm:$0xff] }
 0x75c   :  { %v12821_v42 = vpop.permute.xlu1 %4727  ;;  %4913 = vperm.xlu1 %8602, %v3560_v9   ;;  %v12823_v7 = vpop.permute.xlu0 %4736  ;;  %v17389_v9 = vld [vmem:[#allocation662_spill] sm:$0xff] }
 0x75d   :  { %17378 = vst [vmem:[#allocation140_spill] sm:$0xff] %v12821_v42  ;;  %17379 = vst [vmem:[#allocation141_spill] sm:$0xff] %v12823_v7  ;;  %4922 = vperm.xlu0 %8601, %v3563_v18   ;;  %v17388_v42 = vld [vmem:[#allocation147_spill] sm:$0xff] }
 0x75e   :  { %v3567_v11 = vmul.f32 %v17389_v9, %v17388_v42  ;;  %v17399_v42 = vld [vmem:[#allocation661_spill] sm:$0xff] }
 0x75f   :  { %v3568_v9 = vmul.f32 %v17399_v42, %v17398_v6  ;;  %v17409_v6 = vld [vmem:[#allocation154_spill] sm:$0xff] }
 0x760   :  { %v12829_v52 = vpop.permute.xlu1 %4733  ;;  %4919 = vperm.xlu1 %8602, %v3562_v8   ;;  %v12831_v43 = vpop.permute.xlu0 %4742  ;;  %v17395_v8 = vld [vmem:[#allocation664_spill] sm:$0xff] }
 0x761   :  { %17384 = vst [vmem:[#allocation142_spill] sm:$0xff] %v12829_v52  ;;  %17385 = vst [vmem:[#allocation143_spill] sm:$0xff] %v12831_v43  ;;  %4928 = vperm.xlu0 %8601, %v3565_v5   ;;  %v17394_v52 = vld [vmem:[#allocation149_spill] sm:$0xff] }
 0x762   :  { %v3569_v19 = vmul.f32 %v17395_v8, %v17394_v52  ;;  %v17405_v52 = vld [vmem:[#allocation663_spill] sm:$0xff] }
 0x763   :  { %v3570_v8 = vmul.f32 %v17405_v52, %v17404_v2  ;;  %v17414_v2 = vld [vmem:[#allocation156_spill] sm:$0xff] }
 0x764   :  { %v12837_v7 = vpop.permute.xlu1 %4739  ;;  %4925 = vperm.xlu1 %8602, %v3564_v63   ;;  %v12839_v18 = vpop.permute.xlu0 %4748  ;;  %v17401_v63 = vld [vmem:[#allocation666_spill] sm:$0xff] }
 0x765   :  { %17390 = vst [vmem:[#allocation144_spill] sm:$0xff] %v12837_v7  ;;  %17391 = vst [vmem:[#allocation145_spill] sm:$0xff] %v12839_v18  ;;  %4934 = vperm.xlu0 %8601, %v3567_v11   ;;  %v17400_v7 = vld [vmem:[#allocation151_spill] sm:$0xff] }
 0x766   :  { %v3571_v29 = vmul.f32 %v17401_v63, %v17400_v7  ;;  %v17410_v7 = vld [vmem:[#allocation665_spill] sm:$0xff] }
 0x767   :  { %v3572_v63 = vmul.f32 %v17410_v7, %v17409_v6  ;;  %v17420_v6 = vld [vmem:[#allocation158_spill] sm:$0xff] }
 0x768   :  { %v12845_v43 = vpop.permute.xlu1 %4745  ;;  %4931 = vperm.xlu1 %8602, %v3566_v0   ;;  %v12847_v5 = vpop.permute.xlu0 %4754 }
 0x769   :  { %17396 = vst [vmem:[#allocation146_spill] sm:$0xff] %v12845_v43  ;;  %17397 = vst [vmem:[#allocation147_spill] sm:$0xff] %v12847_v5  ;;  %4940 = vperm.xlu0 %8601, %v3569_v19   ;;  %v17406_v43 = vld [vmem:[#allocation153_spill] sm:$0xff] }
 0x76a   :  { %v3573_v0 = vmul.f32 %v12125_v49, %v17406_v43  ;;  %v17415_v43 = vld [vmem:[#allocation667_spill] sm:$0xff] }
 0x76b   :  { %v3574_v49 = vmul.f32 %v17415_v43, %v17414_v2  ;;  %v17426_v2 = vld [vmem:[#allocation160_spill] sm:$0xff] }
 0x76c   :  { %v12853_v18 = vpop.permute.xlu1 %4751  ;;  %4937 = vperm.xlu1 %8602, %v3568_v9   ;;  %v12855_v11 = vpop.permute.xlu0 %4760 }
 0x76d   :  { %17402 = vst [vmem:[#allocation148_spill] sm:$0xff] %v12853_v18  ;;  %17403 = vst [vmem:[#allocation659_spill] sm:$0xff] %v12855_v11  ;;  %4946 = vperm.xlu0 %8601, %v3571_v29   ;;  %v17411_v18 = vld [vmem:[#allocation155_spill] sm:$0xff] }
 0x76e   :  { %v3575_v9 = vmul.f32 %v12129_v47, %v17411_v18  ;;  %v17421_v18 = vld [vmem:[#allocation669_spill] sm:$0xff] }
 0x76f   :  { %v3576_v47 = vmul.f32 %v17421_v18, %v17420_v6  ;;  %v17432_v6 = vld [vmem:[#allocation162_spill] sm:$0xff] }
 0x770   :  { %v12861_v5 = vpop.permute.xlu1 %4757  ;;  %4943 = vperm.xlu1 %8602, %v3570_v8   ;;  %v12863_v19 = vpop.permute.xlu0 %4766  ;;  %v17417_v8 = vld [vmem:[#allocation672_spill] sm:$0xff] }
 0x771   :  { %17407 = vst [vmem:[#allocation149_spill] sm:$0xff] %v12861_v5  ;;  %17408 = vst [vmem:[#allocation150_spill] sm:$0xff] %v12863_v19  ;;  %4952 = vperm.xlu0 %8601, %v3573_v0   ;;  %v17416_v5 = vld [vmem:[#allocation157_spill] sm:$0xff] }
 0x772   :  { %v3577_v52 = vmul.f32 %v17417_v8, %v17416_v5  ;;  %v17427_v5 = vld [vmem:[#allocation671_spill] sm:$0xff] }
 0x773   :  { %v3578_v8 = vmul.f32 %v17427_v5, %v17426_v2  ;;  %v17438_v2 = vld [vmem:[#allocation164_spill] sm:$0xff] }
 0x774   :  { %v12869_v11 = vpop.permute.xlu1 %4763  ;;  %4949 = vperm.xlu1 %8602, %v3572_v63   ;;  %v12871_v29 = vpop.permute.xlu0 %4772  ;;  %v17423_v63 = vld [vmem:[#allocation674_spill] sm:$0xff] }
 0x775   :  { %17412 = vst [vmem:[#allocation661_spill] sm:$0xff] %v12869_v11  ;;  %17413 = vst [vmem:[#allocation151_spill] sm:$0xff] %v12871_v29  ;;  %4958 = vperm.xlu0 %8601, %v3575_v9   ;;  %v17422_v11 = vld [vmem:[#allocation159_spill] sm:$0xff] }
 0x776   :  { %v3579_v7 = vmul.f32 %v17423_v63, %v17422_v11  ;;  %v17433_v11 = vld [vmem:[#allocation673_spill] sm:$0xff] }
 0x777   :  { %v3580_v63 = vmul.f32 %v17433_v11, %v17432_v6  ;;  %v17444_v6 = vld [vmem:[#allocation166_spill] sm:$0xff] }
 0x778   :  { %v12877_v19 = vpop.permute.xlu1 %4769  ;;  %4955 = vperm.xlu1 %8602, %v3574_v49   ;;  %v12879_v0 = vpop.permute.xlu0 %4778  ;;  %v17429_v49 = vld [vmem:[#allocation676_spill] sm:$0xff] }
 0x779   :  { %17418 = vst [vmem:[#allocation152_spill] sm:$0xff] %v12877_v19  ;;  %17419 = vst [vmem:[#allocation153_spill] sm:$0xff] %v12879_v0  ;;  %4964 = vperm.xlu0 %8601, %v3577_v52   ;;  %v17428_v19 = vld [vmem:[#allocation161_spill] sm:$0xff] }
 0x77a   :  { %v3581_v43 = vmul.f32 %v17429_v49, %v17428_v19  ;;  %v17439_v19 = vld [vmem:[#allocation675_spill] sm:$0xff] }
 0x77b   :  { %v3582_v49 = vmul.f32 %v17439_v19, %v17438_v2  ;;  %v17449_v2 = vld [vmem:[#allocation168_spill] sm:$0xff] }
 0x77c   :  { %v12885_v29 = vpop.permute.xlu1 %4775  ;;  %4961 = vperm.xlu1 %8602, %v3576_v47   ;;  %v12887_v9 = vpop.permute.xlu0 %4784  ;;  %v17435_v47 = vld [vmem:[#allocation678_spill] sm:$0xff] }
 0x77d   :  { %17424 = vst [vmem:[#allocation154_spill] sm:$0xff] %v12885_v29  ;;  %17425 = vst [vmem:[#allocation155_spill] sm:$0xff] %v12887_v9  ;;  %4970 = vperm.xlu0 %8601, %v3579_v7   ;;  %v17434_v29 = vld [vmem:[#allocation163_spill] sm:$0xff] }
 0x77e   :  { %v3583_v18 = vmul.f32 %v17435_v47, %v17434_v29  ;;  %v17445_v29 = vld [vmem:[#allocation677_spill] sm:$0xff] }
 0x77f   :  { %v3584_v47 = vmul.f32 %v17445_v29, %v17444_v6  ;;  %v17454_v6 = vld [vmem:[#allocation170_spill] sm:$0xff] }
 0x780   :  { %v12893_v0 = vpop.permute.xlu1 %4781  ;;  %4967 = vperm.xlu1 %8602, %v3578_v8   ;;  %v12895_v52 = vpop.permute.xlu0 %4790  ;;  %v17441_v8 = vld [vmem:[#allocation680_spill] sm:$0xff] }
 0x781   :  { %17430 = vst [vmem:[#allocation156_spill] sm:$0xff] %v12893_v0  ;;  %17431 = vst [vmem:[#allocation157_spill] sm:$0xff] %v12895_v52  ;;  %4976 = vperm.xlu0 %8601, %v3581_v43   ;;  %v17440_v0 = vld [vmem:[#allocation165_spill] sm:$0xff] }
 0x782   :  { %v3585_v5 = vmul.f32 %v17441_v8, %v17440_v0  ;;  %v17450_v0 = vld [vmem:[#allocation679_spill] sm:$0xff] }
 0x783   :  { %v3586_v8 = vmul.f32 %v17450_v0, %v17449_v2  ;;  %v17459_v2 = vld [vmem:[#allocation172_spill] sm:$0xff] }
 0x784   :  { %v12901_v9 = vpop.permute.xlu1 %4787  ;;  %4973 = vperm.xlu1 %8602, %v3580_v63   ;;  %v12903_v7 = vpop.permute.xlu0 %4796 }
 0x785   :  { %17436 = vst [vmem:[#allocation158_spill] sm:$0xff] %v12901_v9  ;;  %17437 = vst [vmem:[#allocation159_spill] sm:$0xff] %v12903_v7  ;;  %4982 = vperm.xlu0 %8601, %v3583_v18   ;;  %v17446_v9 = vld [vmem:[#allocation167_spill] sm:$0xff] }
 0x786   :  { %v3587_v63 = vmul.f32 %v12153_v46, %v17446_v9  ;;  %v17455_v9 = vld [vmem:[#allocation681_spill] sm:$0xff] }
 0x787   :  { %v3588_v46 = vmul.f32 %v17455_v9, %v17454_v6  ;;  %v17464_v6 = vld [vmem:[#allocation174_spill] sm:$0xff] }
 0x788   :  { %v12909_v52 = vpop.permute.xlu1 %4793  ;;  %4979 = vperm.xlu1 %8602, %v3582_v49   ;;  %v12911_v43 = vpop.permute.xlu0 %4802 }
 0x789   :  { %17442 = vst [vmem:[#allocation160_spill] sm:$0xff] %v12909_v52  ;;  %17443 = vst [vmem:[#allocation161_spill] sm:$0xff] %v12911_v43  ;;  %4988 = vperm.xlu0 %8601, %v3585_v5   ;;  %v17451_v52 = vld [vmem:[#allocation169_spill] sm:$0xff] }
 0x78a   :  { %v3589_v49 = vmul.f32 %v12159_v41, %v17451_v52  ;;  %v17460_v52 = vld [vmem:[#allocation683_spill] sm:$0xff] }
 0x78b   :  { %v3590_v41 = vmul.f32 %v17460_v52, %v17459_v2  ;;  %v17468_v2 = vld [vmem:[#allocation176_spill] sm:$0xff] }
 0x78c   :  { %v12917_v7 = vpop.permute.xlu1 %4799  ;;  %4985 = vperm.xlu1 %8602, %v3584_v47   ;;  %v12919_v18 = vpop.permute.xlu0 %4808 }
 0x78d   :  { %17447 = vst [vmem:[#allocation162_spill] sm:$0xff] %v12917_v7  ;;  %17448 = vst [vmem:[#allocation673_spill] sm:$0xff] %v12919_v18  ;;  %4994 = vperm.xlu0 %8601, %v3587_v63   ;;  %v17456_v7 = vld [vmem:[#allocation171_spill] sm:$0xff] }
 0x78e   :  { %v3591_v47 = vmul.f32 %v12167_v54, %v17456_v7  ;;  %v3592_v7 = vmul.f32 %v12161_v55, %v17464_v6  ;;  %v17472_v6 = vld [vmem:[#allocation178_spill] sm:$0xff] }
 0x790   :  { %v12925_v43 = vpop.permute.xlu1 %4805  ;;  %4991 = vperm.xlu1 %8602, %v3586_v8   ;;  %v12927_v5 = vpop.permute.xlu0 %4814 }
 0x791   :  { %17452 = vst [vmem:[#allocation163_spill] sm:$0xff] %v12925_v43  ;;  %17453 = vst [vmem:[#allocation164_spill] sm:$0xff] %v12927_v5  ;;  %5000 = vperm.xlu0 %8601, %v3589_v49   ;;  %v17461_v43 = vld [vmem:[#allocation173_spill] sm:$0xff] }
 0x792   :  { %v3593_v8 = vmul.f32 %v12175_v40, %v17461_v43  ;;  %v3594_v43 = vmul.f32 %v12169_v1, %v17468_v2  ;;  %v17476_v2 = vld [vmem:[#allocation180_spill] sm:$0xff] }
 0x794   :  { %v12933_v18 = vpop.permute.xlu1 %4811  ;;  %4997 = vperm.xlu1 %8602, %v3588_v46   ;;  %v12935_v63 = vpop.permute.xlu0 %4820 }
 0x795   :  { %17457 = vst [vmem:[#allocation675_spill] sm:$0xff] %v12933_v18  ;;  %17458 = vst [vmem:[#allocation165_spill] sm:$0xff] %v12935_v63  ;;  %5006 = vperm.xlu0 %8601, %v3591_v47   ;;  %v17465_v18 = vld [vmem:[#allocation175_spill] sm:$0xff] }
 0x796   :  { %v3595_v46 = vmul.f32 %v12183_v17, %v17465_v18  ;;  %v3596_v18 = vmul.f32 %v12177_v24, %v17472_v6  ;;  %v17480_v6 = vld [vmem:[#allocation182_spill] sm:$0xff] }
 0x798   :  { %v12941_v5 = vpop.permute.xlu1 %4817  ;;  %5003 = vperm.xlu1 %8602, %v3590_v41   ;;  %v12943_v49 = vpop.permute.xlu0 %4826 }
 0x799   :  { %17462 = vst [vmem:[#allocation166_spill] sm:$0xff] %v12941_v5  ;;  %17463 = vst [vmem:[#allocation677_spill] sm:$0xff] %v12943_v49  ;;  %5012 = vperm.xlu0 %8601, %v3593_v8   ;;  %v17469_v5 = vld [vmem:[#allocation177_spill] sm:$0xff] }
 0x79a   :  { %v3597_v41 = vmul.f32 %v12191_v15, %v17469_v5  ;;  %v3598_v5 = vmul.f32 %v12185_v37, %v17476_v2  ;;  %v17484_v2 = vld [vmem:[#allocation184_spill] sm:$0xff] }
 0x79c   :  { %v12949_v63 = vpop.permute.xlu1 %4823  ;;  %5009 = vperm.xlu1 %8602, %v3592_v7   ;;  %v12951_v47 = vpop.permute.xlu0 %4832 }
 0x79d   :  { %17466 = vst [vmem:[#allocation167_spill] sm:$0xff] %v12949_v63  ;;  %17467 = vst [vmem:[#allocation168_spill] sm:$0xff] %v12951_v47  ;;  %5018 = vperm.xlu0 %8601, %v3595_v46   ;;  %v17473_v63 = vld [vmem:[#allocation179_spill] sm:$0xff] }
 0x79e   :  { %v3599_v7 = vmul.f32 %v12199_v20, %v17473_v63  ;;  %v3600_v63 = vmul.f32 %v12193_v36, %v17480_v6  ;;  %v17488_v6 = vld [vmem:[#allocation186_spill] sm:$0xff] }
 0x7a0   :  { %v12957_v49 = vpop.permute.xlu1 %4829  ;;  %5015 = vperm.xlu1 %8602, %v3594_v43   ;;  %v12959_v8 = vpop.permute.xlu0 %4838 }
 0x7a1   :  { %17470 = vst [vmem:[#allocation679_spill] sm:$0xff] %v12957_v49  ;;  %17471 = vst [vmem:[#allocation169_spill] sm:$0xff] %v12959_v8  ;;  %5024 = vperm.xlu0 %8601, %v3597_v41   ;;  %v17477_v49 = vld [vmem:[#allocation181_spill] sm:$0xff] }
 0x7a2   :  { %v3601_v43 = vmul.f32 %v12207_v14, %v17477_v49  ;;  %v3602_v49 = vmul.f32 %v12201_v21, %v17484_v2  ;;  %v17492_v2 = vld [vmem:[#allocation188_spill] sm:$0xff] }
 0x7a4   :  { %v12965_v47 = vpop.permute.xlu1 %4835  ;;  %5021 = vperm.xlu1 %8602, %v3596_v18   ;;  %v12967_v46 = vpop.permute.xlu0 %4844 }
 0x7a5   :  { %17474 = vst [vmem:[#allocation170_spill] sm:$0xff] %v12965_v47  ;;  %17475 = vst [vmem:[#allocation681_spill] sm:$0xff] %v12967_v46  ;;  %5030 = vperm.xlu0 %8601, %v3599_v7   ;;  %v17481_v47 = vld [vmem:[#allocation183_spill] sm:$0xff] }
 0x7a6   :  { %v3603_v18 = vmul.f32 %v12215_v27, %v17481_v47  ;;  %v3604_v47 = vmul.f32 %v12209_v26, %v17488_v6  ;;  %v17496_v6 = vld [vmem:[#allocation190_spill] sm:$0xff] }
 0x7a8   :  { %v12973_v8 = vpop.permute.xlu1 %4841  ;;  %5027 = vperm.xlu1 %8602, %v3598_v5   ;;  %v12975_v41 = vpop.permute.xlu0 %4850 }
 0x7a9   :  { %17478 = vst [vmem:[#allocation171_spill] sm:$0xff] %v12973_v8  ;;  %17479 = vst [vmem:[#allocation172_spill] sm:$0xff] %v12975_v41  ;;  %5036 = vperm.xlu0 %8601, %v3601_v43   ;;  %v17485_v8 = vld [vmem:[#allocation185_spill] sm:$0xff] }
 0x7aa   :  { %v3605_v5 = vmul.f32 %v12223_v33, %v17485_v8  ;;  %v3606_v8 = vmul.f32 %v12217_v32, %v17492_v2  ;;  %v17500_v2 = vld [vmem:[#allocation192_spill] sm:$0xff] }
 0x7ac   :  { %v12981_v46 = vpop.permute.xlu1 %4847  ;;  %5033 = vperm.xlu1 %8602, %v3600_v63   ;;  %v12983_v7 = vpop.permute.xlu0 %4856 }
 0x7ad   :  { %17482 = vst [vmem:[#allocation683_spill] sm:$0xff] %v12981_v46  ;;  %17483 = vst [vmem:[#allocation173_spill] sm:$0xff] %v12983_v7  ;;  %5042 = vperm.xlu0 %8601, %v3603_v18   ;;  %v17489_v46 = vld [vmem:[#allocation187_spill] sm:$0xff] }
 0x7ae   :  { %v3607_v63 = vmul.f32 %v12231_v39, %v17489_v46  ;;  %v3608_v46 = vmul.f32 %v12225_v38, %v17496_v6  ;;  %v17504_v6 = vld [vmem:[#allocation194_spill] sm:$0xff] }
 0x7b0   :  { %v12989_v41 = vpop.permute.xlu1 %4853  ;;  %5039 = vperm.xlu1 %8602, %v3602_v49   ;;  %v12991_v43 = vpop.permute.xlu0 %4862 }
 0x7b1   :  { %17486 = vst [vmem:[#allocation174_spill] sm:$0xff] %v12989_v41  ;;  %17487 = vst [vmem:[#allocation175_spill] sm:$0xff] %v12991_v43  ;;  %5048 = vperm.xlu0 %8601, %v3605_v5   ;;  %v17493_v41 = vld [vmem:[#allocation189_spill] sm:$0xff] }
 0x7b2   :  { %v3609_v49 = vmul.f32 %v12239_v45, %v17493_v41  ;;  %v3610_v41 = vmul.f32 %v12233_v44, %v17500_v2  ;;  %v17508_v2 = vld [vmem:[#allocation196_spill] sm:$0xff] }
 0x7b3   :  { %v18036_v45 = vld [vmem:[#allocation640_spill] sm:$0xff] }
 0x7b4   :  { %v12997_v7 = vpop.permute.xlu1 %4859  ;;  %5045 = vperm.xlu1 %8602, %v3604_v47   ;;  %v12999_v18 = vpop.permute.xlu0 %4868 }
 0x7b5   :  { %17490 = vst [vmem:[#allocation176_spill] sm:$0xff] %v12997_v7  ;;  %17491 = vst [vmem:[#allocation177_spill] sm:$0xff] %v12999_v18  ;;  %5054 = vperm.xlu0 %8601, %v3607_v63   ;;  %v17497_v7 = vld [vmem:[#allocation191_spill] sm:$0xff] }
 0x7b6   :  { %v3611_v47 = vmul.f32 %v12247_v51, %v17497_v7  ;;  %v3612_v7 = vmul.f32 %v12241_v50, %v17504_v6  ;;  %v17505_v51 = vld [vmem:[#allocation195_spill] sm:$0xff]  ;;  %v17512_v6 = vld [vmem:[#allocation198_spill] sm:$0xff] }
 0x7b8   :  { %v13005_v43 = vpop.permute.xlu1 %4865  ;;  %5051 = vperm.xlu1 %8602, %v3606_v8   ;;  %v13007_v5 = vpop.permute.xlu0 %4874 }
 0x7b9   :  { %17494 = vst [vmem:[#allocation178_spill] sm:$0xff] %v13005_v43  ;;  %17495 = vst [vmem:[#allocation179_spill] sm:$0xff] %v13007_v5  ;;  %5060 = vperm.xlu0 %8601, %v3609_v49   ;;  %v17501_v43 = vld [vmem:[#allocation193_spill] sm:$0xff] }
 0x7ba   :  { %v3613_v8 = vmul.f32 %v12255_v57, %v17501_v43  ;;  %v3614_v43 = vmul.f32 %v12249_v56, %v17508_v2  ;;  %v17509_v57 = vld [vmem:[#allocation197_spill] sm:$0xff]  ;;  %v17516_v2 = vld [vmem:[#allocation200_spill] sm:$0xff] }
 0x7bc   :  { %v13013_v18 = vpop.permute.xlu1 %4871  ;;  %5057 = vperm.xlu1 %8602, %v3608_v46   ;;  %v13015_v63 = vpop.permute.xlu0 %4880  ;;  %v3615_v46 = vmul.f32 %v12263_v35, %v17505_v51  ;;  %v3616_v51 = vmul.f32 %v12257_v62, %v17512_v6  ;;  %v17513_v35 = vld [vmem:[#allocation199_spill] sm:$0xff]  ;;  %v17520_v6 = vld [vmem:[#allocation202_spill] sm:$0xff] }
 0x7bd   :  { %17498 = vst [vmem:[#allocation180_spill] sm:$0xff] %v13013_v18  ;;  %17499 = vst [vmem:[#allocation181_spill] sm:$0xff] %v13015_v63  ;;  %5066 = vperm.xlu0 %8601, %v3611_v47  }
 0x7c0   :  { %v13021_v5 = vpop.permute.xlu1 %4877  ;;  %5063 = vperm.xlu1 %8602, %v3610_v41   ;;  %v13023_v49 = vpop.permute.xlu0 %4886  ;;  %v3617_v41 = vmul.f32 %v12271_v60, %v17509_v57  ;;  %v3618_v57 = vmul.f32 %v12265_v4, %v17516_v2  ;;  %v17517_v60 = vld [vmem:[#allocation201_spill] sm:$0xff]  ;;  %v17524_v2 = vld [vmem:[#allocation204_spill] sm:$0xff] }
 0x7c1   :  { %17502 = vst [vmem:[#allocation182_spill] sm:$0xff] %v13021_v5  ;;  %17503 = vst [vmem:[#allocation183_spill] sm:$0xff] %v13023_v49  ;;  %5072 = vperm.xlu0 %8601, %v3613_v8   ;;  %v17525_v4 = vld [vmem:[#allocation205_spill] sm:$0xff] }
 0x7c4   :  { %v13029_v63 = vpop.permute.xlu1 %4883  ;;  %5069 = vperm.xlu1 %8602, %v3612_v7   ;;  %v13031_v47 = vpop.permute.xlu0 %4892  ;;  %v3619_v7 = vmul.f32 %v12279_v13, %v17513_v35  ;;  %v3620_v35 = vmul.f32 %v12273_v10, %v17520_v6  ;;  %v17521_v13 = vld [vmem:[#allocation203_spill] sm:$0xff]  ;;  %v17528_v6 = vld [vmem:[#allocation206_spill] sm:$0xff] }
 0x7c5   :  { %17506 = vst [vmem:[#allocation184_spill] sm:$0xff] %v13029_v63  ;;  %17507 = vst [vmem:[#allocation185_spill] sm:$0xff] %v13031_v47  ;;  %5078 = vperm.xlu0 %8601, %v3615_v46   ;;  %v18029_v10 = vld [vmem:[#allocation379_spill] sm:$0xff] }
 0x7c8   :  { %v13037_v49 = vpop.permute.xlu1 %4889  ;;  %5075 = vperm.xlu1 %8602, %v3614_v43   ;;  %v13039_v8 = vpop.permute.xlu0 %4898  ;;  %v3621_v43 = vmul.f32 %v12287_v31, %v17517_v60  ;;  %v3622_v60 = vmul.f32 %v12281_v12, %v17524_v2  ;;  %v17532_v2 = vld [vmem:[#allocation208_spill] sm:$0xff]  ;;  %v18023_v31 = vld [vmem:[#allocation377_spill] sm:$0xff]  ;;  %v18026_v12 = vld [vmem:[#allocation382_spill] sm:$0xff] }
 0x7c9   :  { %17510 = vst [vmem:[#allocation186_spill] sm:$0xff] %v13037_v49  ;;  %17511 = vst [vmem:[#allocation187_spill] sm:$0xff] %v13039_v8  ;;  %5084 = vperm.xlu0 %8601, %v3617_v41  }
 0x7cc   :  { %v13045_v50 = vpop.permute.xlu1 %4895  ;;  %5081 = vperm.xlu1 %8602, %v3616_v51   ;;  %v13047_v46 = vpop.permute.xlu0 %4904  ;;  %v3623_v51 = vmul.f32 %v12295_v53, %v17521_v13  ;;  %v3624_v13 = vmul.f32 %v12289_v22, %v17528_v6  ;;  %v17536_v6 = vld [vmem:[#allocation210_spill] sm:$0xff]  ;;  %v18020_v22 = vld [vmem:[#allocation380_spill] sm:$0xff] }
 0x7cd   :  { %17514 = vst [vmem:[#allocation188_spill] sm:$0xff] %v13045_v50  ;;  %17515 = vst [vmem:[#allocation189_spill] sm:$0xff] %v13047_v46  ;;  %5090 = vperm.xlu0 %8601, %v3619_v7   ;;  %v17529_v46 = vld [vmem:[#allocation207_spill] sm:$0xff]  ;;  %v18015_v53 = vld [vmem:[#allocation378_spill] sm:$0xff] }
 0x7d0   :  { %v13053_v56 = vpop.permute.xlu1 %4901  ;;  %5087 = vperm.xlu1 %8602, %v3618_v57   ;;  %v13055_v41 = vpop.permute.xlu0 %4910  ;;  %v3625_v57 = vmul.f32 %v12303_v3, %v17525_v4  ;;  %v3626_v4 = vmul.f32 %v12297_v34, %v17532_v2  ;;  %v17540_v2 = vld [vmem:[#allocation212_spill] sm:$0xff] }
 0x7d1   :  { %17518 = vst [vmem:[#allocation190_spill] sm:$0xff] %v13053_v56  ;;  %17519 = vst [vmem:[#allocation191_spill] sm:$0xff] %v13055_v41  ;;  %5096 = vperm.xlu0 %8601, %v3621_v43  }
 0x7d4   :  { %v13061_v62 = vpop.permute.xlu1 %4907  ;;  %5093 = vperm.xlu1 %8602, %v3620_v35   ;;  %v13063_v7 = vpop.permute.xlu0 %4916  ;;  %v3627_v35 = vmul.f32 %v12311_v59, %v17529_v46  ;;  %v3628_v46 = vmul.f32 %v12305_v48, %v17536_v6  ;;  %v17537_v59 = vld [vmem:[#allocation211_spill] sm:$0xff]  ;;  %v17544_v6 = vld [vmem:[#allocation214_spill] sm:$0xff] }
 0x7d5   :  { %17522 = vst [vmem:[#allocation192_spill] sm:$0xff] %v13061_v62  ;;  %17523 = vst [vmem:[#allocation193_spill] sm:$0xff] %v13063_v7  ;;  %5102 = vperm.xlu0 %8601, %v3623_v51  }
 0x7d8   :  { %v13069_v41 = vpop.permute.xlu1 %4913  ;;  %5099 = vperm.xlu1 %8602, %v3622_v60   ;;  %v13071_v43 = vpop.permute.xlu0 %4922 }
 0x7d9   :  { %17526 = vst [vmem:[#allocation194_spill] sm:$0xff] %v13069_v41  ;;  %17527 = vst [vmem:[#allocation195_spill] sm:$0xff] %v13071_v43  ;;  %5108 = vperm.xlu0 %8601, %v3625_v57   ;;  %v17533_v41 = vld [vmem:[#allocation209_spill] sm:$0xff] }
 0x7da   :  { %v3629_v60 = vmul.f32 %v12319_v58, %v17533_v41  ;;  %v3630_v41 = vmul.f32 %v12313_v61, %v17540_v2  ;;  %v17541_v58 = vld [vmem:[#allocation213_spill] sm:$0xff]  ;;  %v17549_v2 = vld [vmem:[#allocation216_spill] sm:$0xff] }
 0x7db   :  { %v17551_v61 = vld [vmem:[#allocation217_spill] sm:$0xff] }
 0x7dc   :  { %v13077_v7 = vpop.permute.xlu1 %4919  ;;  %5105 = vperm.xlu1 %8602, %v3624_v13   ;;  %v13079_v51 = vpop.permute.xlu0 %4928  ;;  %v3631_v13 = vmul.f32 %v12327_v25, %v17537_v59  ;;  %v3632_v59 = vmul.f32 %v12321_v30, %v17544_v6  ;;  %v17545_v25 = vld [vmem:[#allocation215_spill] sm:$0xff]  ;;  %v17555_v6 = vld [vmem:[#allocation218_spill] sm:$0xff] }
 0x7dd   :  { %17530 = vst [vmem:[#allocation196_spill] sm:$0xff] %v13077_v7  ;;  %17531 = vst [vmem:[#allocation197_spill] sm:$0xff] %v13079_v51  ;;  %5114 = vperm.xlu0 %8601, %v3627_v35   ;;  %v17557_v30 = vld [vmem:[#allocation219_spill] sm:$0xff] }
 0x7e0   :  { %v13085_v43 = vpop.permute.xlu1 %4925  ;;  %5111 = vperm.xlu1 %8602, %v3626_v4   ;;  %v13087_v57 = vpop.permute.xlu0 %4934  ;;  %v3633_v4 = vmul.f32 %v12335_v16, %v17541_v58  ;;  %v17550_v58 = vld [vmem:[#allocation19_spill] sm:$0xff] }
 0x7e1   :  { %17534 = vst [vmem:[#allocation198_spill] sm:$0xff] %v13085_v43  ;;  %17535 = vst [vmem:[#allocation199_spill] sm:$0xff] %v13087_v57  ;;  %5120 = vperm.xlu0 %8601, %v3629_v60   ;;  %v3634_v16 = vmul.f32 %v17550_v58, %v17549_v2  ;;  %v17561_v2 = vld [vmem:[#allocation220_spill] sm:$0xff] }
 0x7e4   :  { %v13093_v51 = vpop.permute.xlu1 %4931  ;;  %5117 = vperm.xlu1 %8602, %v3628_v46   ;;  %v13095_v35 = vpop.permute.xlu0 %4940  ;;  %v17546_v46 = vld [vmem:[#allocation22_spill] sm:$0xff] }
 0x7e5   :  { %17538 = vst [vmem:[#allocation200_spill] sm:$0xff] %v13093_v51  ;;  %17539 = vst [vmem:[#allocation201_spill] sm:$0xff] %v13095_v35  ;;  %5126 = vperm.xlu0 %8601, %v3631_v13   ;;  %v3635_v51 = vmul.f32 %v17546_v46, %v17545_v25  ;;  %v17556_v25 = vld [vmem:[#allocation21_spill] sm:$0xff] }
 0x7e6   :  { %v3636_v46 = vmul.f32 %v17556_v25, %v17555_v6  ;;  %v17567_v6 = vld [vmem:[#allocation222_spill] sm:$0xff]  ;;  %v18013_v25 = vld [vmem:[#allocation373_spill] sm:$0xff] }
 0x7e8   :  { %v13101_v57 = vpop.permute.xlu1 %4937  ;;  %5123 = vperm.xlu1 %8602, %v3630_v41   ;;  %v13103_v60 = vpop.permute.xlu0 %4946  ;;  %v17552_v41 = vld [vmem:[#allocation24_spill] sm:$0xff] }
 0x7e9   :  { %17542 = vst [vmem:[#allocation202_spill] sm:$0xff] %v13101_v57  ;;  %17543 = vst [vmem:[#allocation203_spill] sm:$0xff] %v13103_v60  ;;  %5132 = vperm.xlu0 %8601, %v3633_v4   ;;  %v3637_v57 = vmul.f32 %v17552_v41, %v17551_v61  ;;  %v17562_v61 = vld [vmem:[#allocation23_spill] sm:$0xff] }
 0x7ea   :  { %v3638_v58 = vmul.f32 %v17562_v61, %v17561_v2  ;;  %v17573_v2 = vld [vmem:[#allocation224_spill] sm:$0xff] }
 0x7ec   :  { %v13109_v35 = vpop.permute.xlu1 %4943  ;;  %5129 = vperm.xlu1 %8602, %v3632_v59   ;;  %v13111_v13 = vpop.permute.xlu0 %4952  ;;  %v17558_v59 = vld [vmem:[#allocation26_spill] sm:$0xff] }
 0x7ed   :  { %17547 = vst [vmem:[#allocation204_spill] sm:$0xff] %v13109_v35  ;;  %17548 = vst [vmem:[#allocation205_spill] sm:$0xff] %v13111_v13  ;;  %5138 = vperm.xlu0 %8601, %v3635_v51   ;;  %v3639_v35 = vmul.f32 %v17558_v59, %v17557_v30  ;;  %v17568_v30 = vld [vmem:[#allocation25_spill] sm:$0xff] }
 0x7ee   :  { %v3640_v43 = vmul.f32 %v17568_v30, %v17567_v6  ;;  %v17579_v6 = vld [vmem:[#allocation226_spill] sm:$0xff] }
 0x7f0   :  { %v13117_v60 = vpop.permute.xlu1 %4949  ;;  %5135 = vperm.xlu1 %8602, %v3634_v16   ;;  %v13119_v4 = vpop.permute.xlu0 %4958  ;;  %v17564_v16 = vld [vmem:[#allocation28_spill] sm:$0xff] }
 0x7f1   :  { %17553 = vst [vmem:[#allocation206_spill] sm:$0xff] %v13117_v60  ;;  %17554 = vst [vmem:[#allocation207_spill] sm:$0xff] %v13119_v4  ;;  %5144 = vperm.xlu0 %8601, %v3637_v57   ;;  %v17563_v60 = vld [vmem:[#allocation221_spill] sm:$0xff] }
 0x7f2   :  { %v3641_v48 = vmul.f32 %v17564_v16, %v17563_v60  ;;  %v17574_v60 = vld [vmem:[#allocation27_spill] sm:$0xff] }
 0x7f3   :  { %v3642_v16 = vmul.f32 %v17574_v60, %v17573_v2  ;;  %v17585_v2 = vld [vmem:[#allocation228_spill] sm:$0xff] }
 0x7f4   :  { %v13125_v13 = vpop.permute.xlu1 %4955  ;;  %5141 = vperm.xlu1 %8602, %v3636_v46   ;;  %v13127_v51 = vpop.permute.xlu0 %4964  ;;  %v17570_v46 = vld [vmem:[#allocation30_spill] sm:$0xff] }
 0x7f5   :  { %17559 = vst [vmem:[#allocation208_spill] sm:$0xff] %v13125_v13  ;;  %17560 = vst [vmem:[#allocation209_spill] sm:$0xff] %v13127_v51  ;;  %5150 = vperm.xlu0 %8601, %v3639_v35   ;;  %v17569_v13 = vld [vmem:[#allocation223_spill] sm:$0xff] }
 0x7f6   :  { %v3643_v7 = vmul.f32 %v17570_v46, %v17569_v13  ;;  %v17580_v13 = vld [vmem:[#allocation29_spill] sm:$0xff] }
 0x7f7   :  { %v3644_v46 = vmul.f32 %v17580_v13, %v17579_v6  ;;  %v17591_v6 = vld [vmem:[#allocation230_spill] sm:$0xff] }
 0x7f8   :  { %v13133_v4 = vpop.permute.xlu1 %4961  ;;  %5147 = vperm.xlu1 %8602, %v3638_v58   ;;  %v13135_v57 = vpop.permute.xlu0 %4970  ;;  %v17576_v58 = vld [vmem:[#allocation32_spill] sm:$0xff] }
 0x7f9   :  { %17565 = vst [vmem:[#allocation210_spill] sm:$0xff] %v13133_v4  ;;  %17566 = vst [vmem:[#allocation211_spill] sm:$0xff] %v13135_v57  ;;  %5156 = vperm.xlu0 %8601, %v3641_v48   ;;  %v17575_v4 = vld [vmem:[#allocation225_spill] sm:$0xff] }
 0x7fa   :  { %v3645_v34 = vmul.f32 %v17576_v58, %v17575_v4  ;;  %v17586_v4 = vld [vmem:[#allocation31_spill] sm:$0xff] }
 0x7fb   :  { %v3646_v58 = vmul.f32 %v17586_v4, %v17585_v2  ;;  %v17597_v2 = vld [vmem:[#allocation232_spill] sm:$0xff] }
 0x7fc   :  { %v13141_v51 = vpop.permute.xlu1 %4967  ;;  %5153 = vperm.xlu1 %8602, %v3640_v43   ;;  %v13143_v35 = vpop.permute.xlu0 %4976  ;;  %v17582_v43 = vld [vmem:[#allocation34_spill] sm:$0xff] }
 0x7fd   :  { %17571 = vst [vmem:[#allocation212_spill] sm:$0xff] %v13141_v51  ;;  %17572 = vst [vmem:[#allocation213_spill] sm:$0xff] %v13143_v35  ;;  %5162 = vperm.xlu0 %8601, %v3643_v7   ;;  %v17581_v51 = vld [vmem:[#allocation227_spill] sm:$0xff] }
 0x7fe   :  { %v3647_v30 = vmul.f32 %v17582_v43, %v17581_v51  ;;  %v17592_v51 = vld [vmem:[#allocation33_spill] sm:$0xff] }
 0x7ff   :  { %v3648_v43 = vmul.f32 %v17592_v51, %v17591_v6  ;;  %v17603_v6 = vld [vmem:[#allocation234_spill] sm:$0xff] }
 0x800   :  { %v13149_v57 = vpop.permute.xlu1 %4973  ;;  %5159 = vperm.xlu1 %8602, %v3642_v16   ;;  %v13151_v48 = vpop.permute.xlu0 %4982  ;;  %v17588_v16 = vld [vmem:[#allocation36_spill] sm:$0xff] }
 0x801   :  { %17577 = vst [vmem:[#allocation214_spill] sm:$0xff] %v13149_v57  ;;  %17578 = vst [vmem:[#allocation215_spill] sm:$0xff] %v13151_v48  ;;  %5168 = vperm.xlu0 %8601, %v3645_v34   ;;  %v17587_v57 = vld [vmem:[#allocation229_spill] sm:$0xff] }
 0x802   :  { %v3649_v60 = vmul.f32 %v17588_v16, %v17587_v57  ;;  %v17598_v57 = vld [vmem:[#allocation35_spill] sm:$0xff] }
 0x803   :  { %v3650_v16 = vmul.f32 %v17598_v57, %v17597_v2  ;;  %v17609_v2 = vld [vmem:[#allocation236_spill] sm:$0xff] }
 0x804   :  { %v13157_v35 = vpop.permute.xlu1 %4979  ;;  %5165 = vperm.xlu1 %8602, %v3644_v46   ;;  %v13159_v7 = vpop.permute.xlu0 %4988  ;;  %v17594_v46 = vld [vmem:[#allocation37_spill] sm:$0xff] }
 0x805   :  { %17583 = vst [vmem:[#allocation216_spill] sm:$0xff] %v13157_v35  ;;  %17584 = vst [vmem:[#allocation217_spill] sm:$0xff] %v13159_v7  ;;  %5174 = vperm.xlu0 %8601, %v3647_v30   ;;  %v17593_v35 = vld [vmem:[#allocation231_spill] sm:$0xff] }
 0x806   :  { %v3651_v13 = vmul.f32 %v17594_v46, %v17593_v35  ;;  %v17604_v35 = vld [vmem:[#allocation491_spill] sm:$0xff] }
 0x807   :  { %v3652_v46 = vmul.f32 %v17604_v35, %v17603_v6  ;;  %v17615_v6 = vld [vmem:[#allocation238_spill] sm:$0xff] }
 0x808   :  { %v13165_v48 = vpop.permute.xlu1 %4985  ;;  %5171 = vperm.xlu1 %8602, %v3646_v58   ;;  %v13167_v34 = vpop.permute.xlu0 %4994  ;;  %v17600_v58 = vld [vmem:[#allocation490_spill] sm:$0xff] }
 0x809   :  { %17589 = vst [vmem:[#allocation218_spill] sm:$0xff] %v13165_v48  ;;  %17590 = vst [vmem:[#allocation219_spill] sm:$0xff] %v13167_v34  ;;  %5180 = vperm.xlu0 %8601, %v3649_v60   ;;  %v17599_v48 = vld [vmem:[#allocation233_spill] sm:$0xff] }
 0x80a   :  { %v3653_v4 = vmul.f32 %v17600_v58, %v17599_v48  ;;  %v17610_v48 = vld [vmem:[#allocation492_spill] sm:$0xff] }
 0x80b   :  { %v3654_v58 = vmul.f32 %v17610_v48, %v17609_v2  ;;  %v17621_v2 = vld [vmem:[#allocation240_spill] sm:$0xff] }
 0x80c   :  { %v13173_v7 = vpop.permute.xlu1 %4991  ;;  %5177 = vperm.xlu1 %8602, %v3648_v43   ;;  %v13175_v30 = vpop.permute.xlu0 %5000  ;;  %v17606_v43 = vld [vmem:[#allocation494_spill] sm:$0xff] }
 0x80d   :  { %17595 = vst [vmem:[#allocation220_spill] sm:$0xff] %v13173_v7  ;;  %17596 = vst [vmem:[#allocation221_spill] sm:$0xff] %v13175_v30  ;;  %5186 = vperm.xlu0 %8601, %v3651_v13   ;;  %v17605_v7 = vld [vmem:[#allocation235_spill] sm:$0xff] }
 0x80e   :  { %v3655_v51 = vmul.f32 %v17606_v43, %v17605_v7  ;;  %v17616_v7 = vld [vmem:[#allocation493_spill] sm:$0xff]  ;;  %v17617_v43 = vld [vmem:[#allocation239_spill] sm:$0xff] }
 0x80f   :  { %v3656_v35 = vmul.f32 %v17616_v7, %v17615_v6  ;;  %v17627_v6 = vld [vmem:[#allocation242_spill] sm:$0xff]  ;;  %v17628_v7 = vld [vmem:[#allocation497_spill] sm:$0xff] }
 0x810   :  { %v13181_v34 = vpop.permute.xlu1 %4997  ;;  %5183 = vperm.xlu1 %8602, %v3650_v16   ;;  %v13183_v60 = vpop.permute.xlu0 %5006  ;;  %v17612_v16 = vld [vmem:[#allocation496_spill] sm:$0xff] }
 0x811   :  { %17601 = vst [vmem:[#allocation222_spill] sm:$0xff] %v13181_v34  ;;  %17602 = vst [vmem:[#allocation223_spill] sm:$0xff] %v13183_v60  ;;  %5192 = vperm.xlu0 %8601, %v3653_v4   ;;  %v17611_v34 = vld [vmem:[#allocation237_spill] sm:$0xff] }
 0x812   :  { %v3657_v57 = vmul.f32 %v17612_v16, %v17611_v34  ;;  %v17622_v34 = vld [vmem:[#allocation495_spill] sm:$0xff]  ;;  %v17623_v16 = vld [vmem:[#allocation241_spill] sm:$0xff] }
 0x813   :  { %v3658_v48 = vmul.f32 %v17622_v34, %v17621_v2  ;;  %v17633_v2 = vld [vmem:[#allocation244_spill] sm:$0xff]  ;;  %v17634_v34 = vld [vmem:[#allocation499_spill] sm:$0xff] }
 0x814   :  { %v13189_v30 = vpop.permute.xlu1 %5003  ;;  %5189 = vperm.xlu1 %8602, %v3652_v46   ;;  %v13191_v13 = vpop.permute.xlu0 %5012  ;;  %v17618_v46 = vld [vmem:[#allocation498_spill] sm:$0xff] }
 0x815   :  { %17607 = vst [vmem:[#allocation224_spill] sm:$0xff] %v13189_v30  ;;  %17608 = vst [vmem:[#allocation225_spill] sm:$0xff] %v13191_v13  ;;  %5198 = vperm.xlu0 %8601, %v3655_v51   ;;  %v3659_v30 = vmul.f32 %v17618_v46, %v17617_v43  ;;  %v3660_v43 = vmul.f32 %v17628_v7, %v17627_v6  ;;  %v17629_v46 = vld [vmem:[#allocation243_spill] sm:$0xff]  ;;  %v17639_v6 = vld [vmem:[#allocation246_spill] sm:$0xff] }
 0x816   :  { %v17640_v7 = vld [vmem:[#allocation501_spill] sm:$0xff] }
 0x818   :  { %v13197_v60 = vpop.permute.xlu1 %5009  ;;  %5195 = vperm.xlu1 %8602, %v3654_v58   ;;  %v13199_v4 = vpop.permute.xlu0 %5018  ;;  %v17624_v58 = vld [vmem:[#allocation500_spill] sm:$0xff] }
 0x819   :  { %17613 = vst [vmem:[#allocation226_spill] sm:$0xff] %v13197_v60  ;;  %17614 = vst [vmem:[#allocation227_spill] sm:$0xff] %v13199_v4  ;;  %5204 = vperm.xlu0 %8601, %v3657_v57   ;;  %v3661_v60 = vmul.f32 %v17624_v58, %v17623_v16  ;;  %v3662_v16 = vmul.f32 %v17634_v34, %v17633_v2  ;;  %v17635_v58 = vld [vmem:[#allocation245_spill] sm:$0xff]  ;;  %v17645_v2 = vld [vmem:[#allocation248_spill] sm:$0xff] }
 0x81a   :  { %v17646_v34 = vld [vmem:[#allocation503_spill] sm:$0xff] }
 0x81c   :  { %v13205_v13 = vpop.permute.xlu1 %5015  ;;  %5201 = vperm.xlu1 %8602, %v3656_v35   ;;  %v13207_v51 = vpop.permute.xlu0 %5024  ;;  %v17630_v35 = vld [vmem:[#allocation502_spill] sm:$0xff] }
 0x81d   :  { %17619 = vst [vmem:[#allocation228_spill] sm:$0xff] %v13205_v13  ;;  %17620 = vst [vmem:[#allocation229_spill] sm:$0xff] %v13207_v51  ;;  %5210 = vperm.xlu0 %8601, %v3659_v30   ;;  %v3663_v13 = vmul.f32 %v17630_v35, %v17629_v46  ;;  %v3664_v46 = vmul.f32 %v17640_v7, %v17639_v6  ;;  %v17641_v35 = vld [vmem:[#allocation247_spill] sm:$0xff]  ;;  %v17651_v6 = vld [vmem:[#allocation250_spill] sm:$0xff] }
 0x81e   :  { %v17652_v7 = vld [vmem:[#allocation505_spill] sm:$0xff] }
 0x820   :  { %v13213_v4 = vpop.permute.xlu1 %5021  ;;  %5207 = vperm.xlu1 %8602, %v3658_v48   ;;  %v13215_v57 = vpop.permute.xlu0 %5030  ;;  %v17636_v48 = vld [vmem:[#allocation504_spill] sm:$0xff] }
 0x821   :  { %17625 = vst [vmem:[#allocation230_spill] sm:$0xff] %v13213_v4  ;;  %17626 = vst [vmem:[#allocation231_spill] sm:$0xff] %v13215_v57  ;;  %5216 = vperm.xlu0 %8601, %v3661_v60   ;;  %v3665_v4 = vmul.f32 %v17636_v48, %v17635_v58  ;;  %v3666_v58 = vmul.f32 %v17646_v34, %v17645_v2  ;;  %v17647_v48 = vld [vmem:[#allocation249_spill] sm:$0xff]  ;;  %v17657_v2 = vld [vmem:[#allocation252_spill] sm:$0xff] }
 0x822   :  { %v17658_v34 = vld [vmem:[#allocation507_spill] sm:$0xff] }
 0x824   :  { %v13221_v51 = vpop.permute.xlu1 %5027  ;;  %5213 = vperm.xlu1 %8602, %v3660_v43   ;;  %v13223_v30 = vpop.permute.xlu0 %5036  ;;  %v17642_v43 = vld [vmem:[#allocation506_spill] sm:$0xff] }
 0x825   :  { %17631 = vst [vmem:[#allocation232_spill] sm:$0xff] %v13221_v51  ;;  %17632 = vst [vmem:[#allocation233_spill] sm:$0xff] %v13223_v30  ;;  %5222 = vperm.xlu0 %8601, %v3663_v13   ;;  %v3667_v51 = vmul.f32 %v17642_v43, %v17641_v35  ;;  %v3668_v35 = vmul.f32 %v17652_v7, %v17651_v6  ;;  %v17653_v43 = vld [vmem:[#allocation251_spill] sm:$0xff]  ;;  %v17663_v6 = vld [vmem:[#allocation254_spill] sm:$0xff] }
 0x826   :  { %v17664_v7 = vld [vmem:[#allocation509_spill] sm:$0xff] }
 0x828   :  { %v13229_v57 = vpop.permute.xlu1 %5033  ;;  %5219 = vperm.xlu1 %8602, %v3662_v16   ;;  %v13231_v60 = vpop.permute.xlu0 %5042  ;;  %v17648_v16 = vld [vmem:[#allocation508_spill] sm:$0xff] }
 0x829   :  { %17637 = vst [vmem:[#allocation490_spill] sm:$0xff] %v13229_v57  ;;  %17638 = vst [vmem:[#allocation234_spill] sm:$0xff] %v13231_v60  ;;  %5228 = vperm.xlu0 %8601, %v3665_v4   ;;  %v3669_v57 = vmul.f32 %v17648_v16, %v17647_v48  ;;  %v3670_v48 = vmul.f32 %v17658_v34, %v17657_v2  ;;  %v17659_v16 = vld [vmem:[#allocation253_spill] sm:$0xff]  ;;  %v17669_v2 = vld [vmem:[#allocation256_spill] sm:$0xff] }
 0x82a   :  { %v17670_v34 = vld [vmem:[#allocation511_spill] sm:$0xff] }
 0x82c   :  { %v13237_v30 = vpop.permute.xlu1 %5039  ;;  %5225 = vperm.xlu1 %8602, %v3664_v46   ;;  %v13239_v13 = vpop.permute.xlu0 %5048  ;;  %v17654_v46 = vld [vmem:[#allocation510_spill] sm:$0xff] }
 0x82d   :  { %17643 = vst [vmem:[#allocation491_spill] sm:$0xff] %v13237_v30  ;;  %17644 = vst [vmem:[#allocation235_spill] sm:$0xff] %v13239_v13  ;;  %5234 = vperm.xlu0 %8601, %v3667_v51   ;;  %v3671_v30 = vmul.f32 %v17654_v46, %v17653_v43  ;;  %v3672_v43 = vmul.f32 %v17664_v7, %v17663_v6  ;;  %v17665_v46 = vld [vmem:[#allocation255_spill] sm:$0xff]  ;;  %v17675_v6 = vld [vmem:[#allocation258_spill] sm:$0xff] }
 0x82e   :  { %v17676_v7 = vld [vmem:[#allocation513_spill] sm:$0xff] }
 0x830   :  { %v13245_v60 = vpop.permute.xlu1 %5045  ;;  %5231 = vperm.xlu1 %8602, %v3666_v58   ;;  %v13247_v4 = vpop.permute.xlu0 %5054  ;;  %v17660_v58 = vld [vmem:[#allocation512_spill] sm:$0xff] }
 0x831   :  { %17649 = vst [vmem:[#allocation494_spill] sm:$0xff] %v13245_v60  ;;  %17650 = vst [vmem:[#allocation236_spill] sm:$0xff] %v13247_v4  ;;  %5240 = vperm.xlu0 %8601, %v3669_v57   ;;  %v3673_v60 = vmul.f32 %v17660_v58, %v17659_v16  ;;  %v3674_v16 = vmul.f32 %v17670_v34, %v17669_v2  ;;  %v17671_v58 = vld [vmem:[#allocation257_spill] sm:$0xff]  ;;  %v17681_v2 = vld [vmem:[#allocation260_spill] sm:$0xff] }
 0x832   :  { %v17682_v34 = vld [vmem:[#allocation515_spill] sm:$0xff] }
 0x834   :  { %v13253_v13 = vpop.permute.xlu1 %5051  ;;  %5237 = vperm.xlu1 %8602, %v3668_v35   ;;  %v13255_v51 = vpop.permute.xlu0 %5060  ;;  %v17666_v35 = vld [vmem:[#allocation514_spill] sm:$0xff] }
 0x835   :  { %17655 = vst [vmem:[#allocation492_spill] sm:$0xff] %v13253_v13  ;;  %17656 = vst [vmem:[#allocation237_spill] sm:$0xff] %v13255_v51  ;;  %5246 = vperm.xlu0 %8601, %v3671_v30   ;;  %v3675_v13 = vmul.f32 %v17666_v35, %v17665_v46  ;;  %v3676_v46 = vmul.f32 %v17676_v7, %v17675_v6  ;;  %v17677_v35 = vld [vmem:[#allocation259_spill] sm:$0xff]  ;;  %v17687_v6 = vld [vmem:[#allocation262_spill] sm:$0xff] }
 0x836   :  { %v17688_v7 = vld [vmem:[#allocation517_spill] sm:$0xff] }
 0x838   :  { %v13261_v4 = vpop.permute.xlu1 %5057  ;;  %5243 = vperm.xlu1 %8602, %v3670_v48   ;;  %v13263_v57 = vpop.permute.xlu0 %5066  ;;  %v17672_v48 = vld [vmem:[#allocation516_spill] sm:$0xff] }
 0x839   :  { %17661 = vst [vmem:[#allocation496_spill] sm:$0xff] %v13261_v4  ;;  %17662 = vst [vmem:[#allocation238_spill] sm:$0xff] %v13263_v57  ;;  %5252 = vperm.xlu0 %8601, %v3673_v60   ;;  %v3677_v4 = vmul.f32 %v17672_v48, %v17671_v58  ;;  %v3678_v58 = vmul.f32 %v17682_v34, %v17681_v2  ;;  %v17683_v48 = vld [vmem:[#allocation261_spill] sm:$0xff]  ;;  %v17693_v2 = vld [vmem:[#allocation264_spill] sm:$0xff] }
 0x83a   :  { %v17694_v34 = vld [vmem:[#allocation519_spill] sm:$0xff] }
 0x83c   :  { %v13269_v51 = vpop.permute.xlu1 %5063  ;;  %5249 = vperm.xlu1 %8602, %v3672_v43   ;;  %v13271_v30 = vpop.permute.xlu0 %5072  ;;  %v17678_v43 = vld [vmem:[#allocation518_spill] sm:$0xff] }
 0x83d   :  { %17667 = vst [vmem:[#allocation493_spill] sm:$0xff] %v13269_v51  ;;  %17668 = vst [vmem:[#allocation239_spill] sm:$0xff] %v13271_v30  ;;  %5258 = vperm.xlu0 %8601, %v3675_v13   ;;  %v3679_v51 = vmul.f32 %v17678_v43, %v17677_v35  ;;  %v3680_v35 = vmul.f32 %v17688_v7, %v17687_v6  ;;  %v17689_v43 = vld [vmem:[#allocation263_spill] sm:$0xff]  ;;  %v17699_v6 = vld [vmem:[#allocation266_spill] sm:$0xff] }
 0x83e   :  { %v17700_v7 = vld [vmem:[#allocation521_spill] sm:$0xff] }
 0x840   :  { %v13277_v57 = vpop.permute.xlu1 %5069  ;;  %5255 = vperm.xlu1 %8602, %v3674_v16   ;;  %v13279_v60 = vpop.permute.xlu0 %5078  ;;  %v17684_v16 = vld [vmem:[#allocation520_spill] sm:$0xff] }
 0x841   :  { %17673 = vst [vmem:[#allocation498_spill] sm:$0xff] %v13277_v57  ;;  %17674 = vst [vmem:[#allocation240_spill] sm:$0xff] %v13279_v60  ;;  %5264 = vperm.xlu0 %8601, %v3677_v4   ;;  %v3681_v57 = vmul.f32 %v17684_v16, %v17683_v48  ;;  %v3682_v48 = vmul.f32 %v17694_v34, %v17693_v2  ;;  %v17695_v16 = vld [vmem:[#allocation265_spill] sm:$0xff]  ;;  %v17705_v2 = vld [vmem:[#allocation268_spill] sm:$0xff] }
 0x842   :  { %v17706_v34 = vld [vmem:[#allocation523_spill] sm:$0xff] }
 0x844   :  { %v13285_v30 = vpop.permute.xlu1 %5075  ;;  %5261 = vperm.xlu1 %8602, %v3676_v46   ;;  %v13287_v13 = vpop.permute.xlu0 %5084  ;;  %v17690_v46 = vld [vmem:[#allocation522_spill] sm:$0xff] }
 0x845   :  { %17679 = vst [vmem:[#allocation495_spill] sm:$0xff] %v13285_v30  ;;  %17680 = vst [vmem:[#allocation241_spill] sm:$0xff] %v13287_v13  ;;  %5270 = vperm.xlu0 %8601, %v3679_v51   ;;  %v3683_v30 = vmul.f32 %v17690_v46, %v17689_v43  ;;  %v3684_v43 = vmul.f32 %v17700_v7, %v17699_v6  ;;  %v17701_v46 = vld [vmem:[#allocation267_spill] sm:$0xff]  ;;  %v17711_v6 = vld [vmem:[#allocation270_spill] sm:$0xff] }
 0x846   :  { %v17712_v7 = vld [vmem:[#allocation525_spill] sm:$0xff] }
 0x848   :  { %v13293_v60 = vpop.permute.xlu1 %5081  ;;  %5267 = vperm.xlu1 %8602, %v3678_v58   ;;  %v13295_v4 = vpop.permute.xlu0 %5090  ;;  %v17696_v58 = vld [vmem:[#allocation524_spill] sm:$0xff] }
 0x849   :  { %17685 = vst [vmem:[#allocation500_spill] sm:$0xff] %v13293_v60  ;;  %17686 = vst [vmem:[#allocation242_spill] sm:$0xff] %v13295_v4  ;;  %5276 = vperm.xlu0 %8601, %v3681_v57   ;;  %v3685_v60 = vmul.f32 %v17696_v58, %v17695_v16  ;;  %v3686_v16 = vmul.f32 %v17706_v34, %v17705_v2  ;;  %v17707_v58 = vld [vmem:[#allocation269_spill] sm:$0xff]  ;;  %v17717_v2 = vld [vmem:[#allocation272_spill] sm:$0xff] }
 0x84a   :  { %v17718_v34 = vld [vmem:[#allocation527_spill] sm:$0xff] }
 0x84c   :  { %v13301_v13 = vpop.permute.xlu1 %5087  ;;  %5273 = vperm.xlu1 %8602, %v3680_v35   ;;  %v13303_v51 = vpop.permute.xlu0 %5096  ;;  %v17702_v35 = vld [vmem:[#allocation526_spill] sm:$0xff] }
 0x84d   :  { %17691 = vst [vmem:[#allocation497_spill] sm:$0xff] %v13301_v13  ;;  %17692 = vst [vmem:[#allocation243_spill] sm:$0xff] %v13303_v51  ;;  %5282 = vperm.xlu0 %8601, %v3683_v30   ;;  %v3687_v13 = vmul.f32 %v17702_v35, %v17701_v46  ;;  %v3688_v46 = vmul.f32 %v17712_v7, %v17711_v6  ;;  %v17713_v35 = vld [vmem:[#allocation271_spill] sm:$0xff]  ;;  %v17723_v6 = vld [vmem:[#allocation274_spill] sm:$0xff] }
 0x84e   :  { %v17724_v7 = vld [vmem:[#allocation529_spill] sm:$0xff] }
 0x850   :  { %v13309_v4 = vpop.permute.xlu1 %5093  ;;  %5279 = vperm.xlu1 %8602, %v3682_v48   ;;  %v13311_v57 = vpop.permute.xlu0 %5102  ;;  %v17708_v48 = vld [vmem:[#allocation528_spill] sm:$0xff] }
 0x851   :  { %17697 = vst [vmem:[#allocation502_spill] sm:$0xff] %v13309_v4  ;;  %17698 = vst [vmem:[#allocation244_spill] sm:$0xff] %v13311_v57  ;;  %5288 = vperm.xlu0 %8601, %v3685_v60   ;;  %v3689_v4 = vmul.f32 %v17708_v48, %v17707_v58  ;;  %v3690_v58 = vmul.f32 %v17718_v34, %v17717_v2  ;;  %v17719_v48 = vld [vmem:[#allocation273_spill] sm:$0xff]  ;;  %v17729_v2 = vld [vmem:[#allocation276_spill] sm:$0xff] }
 0x852   :  { %v17730_v34 = vld [vmem:[#allocation531_spill] sm:$0xff] }
 0x854   :  { %v13317_v51 = vpop.permute.xlu1 %5099  ;;  %5285 = vperm.xlu1 %8602, %v3684_v43   ;;  %v13319_v30 = vpop.permute.xlu0 %5108  ;;  %v17714_v43 = vld [vmem:[#allocation530_spill] sm:$0xff] }
 0x855   :  { %17703 = vst [vmem:[#allocation499_spill] sm:$0xff] %v13317_v51  ;;  %17704 = vst [vmem:[#allocation245_spill] sm:$0xff] %v13319_v30  ;;  %5294 = vperm.xlu0 %8601, %v3687_v13   ;;  %v3691_v51 = vmul.f32 %v17714_v43, %v17713_v35  ;;  %v3692_v35 = vmul.f32 %v17724_v7, %v17723_v6  ;;  %v17725_v43 = vld [vmem:[#allocation275_spill] sm:$0xff]  ;;  %v17735_v6 = vld [vmem:[#allocation278_spill] sm:$0xff] }
 0x856   :  { %v17736_v7 = vld [vmem:[#allocation533_spill] sm:$0xff] }
 0x858   :  { %v13325_v57 = vpop.permute.xlu1 %5105  ;;  %5291 = vperm.xlu1 %8602, %v3686_v16   ;;  %v13327_v60 = vpop.permute.xlu0 %5114  ;;  %v17720_v16 = vld [vmem:[#allocation532_spill] sm:$0xff] }
 0x859   :  { %17709 = vst [vmem:[#allocation504_spill] sm:$0xff] %v13325_v57  ;;  %17710 = vst [vmem:[#allocation246_spill] sm:$0xff] %v13327_v60  ;;  %5300 = vperm.xlu0 %8601, %v3689_v4   ;;  %v3693_v57 = vmul.f32 %v17720_v16, %v17719_v48  ;;  %v3694_v48 = vmul.f32 %v17730_v34, %v17729_v2  ;;  %v17731_v16 = vld [vmem:[#allocation277_spill] sm:$0xff]  ;;  %v17741_v2 = vld [vmem:[#allocation280_spill] sm:$0xff] }
 0x85a   :  { %v17742_v34 = vld [vmem:[#allocation535_spill] sm:$0xff] }
 0x85c   :  { %v13333_v30 = vpop.permute.xlu1 %5111  ;;  %5297 = vperm.xlu1 %8602, %v3688_v46   ;;  %v13335_v13 = vpop.permute.xlu0 %5120  ;;  %v17726_v46 = vld [vmem:[#allocation534_spill] sm:$0xff] }
 0x85d   :  { %17715 = vst [vmem:[#allocation501_spill] sm:$0xff] %v13333_v30  ;;  %17716 = vst [vmem:[#allocation247_spill] sm:$0xff] %v13335_v13  ;;  %5306 = vperm.xlu0 %8601, %v3691_v51   ;;  %v3695_v30 = vmul.f32 %v17726_v46, %v17725_v43  ;;  %v3696_v43 = vmul.f32 %v17736_v7, %v17735_v6  ;;  %v17737_v46 = vld [vmem:[#allocation279_spill] sm:$0xff]  ;;  %v17747_v6 = vld [vmem:[#allocation282_spill] sm:$0xff] }
 0x85e   :  { %v17748_v7 = vld [vmem:[#allocation537_spill] sm:$0xff] }
 0x860   :  { %v13341_v60 = vpop.permute.xlu1 %5117  ;;  %5303 = vperm.xlu1 %8602, %v3690_v58   ;;  %v13343_v4 = vpop.permute.xlu0 %5126  ;;  %v17732_v58 = vld [vmem:[#allocation536_spill] sm:$0xff] }
 0x861   :  { %17721 = vst [vmem:[#allocation506_spill] sm:$0xff] %v13341_v60  ;;  %17722 = vst [vmem:[#allocation248_spill] sm:$0xff] %v13343_v4  ;;  %5312 = vperm.xlu0 %8601, %v3693_v57   ;;  %v3697_v60 = vmul.f32 %v17732_v58, %v17731_v16  ;;  %v3698_v16 = vmul.f32 %v17742_v34, %v17741_v2  ;;  %v17743_v58 = vld [vmem:[#allocation281_spill] sm:$0xff]  ;;  %v17753_v2 = vld [vmem:[#allocation284_spill] sm:$0xff] }
 0x862   :  { %v17754_v34 = vld [vmem:[#allocation539_spill] sm:$0xff] }
 0x864   :  { %v13349_v13 = vpop.permute.xlu1 %5123  ;;  %5309 = vperm.xlu1 %8602, %v3692_v35   ;;  %v13351_v51 = vpop.permute.xlu0 %5132  ;;  %v17738_v35 = vld [vmem:[#allocation538_spill] sm:$0xff] }
 0x865   :  { %17727 = vst [vmem:[#allocation503_spill] sm:$0xff] %v13349_v13  ;;  %17728 = vst [vmem:[#allocation249_spill] sm:$0xff] %v13351_v51  ;;  %5318 = vperm.xlu0 %8601, %v3695_v30   ;;  %v3699_v13 = vmul.f32 %v17738_v35, %v17737_v46  ;;  %v3700_v46 = vmul.f32 %v17748_v7, %v17747_v6  ;;  %v17749_v35 = vld [vmem:[#allocation283_spill] sm:$0xff]  ;;  %v17759_v6 = vld [vmem:[#allocation286_spill] sm:$0xff] }
 0x866   :  { %v17760_v7 = vld [vmem:[#allocation541_spill] sm:$0xff] }
 0x868   :  { %v13357_v4 = vpop.permute.xlu1 %5129  ;;  %5315 = vperm.xlu1 %8602, %v3694_v48   ;;  %v13359_v57 = vpop.permute.xlu0 %5138  ;;  %v17744_v48 = vld [vmem:[#allocation540_spill] sm:$0xff] }
 0x869   :  { %17733 = vst [vmem:[#allocation508_spill] sm:$0xff] %v13357_v4  ;;  %17734 = vst [vmem:[#allocation250_spill] sm:$0xff] %v13359_v57  ;;  %5324 = vperm.xlu0 %8601, %v3697_v60   ;;  %v3701_v4 = vmul.f32 %v17744_v48, %v17743_v58  ;;  %v3702_v58 = vmul.f32 %v17754_v34, %v17753_v2  ;;  %v17755_v48 = vld [vmem:[#allocation285_spill] sm:$0xff]  ;;  %v17765_v2 = vld [vmem:[#allocation288_spill] sm:$0xff] }
 0x86a   :  { %v17766_v34 = vld [vmem:[#allocation543_spill] sm:$0xff] }
 0x86c   :  { %v13365_v51 = vpop.permute.xlu1 %5135  ;;  %5321 = vperm.xlu1 %8602, %v3696_v43   ;;  %v13367_v30 = vpop.permute.xlu0 %5144  ;;  %v17750_v43 = vld [vmem:[#allocation542_spill] sm:$0xff] }
 0x86d   :  { %17739 = vst [vmem:[#allocation505_spill] sm:$0xff] %v13365_v51  ;;  %17740 = vst [vmem:[#allocation251_spill] sm:$0xff] %v13367_v30  ;;  %5330 = vperm.xlu0 %8601, %v3699_v13   ;;  %v3703_v51 = vmul.f32 %v17750_v43, %v17749_v35  ;;  %v3704_v35 = vmul.f32 %v17760_v7, %v17759_v6  ;;  %v17761_v43 = vld [vmem:[#allocation287_spill] sm:$0xff]  ;;  %v17771_v6 = vld [vmem:[#allocation290_spill] sm:$0xff] }
 0x86e   :  { %v17772_v7 = vld [vmem:[#allocation545_spill] sm:$0xff] }
 0x870   :  { %v13373_v57 = vpop.permute.xlu1 %5141  ;;  %5327 = vperm.xlu1 %8602, %v3698_v16   ;;  %v13375_v60 = vpop.permute.xlu0 %5150  ;;  %v17756_v16 = vld [vmem:[#allocation544_spill] sm:$0xff] }
 0x871   :  { %17745 = vst [vmem:[#allocation510_spill] sm:$0xff] %v13373_v57  ;;  %17746 = vst [vmem:[#allocation252_spill] sm:$0xff] %v13375_v60  ;;  %5336 = vperm.xlu0 %8601, %v3701_v4   ;;  %v3705_v57 = vmul.f32 %v17756_v16, %v17755_v48  ;;  %v3706_v48 = vmul.f32 %v17766_v34, %v17765_v2  ;;  %v17767_v16 = vld [vmem:[#allocation289_spill] sm:$0xff]  ;;  %v17777_v2 = vld [vmem:[#allocation292_spill] sm:$0xff] }
 0x872   :  { %v17778_v34 = vld [vmem:[#allocation547_spill] sm:$0xff] }
 0x874   :  { %v13381_v30 = vpop.permute.xlu1 %5147  ;;  %5333 = vperm.xlu1 %8602, %v3700_v46   ;;  %v13383_v13 = vpop.permute.xlu0 %5156  ;;  %v17762_v46 = vld [vmem:[#allocation546_spill] sm:$0xff] }
 0x875   :  { %17751 = vst [vmem:[#allocation507_spill] sm:$0xff] %v13381_v30  ;;  %17752 = vst [vmem:[#allocation253_spill] sm:$0xff] %v13383_v13  ;;  %5342 = vperm.xlu0 %8601, %v3703_v51   ;;  %v3707_v30 = vmul.f32 %v17762_v46, %v17761_v43  ;;  %v3708_v43 = vmul.f32 %v17772_v7, %v17771_v6  ;;  %v17773_v46 = vld [vmem:[#allocation291_spill] sm:$0xff]  ;;  %v17783_v6 = vld [vmem:[#allocation294_spill] sm:$0xff] }
 0x876   :  { %v17784_v7 = vld [vmem:[#allocation549_spill] sm:$0xff] }
 0x878   :  { %v13389_v60 = vpop.permute.xlu1 %5153  ;;  %5339 = vperm.xlu1 %8602, %v3702_v58   ;;  %v13391_v4 = vpop.permute.xlu0 %5162  ;;  %v17768_v58 = vld [vmem:[#allocation548_spill] sm:$0xff] }
 0x879   :  { %17757 = vst [vmem:[#allocation512_spill] sm:$0xff] %v13389_v60  ;;  %17758 = vst [vmem:[#allocation254_spill] sm:$0xff] %v13391_v4  ;;  %5348 = vperm.xlu0 %8601, %v3705_v57   ;;  %v3709_v60 = vmul.f32 %v17768_v58, %v17767_v16  ;;  %v3710_v16 = vmul.f32 %v17778_v34, %v17777_v2  ;;  %v17779_v58 = vld [vmem:[#allocation293_spill] sm:$0xff]  ;;  %v17789_v2 = vld [vmem:[#allocation296_spill] sm:$0xff] }
 0x87a   :  { %v17790_v34 = vld [vmem:[#allocation551_spill] sm:$0xff] }
 0x87c   :  { %v13397_v13 = vpop.permute.xlu1 %5159  ;;  %5345 = vperm.xlu1 %8602, %v3704_v35   ;;  %v13399_v51 = vpop.permute.xlu0 %5168  ;;  %v17774_v35 = vld [vmem:[#allocation550_spill] sm:$0xff] }
 0x87d   :  { %17763 = vst [vmem:[#allocation509_spill] sm:$0xff] %v13397_v13  ;;  %17764 = vst [vmem:[#allocation255_spill] sm:$0xff] %v13399_v51  ;;  %5354 = vperm.xlu0 %8601, %v3707_v30   ;;  %v3711_v13 = vmul.f32 %v17774_v35, %v17773_v46  ;;  %v3712_v46 = vmul.f32 %v17784_v7, %v17783_v6  ;;  %v17785_v35 = vld [vmem:[#allocation295_spill] sm:$0xff]  ;;  %v17795_v6 = vld [vmem:[#allocation298_spill] sm:$0xff] }
 0x87e   :  { %v17796_v7 = vld [vmem:[#allocation553_spill] sm:$0xff] }
 0x880   :  { %v13405_v4 = vpop.permute.xlu1 %5165  ;;  %5351 = vperm.xlu1 %8602, %v3706_v48   ;;  %v13407_v57 = vpop.permute.xlu0 %5174  ;;  %v17780_v48 = vld [vmem:[#allocation552_spill] sm:$0xff] }
 0x881   :  { %17769 = vst [vmem:[#allocation514_spill] sm:$0xff] %v13405_v4  ;;  %17770 = vst [vmem:[#allocation256_spill] sm:$0xff] %v13407_v57  ;;  %5360 = vperm.xlu0 %8601, %v3709_v60   ;;  %v3713_v4 = vmul.f32 %v17780_v48, %v17779_v58  ;;  %v3714_v58 = vmul.f32 %v17790_v34, %v17789_v2  ;;  %v17791_v48 = vld [vmem:[#allocation297_spill] sm:$0xff]  ;;  %v17801_v2 = vld [vmem:[#allocation300_spill] sm:$0xff] }
 0x882   :  { %v17802_v34 = vld [vmem:[#allocation555_spill] sm:$0xff] }
 0x884   :  { %v13413_v51 = vpop.permute.xlu1 %5171  ;;  %5357 = vperm.xlu1 %8602, %v3708_v43   ;;  %v13415_v30 = vpop.permute.xlu0 %5180  ;;  %v17786_v43 = vld [vmem:[#allocation554_spill] sm:$0xff] }
 0x885   :  { %17775 = vst [vmem:[#allocation511_spill] sm:$0xff] %v13413_v51  ;;  %17776 = vst [vmem:[#allocation257_spill] sm:$0xff] %v13415_v30  ;;  %5366 = vperm.xlu0 %8601, %v3711_v13   ;;  %v3715_v51 = vmul.f32 %v17786_v43, %v17785_v35  ;;  %v17797_v35 = vld [vmem:[#allocation299_spill] sm:$0xff]  ;;  %v17798_v43 = vld [vmem:[#allocation558_spill] sm:$0xff] }
 0x888   :  { %v13421_v57 = vpop.permute.xlu1 %5177  ;;  %5363 = vperm.xlu1 %8602, %v3710_v16   ;;  %v13423_v60 = vpop.permute.xlu0 %5186  ;;  %v17792_v16 = vld [vmem:[#allocation556_spill] sm:$0xff] }
 0x889   :  { %17781 = vst [vmem:[#allocation516_spill] sm:$0xff] %v13421_v57  ;;  %17782 = vst [vmem:[#allocation258_spill] sm:$0xff] %v13423_v60  ;;  %5372 = vperm.xlu0 %8601, %v3713_v4   ;;  %v3717_v57 = vmul.f32 %v17792_v16, %v17791_v48  ;;  %v17803_v48 = vld [vmem:[#allocation301_spill] sm:$0xff]  ;;  %v17804_v16 = vld [vmem:[#allocation560_spill] sm:$0xff] }
 0x88a   :  { %v3721_v62 = vmul.f32 %v17804_v16, %v17803_v48  ;;  %v17815_v48 = vld [vmem:[#allocation305_spill] sm:$0xff]  ;;  %v17816_v16 = vld [vmem:[#allocation564_spill] sm:$0xff] }
 0x88b   :  { %v3725_v61 = vmul.f32 %v17816_v16, %v17815_v48  ;;  %v17827_v48 = vld [vmem:[#allocation309_spill] sm:$0xff]  ;;  %v17828_v16 = vld [vmem:[#allocation568_spill] sm:$0xff] }
 0x88c   :  { %5369 = vperm.xlu1 %8602, %v3712_v46   ;;  %v13429_v13 = vpop.permute.xlu1 %5183  ;;  %v13431_v30 = vpop.permute.xlu0 %5192  ;;  %v3716_v46 = vmul.f32 %v17796_v7, %v17795_v6  ;;  %v17807_v6 = vld [vmem:[#allocation302_spill] sm:$0xff]  ;;  %v17808_v7 = vld [vmem:[#allocation557_spill] sm:$0xff]  ;;  %v3729_v63 = vmul.f32 %v17828_v16, %v17827_v48  ;;  %v17840_v16 = vld [vmem:[#allocation572_spill] sm:$0xff] }
 0x88d   :  { %17787 = vst [vmem:[#allocation513_spill] sm:$0xff] %v13429_v13  ;;  %17788 = vst [vmem:[#allocation259_spill] sm:$0xff] %v13431_v30  ;;  %5378 = vperm.xlu0 %8601, %v3715_v51   ;;  %v3719_v13 = vmul.f32 %v17798_v43, %v17797_v35  ;;  %v17809_v35 = vld [vmem:[#allocation303_spill] sm:$0xff]  ;;  %v17810_v43 = vld [vmem:[#allocation562_spill] sm:$0xff] }
 0x88e   :  { %v3723_v59 = vmul.f32 %v17810_v43, %v17809_v35  ;;  %v17821_v35 = vld [vmem:[#allocation307_spill] sm:$0xff]  ;;  %v17822_v43 = vld [vmem:[#allocation566_spill] sm:$0xff]  ;;  %v17839_v48 = vld [vmem:[#allocation313_spill] sm:$0xff] }
 0x88f   :  { %v3727_v50 = vmul.f32 %v17822_v43, %v17821_v35  ;;  %v17833_v35 = vld [vmem:[#allocation311_spill] sm:$0xff]  ;;  %v17834_v43 = vld [vmem:[#allocation570_spill] sm:$0xff]  ;;  %v17998_v30 = vld [vmem:[#allocation625_spill] sm:$0xff] }
 0x890   :  { %5375 = vperm.xlu1 %8602, %v3714_v58   ;;  %v13437_v4 = vpop.permute.xlu1 %5189  ;;  %v13439_v60 = vpop.permute.xlu0 %5198  ;;  %v3718_v58 = vmul.f32 %v17802_v34, %v17801_v2  ;;  %v17813_v2 = vld [vmem:[#allocation304_spill] sm:$0xff]  ;;  %v17814_v34 = vld [vmem:[#allocation559_spill] sm:$0xff] }
 0x891   :  { %17793 = vst [vmem:[#allocation518_spill] sm:$0xff] %v13437_v4  ;;  %17794 = vst [vmem:[#allocation260_spill] sm:$0xff] %v13439_v60  ;;  %5384 = vperm.xlu0 %8601, %v3717_v57   ;;  %v17993_v60 = vld [vmem:[#allocation368_spill] sm:$0xff] }
 0x894   :  { %5381 = vperm.xlu1 %8602, %v3716_v46   ;;  %v13445_v51 = vpop.permute.xlu1 %5195  ;;  %v13447_v3 = vpop.permute.xlu0 %5204  ;;  %v3720_v46 = vmul.f32 %v17808_v7, %v17807_v6  ;;  %v17819_v6 = vld [vmem:[#allocation306_spill] sm:$0xff]  ;;  %v17820_v7 = vld [vmem:[#allocation561_spill] sm:$0xff] }
 0x895   :  { %17799 = vst [vmem:[#allocation515_spill] sm:$0xff] %v13445_v51  ;;  %17800 = vst [vmem:[#allocation261_spill] sm:$0xff] %v13447_v3  ;;  %5390 = vperm.xlu0 %8601, %v3719_v13  }
 0x898   :  { %5387 = vperm.xlu1 %8602, %v3718_v58   ;;  %v13453_v57 = vpop.permute.xlu1 %5201  ;;  %v13455_v56 = vpop.permute.xlu0 %5210  ;;  %v3722_v58 = vmul.f32 %v17814_v34, %v17813_v2  ;;  %v17825_v2 = vld [vmem:[#allocation308_spill] sm:$0xff]  ;;  %v17826_v34 = vld [vmem:[#allocation563_spill] sm:$0xff] }
 0x899   :  { %17805 = vst [vmem:[#allocation520_spill] sm:$0xff] %v13453_v57  ;;  %17806 = vst [vmem:[#allocation262_spill] sm:$0xff] %v13455_v56  ;;  %5396 = vperm.xlu0 %8601, %v3721_v62   ;;  %v17994_v57 = vld [vmem:[#allocation623_spill] sm:$0xff] }
 0x89c   :  { %5393 = vperm.xlu1 %8602, %v3720_v46   ;;  %v13461_v13 = vpop.permute.xlu1 %5207  ;;  %v13463_v8 = vpop.permute.xlu0 %5216  ;;  %v3724_v46 = vmul.f32 %v17820_v7, %v17819_v6  ;;  %v17831_v6 = vld [vmem:[#allocation310_spill] sm:$0xff]  ;;  %v17832_v7 = vld [vmem:[#allocation565_spill] sm:$0xff] }
 0x89d   :  { %17811 = vst [vmem:[#allocation517_spill] sm:$0xff] %v13461_v13  ;;  %17812 = vst [vmem:[#allocation263_spill] sm:$0xff] %v13463_v8  ;;  %5402 = vperm.xlu0 %8601, %v3723_v59   ;;  %v3731_v8 = vmul.f32 %v17834_v43, %v17833_v35  ;;  %v17845_v35 = vld [vmem:[#allocation315_spill] sm:$0xff]  ;;  %v17846_v43 = vld [vmem:[#allocation574_spill] sm:$0xff] }
 0x89e   :  { %v17992_v13 = vld [vmem:[#allocation622_spill] sm:$0xff] }
 0x8a0   :  { %5399 = vperm.xlu1 %8602, %v3722_v58   ;;  %v13469_v62 = vpop.permute.xlu1 %5213  ;;  %v13471_v47 = vpop.permute.xlu0 %5222  ;;  %v3726_v58 = vmul.f32 %v17826_v34, %v17825_v2  ;;  %v17837_v2 = vld [vmem:[#allocation312_spill] sm:$0xff]  ;;  %v17838_v34 = vld [vmem:[#allocation567_spill] sm:$0xff] }
 0x8a1   :  { %17817 = vst [vmem:[#allocation522_spill] sm:$0xff] %v13469_v62  ;;  %17818 = vst [vmem:[#allocation264_spill] sm:$0xff] %v13471_v47  ;;  %5408 = vperm.xlu0 %8601, %v3725_v61  }
 0x8a4   :  { %5405 = vperm.xlu1 %8602, %v3724_v46   ;;  %v13477_v59 = vpop.permute.xlu1 %5219  ;;  %v13479_v49 = vpop.permute.xlu0 %5228  ;;  %v3728_v46 = vmul.f32 %v17832_v7, %v17831_v6  ;;  %v17843_v6 = vld [vmem:[#allocation314_spill] sm:$0xff]  ;;  %v17844_v7 = vld [vmem:[#allocation569_spill] sm:$0xff] }
 0x8a5   :  { %17823 = vst [vmem:[#allocation519_spill] sm:$0xff] %v13477_v59  ;;  %17824 = vst [vmem:[#allocation265_spill] sm:$0xff] %v13479_v49  ;;  %5414 = vperm.xlu0 %8601, %v3727_v50  }
 0x8a8   :  { %5411 = vperm.xlu1 %8602, %v3726_v58   ;;  %v13485_v61 = vpop.permute.xlu1 %5225  ;;  %v13487_v47 = vpop.permute.xlu0 %5234  ;;  %v3730_v58 = vmul.f32 %v17838_v34, %v17837_v2  ;;  %v17849_v2 = vld [vmem:[#allocation316_spill] sm:$0xff]  ;;  %v17850_v34 = vld [vmem:[#allocation571_spill] sm:$0xff] }
 0x8a9   :  { %17829 = vst [vmem:[#allocation524_spill] sm:$0xff] %v13485_v61  ;;  %17830 = vst [vmem:[#allocation266_spill] sm:$0xff] %v13487_v47  ;;  %5420 = vperm.xlu0 %8601, %v3729_v63   ;;  %v3733_v61 = vmul.f32 %v17840_v16, %v17839_v48  ;;  %v17851_v48 = vld [vmem:[#allocation317_spill] sm:$0xff]  ;;  %v17852_v16 = vld [vmem:[#allocation576_spill] sm:$0xff] }
 0x8aa   :  { %v3737_v56 = vmul.f32 %v17852_v16, %v17851_v48  ;;  %v17863_v48 = vld [vmem:[#allocation321_spill] sm:$0xff]  ;;  %v17864_v16 = vld [vmem:[#allocation580_spill] sm:$0xff] }
 0x8ac   :  { %5417 = vperm.xlu1 %8602, %v3728_v46   ;;  %v13493_v50 = vpop.permute.xlu1 %5231  ;;  %v13495_v49 = vpop.permute.xlu0 %5240  ;;  %v3732_v46 = vmul.f32 %v17844_v7, %v17843_v6  ;;  %v17855_v6 = vld [vmem:[#allocation318_spill] sm:$0xff]  ;;  %v17856_v7 = vld [vmem:[#allocation573_spill] sm:$0xff] }
 0x8ad   :  { %17835 = vst [vmem:[#allocation521_spill] sm:$0xff] %v13493_v50  ;;  %17836 = vst [vmem:[#allocation267_spill] sm:$0xff] %v13495_v49  ;;  %5426 = vperm.xlu0 %8601, %v3731_v8   ;;  %v3735_v50 = vmul.f32 %v17846_v43, %v17845_v35  ;;  %v17857_v35 = vld [vmem:[#allocation319_spill] sm:$0xff]  ;;  %v17858_v43 = vld [vmem:[#allocation578_spill] sm:$0xff] }
 0x8ae   :  { %v3739_v62 = vmul.f32 %v17858_v43, %v17857_v35  ;;  %v17869_v35 = vld [vmem:[#allocation323_spill] sm:$0xff]  ;;  %v17870_v43 = vld [vmem:[#allocation582_spill] sm:$0xff] }
 0x8af   :  { %v17989_v49 = vld [vmem:[#allocation366_spill] sm:$0xff] }
 0x8b0   :  { %5423 = vperm.xlu1 %8602, %v3730_v58   ;;  %v13501_v63 = vpop.permute.xlu1 %5237  ;;  %v13503_v47 = vpop.permute.xlu0 %5246  ;;  %v3734_v58 = vmul.f32 %v17850_v34, %v17849_v2  ;;  %v17861_v2 = vld [vmem:[#allocation320_spill] sm:$0xff]  ;;  %v17862_v34 = vld [vmem:[#allocation575_spill] sm:$0xff] }
 0x8b1   :  { %17841 = vst [vmem:[#allocation526_spill] sm:$0xff] %v13501_v63  ;;  %17842 = vst [vmem:[#allocation268_spill] sm:$0xff] %v13503_v47  ;;  %5432 = vperm.xlu0 %8601, %v3733_v61   ;;  %v17991_v63 = vld [vmem:[#allocation363_spill] sm:$0xff] }
 0x8b2   :  { %v3783_v18 = vmul.f32 %v17992_v13, %v17991_v63  ;;  %v18003_v13 = vld [vmem:[#allocation369_spill] sm:$0xff]  ;;  %v18004_v63 = vld [vmem:[#allocation628_spill] sm:$0xff] }
 0x8b3   :  { %v13738_v4 = vmul.f32 %v18004_v63, %v18003_v13  ;;  %v18014_v13 = vld [vmem:[#allocation632_spill] sm:$0xff] }
 0x8b4   :  { %5429 = vperm.xlu1 %8602, %v3732_v46   ;;  %v13509_v8 = vpop.permute.xlu1 %5243  ;;  %v13511_v59 = vpop.permute.xlu0 %5252  ;;  %v3736_v46 = vmul.f32 %v17856_v7, %v17855_v6  ;;  %v17867_v6 = vld [vmem:[#allocation322_spill] sm:$0xff]  ;;  %v17868_v7 = vld [vmem:[#allocation577_spill] sm:$0xff]  ;;  %v13758_v63 = vmul.f32 %v18014_v13, %v18013_v25 }
 0x8b5   :  { %17847 = vst [vmem:[#allocation523_spill] sm:$0xff] %v13509_v8  ;;  %17848 = vst [vmem:[#allocation269_spill] sm:$0xff] %v13511_v59  ;;  %5438 = vperm.xlu0 %8601, %v3735_v50   ;;  %v17990_v8 = vld [vmem:[#allocation621_spill] sm:$0xff] }
 0x8b6   :  { %v13714_v3 = vmul.f32 %v17990_v8, %v17989_v49  ;;  %v18001_v49 = vld [vmem:[#allocation372_spill] sm:$0xff]  ;;  %v18002_v8 = vld [vmem:[#allocation627_spill] sm:$0xff]  ;;  %v18027_v25 = vld [vmem:[#allocation637_spill] sm:$0xff] }
 0x8b7   :  { %v13734_v51 = vmul.f32 %v18002_v8, %v18001_v49  ;;  %v18012_v49 = vld [vmem:[#allocation631_spill] sm:$0xff]  ;;  %v13778_v13 = vmul.f32 %v18027_v25, %v18026_v12  ;;  %v18042_v25 = vld [vmem:[#allocation388_spill] sm:$0xff] }
 0x8b8   :  { %5435 = vperm.xlu1 %8602, %v3734_v58   ;;  %v13517_v61 = vpop.permute.xlu1 %5249  ;;  %v13519_v47 = vpop.permute.xlu0 %5258  ;;  %v3738_v58 = vmul.f32 %v17862_v34, %v17861_v2  ;;  %v17873_v2 = vld [vmem:[#allocation324_spill] sm:$0xff]  ;;  %v17874_v34 = vld [vmem:[#allocation579_spill] sm:$0xff] }
 0x8b9   :  { %17853 = vst [vmem:[#allocation528_spill] sm:$0xff] %v13517_v61  ;;  %17854 = vst [vmem:[#allocation270_spill] sm:$0xff] %v13519_v47  ;;  %5444 = vperm.xlu0 %8601, %v3737_v56   ;;  %v3741_v61 = vmul.f32 %v17864_v16, %v17863_v48  ;;  %v17875_v48 = vld [vmem:[#allocation325_spill] sm:$0xff]  ;;  %v17876_v16 = vld [vmem:[#allocation584_spill] sm:$0xff] }
 0x8ba   :  { %18028 = vst [vmem:[#allocation294_spill] sm:$0xff] %v13778_v13  ;;  %v18043_v13 = vld [vmem:[#allocation643_spill] sm:$0xff] }
 0x8bc   :  { %5441 = vperm.xlu1 %8602, %v3736_v46   ;;  %v13525_v50 = vpop.permute.xlu1 %5255  ;;  %v13527_v59 = vpop.permute.xlu0 %5264  ;;  %v3740_v46 = vmul.f32 %v17868_v7, %v17867_v6  ;;  %v17879_v6 = vld [vmem:[#allocation326_spill] sm:$0xff]  ;;  %v17880_v7 = vld [vmem:[#allocation581_spill] sm:$0xff] }
 0x8bd   :  { %17859 = vst [vmem:[#allocation525_spill] sm:$0xff] %v13525_v50  ;;  %17860 = vst [vmem:[#allocation271_spill] sm:$0xff] %v13527_v59  ;;  %5450 = vperm.xlu0 %8601, %v3739_v62   ;;  %v3743_v50 = vmul.f32 %v17870_v43, %v17869_v35  ;;  %v17881_v35 = vld [vmem:[#allocation327_spill] sm:$0xff]  ;;  %v17882_v43 = vld [vmem:[#allocation586_spill] sm:$0xff] }
 0x8c0   :  { %5447 = vperm.xlu1 %8602, %v3738_v58   ;;  %v13533_v56 = vpop.permute.xlu1 %5261  ;;  %v13535_v47 = vpop.permute.xlu0 %5270  ;;  %v3742_v58 = vmul.f32 %v17874_v34, %v17873_v2  ;;  %v17885_v2 = vld [vmem:[#allocation328_spill] sm:$0xff]  ;;  %v17886_v34 = vld [vmem:[#allocation583_spill] sm:$0xff] }
 0x8c1   :  { %17865 = vst [vmem:[#allocation530_spill] sm:$0xff] %v13533_v56  ;;  %17866 = vst [vmem:[#allocation272_spill] sm:$0xff] %v13535_v47  ;;  %5456 = vperm.xlu0 %8601, %v3741_v61   ;;  %v3745_v56 = vmul.f32 %v17876_v16, %v17875_v48  ;;  %v17887_v48 = vld [vmem:[#allocation329_spill] sm:$0xff]  ;;  %v17888_v16 = vld [vmem:[#allocation588_spill] sm:$0xff] }
 0x8c4   :  { %5453 = vperm.xlu1 %8602, %v3740_v46   ;;  %v13541_v62 = vpop.permute.xlu1 %5267  ;;  %v13543_v59 = vpop.permute.xlu0 %5276  ;;  %v3744_v46 = vmul.f32 %v17880_v7, %v17879_v6  ;;  %v17891_v6 = vld [vmem:[#allocation330_spill] sm:$0xff]  ;;  %v17892_v7 = vld [vmem:[#allocation585_spill] sm:$0xff] }
 0x8c5   :  { %17871 = vst [vmem:[#allocation527_spill] sm:$0xff] %v13541_v62  ;;  %17872 = vst [vmem:[#allocation273_spill] sm:$0xff] %v13543_v59  ;;  %5462 = vperm.xlu0 %8601, %v3743_v50   ;;  %v3747_v62 = vmul.f32 %v17882_v43, %v17881_v35  ;;  %v17893_v35 = vld [vmem:[#allocation331_spill] sm:$0xff]  ;;  %v17894_v43 = vld [vmem:[#allocation590_spill] sm:$0xff] }
 0x8c8   :  { %5459 = vperm.xlu1 %8602, %v3742_v58   ;;  %v13549_v61 = vpop.permute.xlu1 %5273  ;;  %v13551_v47 = vpop.permute.xlu0 %5282  ;;  %v3746_v58 = vmul.f32 %v17886_v34, %v17885_v2  ;;  %v17897_v2 = vld [vmem:[#allocation332_spill] sm:$0xff]  ;;  %v17898_v34 = vld [vmem:[#allocation587_spill] sm:$0xff] }
 0x8c9   :  { %17877 = vst [vmem:[#allocation532_spill] sm:$0xff] %v13549_v61  ;;  %17878 = vst [vmem:[#allocation274_spill] sm:$0xff] %v13551_v47  ;;  %5468 = vperm.xlu0 %8601, %v3745_v56   ;;  %v3749_v61 = vmul.f32 %v17888_v16, %v17887_v48  ;;  %v17899_v48 = vld [vmem:[#allocation333_spill] sm:$0xff]  ;;  %v17900_v16 = vld [vmem:[#allocation592_spill] sm:$0xff] }
 0x8cc   :  { %5465 = vperm.xlu1 %8602, %v3744_v46   ;;  %v13557_v50 = vpop.permute.xlu1 %5279  ;;  %v13559_v59 = vpop.permute.xlu0 %5288  ;;  %v3748_v46 = vmul.f32 %v17892_v7, %v17891_v6  ;;  %v17903_v6 = vld [vmem:[#allocation334_spill] sm:$0xff]  ;;  %v17904_v7 = vld [vmem:[#allocation589_spill] sm:$0xff] }
 0x8cd   :  { %17883 = vst [vmem:[#allocation529_spill] sm:$0xff] %v13557_v50  ;;  %17884 = vst [vmem:[#allocation275_spill] sm:$0xff] %v13559_v59  ;;  %5474 = vperm.xlu0 %8601, %v3747_v62   ;;  %v3751_v50 = vmul.f32 %v17894_v43, %v17893_v35  ;;  %v17905_v35 = vld [vmem:[#allocation335_spill] sm:$0xff]  ;;  %v17906_v43 = vld [vmem:[#allocation594_spill] sm:$0xff] }
 0x8d0   :  { %5471 = vperm.xlu1 %8602, %v3746_v58   ;;  %v13565_v56 = vpop.permute.xlu1 %5285  ;;  %v13567_v47 = vpop.permute.xlu0 %5294  ;;  %v3750_v58 = vmul.f32 %v17898_v34, %v17897_v2  ;;  %v17909_v2 = vld [vmem:[#allocation336_spill] sm:$0xff]  ;;  %v17910_v34 = vld [vmem:[#allocation591_spill] sm:$0xff] }
 0x8d1   :  { %17889 = vst [vmem:[#allocation534_spill] sm:$0xff] %v13565_v56  ;;  %17890 = vst [vmem:[#allocation276_spill] sm:$0xff] %v13567_v47  ;;  %5480 = vperm.xlu0 %8601, %v3749_v61   ;;  %v3753_v56 = vmul.f32 %v17900_v16, %v17899_v48  ;;  %v17911_v48 = vld [vmem:[#allocation337_spill] sm:$0xff]  ;;  %v17912_v16 = vld [vmem:[#allocation596_spill] sm:$0xff] }
 0x8d4   :  { %5477 = vperm.xlu1 %8602, %v3748_v46   ;;  %v13573_v62 = vpop.permute.xlu1 %5291  ;;  %v13575_v59 = vpop.permute.xlu0 %5300  ;;  %v3752_v46 = vmul.f32 %v17904_v7, %v17903_v6  ;;  %v17915_v6 = vld [vmem:[#allocation338_spill] sm:$0xff]  ;;  %v17916_v7 = vld [vmem:[#allocation593_spill] sm:$0xff] }
 0x8d5   :  { %17895 = vst [vmem:[#allocation531_spill] sm:$0xff] %v13573_v62  ;;  %17896 = vst [vmem:[#allocation277_spill] sm:$0xff] %v13575_v59  ;;  %5486 = vperm.xlu0 %8601, %v3751_v50   ;;  %v3755_v62 = vmul.f32 %v17906_v43, %v17905_v35  ;;  %v17917_v35 = vld [vmem:[#allocation339_spill] sm:$0xff]  ;;  %v17918_v43 = vld [vmem:[#allocation598_spill] sm:$0xff] }
 0x8d8   :  { %5483 = vperm.xlu1 %8602, %v3750_v58   ;;  %v13581_v61 = vpop.permute.xlu1 %5297  ;;  %v13583_v47 = vpop.permute.xlu0 %5306  ;;  %v3754_v58 = vmul.f32 %v17910_v34, %v17909_v2  ;;  %v17921_v2 = vld [vmem:[#allocation340_spill] sm:$0xff]  ;;  %v17922_v34 = vld [vmem:[#allocation595_spill] sm:$0xff] }
 0x8d9   :  { %17901 = vst [vmem:[#allocation536_spill] sm:$0xff] %v13581_v61  ;;  %17902 = vst [vmem:[#allocation278_spill] sm:$0xff] %v13583_v47  ;;  %5492 = vperm.xlu0 %8601, %v3753_v56   ;;  %v3757_v61 = vmul.f32 %v17912_v16, %v17911_v48  ;;  %v17923_v48 = vld [vmem:[#allocation341_spill] sm:$0xff]  ;;  %v17924_v16 = vld [vmem:[#allocation600_spill] sm:$0xff] }
 0x8dc   :  { %5489 = vperm.xlu1 %8602, %v3752_v46   ;;  %v13589_v50 = vpop.permute.xlu1 %5303  ;;  %v13591_v59 = vpop.permute.xlu0 %5312  ;;  %v3756_v46 = vmul.f32 %v17916_v7, %v17915_v6  ;;  %v17927_v6 = vld [vmem:[#allocation342_spill] sm:$0xff]  ;;  %v17928_v7 = vld [vmem:[#allocation597_spill] sm:$0xff] }
 0x8dd   :  { %17907 = vst [vmem:[#allocation533_spill] sm:$0xff] %v13589_v50  ;;  %17908 = vst [vmem:[#allocation279_spill] sm:$0xff] %v13591_v59  ;;  %5498 = vperm.xlu0 %8601, %v3755_v62   ;;  %v3759_v50 = vmul.f32 %v17918_v43, %v17917_v35  ;;  %v17929_v35 = vld [vmem:[#allocation343_spill] sm:$0xff]  ;;  %v17930_v43 = vld [vmem:[#allocation602_spill] sm:$0xff] }
 0x8e0   :  { %5495 = vperm.xlu1 %8602, %v3754_v58   ;;  %v13597_v56 = vpop.permute.xlu1 %5309  ;;  %v13599_v47 = vpop.permute.xlu0 %5318  ;;  %v3758_v58 = vmul.f32 %v17922_v34, %v17921_v2  ;;  %v17933_v2 = vld [vmem:[#allocation344_spill] sm:$0xff]  ;;  %v17934_v34 = vld [vmem:[#allocation599_spill] sm:$0xff] }
 0x8e1   :  { %17913 = vst [vmem:[#allocation538_spill] sm:$0xff] %v13597_v56  ;;  %17914 = vst [vmem:[#allocation280_spill] sm:$0xff] %v13599_v47  ;;  %5504 = vperm.xlu0 %8601, %v3757_v61   ;;  %v3761_v56 = vmul.f32 %v17924_v16, %v17923_v48  ;;  %v17935_v48 = vld [vmem:[#allocation345_spill] sm:$0xff]  ;;  %v17936_v16 = vld [vmem:[#allocation604_spill] sm:$0xff] }
 0x8e4   :  { %5501 = vperm.xlu1 %8602, %v3756_v46   ;;  %v13605_v62 = vpop.permute.xlu1 %5315  ;;  %v13607_v59 = vpop.permute.xlu0 %5324  ;;  %v3760_v46 = vmul.f32 %v17928_v7, %v17927_v6  ;;  %v17939_v6 = vld [vmem:[#allocation346_spill] sm:$0xff]  ;;  %v17940_v7 = vld [vmem:[#allocation601_spill] sm:$0xff] }
 0x8e5   :  { %17919 = vst [vmem:[#allocation535_spill] sm:$0xff] %v13605_v62  ;;  %17920 = vst [vmem:[#allocation281_spill] sm:$0xff] %v13607_v59  ;;  %5510 = vperm.xlu0 %8601, %v3759_v50   ;;  %v3763_v62 = vmul.f32 %v17930_v43, %v17929_v35  ;;  %v17941_v35 = vld [vmem:[#allocation347_spill] sm:$0xff]  ;;  %v17942_v43 = vld [vmem:[#allocation606_spill] sm:$0xff] }
 0x8e8   :  { %5507 = vperm.xlu1 %8602, %v3758_v58   ;;  %v13613_v61 = vpop.permute.xlu1 %5321  ;;  %v13615_v47 = vpop.permute.xlu0 %5330  ;;  %v3762_v58 = vmul.f32 %v17934_v34, %v17933_v2  ;;  %v17945_v2 = vld [vmem:[#allocation348_spill] sm:$0xff]  ;;  %v17946_v34 = vld [vmem:[#allocation603_spill] sm:$0xff] }
 0x8e9   :  { %17925 = vst [vmem:[#allocation540_spill] sm:$0xff] %v13613_v61  ;;  %17926 = vst [vmem:[#allocation282_spill] sm:$0xff] %v13615_v47  ;;  %5516 = vperm.xlu0 %8601, %v3761_v56   ;;  %v3765_v61 = vmul.f32 %v17936_v16, %v17935_v48  ;;  %v17947_v48 = vld [vmem:[#allocation349_spill] sm:$0xff]  ;;  %v17948_v16 = vld [vmem:[#allocation608_spill] sm:$0xff] }
 0x8ec   :  { %5513 = vperm.xlu1 %8602, %v3760_v46   ;;  %v13621_v50 = vpop.permute.xlu1 %5327  ;;  %v13623_v59 = vpop.permute.xlu0 %5336  ;;  %v3764_v46 = vmul.f32 %v17940_v7, %v17939_v6  ;;  %v17951_v6 = vld [vmem:[#allocation350_spill] sm:$0xff]  ;;  %v17952_v7 = vld [vmem:[#allocation605_spill] sm:$0xff] }
 0x8ed   :  { %17931 = vst [vmem:[#allocation537_spill] sm:$0xff] %v13621_v50  ;;  %17932 = vst [vmem:[#allocation283_spill] sm:$0xff] %v13623_v59  ;;  %5522 = vperm.xlu0 %8601, %v3763_v62   ;;  %v3767_v50 = vmul.f32 %v17942_v43, %v17941_v35  ;;  %v17953_v35 = vld [vmem:[#allocation351_spill] sm:$0xff]  ;;  %v17954_v43 = vld [vmem:[#allocation610_spill] sm:$0xff] }
 0x8f0   :  { %5519 = vperm.xlu1 %8602, %v3762_v58   ;;  %v13629_v56 = vpop.permute.xlu1 %5333  ;;  %v13631_v47 = vpop.permute.xlu0 %5342  ;;  %v3766_v58 = vmul.f32 %v17946_v34, %v17945_v2  ;;  %v17957_v2 = vld [vmem:[#allocation352_spill] sm:$0xff]  ;;  %v17958_v34 = vld [vmem:[#allocation607_spill] sm:$0xff] }
 0x8f1   :  { %17937 = vst [vmem:[#allocation542_spill] sm:$0xff] %v13629_v56  ;;  %17938 = vst [vmem:[#allocation284_spill] sm:$0xff] %v13631_v47  ;;  %5528 = vperm.xlu0 %8601, %v3765_v61   ;;  %v3769_v56 = vmul.f32 %v17948_v16, %v17947_v48  ;;  %v17959_v48 = vld [vmem:[#allocation353_spill] sm:$0xff]  ;;  %v17960_v16 = vld [vmem:[#allocation612_spill] sm:$0xff] }
 0x8f4   :  { %5525 = vperm.xlu1 %8602, %v3764_v46   ;;  %v13637_v62 = vpop.permute.xlu1 %5339  ;;  %v13639_v59 = vpop.permute.xlu0 %5348  ;;  %v3768_v46 = vmul.f32 %v17952_v7, %v17951_v6  ;;  %v17963_v6 = vld [vmem:[#allocation354_spill] sm:$0xff]  ;;  %v17964_v7 = vld [vmem:[#allocation609_spill] sm:$0xff] }
 0x8f5   :  { %17943 = vst [vmem:[#allocation539_spill] sm:$0xff] %v13637_v62  ;;  %17944 = vst [vmem:[#allocation285_spill] sm:$0xff] %v13639_v59  ;;  %5534 = vperm.xlu0 %8601, %v3767_v50   ;;  %v3771_v62 = vmul.f32 %v17954_v43, %v17953_v35  ;;  %v17965_v35 = vld [vmem:[#allocation355_spill] sm:$0xff]  ;;  %v17966_v43 = vld [vmem:[#allocation614_spill] sm:$0xff] }
 0x8f8   :  { %5531 = vperm.xlu1 %8602, %v3766_v58   ;;  %v13645_v61 = vpop.permute.xlu1 %5345  ;;  %v13647_v47 = vpop.permute.xlu0 %5354  ;;  %v3770_v58 = vmul.f32 %v17958_v34, %v17957_v2  ;;  %v17969_v2 = vld [vmem:[#allocation356_spill] sm:$0xff] }
 0x8f9   :  { %17949 = vst [vmem:[#allocation544_spill] sm:$0xff] %v13645_v61  ;;  %17950 = vst [vmem:[#allocation286_spill] sm:$0xff] %v13647_v47  ;;  %5540 = vperm.xlu0 %8601, %v3769_v56   ;;  %v3773_v61 = vmul.f32 %v17960_v16, %v17959_v48  ;;  %v3774_v34 = vmul.f32 %v17250_v28, %v17969_v2  ;;  %v17971_v48 = vld [vmem:[#allocation616_spill] sm:$0xff] }
 0x8fc   :  { %5537 = vperm.xlu1 %8602, %v3768_v46   ;;  %v13653_v50 = vpop.permute.xlu1 %5351  ;;  %v13655_v59 = vpop.permute.xlu0 %5360  ;;  %v3772_v46 = vmul.f32 %v17964_v7, %v17963_v6  ;;  %v17974_v6 = vlaneseq }
 0x8fd   :  { %17955 = vst [vmem:[#allocation541_spill] sm:$0xff] %v13653_v50  ;;  %17956 = vst [vmem:[#allocation287_spill] sm:$0xff] %v13655_v59  ;;  %5546 = vperm.xlu0 %8601, %v3771_v62   ;;  %v3775_v50 = vmul.f32 %v17966_v43, %v17965_v35  ;;  %v17976_v35 = vld [vmem:[#allocation613_spill] sm:$0xff] }
 0x8fe   :  { %v13682_v7 = vand.u32 127, %v17974_v6  ;;  %v17981_v6 = vld [vmem:[#allocation360_spill] sm:$0xff] }
 0x900   :  { %5543 = vperm.xlu1 %8602, %v3770_v58   ;;  %v13661_v56 = vpop.permute.xlu1 %5357  ;;  %v13663_v47 = vpop.permute.xlu0 %5366  ;;  %v17970_v58 = vld [vmem:[#allocation357_spill] sm:$0xff]  ;;  %v13689_v28 = vadd.s32 4294967288, %v13682_v7 }
 0x901   :  { %17961 = vst [vmem:[#allocation546_spill] sm:$0xff] %v13661_v56  ;;  %17962 = vst [vmem:[#allocation288_spill] sm:$0xff] %v13663_v47  ;;  %5552 = vperm.xlu0 %8601, %v3773_v61   ;;  %v3777_v16 = vmul.f32 %v17971_v48, %v17970_v58  ;;  %v13696_v58 = vadd.s32 4294967280, %v13682_v7  ;;  %v13699_v48 = vadd.s32 4294967272, %v13682_v7  ;;  %v17988_v56 = vld [vmem:[#allocation620_spill] sm:$0xff] }
 0x904   :  { %5549 = vperm.xlu1 %8602, %v3772_v46   ;;  %v13669_v62 = vpop.permute.xlu1 %5363  ;;  %v13671_v59 = vpop.permute.xlu0 %5372  ;;  %v17975_v46 = vld [vmem:[#allocation358_spill] sm:$0xff] }
 0x905   :  { %17967 = vst [vmem:[#allocation543_spill] sm:$0xff] %v13669_v62  ;;  %17968 = vst [vmem:[#allocation289_spill] sm:$0xff] %v13671_v59  ;;  %5558 = vperm.xlu0 %8601, %v3775_v50   ;;  %v3776_v43 = vmul.f32 %v17976_v35, %v17975_v46  ;;  %v17977_v59 = vld [vmem:[#allocation359_spill] sm:$0xff]  ;;  %v17978_v50 = vld [vmem:[#allocation618_spill] sm:$0xff] }
 0x906   :  { %v3779_v62 = vmul.f32 %v17978_v50, %v17977_v59  ;;  %v17982_v46 = vld [vmem:[#allocation615_spill] sm:$0xff]  ;;  %v17983_v35 = vld [vmem:[#allocation362_spill] sm:$0xff]  ;;  %v17984_v50 = vld [vmem:[#allocation617_spill] sm:$0xff] }
 0x907   :  { %v3778_v59 = vmul.f32 %v17982_v46, %v17981_v6  ;;  %v13720_v6 = vmul.f32 %v17994_v57, %v17993_v60  ;;  %v17996_v46 = vld [vmem:[#allocation624_spill] sm:$0xff]  ;;  %v18005_v60 = vld [vmem:[#allocation374_spill] sm:$0xff]  ;;  %v18006_v57 = vld [vmem:[#allocation629_spill] sm:$0xff] }
 0x908   :  { %5555 = vperm.xlu1 %8602, %v3774_v34   ;;  %v13677_v61 = vpop.permute.xlu1 %5369  ;;  %v13679_v47 = vpop.permute.xlu0 %5378  ;;  %v13742_v41 = vmul.f32 %v18006_v57, %v18005_v60  ;;  %v18016_v60 = vld [vmem:[#allocation633_spill] sm:$0xff] }
 0x909   :  { %17972 = vst [vmem:[#allocation548_spill] sm:$0xff] %v13677_v61  ;;  %17973 = vst [vmem:[#allocation290_spill] sm:$0xff] %v13679_v47  ;;  %5564 = vperm.xlu0 %8601, %v3777_v16   ;;  %v13702_v16 = vadd.s32 4294967264, %v13682_v7  ;;  %v17985_v47 = vld [vmem:[#allocation364_spill] sm:$0xff]  ;;  %v13762_v57 = vmul.f32 %v18016_v60, %v18015_v53  ;;  %v18030_v53 = vld [vmem:[#allocation638_spill] sm:$0xff] }
 0x90a   :  { %v13782_v60 = vmul.f32 %v18030_v53, %v18029_v10  ;;  %v13802_v10 = vmul.f32 %v18043_v13, %v18042_v25  ;;  %v18045_v53 = vld [vmem:[#allocation385_spill] sm:$0xff]  ;;  %v18057_v13 = vld [vmem:[#allocation647_spill] sm:$0xff] }
 0x90b   :  { %18017 = vst [vmem:[#allocation547_spill] sm:$0xff] %v13762_v57  ;;  %v18033_v57 = vld [vmem:[#allocation639_spill] sm:$0xff] }
 0x90c   :  { %5561 = vperm.xlu1 %8602, %v3776_v43   ;;  %v13691_v2 = vpop.permute.xlu1 %5375  ;;  %v13693_v34 = vpop.permute.xlu0 %5384  ;;  %v3780_v43 = vmul.f32 %v17984_v50, %v17983_v35  ;;  %v17997_v50 = vld [vmem:[#allocation370_spill] sm:$0xff]  ;;  %18031 = vst [vmem:[#allocation549_spill] sm:$0xff] %v13782_v60  ;;  %18044 = vst [vmem:[#allocation296_spill] sm:$0xff] %v13802_v10  ;;  %v18046_v60 = vld [vmem:[#allocation644_spill] sm:$0xff] }
 0x90d   :  { %17979 = vst [vmem:[#allocation545_spill] sm:$0xff] %v13691_v2  ;;  %17980 = vst [vmem:[#allocation291_spill] sm:$0xff] %v13693_v34  ;;  %5570 = vperm.xlu0 %8601, %v3779_v62   ;;  %v17986_v2 = vld [vmem:[#allocation619_spill] sm:$0xff]  ;;  %v17987_v34 = vld [vmem:[#allocation361_spill] sm:$0xff] }
 0x90e   :  { %v3782_v61 = vmul.f32 %v17986_v2, %v17985_v47  ;;  %v3781_v5 = vmul.f32 %v17988_v56, %v17987_v34  ;;  %v17995_v62 = vld [vmem:[#allocation365_spill] sm:$0xff]  ;;  %v13726_v47 = vmul.f32 %v17998_v30, %v17997_v50  ;;  %v17999_v2 = vld [vmem:[#allocation367_spill] sm:$0xff]  ;;  %v18000_v56 = vld [vmem:[#allocation626_spill] sm:$0xff] }
 0x90f   :  { %v3785_v35 = vmul.f32 %v17996_v46, %v17995_v62  ;;  %v13730_v34 = vmul.f32 %v18000_v56, %v17999_v2  ;;  %v18009_v46 = vld [vmem:[#allocation371_spill] sm:$0xff]  ;;  %v18010_v50 = vld [vmem:[#allocation630_spill] sm:$0xff]  ;;  %v18011_v56 = vld [vmem:[#allocation376_spill] sm:$0xff] }
 0x910   :  { %5567 = vperm.xlu1 %8602, %v3778_v59   ;;  %v13744_v62 = vpop.permute.xlu1 %5381  ;;  %v13746_v30 = vpop.permute.xlu0 %5390  ;;  %v13750_v2 = vmul.f32 %v18010_v50, %v18009_v46  ;;  %v13754_v8 = vmul.f32 %v18012_v49, %v18011_v56  ;;  %v18018_v59 = vld [vmem:[#allocation375_spill] sm:$0xff]  ;;  %v18024_v56 = vld [vmem:[#allocation636_spill] sm:$0xff]  ;;  %v18059_v10 = vld [vmem:[#allocation389_spill] sm:$0xff] }
 0x911   :  { %18007 = vst [vmem:[#allocation550_spill] sm:$0xff] %v13744_v62  ;;  %18008 = vst [vmem:[#allocation292_spill] sm:$0xff] %v13746_v30  ;;  %5576 = vperm.xlu0 %8601, %v3781_v5   ;;  %v18019_v62 = vld [vmem:[#allocation634_spill] sm:$0xff]  ;;  %v18021_v46 = vld [vmem:[#allocation635_spill] sm:$0xff]  ;;  %v13774_v49 = vmul.f32 %v18024_v56, %v18023_v31 }
 0x912   :  { %v13766_v30 = vmul.f32 %v18019_v62, %v18018_v59  ;;  %v13770_v50 = vmul.f32 %v18021_v46, %v18020_v22  ;;  %v18032_v5 = vld [vmem:[#allocation384_spill] sm:$0xff]  ;;  %v18035_v59 = vld [vmem:[#allocation381_spill] sm:$0xff]  ;;  %v18037_v46 = vld [vmem:[#allocation386_spill] sm:$0xff] }
 0x913   :  { %18025 = vst [vmem:[#allocation552_spill] sm:$0xff] %v13774_v49  ;;  %v13786_v62 = vmul.f32 %v18033_v57, %v18032_v5  ;;  %v13790_v22 = vmul.f32 %v18036_v45, %v18035_v59  ;;  %v18040_v56 = vld [vmem:[#allocation383_spill] sm:$0xff]  ;;  %v18041_v49 = vld [vmem:[#allocation642_spill] sm:$0xff]  ;;  %v13806_v57 = vmul.f32 %v18046_v60, %v18045_v53  ;;  %v18060_v60 = vld [vmem:[#allocation648_spill] sm:$0xff] }
 0x914   :  { %18022 = vst [vmem:[#allocation293_spill] sm:$0xff] %v13770_v50  ;;  %v18038_v50 = vld [vmem:[#allocation641_spill] sm:$0xff]  ;;  %v13798_v12 = vmul.f32 %v18041_v49, %v18040_v56  ;;  %v18048_v5 = vld [vmem:[#allocation390_spill] sm:$0xff]  ;;  %5573 = vperm.xlu1 %8602, %v3780_v43   ;;  %v13812_v59 = vpop.permute.xlu1 %5387  ;;  %v13826_v53 = vmul.f32 %v18060_v60, %v18059_v10  ;;  %v18065_v43 = vld [vmem:[#allocation391_spill] sm:$0xff] }
 0x915   :  { %18034 = vst [vmem:[#allocation295_spill] sm:$0xff] %v13786_v62  ;;  %v13794_v31 = vmul.f32 %v18038_v50, %v18037_v46  ;;  %18047 = vst [vmem:[#allocation551_spill] sm:$0xff] %v13806_v57  ;;  %v18049_v62 = vld [vmem:[#allocation645_spill] sm:$0xff]  ;;  %v13814_v50 = vpop.permute.xlu0 %5396  ;;  %v18053_v46 = vld [vmem:[#allocation387_spill] sm:$0xff]  ;;  %5582 = vperm.xlu0 %8601, %v3783_v18  }
 0x916   :  { %v13810_v45 = vmul.f32 %v18049_v62, %v18048_v5  ;;  %18051 = vst [vmem:[#allocation556_spill] sm:$0xff] %v13812_v59  ;;  %18052 = vst [vmem:[#allocation298_spill] sm:$0xff] %v13814_v50  ;;  %v18054_v49 = vld [vmem:[#allocation646_spill] sm:$0xff]  ;;  %v18063_v62 = vld [vmem:[#allocation649_spill] sm:$0xff] }
 0x917   :  { %18039 = vst [vmem:[#allocation554_spill] sm:$0xff] %v13794_v31  ;;  %v13818_v56 = vmul.f32 %v18054_v49, %v18053_v46  ;;  %v18056_v31 = vld [vmem:[#allocation392_spill] sm:$0xff]  ;;  %18061 = vst [vmem:[#allocation558_spill] sm:$0xff] %v13826_v53  ;;  %v18062_v57 = vld [vmem:[#allocation394_spill] sm:$0xff] }
 0x918   :  { %18050 = vst [vmem:[#allocation297_spill] sm:$0xff] %v13810_v45  ;;  %v13822_v25 = vmul.f32 %v18057_v13, %v18056_v31  ;;  %v13830_v5 = vmul.f32 %v18063_v62, %v18062_v57  ;;  %v18066_v59 = vld [vmem:[#allocation650_spill] sm:$0xff]  ;;  %v18068_v45 = vld [vmem:[#allocation396_spill] sm:$0xff]  ;;  %v18069_v46 = vld [vmem:[#allocation651_spill] sm:$0xff]  ;;  %5579 = vperm.xlu1 %8602, %v3782_v61  }
 0x919   :  { %18055 = vst [vmem:[#allocation553_spill] sm:$0xff] %v13818_v56  ;;  %v13834_v50 = vmul.f32 %v18066_v59, %v18065_v43  ;;  %v13838_v49 = vmul.f32 %v18069_v46, %v18068_v45  ;;  %v18071_v56 = vld [vmem:[#allocation393_spill] sm:$0xff]  ;;  %v18072_v31 = vld [vmem:[#allocation652_spill] sm:$0xff]  ;;  %v18077_v53 = vld [vmem:[#allocation395_spill] sm:$0xff]  ;;  %5588 = vperm.xlu0 %8601, %v3785_v35  }
 0x91a   :  { %18058 = vst [vmem:[#allocation299_spill] sm:$0xff] %v13822_v25  ;;  %18064 = vst [vmem:[#allocation300_spill] sm:$0xff] %v13830_v5  ;;  %v13842_v13 = vmul.f32 %v18072_v31, %v18071_v56  ;;  %v18074_v25 = vld [vmem:[#allocation398_spill] sm:$0xff]  ;;  %v18075_v10 = vld [vmem:[#allocation653_spill] sm:$0xff] }
 0x91b   :  { %18067 = vst [vmem:[#allocation555_spill] sm:$0xff] %v13834_v50  ;;  %18070 = vst [vmem:[#allocation301_spill] sm:$0xff] %v13838_v49  ;;  %v13846_v60 = vmul.f32 %v18075_v10, %v18074_v25  ;;  %v18078_v57 = vld [vmem:[#allocation654_spill] sm:$0xff]  ;;  %v18079_v18 = vld [vmem:[#allocation400_spill] sm:$0xff] }
 0x91c   :  { %18073 = vst [vmem:[#allocation560_spill] sm:$0xff] %v13842_v13  ;;  %v13850_v62 = vmul.f32 %v18078_v57, %v18077_v53  ;;  %v18080_v5 = vld [vmem:[#allocation655_spill] sm:$0xff]  ;;  %v18081_v43 = vld [vmem:[#allocation397_spill] sm:$0xff]  ;;  %v18082_v50 = vld [vmem:[#allocation656_spill] sm:$0xff]  ;;  %5585 = vperm.xlu1 %8602, %v13714_v3  }
 0x91d   :  { %18076 = vst [vmem:[#allocation302_spill] sm:$0xff] %v13846_v60  ;;  %v13854_v59 = vmul.f32 %v18080_v5, %v18079_v18  ;;  %v13858_v45 = vmul.f32 %v18082_v50, %v18081_v43  ;;  %v18083_v46 = vld [vmem:[#allocation402_spill] sm:$0xff]  ;;  %v18084_v49 = vld [vmem:[#allocation657_spill] sm:$0xff]  ;;  %v18086_v31 = vld [vmem:[#allocation399_spill] sm:$0xff]  ;;  %v13880_v43 = vpop.permute.xlu1 %5393  ;;  %5594 = vperm.xlu0 %8601, %v13730_v34   ;;  %v6004_v34 = vadd.s32 4294967240, %v13682_v7 }
 0x91e   :  { %v13862_v56 = vmul.f32 %v18084_v49, %v18083_v46  ;;  %v18087_v13 = vld [vmem:[#allocation658_spill] sm:$0xff]  ;;  %v18088_v10 = vld [vmem:[#allocation404_spill] sm:$0xff]  ;;  %v18090_v57 = vld [vmem:[#allocation401_spill] sm:$0xff]  ;;  %18095 = vst [vmem:[#allocation559_spill] sm:$0xff] %v13880_v43  ;;  %v13882_v49 = vpop.permute.xlu0 %5402 }
 0x91f   :  { %v13866_v25 = vmul.f32 %v18087_v13, %v18086_v31  ;;  %v13870_v53 = vmul.f32 %v17393_v23, %v18088_v10  ;;  %v18091_v60 = vld [vmem:[#allocation660_spill] sm:$0xff]  ;;  %v18093_v18 = vld [vmem:[#allocation406_spill] sm:$0xff]  ;;  %18096 = vst [vmem:[#allocation305_spill] sm:$0xff] %v13882_v49  ;;  %v18097_v46 = vld [vmem:[#allocation403_spill] sm:$0xff] }
 0x920   :  { %18085 = vst [vmem:[#allocation557_spill] sm:$0xff] %v13862_v56  ;;  %v13874_v5 = vmul.f32 %v18091_v60, %v18090_v57  ;;  %v13878_v50 = vmul.f32 %v17399_v42, %v18093_v18  ;;  %v18098_v13 = vld [vmem:[#allocation662_spill] sm:$0xff]  ;;  %v18100_v56 = vld [vmem:[#allocation408_spill] sm:$0xff]  ;;  %v18101_v23 = vld [vmem:[#allocation663_spill] sm:$0xff]  ;;  %5591 = vperm.xlu1 %8602, %v13720_v6  }
 0x921   :  { %18089 = vst [vmem:[#allocation303_spill] sm:$0xff] %v13870_v53  ;;  %v13886_v31 = vmul.f32 %v18098_v13, %v18097_v46  ;;  %v13890_v10 = vmul.f32 %v18101_v23, %v18100_v56  ;;  %v18103_v53 = vld [vmem:[#allocation405_spill] sm:$0xff]  ;;  %v18104_v60 = vld [vmem:[#allocation664_spill] sm:$0xff]  ;;  %v18109_v61 = vld [vmem:[#allocation407_spill] sm:$0xff]  ;;  %5600 = vperm.xlu0 %8601, %v13738_v4   ;;  %v6032_v4 = vadd.s32 4294967208, %v13682_v7 }
 0x922   :  { %18092 = vst [vmem:[#allocation562_spill] sm:$0xff] %v13874_v5  ;;  %18094 = vst [vmem:[#allocation304_spill] sm:$0xff] %v13878_v50  ;;  %v13894_v57 = vmul.f32 %v18104_v60, %v18103_v53  ;;  %v18106_v5 = vld [vmem:[#allocation410_spill] sm:$0xff]  ;;  %v18107_v42 = vld [vmem:[#allocation665_spill] sm:$0xff] }
 0x923   :  { %18099 = vst [vmem:[#allocation564_spill] sm:$0xff] %v13886_v31  ;;  %18102 = vst [vmem:[#allocation306_spill] sm:$0xff] %v13890_v10  ;;  %v13898_v18 = vmul.f32 %v18107_v42, %v18106_v5  ;;  %v18110_v43 = vld [vmem:[#allocation666_spill] sm:$0xff]  ;;  %v18112_v50 = vld [vmem:[#allocation412_spill] sm:$0xff] }
 0x924   :  { %18105 = vst [vmem:[#allocation561_spill] sm:$0xff] %v13894_v57  ;;  %v13902_v49 = vmul.f32 %v18110_v43, %v18109_v61  ;;  %v18113_v46 = vld [vmem:[#allocation667_spill] sm:$0xff]  ;;  %v18115_v31 = vld [vmem:[#allocation409_spill] sm:$0xff]  ;;  %v18116_v56 = vld [vmem:[#allocation668_spill] sm:$0xff]  ;;  %5597 = vperm.xlu1 %8602, %v13726_v47  }
 0x925   :  { %18108 = vst [vmem:[#allocation307_spill] sm:$0xff] %v13898_v18  ;;  %v13906_v13 = vmul.f32 %v18113_v46, %v18112_v50  ;;  %v13910_v23 = vmul.f32 %v18116_v56, %v18115_v31  ;;  %v18117_v10 = vld [vmem:[#allocation414_spill] sm:$0xff]  ;;  %v18118_v53 = vld [vmem:[#allocation669_spill] sm:$0xff]  ;;  %v18120_v57 = vld [vmem:[#allocation411_spill] sm:$0xff]  ;;  %5606 = vperm.xlu0 %8601, %v13750_v2   ;;  %v6039_v2 = vadd.s32 4294967200, %v13682_v7 }
 0x926   :  { %18111 = vst [vmem:[#allocation566_spill] sm:$0xff] %v13902_v49  ;;  %v13914_v60 = vmul.f32 %v18118_v53, %v18117_v10  ;;  %v18121_v5 = vld [vmem:[#allocation670_spill] sm:$0xff]  ;;  %v18122_v35 = vld [vmem:[#allocation416_spill] sm:$0xff]  ;;  %v18123_v18 = vld [vmem:[#allocation671_spill] sm:$0xff] }
 0x927   :  { %18114 = vst [vmem:[#allocation308_spill] sm:$0xff] %v13906_v13  ;;  %v13918_v42 = vmul.f32 %v18121_v5, %v18120_v57  ;;  %v13922_v43 = vmul.f32 %v18123_v18, %v18122_v35  ;;  %v18124_v61 = vld [vmem:[#allocation413_spill] sm:$0xff]  ;;  %v18125_v49 = vld [vmem:[#allocation672_spill] sm:$0xff]  ;;  %v18126_v46 = vld [vmem:[#allocation418_spill] sm:$0xff] }
 0x928   :  { %18119 = vst [vmem:[#allocation563_spill] sm:$0xff] %v13914_v60  ;;  %v13926_v50 = vmul.f32 %v18125_v49, %v18124_v61  ;;  %v13930_v31 = vmul.f32 %v17433_v11, %v18126_v46  ;;  %v18127_v56 = vld [vmem:[#allocation415_spill] sm:$0xff]  ;;  %v18128_v13 = vld [vmem:[#allocation674_spill] sm:$0xff]  ;;  %v18129_v53 = vld [vmem:[#allocation420_spill] sm:$0xff]  ;;  %v13949_v11 = vpop.permute.xlu1 %5399  ;;  %v13951_v61 = vpop.permute.xlu0 %5408  ;;  %5603 = vperm.xlu1 %8602, %v13734_v51  }
 0x929   :  { %v13934_v10 = vmul.f32 %v18128_v13, %v18127_v56  ;;  %v13938_v57 = vmul.f32 %v17439_v19, %v18129_v53  ;;  %v18131_v5 = vld [vmem:[#allocation417_spill] sm:$0xff]  ;;  %v18132_v60 = vld [vmem:[#allocation676_spill] sm:$0xff]  ;;  %v18133_v35 = vld [vmem:[#allocation422_spill] sm:$0xff]  ;;  %18134 = vst [vmem:[#allocation568_spill] sm:$0xff] %v13949_v11  ;;  %5612 = vperm.xlu0 %8601, %v13758_v63  }
 0x92a   :  { %v13942_v18 = vmul.f32 %v18132_v60, %v18131_v5  ;;  %v13946_v49 = vmul.f32 %v17445_v29, %v18133_v35  ;;  %18135 = vst [vmem:[#allocation310_spill] sm:$0xff] %v13951_v61  ;;  %v18136_v13 = vld [vmem:[#allocation419_spill] sm:$0xff]  ;;  %v18137_v46 = vld [vmem:[#allocation678_spill] sm:$0xff]  ;;  %v18138_v19 = vld [vmem:[#allocation425_spill] sm:$0xff]  ;;  %v5990_v29 = vadd.s32 4294967256, %v13682_v7 }
 0x92b   :  { %18130 = vst [vmem:[#allocation309_spill] sm:$0xff] %v13938_v57  ;;  %v13955_v56 = vmul.f32 %v18137_v46, %v18136_v13  ;;  %v13959_v53 = vmul.f32 %v17450_v0, %v18138_v19  ;;  %v18140_v60 = vld [vmem:[#allocation421_spill] sm:$0xff]  ;;  %v18141_v5 = vld [vmem:[#allocation680_spill] sm:$0xff]  ;;  %v18142_v3 = vld [vmem:[#allocation427_spill] sm:$0xff] }
 0x92c   :  { %v13963_v57 = vmul.f32 %v18141_v5, %v18140_v60  ;;  %v13969_v35 = vmul.f32 %v17455_v9, %v18142_v3  ;;  %v18144_v61 = vld [vmem:[#allocation424_spill] sm:$0xff]  ;;  %v18145_v11 = vld [vmem:[#allocation682_spill] sm:$0xff]  ;;  %v18146_v46 = vld [vmem:[#allocation429_spill] sm:$0xff]  ;;  %5609 = vperm.xlu1 %8602, %v13742_v41  }
 0x92d   :  { %18139 = vst [vmem:[#allocation565_spill] sm:$0xff] %v13959_v53  ;;  %v13973_v13 = vmul.f32 %v18145_v11, %v18144_v61  ;;  %v13977_v0 = vmul.f32 %v17460_v52, %v18146_v46  ;;  %v18148_v19 = vld [vmem:[#allocation423_spill] sm:$0xff]  ;;  %v18149_v11 = vld [vmem:[#allocation426_spill] sm:$0xff]  ;;  %v18150_v61 = vld [vmem:[#allocation684_spill] sm:$0xff]  ;;  %5618 = vperm.xlu0 %8601, %v13766_v30  }
 0x92e   :  { %18143 = vst [vmem:[#allocation311_spill] sm:$0xff] %v13969_v35  ;;  %v13981_v60 = vsub.s32 %v13682_v7, %v18148_v19  ;;  %v13985_v5 = vsub.s32 %v13689_v28, %v18148_v19  ;;  %v13989_v9 = vsub.s32 %v13699_v48, %v18148_v19  ;;  %v13994_v3 = vmul.f32 %v18150_v61, %v18149_v11  ;;  %v18152_v52 = vld [vmem:[#allocation431_spill] sm:$0xff]  ;;  %v14005_v28 = vpop.permute.xlu1 %5405  ;;  %v14007_v48 = vpop.permute.xlu0 %5414  ;;  %v18156_v35 = vld [vmem:[#allocation428_spill] sm:$0xff] }
 0x92f   :  { %18147 = vst [vmem:[#allocation570_spill] sm:$0xff] %v13977_v0  ;;  %v13998_v46 = vmul.f32 %v12161_v55, %v18152_v52  ;;  %v14002_v0 = vsub.s32 %v13696_v58, %v18148_v19  ;;  %18154 = vst [vmem:[#allocation313_spill] sm:$0xff] %v14005_v28  ;;  %v14011_v53 = vmul.f32 %v12167_v54, %v18156_v35  ;;  %v5997_v55 = vadd.s32 4294967248, %v13682_v7  ;;  %v18158_v58 = vld [vmem:[#allocation433_spill] sm:$0xff]  ;;  %v18183_v51 = vld [vmem:[#allocation436_spill] sm:$0xff] }
 0x930   :  { %18151 = vst [vmem:[#allocation312_spill] sm:$0xff] %v13994_v3  ;;  %18155 = vst [vmem:[#allocation572_spill] sm:$0xff] %v14007_v48  ;;  %v14014_v11 = vsub.s32 %v5990_v29, %v18148_v19  ;;  %v6018_v61 = vadd.s32 4294967224, %v13682_v7  ;;  %v14021_v6 = vmul.f32 %v12169_v1, %v18158_v58  ;;  %v14025_v52 = vsub.s32 %v13702_v16, %v18148_v19  ;;  %v18160_v29 = vld [vmem:[#allocation39_spill] sm:$0xff]  ;;  %v18165_v16 = vld [vmem:[#allocation41_spill] sm:$0xff] }
 0x931   :  { %18153 = vst [vmem:[#allocation567_spill] sm:$0xff] %v13998_v46  ;;  %18157 = vst [vmem:[#allocation314_spill] sm:$0xff] %v14011_v53  ;;  %v6011_v54 = vadd.s32 4294967232, %v13682_v7  ;;  %v5966_v35 = vrot.slane %v18160_v29, %v13985_v5  ;;  %v14031_v48 = vsub.s32 %v6004_v34, %v18148_v19  ;;  %v18161_v46 = vld [vmem:[#allocation430_spill] sm:$0xff]  ;;  %v18163_v58 = vld [vmem:[#allocation435_spill] sm:$0xff]  ;;  %v5973_v28 = vrot.slane %v18165_v16, %v14002_v0 }
 0x932   :  { %18159 = vst [vmem:[#allocation569_spill] sm:$0xff] %v14021_v6  ;;  %v14036_v1 = vmul.f32 %v12175_v40, %v18161_v46  ;;  %v14040_v6 = vmul.f32 %v12177_v24, %v18163_v58  ;;  %v14045_v29 = vpop.permute.xlu1 %5411  ;;  %v14047_v34 = vpop.permute.xlu0 %5420  ;;  %v18168_v53 = vld [vmem:[#allocation38_spill] sm:$0xff]  ;;  %v14052_v40 = vsub.s32 %v5997_v55, %v18148_v19  ;;  %v14055_v24 = vsub.s32 %v6018_v61, %v18148_v19  ;;  %v18169_v58 = vld [vmem:[#allocation432_spill] sm:$0xff]  ;;  %v18171_v16 = vld [vmem:[#allocation437_spill] sm:$0xff] }
 0x933   :  { %18166 = vst [vmem:[#allocation316_spill] sm:$0xff] %v14045_v29  ;;  %18167 = vst [vmem:[#allocation571_spill] sm:$0xff] %v14047_v34  ;;  %v5961_v3 = vrot.slane %v18168_v53, %v13981_v60  ;;  %v6025_v46 = vadd.s32 4294967216, %v13682_v7  ;;  %v14061_v47 = vmul.f32 %v12183_v17, %v18169_v58  ;;  %v14068_v53 = vsub.s32 %v6011_v54, %v18148_v19  ;;  %v18173_v17 = vld [vmem:[#allocation434_spill] sm:$0xff]  ;;  %v18175_v54 = vld [vmem:[#allocation43_spill] sm:$0xff] }
 0x934   :  { %18162 = vst [vmem:[#allocation315_spill] sm:$0xff] %v14036_v1  ;;  %18164 = vst [vmem:[#allocation574_spill] sm:$0xff] %v14040_v6  ;;  %v14065_v6 = vmul.f32 %v12185_v37, %v18171_v16  ;;  %v6046_v55 = vadd.s32 4294967192, %v13682_v7  ;;  %v14073_v34 = vsub.s32 %v6032_v4, %v18148_v19  ;;  %v6060_v29 = vadd.s32 4294967176, %v13682_v7  ;;  %v18196_v41 = vld [vmem:[#allocation440_spill] sm:$0xff]  ;;  %5615 = vperm.xlu1 %8602, %v13754_v8   ;;  %v18215_v8 = vld [vmem:[#allocation685_spill] sm:$0xff] }
 0x935   :  { %18170 = vst [vmem:[#allocation317_spill] sm:$0xff] %v14061_v47  ;;  %v5968_v61 = vsel %vm5967_vm1, %v5966_v35, %v5961_v3  ;;  %v14079_v58 = vmul.f32 %v12191_v15, %v18173_v17  ;;  %v5987_v16 = vrot.slane %v18175_v54, %v14025_v52  ;;  %v18179_v47 = vld [vmem:[#allocation439_spill] sm:$0xff]  ;;  %v18181_v15 = vld [vmem:[#allocation40_spill] sm:$0xff]  ;;  %v18182_v17 = vld [vmem:[#allocation57_spill] sm:$0xff]  ;;  %v14105_v54 = vmul.f32 %v12199_v20, %v18183_v51 }
 0x936   :  { %18172 = vst [vmem:[#allocation576_spill] sm:$0xff] %v14065_v6  ;;  %v5975_v37 = vsel %vm16259_vm2, %v5973_v28, %v5968_v61  ;;  %v18176_v6 = vld [vmem:[#allocation55_spill] sm:$0xff]  ;;  %v14087_v35 = vpop.permute.xlu1 %5417  ;;  %v14089_v4 = vpop.permute.xlu0 %5426  ;;  %v14093_v1 = vmul.f32 %v12193_v36, %v18179_v47  ;;  %v5980_v28 = vrot.slane %v18181_v15, %v13989_v9  ;;  %v14098_v61 = vsub.s32 %v6025_v46, %v18148_v19  ;;  %v18185_v47 = vld [vmem:[#allocation54_spill] sm:$0xff] }
 0x937   :  { %18174 = vst [vmem:[#allocation318_spill] sm:$0xff] %v14079_v58  ;;  %v6070_v3 = vrot.slane %v18176_v6, %v13981_v60  ;;  %18177 = vst [vmem:[#allocation573_spill] sm:$0xff] %v14087_v35  ;;  %v6079_v6 = vrot.slane %v18182_v17, %v14002_v0  ;;  %v6053_v36 = vadd.s32 4294967184, %v13682_v7  ;;  %v6074_v15 = vrot.slane %v18185_v47, %v13985_v5  ;;  %v18188_v51 = vld [vmem:[#allocation438_spill] sm:$0xff]  ;;  %v18190_v47 = vld [vmem:[#allocation45_spill] sm:$0xff] }
 0x938   :  { %18178 = vst [vmem:[#allocation319_spill] sm:$0xff] %v14089_v4  ;;  %18180 = vst [vmem:[#allocation578_spill] sm:$0xff] %v14093_v1  ;;  %v14108_v4 = vsub.s32 %v6046_v55, %v18148_v19  ;;  %v18186_v1 = vld [vmem:[#allocation441_spill] sm:$0xff]  ;;  %v5982_v17 = vsel %vm5981_vm3, %v5980_v28, %v5975_v37  ;;  %v14119_v63 = vsub.s32 %v6039_v2, %v18148_v19 }
 0x939   :  { %18184 = vst [vmem:[#allocation320_spill] sm:$0xff] %v14105_v54  ;;  %v14115_v46 = vmul.f32 %v12201_v21, %v18186_v1  ;;  %v14122_v20 = vsub.s32 %v6060_v29, %v18148_v19  ;;  %v14126_v55 = vmul.f32 %v12207_v14, %v18188_v51  ;;  %v5989_v7 = vsel %vm5988_vm4, %v5987_v16, %v5982_v17  ;;  %v18192_v29 = vld [vmem:[#allocation443_spill] sm:$0xff]  ;;  %v18194_v14 = vld [vmem:[#allocation42_spill] sm:$0xff] }
 0x93a   :  { %v6001_v54 = vrot.slane %v18190_v47, %v14052_v40  ;;  %v6075_v21 = vsel %vm5967_vm1, %v6074_v15, %v6070_v3  ;;  %v14133_v1 = vpop.permute.xlu1 %5423  ;;  %v14135_v2 = vpop.permute.xlu0 %5432  ;;  %v14139_v37 = vmul.f32 %v12209_v26, %v18192_v29  ;;  %v5994_v28 = vrot.slane %v18194_v14, %v14014_v11  ;;  %v18195_v17 = vld [vmem:[#allocation59_spill] sm:$0xff]  ;;  %v18198_v15 = vld [vmem:[#allocation445_spill] sm:$0xff]  ;;  %v18200_v29 = vld [vmem:[#allocation56_spill] sm:$0xff] }
 0x93b   :  { %18187 = vst [vmem:[#allocation575_spill] sm:$0xff] %v14115_v46  ;;  %18189 = vst [vmem:[#allocation321_spill] sm:$0xff] %v14126_v55  ;;  %v6080_v16 = vsel %vm16259_vm2, %v6079_v6, %v6075_v21  ;;  %v6089_v51 = vrot.slane %v18195_v17, %v14025_v52  ;;  %v14149_v3 = vmul.f32 %v12215_v27, %v18196_v41  ;;  %v18201_v6 = vld [vmem:[#allocation442_spill] sm:$0xff]  ;;  %v18203_v17 = vld [vmem:[#allocation447_spill] sm:$0xff] }
 0x93c   :  { %18191 = vst [vmem:[#allocation580_spill] sm:$0xff] %v14133_v1  ;;  %18193 = vst [vmem:[#allocation322_spill] sm:$0xff] %v14139_v37  ;;  %v14153_v47 = vmul.f32 %v12217_v32, %v18198_v15  ;;  %v14156_v26 = vsub.s32 %v6053_v36, %v18148_v19  ;;  %v6084_v14 = vrot.slane %v18200_v29, %v13989_v9  ;;  %v18205_v27 = vld [vmem:[#allocation444_spill] sm:$0xff]  ;;  %v18207_v15 = vld [vmem:[#allocation449_spill] sm:$0xff] }
 0x93d   :  { %18197 = vst [vmem:[#allocation577_spill] sm:$0xff] %v14149_v3  ;;  %v14162_v21 = vmul.f32 %v12223_v33, %v18201_v6  ;;  %v14166_v30 = vmul.f32 %v12225_v38, %v18203_v17  ;;  %v14170_v41 = vmul.f32 %v12231_v39, %v18205_v27  ;;  %v5996_v32 = vsel %vm5995_vm5, %v5994_v28, %v5989_v7  ;;  %v18209_v29 = vld [vmem:[#allocation47_spill] sm:$0xff]  ;;  %v18210_v39 = vld [vmem:[#allocation44_spill] sm:$0xff]  ;;  %v18211_v28 = vld [vmem:[#allocation61_spill] sm:$0xff] }
 0x93e   :  { %18199 = vst [vmem:[#allocation323_spill] sm:$0xff] %v14153_v47  ;;  %v14175_v19 = vmul.f32 %v12233_v44, %v18207_v15  ;;  %v6003_v36 = vsel %vm6002_vm6, %v6001_v54, %v5996_v32  ;;  %v6015_v33 = vrot.slane %v18209_v29, %v14068_v53  ;;  %v6085_v6 = vsel %vm5981_vm3, %v6084_v14, %v6080_v16  ;;  %v14182_v38 = vpop.permute.xlu1 %5429  ;;  %v14184_v17 = vpop.permute.xlu0 %5438  ;;  %v18212_v27 = vld [vmem:[#allocation71_spill] sm:$0xff]  ;;  %v18213_v15 = vld [vmem:[#allocation552_spill] sm:$0xff]  ;;  %v18214_v16 = vld [vmem:[#allocation446_spill] sm:$0xff] }
 0x93f   :  { %18202 = vst [vmem:[#allocation582_spill] sm:$0xff] %v14162_v21  ;;  %18204 = vst [vmem:[#allocation324_spill] sm:$0xff] %v14166_v30  ;;  %v6008_v7 = vrot.slane %v18210_v39, %v14031_v48  ;;  %v6090_v44 = vsel %vm5988_vm4, %v6089_v51, %v6085_v6  ;;  %v6099_v54 = vrot.slane %v18211_v28, %v14052_v40  ;;  %5624 = vperm.xlu0 %8601, %v18213_v15   ;;  %v18217_v29 = vld [vmem:[#allocation459_spill] sm:$0xff]  ;;  %v18220_v39 = vld [vmem:[#allocation58_spill] sm:$0xff] }
 0x940   :  { %18206 = vst [vmem:[#allocation579_spill] sm:$0xff] %v14170_v41  ;;  %18208 = vst [vmem:[#allocation325_spill] sm:$0xff] %v14175_v19  ;;  %v6149_v32 = vrot.slane %v18212_v27, %v13981_v60  ;;  %v14196_v14 = vmul.f32 %v18215_v8, %v18214_v16  ;;  %v18218_v19 = vld [vmem:[#allocation5_spill] sm:$0xff]  ;;  %v6094_v51 = vrot.slane %v18220_v39, %v14014_v11  ;;  %v18223_v41 = vld [vmem:[#allocation7_spill] sm:$0xff] }
 0x941   :  { %v14200_v30 = vmul.f32 %v18218_v19, %v18217_v29  ;;  %v18221_v6 = vld [vmem:[#allocation73_spill] sm:$0xff]  ;;  %v18225_v15 = vld [vmem:[#allocation458_spill] sm:$0xff]  ;;  %v18226_v37 = vld [vmem:[#allocation8_spill] sm:$0xff]  ;;  %v6010_v16 = vsel %vm6009_vm7, %v6008_v7, %v6003_v36 }
 0x942   :  { %18216 = vst [vmem:[#allocation584_spill] sm:$0xff] %v14196_v14  ;;  %v6158_v28 = vrot.slane %v18221_v6, %v14002_v0  ;;  %v18222_v47 = vld [vmem:[#allocation461_spill] sm:$0xff]  ;;  %v14212_v21 = vmul.f32 %v18226_v37, %v18225_v15  ;;  %v18228_v19 = vld [vmem:[#allocation70_spill] sm:$0xff]  ;;  %v18229_v29 = vld [vmem:[#allocation463_spill] sm:$0xff]  ;;  %v6017_v39 = vsel %vm6016_vm8, %v6015_v33, %v6010_v16  ;;  %v14226_v37 = vpop.permute.xlu1 %5435  ;;  %v14228_v15 = vpop.permute.xlu0 %5444 }
 0x943   :  { %18219 = vst [vmem:[#allocation326_spill] sm:$0xff] %v14200_v30  ;;  %v14208_v27 = vmul.f32 %v18223_v41, %v18222_v47  ;;  %v6153_v8 = vrot.slane %v18228_v19, %v13985_v5  ;;  %v18230_v14 = vld [vmem:[#allocation9_spill] sm:$0xff]  ;;  %v6095_v47 = vsel %vm5995_vm5, %v6094_v51, %v6090_v44  ;;  %v18233_v41 = vld [vmem:[#allocation547_spill] sm:$0xff]  ;;  %18234 = vst [vmem:[#allocation328_spill] sm:$0xff] %v14228_v15 }
 0x944   :  { %18227 = vst [vmem:[#allocation327_spill] sm:$0xff] %v14212_v21  ;;  %v14219_v30 = vmul.f32 %v18230_v14, %v18229_v29  ;;  %v18232_v6 = vld [vmem:[#allocation49_spill] sm:$0xff]  ;;  %5621 = vperm.xlu1 %8602, %v18233_v41   ;;  %v18235_v36 = vld [vmem:[#allocation46_spill] sm:$0xff]  ;;  %v6100_v19 = vsel %vm6002_vm6, %v6099_v54, %v6095_v47  ;;  %v18236_v14 = vld [vmem:[#allocation63_spill] sm:$0xff] }
 0x945   :  { %18224 = vst [vmem:[#allocation581_spill] sm:$0xff] %v14208_v27  ;;  %v6029_v46 = vrot.slane %v18232_v6, %v14098_v61  ;;  %v6022_v7 = vrot.slane %v18235_v36, %v14055_v24  ;;  %v6109_v29 = vrot.slane %v18236_v14, %v14068_v53  ;;  %v6154_v33 = vsel %vm5967_vm1, %v6153_v8, %v6149_v32  ;;  %v18237_v16 = vld [vmem:[#allocation549_spill] sm:$0xff]  ;;  %v18238_v44 = vld [vmem:[#allocation60_spill] sm:$0xff]  ;;  %v18239_v41 = vld [vmem:[#allocation75_spill] sm:$0xff] }
 0x946   :  { %18231 = vst [vmem:[#allocation586_spill] sm:$0xff] %v14219_v30  ;;  %5630 = vperm.xlu0 %8601, %v18237_v16   ;;  %v6104_v51 = vrot.slane %v18238_v44, %v14031_v48  ;;  %v6159_v6 = vsel %vm16259_vm2, %v6158_v28, %v6154_v33  ;;  %v6168_v30 = vrot.slane %v18239_v41, %v14025_v52  ;;  %v18240_v27 = vld [vmem:[#allocation87_spill] sm:$0xff]  ;;  %v18241_v21 = vld [vmem:[#allocation460_spill] sm:$0xff]  ;;  %v18242_v54 = vld [vmem:[#allocation10_spill] sm:$0xff] }
 0x947   :  { %v6228_v36 = vrot.slane %v18240_v27, %v13981_v60  ;;  %v14246_v47 = vmul.f32 %v18242_v54, %v18241_v21  ;;  %v6024_v14 = vsel %vm16261_vm9, %v6022_v7, %v6017_v39  ;;  %v18244_v32 = vld [vmem:[#allocation72_spill] sm:$0xff]  ;;  %v18245_v16 = vld [vmem:[#allocation89_spill] sm:$0xff]  ;;  %v18247_v27 = vld [vmem:[#allocation86_spill] sm:$0xff]  ;;  %v14260_v54 = vpop.permute.xlu1 %5441  ;;  %v14262_v39 = vpop.permute.xlu0 %5450 }
 0x948   :  { %v6163_v8 = vrot.slane %v18244_v32, %v13989_v9  ;;  %v6237_v44 = vrot.slane %v18245_v16, %v14002_v0  ;;  %v18246_v28 = vld [vmem:[#allocation48_spill] sm:$0xff]  ;;  %v6031_v41 = vsel %vm6030_vm10, %v6029_v46, %v6024_v14  ;;  %v6105_v3 = vsel %vm6009_vm7, %v6104_v51, %v6100_v19  ;;  %v18248_v21 = vld [vmem:[#allocation293_spill] sm:$0xff]  ;;  %18249 = vst [vmem:[#allocation329_spill] sm:$0xff] %v14262_v39  ;;  %v18250_v7 = vld [vmem:[#allocation51_spill] sm:$0xff] }
 0x949   :  { %18243 = vst [vmem:[#allocation583_spill] sm:$0xff] %v14246_v47  ;;  %v6036_v33 = vrot.slane %v18246_v28, %v14073_v34  ;;  %v6232_v55 = vrot.slane %v18247_v27, %v13985_v5  ;;  %5627 = vperm.xlu1 %8602, %v18248_v21   ;;  %v6043_v32 = vrot.slane %v18250_v7, %v14119_v63  ;;  %v18251_v28 = vld [vmem:[#allocation65_spill] sm:$0xff]  ;;  %v18252_v51 = vld [vmem:[#allocation62_spill] sm:$0xff] }
 0x94a   :  { %v6110_v16 = vsel %vm6016_vm8, %v6109_v29, %v6105_v3  ;;  %v6119_v46 = vrot.slane %v18251_v28, %v14098_v61  ;;  %v6164_v19 = vsel %vm5981_vm3, %v6163_v8, %v6159_v6  ;;  %5636 = vperm.xlu0 %8601, %v13790_v22   ;;  %v6114_v14 = vrot.slane %v18252_v51, %v14055_v24  ;;  %v18253_v21 = vld [vmem:[#allocation77_spill] sm:$0xff]  ;;  %v18254_v3 = vld [vmem:[#allocation50_spill] sm:$0xff]  ;;  %v18256_v22 = vld [vmem:[#allocation91_spill] sm:$0xff] }
 0x94b   :  { %v6169_v27 = vsel %vm5988_vm4, %v6168_v30, %v6164_v19  ;;  %v6178_v47 = vrot.slane %v18253_v21, %v14052_v40  ;;  %v6233_v7 = vsel %vm5967_vm1, %v6232_v55, %v6228_v36  ;;  %v6050_v29 = vrot.slane %v18254_v3, %v14108_v4  ;;  %v18255_v28 = vld [vmem:[#allocation74_spill] sm:$0xff]  ;;  %v18257_v30 = vld [vmem:[#allocation52_spill] sm:$0xff]  ;;  %v14291_v3 = vpop.permute.xlu1 %5447 }
 0x94c   :  { %v6173_v1 = vrot.slane %v18255_v28, %v14014_v11  ;;  %v6238_v6 = vsel %vm16259_vm2, %v6237_v44, %v6233_v7  ;;  %v6247_v8 = vrot.slane %v18256_v22, %v14025_v52  ;;  %v6038_v51 = vsel %vm6037_vm11, %v6036_v33, %v6031_v41  ;;  %v18258_v55 = vld [vmem:[#allocation88_spill] sm:$0xff]  ;;  %v18259_v39 = vld [vmem:[#allocation294_spill] sm:$0xff]  ;;  %18260 = vst [vmem:[#allocation588_spill] sm:$0xff] %v14291_v3  ;;  %v14293_v28 = vpop.permute.xlu0 %5456  ;;  %v18262_v33 = vld [vmem:[#allocation67_spill] sm:$0xff] }
 0x94d   :  { %v6115_v21 = vsel %vm16261_vm9, %v6114_v14, %v6110_v16  ;;  %v6242_v36 = vrot.slane %v18258_v55, %v13989_v9  ;;  %5633 = vperm.xlu1 %8602, %v18259_v39   ;;  %18261 = vst [vmem:[#allocation330_spill] sm:$0xff] %v14293_v28  ;;  %v6045_v44 = vsel %vm6044_vm12, %v6043_v32, %v6038_v51  ;;  %v18263_v16 = vld [vmem:[#allocation64_spill] sm:$0xff]  ;;  %v18264_v55 = vld [vmem:[#allocation79_spill] sm:$0xff] }
 0x94e   :  { %v6120_v7 = vsel %vm6030_vm10, %v6119_v46, %v6115_v21  ;;  %v6129_v41 = vrot.slane %v18262_v33, %v14119_v63  ;;  %v6174_v22 = vsel %vm5995_vm5, %v6173_v1, %v6169_v27  ;;  %5642 = vperm.xlu0 %8601, %v13798_v12   ;;  %v6124_v14 = vrot.slane %v18263_v16, %v14073_v34  ;;  %v18265_v46 = vld [vmem:[#allocation76_spill] sm:$0xff]  ;;  %v18266_v1 = vld [vmem:[#allocation93_spill] sm:$0xff]  ;;  %v18267_v12 = vld [vmem:[#allocation102_spill] sm:$0xff] }
 0x94f   :  { %v6179_v39 = vsel %vm6002_vm6, %v6178_v47, %v6174_v22  ;;  %v6188_v19 = vrot.slane %v18264_v55, %v14068_v53  ;;  %v6243_v32 = vsel %vm5981_vm3, %v6242_v36, %v6238_v6  ;;  %v6183_v51 = vrot.slane %v18265_v46, %v14031_v48  ;;  %v18268_v16 = vld [vmem:[#allocation53_spill] sm:$0xff]  ;;  %v18269_v22 = vld [vmem:[#allocation90_spill] sm:$0xff]  ;;  %v18270_v6 = vld [vmem:[#allocation104_spill] sm:$0xff] }
 0x950   :  { %v6248_v21 = vsel %vm5988_vm4, %v6247_v8, %v6243_v32  ;;  %v6257_v27 = vrot.slane %v18266_v1, %v14052_v40  ;;  %v6307_v33 = vrot.slane %v18267_v12, %v13981_v60  ;;  %v6057_v28 = vrot.slane %v18268_v16, %v14156_v26  ;;  %v18271_v46 = vld [vmem:[#allocation295_spill] sm:$0xff]  ;;  %v14322_v8 = vpop.permute.xlu1 %5453  ;;  %v14324_v32 = vpop.permute.xlu0 %5462  ;;  %v18274_v1 = vld [vmem:[#allocation66_spill] sm:$0xff] }
 0x951   :  { %v6125_v47 = vsel %vm6037_vm11, %v6124_v14, %v6120_v7  ;;  %v6252_v55 = vrot.slane %v18269_v22, %v14014_v11  ;;  %v6316_v36 = vrot.slane %v18270_v6, %v14002_v0  ;;  %5639 = vperm.xlu1 %8602, %v18271_v46   ;;  %18272 = vst [vmem:[#allocation585_spill] sm:$0xff] %v14322_v8  ;;  %18273 = vst [vmem:[#allocation331_spill] sm:$0xff] %v14324_v32  ;;  %v18275_v7 = vld [vmem:[#allocation101_spill] sm:$0xff]  ;;  %v18276_v22 = vld [vmem:[#allocation551_spill] sm:$0xff] }
 0x952   :  { %v6134_v12 = vrot.slane %v18274_v1, %v14108_v4  ;;  %v6130_v35 = vsel %vm6044_vm12, %v6129_v41, %v6125_v47  ;;  %v6184_v16 = vsel %vm6009_vm7, %v6183_v51, %v6179_v39  ;;  %v6311_v14 = vrot.slane %v18275_v7, %v13985_v5  ;;  %5648 = vperm.xlu0 %8601, %v18276_v22   ;;  %v18277_v6 = vld [vmem:[#allocation69_spill] sm:$0xff]  ;;  %v18279_v1 = vld [vmem:[#allocation78_spill] sm:$0xff]  ;;  %v18280_v51 = vld [vmem:[#allocation95_spill] sm:$0xff] }
 0x953   :  { %v6139_v58 = vrot.slane %v18277_v6, %v14156_v26  ;;  %v6189_v46 = vsel %vm6016_vm8, %v6188_v19, %v6184_v16  ;;  %v18278_v8 = vld [vmem:[#allocation81_spill] sm:$0xff]  ;;  %v6253_v15 = vsel %vm5995_vm5, %v6252_v55, %v6248_v21  ;;  %v6193_v41 = vrot.slane %v18279_v1, %v14055_v24  ;;  %v18281_v6 = vld [vmem:[#allocation92_spill] sm:$0xff]  ;;  %v18283_v55 = vld [vmem:[#allocation554_spill] sm:$0xff] }
 0x954   :  { %v6198_v32 = vrot.slane %v18278_v8, %v14098_v61  ;;  %v6258_v39 = vsel %vm6002_vm6, %v6257_v27, %v6253_v15  ;;  %v6267_v47 = vrot.slane %v18280_v51, %v14068_v53  ;;  %v6312_v7 = vsel %vm5967_vm1, %v6311_v14, %v6307_v33  ;;  %v18282_v8 = vld [vmem:[#allocation106_spill] sm:$0xff]  ;;  %v14352_v1 = vpop.permute.xlu1 %5459  ;;  %v14354_v15 = vpop.permute.xlu0 %5468  ;;  %v18287_v51 = vld [vmem:[#allocation553_spill] sm:$0xff]  ;;  %v18324_v3 = vld [vmem:[#allocation299_spill] sm:$0xff] }
 0x955   :  { %v6052_v22 = vsel %vm6051_vm13, %v6050_v29, %v6045_v44  ;;  %v6262_v19 = vrot.slane %v18281_v6, %v14031_v48  ;;  %v6317_v16 = vsel %vm16259_vm2, %v6316_v36, %v6312_v7  ;;  %v6326_v21 = vrot.slane %v18282_v8, %v14025_v52  ;;  %5645 = vperm.xlu1 %8602, %v18283_v55   ;;  %v18286_v44 = vld [vmem:[#allocation103_spill] sm:$0xff]  ;;  %v18288_v36 = vld [vmem:[#allocation68_spill] sm:$0xff] }
 0x956   :  { %18284 = vst [vmem:[#allocation590_spill] sm:$0xff] %v14352_v1  ;;  %18285 = vst [vmem:[#allocation332_spill] sm:$0xff] %v14354_v15  ;;  %v6059_v27 = vsel %vm6058_vm14, %v6057_v28, %v6052_v22  ;;  %v6135_v33 = vsel %vm6051_vm13, %v6134_v12, %v6130_v35  ;;  %v6194_v29 = vsel %vm16261_vm9, %v6193_v41, %v6189_v46  ;;  %5654 = vperm.xlu0 %8601, %v18287_v51   ;;  %v18289_v28 = vld [vmem:[#allocation83_spill] sm:$0xff]  ;;  %v18290_v12 = vld [vmem:[#allocation97_spill] sm:$0xff] }
 0x957   :  { %v6321_v14 = vrot.slane %v18286_v44, %v13989_v9  ;;  %v6144_v7 = vrot.slane %v18288_v36, %v14122_v20  ;;  %v6140_v6 = vsel %vm6058_vm14, %v6139_v58, %v6135_v33  ;;  %v6199_v8 = vsel %vm6030_vm10, %v6198_v32, %v6194_v29  ;;  %v18291_v44 = vld [vmem:[#allocation80_spill] sm:$0xff]  ;;  %v18292_v36 = vld [vmem:[#allocation94_spill] sm:$0xff] }
 0x958   :  { %v6263_v55 = vsel %vm6009_vm7, %v6262_v19, %v6258_v39  ;;  %v6208_v22 = vrot.slane %v18289_v28, %v14119_v63  ;;  %v6277_v46 = vrot.slane %v18290_v12, %v14098_v61  ;;  %v6203_v51 = vrot.slane %v18291_v44, %v14073_v34  ;;  %v18293_v39 = vld [vmem:[#allocation108_spill] sm:$0xff]  ;;  %v14381_v29 = vpop.permute.xlu1 %5465  ;;  %v18298_v28 = vld [vmem:[#allocation21_spill] sm:$0xff] }
 0x959   :  { %v6268_v35 = vsel %vm6016_vm8, %v6267_v47, %v6263_v55  ;;  %v6322_v41 = vsel %vm5981_vm3, %v6321_v14, %v6317_v16  ;;  %v6272_v58 = vrot.slane %v18292_v36, %v14055_v24  ;;  %v6336_v19 = vrot.slane %v18293_v39, %v14052_v40  ;;  %v18294_v33 = vld [vmem:[#allocation296_spill] sm:$0xff]  ;;  %18295 = vst [vmem:[#allocation587_spill] sm:$0xff] %v14381_v29  ;;  %v14383_v47 = vpop.permute.xlu0 %5474  ;;  %v18297_v55 = vld [vmem:[#allocation475_spill] sm:$0xff]  ;;  %v18300_v14 = vld [vmem:[#allocation474_spill] sm:$0xff] }
 0x95a   :  { %v6327_v32 = vsel %vm5988_vm4, %v6326_v21, %v6322_v41  ;;  %5651 = vperm.xlu1 %8602, %v18294_v33   ;;  %18296 = vst [vmem:[#allocation333_spill] sm:$0xff] %v14383_v47  ;;  %v14387_v16 = vmul.f32 %v18298_v28, %v18297_v55  ;;  %v18301_v12 = vld [vmem:[#allocation24_spill] sm:$0xff]  ;;  %v18303_v21 = vrot.slane %v18257_v30, %v14122_v20  ;;  %v18304_v36 = vld [vmem:[#allocation105_spill] sm:$0xff]  ;;  %v18305_v33 = vld [vmem:[#allocation558_spill] sm:$0xff] }
 0x95b   :  { %v14391_v44 = vmul.f32 %v18301_v12, %v18300_v14  ;;  %v6331_v39 = vrot.slane %v18304_v36, %v14014_v11  ;;  %5660 = vperm.xlu0 %8601, %v18305_v33   ;;  %v14403_v47 = vsel %vm6065_vm15, %v6144_v7, %v6140_v6  ;;  %v18306_v55 = vld [vmem:[#allocation82_spill] sm:$0xff]  ;;  %v6204_v14 = vsel %vm6037_vm11, %v6203_v51, %v6199_v8  ;;  %v18308_v33 = vld [vmem:[#allocation99_spill] sm:$0xff]  ;;  %v18311_v51 = vld [vmem:[#allocation297_spill] sm:$0xff] }
 0x95c   :  { %18299 = vst [vmem:[#allocation592_spill] sm:$0xff] %v14387_v16  ;;  %v14397_v41 = vsel %vm6065_vm15, %v18303_v21, %v6059_v27  ;;  %v6213_v28 = vrot.slane %v18306_v55, %v14108_v4  ;;  %v6273_v12 = vsel %vm16261_vm9, %v6272_v58, %v6268_v35  ;;  %v6209_v30 = vsel %vm6044_vm12, %v6208_v22, %v6204_v14  ;;  %v18307_v27 = vld [vmem:[#allocation85_spill] sm:$0xff]  ;;  %v18309_v55 = vld [vmem:[#allocation110_spill] sm:$0xff]  ;;  %v14422_v22 = vpop.permute.xlu1 %5471 }
 0x95d   :  { %18302 = vst [vmem:[#allocation334_spill] sm:$0xff] %v14391_v44  ;;  %v6218_v21 = vrot.slane %v18307_v27, %v14156_v26  ;;  %v6278_v16 = vsel %vm6030_vm10, %v6277_v46, %v6273_v12  ;;  %v6332_v36 = vsel %vm5995_vm5, %v6331_v39, %v6327_v32  ;;  %v6287_v7 = vrot.slane %v18308_v33, %v14119_v63  ;;  %v18310_v8 = vld [vmem:[#allocation118_spill] sm:$0xff]  ;;  %v14424_v58 = vpop.permute.xlu0 %5480  ;;  %v18314_v46 = vld [vmem:[#allocation96_spill] sm:$0xff]  ;;  %v18315_v39 = vld [vmem:[#allocation107_spill] sm:$0xff] }
 0x95e   :  { %v6337_v6 = vsel %vm6002_vm6, %v6336_v19, %v6332_v36  ;;  %v6346_v44 = vrot.slane %v18309_v55, %v14068_v53  ;;  %v6386_v35 = vrot.slane %v18310_v8, %v13981_v60  ;;  %5657 = vperm.xlu1 %8602, %v18311_v51   ;;  %18312 = vst [vmem:[#allocation589_spill] sm:$0xff] %v14422_v22  ;;  %18313 = vst [vmem:[#allocation335_spill] sm:$0xff] %v14424_v58  ;;  %v18316_v19 = vld [vmem:[#allocation120_spill] sm:$0xff]  ;;  %v18317_v27 = vld [vmem:[#allocation134_spill] sm:$0xff] }
 0x95f   :  { %v6282_v32 = vrot.slane %v18314_v46, %v14073_v34  ;;  %v6341_v14 = vrot.slane %v18315_v39, %v14031_v48  ;;  %v6395_v12 = vrot.slane %v18316_v19, %v14002_v0  ;;  %v6465_v36 = vrot.slane %v18317_v27, %v13981_v60  ;;  %v18318_v33 = vld [vmem:[#allocation555_spill] sm:$0xff]  ;;  %v18319_v55 = vld [vmem:[#allocation84_spill] sm:$0xff]  ;;  %v18320_v22 = vld [vmem:[#allocation117_spill] sm:$0xff] }
 0x960   :  { %5666 = vperm.xlu0 %8601, %v18318_v33   ;;  %v6223_v8 = vrot.slane %v18319_v55, %v14122_v20  ;;  %v6214_v51 = vsel %vm6051_vm13, %v6213_v28, %v6209_v30  ;;  %v6390_v15 = vrot.slane %v18320_v22, %v13985_v5  ;;  %v18321_v46 = vld [vmem:[#allocation136_spill] sm:$0xff]  ;;  %v18322_v27 = vld [vmem:[#allocation133_spill] sm:$0xff] }
 0x961   :  { %v6474_v29 = vrot.slane %v18321_v46, %v14002_v0  ;;  %v6219_v39 = vsel %vm6058_vm14, %v6218_v21, %v6214_v51  ;;  %v6283_v19 = vsel %vm6037_vm11, %v6282_v32, %v6278_v16  ;;  %v6342_v1 = vsel %vm6009_vm7, %v6341_v14, %v6337_v6  ;;  %v18323_v28 = vld [vmem:[#allocation112_spill] sm:$0xff]  ;;  %v14453_v46 = vpop.permute.xlu1 %5477  ;;  %v14455_v21 = vpop.permute.xlu0 %5486  ;;  %v18327_v16 = vld [vmem:[#allocation109_spill] sm:$0xff] }
 0x962   :  { %v6469_v33 = vrot.slane %v18322_v27, %v13985_v5  ;;  %v6288_v58 = vsel %vm6044_vm12, %v6287_v7, %v6283_v19  ;;  %v6347_v55 = vsel %vm6016_vm8, %v6346_v44, %v6342_v1  ;;  %v6356_v30 = vrot.slane %v18323_v28, %v14098_v61  ;;  %5663 = vperm.xlu1 %8602, %v18324_v3   ;;  %v18328_v7 = vld [vmem:[#allocation122_spill] sm:$0xff]  ;;  %v18329_v44 = vld [vmem:[#allocation560_spill] sm:$0xff]  ;;  %v18331_v3 = vld [vmem:[#allocation119_spill] sm:$0xff] }
 0x963   :  { %v6391_v22 = vsel %vm5967_vm1, %v6390_v15, %v6386_v35  ;;  %18325 = vst [vmem:[#allocation594_spill] sm:$0xff] %v14453_v46  ;;  %18326 = vst [vmem:[#allocation336_spill] sm:$0xff] %v14455_v21  ;;  %v6351_v6 = vrot.slane %v18327_v16, %v14055_v24  ;;  %v6405_v14 = vrot.slane %v18328_v7, %v14025_v52  ;;  %v18330_v15 = vld [vmem:[#allocation98_spill] sm:$0xff] }
 0x964   :  { %v6396_v32 = vsel %vm16259_vm2, %v6395_v12, %v6391_v22  ;;  %v6470_v1 = vsel %vm5967_vm1, %v6469_v33, %v6465_v36  ;;  %5672 = vperm.xlu0 %8601, %v18329_v44   ;;  %v6292_v35 = vrot.slane %v18330_v15, %v14108_v4  ;;  %v6400_v51 = vrot.slane %v18331_v3, %v13989_v9  ;;  %v18332_v27 = vld [vmem:[#allocation138_spill] sm:$0xff]  ;;  %v18333_v22 = vld [vmem:[#allocation611_spill] sm:$0xff] }
 0x965   :  { %v6475_v19 = vsel %vm16259_vm2, %v6474_v29, %v6470_v1  ;;  %v6484_v28 = vrot.slane %v18332_v27, %v14025_v52  ;;  %v14472_v12 = vsel %vm6065_vm15, %v6223_v8, %v6219_v39  ;;  %v6297_v16 = vrot.slane %v18333_v22, %v14156_v26  ;;  %v18334_v33 = vld [vmem:[#allocation135_spill] sm:$0xff]  ;;  %v18336_v27 = vld [vmem:[#allocation300_spill] sm:$0xff]  ;;  %v14485_v8 = vpop.permute.xlu1 %5483  ;;  %v14487_v39 = vpop.permute.xlu0 %5492 }
 0x966   :  { %v6352_v36 = vsel %vm16261_vm9, %v6351_v6, %v6347_v55  ;;  %v6479_v7 = vrot.slane %v18334_v33, %v13989_v9  ;;  %v6293_v44 = vsel %vm6051_vm13, %v6292_v35, %v6288_v58  ;;  %v18335_v15 = vld [vmem:[#allocation111_spill] sm:$0xff]  ;;  %v6401_v1 = vsel %vm5981_vm3, %v6400_v51, %v6396_v32  ;;  %5669 = vperm.xlu1 %8602, %v18336_v27   ;;  %v18339_v55 = vld [vmem:[#allocation114_spill] sm:$0xff]  ;;  %v18340_v58 = vld [vmem:[#allocation124_spill] sm:$0xff] }
 0x967   :  { %v6361_v3 = vrot.slane %v18335_v15, %v14073_v34  ;;  %v6357_v29 = vsel %vm6030_vm10, %v6356_v30, %v6352_v36  ;;  %18337 = vst [vmem:[#allocation591_spill] sm:$0xff] %v14485_v8  ;;  %18338 = vst [vmem:[#allocation337_spill] sm:$0xff] %v14487_v39  ;;  %v6366_v6 = vrot.slane %v18339_v55, %v14119_v63  ;;  %v18341_v30 = vld [vmem:[#allocation121_spill] sm:$0xff]  ;;  %v18342_v36 = vld [vmem:[#allocation140_spill] sm:$0xff] }
 0x968   :  { %v6406_v22 = vsel %vm5988_vm4, %v6405_v14, %v6401_v1  ;;  %v6415_v35 = vrot.slane %v18340_v58, %v14052_v40  ;;  %v6480_v33 = vsel %vm5981_vm3, %v6479_v7, %v6475_v19  ;;  %5678 = vperm.xlu0 %8601, %v13850_v62   ;;  %v6410_v32 = vrot.slane %v18341_v30, %v14014_v11  ;;  %v18343_v27 = vld [vmem:[#allocation149_spill] sm:$0xff]  ;;  %v18344_v14 = vld [vmem:[#allocation100_spill] sm:$0xff] }
 0x969   :  { %v6485_v51 = vsel %vm5988_vm4, %v6484_v28, %v6480_v33  ;;  %v6494_v15 = vrot.slane %v18342_v36, %v14052_v40  ;;  %v6544_v55 = vrot.slane %v18343_v27, %v13981_v60  ;;  %v14506_v58 = vsel %vm6058_vm14, %v6297_v16, %v6293_v44  ;;  %v18345_v19 = vld [vmem:[#allocation137_spill] sm:$0xff]  ;;  %v18348_v27 = vld [vmem:[#allocation659_spill] sm:$0xff]  ;;  %v14519_v16 = vpop.permute.xlu1 %5489  ;;  %v14521_v44 = vpop.permute.xlu0 %5498 }
 0x96a   :  { %v6489_v62 = vrot.slane %v18345_v19, %v14014_v11  ;;  %v18346_v7 = vld [vmem:[#allocation661_spill] sm:$0xff]  ;;  %v6362_v36 = vsel %vm6037_vm11, %v6361_v3, %v6357_v29  ;;  %v6411_v39 = vsel %vm5995_vm5, %v6410_v32, %v6406_v22  ;;  %v6548_v21 = vrot.slane %v18348_v27, %v13985_v5  ;;  %18350 = vst [vmem:[#allocation596_spill] sm:$0xff] %v14519_v16  ;;  %v18353_v29 = vld [vmem:[#allocation126_spill] sm:$0xff] }
 0x96b   :  { %v6553_v30 = vrot.slane %v18346_v7, %v14002_v0  ;;  %v18347_v28 = vld [vmem:[#allocation113_spill] sm:$0xff]  ;;  %18351 = vst [vmem:[#allocation338_spill] sm:$0xff] %v14521_v44  ;;  %v6367_v19 = vsel %vm6044_vm12, %v6366_v6, %v6362_v36  ;;  %v18352_v7 = vld [vmem:[#allocation123_spill] sm:$0xff]  ;;  %v6425_v22 = vrot.slane %v18353_v29, %v14068_v53 }
 0x96c   :  { %v6371_v33 = vrot.slane %v18347_v28, %v14108_v4  ;;  %v18349_v1 = vld [vmem:[#allocation301_spill] sm:$0xff]  ;;  %v6420_v8 = vrot.slane %v18352_v7, %v14031_v48  ;;  %v6416_v28 = vsel %vm6002_vm6, %v6415_v35, %v6411_v39  ;;  %v6490_v3 = vsel %vm5995_vm5, %v6489_v62, %v6485_v51  ;;  %5684 = vperm.xlu0 %8601, %v13858_v45   ;;  %v18355_v6 = vld [vmem:[#allocation139_spill] sm:$0xff]  ;;  %v18356_v39 = vld [vmem:[#allocation152_spill] sm:$0xff] }
 0x96d   :  { %5675 = vperm.xlu1 %8602, %v18349_v1   ;;  %v6495_v32 = vsel %vm6002_vm6, %v6494_v15, %v6490_v3  ;;  %v18354_v1 = vld [vmem:[#allocation142_spill] sm:$0xff]  ;;  %v6549_v44 = vsel %vm5967_vm1, %v6548_v21, %v6544_v55  ;;  %v6499_v36 = vrot.slane %v18355_v6, %v14031_v48  ;;  %v6563_v35 = vrot.slane %v18356_v39, %v14025_v52  ;;  %v18357_v45 = vld [vmem:[#allocation163_spill] sm:$0xff]  ;;  %v18364_v39 = vld [vmem:[#allocation125_spill] sm:$0xff] }
 0x96e   :  { %v6504_v27 = vrot.slane %v18354_v1, %v14068_v53  ;;  %v6554_v7 = vsel %vm16259_vm2, %v6553_v30, %v6549_v44  ;;  %v6623_v51 = vrot.slane %v18357_v45, %v13981_v60  ;;  %v18358_v62 = vld [vmem:[#allocation115_spill] sm:$0xff]  ;;  %v6372_v15 = vsel %vm6051_vm13, %v6371_v33, %v6367_v19  ;;  %v18359_v3 = vld [vmem:[#allocation150_spill] sm:$0xff]  ;;  %v14550_v30 = vpop.permute.xlu1 %5495  ;;  %v14552_v44 = vpop.permute.xlu0 %5504  ;;  %v18365_v33 = vld [vmem:[#allocation673_spill] sm:$0xff] }
 0x96f   :  { %v6558_v1 = vrot.slane %v18359_v3, %v13989_v9  ;;  %v18360_v21 = vld [vmem:[#allocation675_spill] sm:$0xff]  ;;  %v18361_v6 = vld [vmem:[#allocation302_spill] sm:$0xff]  ;;  %18362 = vst [vmem:[#allocation593_spill] sm:$0xff] %v14550_v30  ;;  %18363 = vst [vmem:[#allocation339_spill] sm:$0xff] %v14552_v44  ;;  %v6430_v45 = vrot.slane %v18364_v39, %v14055_v24  ;;  %v6421_v16 = vsel %vm6009_vm7, %v6420_v8, %v6416_v28 }
 0x970   :  { %v6632_v55 = vrot.slane %v18360_v21, %v14002_v0  ;;  %v6500_v29 = vsel %vm6009_vm7, %v6499_v36, %v6495_v32  ;;  %v6627_v19 = vrot.slane %v18365_v33, %v13985_v5  ;;  %5690 = vperm.xlu0 %8601, %v13866_v25   ;;  %v6426_v3 = vsel %vm6016_vm8, %v6425_v22, %v6421_v16  ;;  %v18366_v21 = vld [vmem:[#allocation128_spill] sm:$0xff]  ;;  %v18368_v28 = vld [vmem:[#allocation154_spill] sm:$0xff]  ;;  %v18369_v25 = vld [vmem:[#allocation141_spill] sm:$0xff] }
 0x971   :  { %5681 = vperm.xlu1 %8602, %v18361_v6   ;;  %v6435_v6 = vrot.slane %v18366_v21, %v14098_v61  ;;  %v6505_v30 = vsel %vm6016_vm8, %v6504_v27, %v6500_v29  ;;  %v6559_v44 = vsel %vm5981_vm3, %v6558_v1, %v6554_v7  ;;  %v18367_v39 = vld [vmem:[#allocation144_spill] sm:$0xff]  ;;  %v6573_v32 = vrot.slane %v18368_v28, %v14052_v40  ;;  %v18370_v22 = vld [vmem:[#allocation151_spill] sm:$0xff]  ;;  %v18371_v7 = vld [vmem:[#allocation166_spill] sm:$0xff] }
 0x972   :  { %v6514_v46 = vrot.slane %v18367_v39, %v14098_v61  ;;  %v6564_v8 = vsel %vm5988_vm4, %v6563_v35, %v6559_v44  ;;  %v6628_v36 = vsel %vm5967_vm1, %v6627_v19, %v6623_v51  ;;  %v6509_v16 = vrot.slane %v18369_v25, %v14055_v24  ;;  %v14580_v1 = vpop.permute.xlu1 %5501  ;;  %v14582_v35 = vpop.permute.xlu0 %5510  ;;  %v18374_v44 = vld [vmem:[#allocation116_spill] sm:$0xff]  ;;  %v18375_v19 = vld [vmem:[#allocation127_spill] sm:$0xff] }
 0x973   :  { %v6568_v33 = vrot.slane %v18370_v22, %v14014_v11  ;;  %v6633_v27 = vsel %vm16259_vm2, %v6632_v55, %v6628_v36  ;;  %v6642_v29 = vrot.slane %v18371_v7, %v14025_v52  ;;  %18372 = vst [vmem:[#allocation598_spill] sm:$0xff] %v14580_v1  ;;  %18373 = vst [vmem:[#allocation340_spill] sm:$0xff] %v14582_v35  ;;  %v18376_v28 = vld [vmem:[#allocation164_spill] sm:$0xff]  ;;  %v18377_v36 = vld [vmem:[#allocation562_spill] sm:$0xff] }
 0x974   :  { %v6376_v51 = vrot.slane %v18374_v44, %v14156_v26  ;;  %v6440_v21 = vrot.slane %v18375_v19, %v14073_v34  ;;  %v6431_v39 = vsel %vm16261_vm9, %v6430_v45, %v6426_v3  ;;  %v6637_v55 = vrot.slane %v18376_v28, %v13989_v9  ;;  %5696 = vperm.xlu0 %8601, %v18377_v36   ;;  %v18379_v45 = vld [vmem:[#allocation156_spill] sm:$0xff]  ;;  %v18380_v36 = vld [vmem:[#allocation146_spill] sm:$0xff] }
 0x975   :  { %5687 = vperm.xlu1 %8602, %v13854_v59   ;;  %v6436_v25 = vsel %vm6030_vm10, %v6435_v6, %v6431_v39  ;;  %v18378_v59 = vld [vmem:[#allocation130_spill] sm:$0xff]  ;;  %v6510_v7 = vsel %vm16261_vm9, %v6509_v16, %v6505_v30  ;;  %v6569_v35 = vsel %vm5995_vm5, %v6568_v33, %v6564_v8  ;;  %v6583_v3 = vrot.slane %v18379_v45, %v14068_v53  ;;  %v18381_v6 = vld [vmem:[#allocation153_spill] sm:$0xff]  ;;  %v18382_v30 = vld [vmem:[#allocation167_spill] sm:$0xff] }
 0x976   :  { %v6445_v22 = vrot.slane %v18378_v59, %v14119_v63  ;;  %v6515_v44 = vsel %vm6030_vm10, %v6514_v46, %v6510_v7  ;;  %v6574_v19 = vsel %vm6002_vm6, %v6573_v32, %v6569_v35  ;;  %v6638_v28 = vsel %vm5981_vm3, %v6637_v55, %v6633_v27  ;;  %v18383_v16 = vld [vmem:[#allocation557_spill] sm:$0xff]  ;;  %v14610_v46 = vpop.permute.xlu1 %5507  ;;  %v14612_v32 = vpop.permute.xlu0 %5516  ;;  %v18386_v35 = vld [vmem:[#allocation143_spill] sm:$0xff] }
 0x977   :  { %v6524_v1 = vrot.slane %v18380_v36, %v14119_v63  ;;  %v6578_v39 = vrot.slane %v18381_v6, %v14031_v48  ;;  %v6643_v59 = vsel %vm5988_vm4, %v6642_v29, %v6638_v28  ;;  %v6652_v8 = vrot.slane %v18382_v30, %v14052_v40  ;;  %18384 = vst [vmem:[#allocation595_spill] sm:$0xff] %v14610_v46  ;;  %v18387_v7 = vld [vmem:[#allocation165_spill] sm:$0xff]  ;;  %v18388_v29 = vld [vmem:[#allocation564_spill] sm:$0xff] }
 0x978   :  { %18385 = vst [vmem:[#allocation341_spill] sm:$0xff] %v14612_v32  ;;  %v6377_v33 = vsel %vm6058_vm14, %v6376_v51, %v6372_v15  ;;  %v6441_v27 = vsel %vm6037_vm11, %v6440_v21, %v6436_v25  ;;  %v6519_v55 = vrot.slane %v18386_v35, %v14073_v34  ;;  %v6647_v45 = vrot.slane %v18387_v7, %v14014_v11  ;;  %v18389_v28 = vld [vmem:[#allocation129_spill] sm:$0xff]  ;;  %v18390_v30 = vld [vmem:[#allocation132_spill] sm:$0xff]  ;;  %v18391_v25 = vld [vmem:[#allocation158_spill] sm:$0xff] }
 0x979   :  { %5693 = vperm.xlu1 %8602, %v18383_v16   ;;  %5702 = vperm.xlu0 %8601, %v18388_v29   ;;  %v6450_v36 = vrot.slane %v18389_v28, %v14108_v4  ;;  %v6446_v6 = vsel %vm6044_vm12, %v6445_v22, %v6441_v27  ;;  %v6455_v16 = vrot.slane %v18390_v30, %v14156_v26  ;;  %v18392_v28 = vld [vmem:[#allocation155_spill] sm:$0xff] }
 0x97a   :  { %v6579_v15 = vsel %vm6009_vm7, %v6578_v39, %v6574_v19  ;;  %v6520_v51 = vsel %vm6037_vm11, %v6519_v55, %v6515_v44  ;;  %v6593_v35 = vrot.slane %v18391_v25, %v14098_v61  ;;  %v6648_v7 = vsel %vm5995_vm5, %v6647_v45, %v6643_v59  ;;  %v18393_v27 = vld [vmem:[#allocation679_spill] sm:$0xff]  ;;  %v14639_v44 = vpop.permute.xlu1 %5513  ;;  %v18400_v55 = vld [vmem:[#allocation145_spill] sm:$0xff] }
 0x97b   :  { %v6584_v21 = vsel %vm6016_vm8, %v6583_v3, %v6579_v15  ;;  %v6525_v29 = vsel %vm6044_vm12, %v6524_v1, %v6520_v51  ;;  %v6588_v32 = vrot.slane %v18392_v28, %v14055_v24  ;;  %v6653_v22 = vsel %vm6002_vm6, %v6652_v8, %v6648_v7  ;;  %v18394_v19 = vld [vmem:[#allocation303_spill] sm:$0xff]  ;;  %18395 = vst [vmem:[#allocation600_spill] sm:$0xff] %v14639_v44  ;;  %v14641_v3 = vpop.permute.xlu0 %5522  ;;  %v18401_v15 = vld [vmem:[#allocation677_spill] sm:$0xff]  ;;  %v18404_v28 = vld [vmem:[#allocation148_spill] sm:$0xff] }
 0x97c   :  { %v6662_v30 = vrot.slane %v18393_v27, %v14068_v53  ;;  %18396 = vst [vmem:[#allocation342_spill] sm:$0xff] %v14641_v3  ;;  %v18397_v39 = vrot.slane %v18344_v14, %v14122_v20  ;;  %v18398_v59 = vrot.slane %v18358_v62, %v14122_v20  ;;  %v6529_v45 = vrot.slane %v18400_v55, %v14108_v4  ;;  %v18402_v25 = vld [vmem:[#allocation561_spill] sm:$0xff]  ;;  %v18403_v7 = vld [vmem:[#allocation131_spill] sm:$0xff]  ;;  %v18405_v55 = vld [vmem:[#allocation160_spill] sm:$0xff] }
 0x97d   :  { %5699 = vperm.xlu1 %8602, %v18394_v19   ;;  %v6657_v51 = vrot.slane %v18401_v15, %v14031_v48  ;;  %5708 = vperm.xlu0 %8601, %v18402_v25   ;;  %v6460_v14 = vrot.slane %v18403_v7, %v14122_v20  ;;  %v6534_v27 = vrot.slane %v18404_v28, %v14156_v26  ;;  %v18407_v7 = vld [vmem:[#allocation174_spill] sm:$0xff] }
 0x97e   :  { %v14648_v1 = vsel %vm6065_vm15, %v18397_v39, %v14506_v58  ;;  %v14654_v8 = vsel %vm6065_vm15, %v18398_v59, %v6377_v33  ;;  %v6451_v58 = vsel %vm6051_vm13, %v6450_v36, %v6446_v6  ;;  %v6589_v62 = vsel %vm16261_vm9, %v6588_v32, %v6584_v21  ;;  %v18406_v36 = vld [vmem:[#allocation170_spill] sm:$0xff]  ;;  %v18408_v32 = vld [vmem:[#allocation304_spill] sm:$0xff] }
 0x97f   :  { %18399 = vst [vmem:[#allocation597_spill] sm:$0xff] %v14654_v8  ;;  %v6456_v33 = vsel %vm6058_vm14, %v6455_v16, %v6451_v58  ;;  %v6530_v19 = vsel %vm6051_vm13, %v6529_v45, %v6525_v29  ;;  %v6594_v39 = vsel %vm6030_vm10, %v6593_v35, %v6589_v62  ;;  %v6658_v59 = vsel %vm6009_vm7, %v6657_v51, %v6653_v22  ;;  %v14679_v16 = vpop.permute.xlu1 %5519  ;;  %v14681_v21 = vpop.permute.xlu0 %5528  ;;  %v18411_v35 = vld [vmem:[#allocation157_spill] sm:$0xff]  ;;  %v18412_v22 = vld [vmem:[#allocation168_spill] sm:$0xff]  ;;  %v18414_v58 = vld [vmem:[#allocation518_spill] sm:$0xff] }
 0x980   :  { %v6603_v15 = vrot.slane %v18405_v55, %v14119_v63  ;;  %v6663_v25 = vsel %vm6016_vm8, %v6662_v30, %v6658_v59  ;;  %v6672_v6 = vrot.slane %v18406_v36, %v14098_v61  ;;  %v6702_v28 = vrot.slane %v18407_v7, %v13981_v60  ;;  %18409 = vst [vmem:[#allocation343_spill] sm:$0xff] %v14679_v16  ;;  %v18413_v30 = vld [vmem:[#allocation176_spill] sm:$0xff]  ;;  %v18415_v59 = vld [vmem:[#allocation566_spill] sm:$0xff]  ;;  %v18416_v55 = vld [vmem:[#allocation147_spill] sm:$0xff] }
 0x981   :  { %5705 = vperm.xlu1 %8602, %v18408_v32   ;;  %18410 = vst [vmem:[#allocation602_spill] sm:$0xff] %v14681_v21  ;;  %v6598_v29 = vrot.slane %v18411_v35, %v14073_v34  ;;  %v6667_v45 = vrot.slane %v18412_v22, %v14055_v24  ;;  %v6711_v51 = vrot.slane %v18413_v30, %v14002_v0  ;;  %v18417_v32 = vld [vmem:[#allocation173_spill] sm:$0xff]  ;;  %v18418_v35 = vld [vmem:[#allocation515_spill] sm:$0xff] }
 0x982   :  { %v7255_v62 = vrot.slane %v18414_v58, %v13981_v60  ;;  %5714 = vperm.xlu0 %8601, %v18415_v59   ;;  %v6539_v36 = vrot.slane %v18416_v55, %v14122_v20  ;;  %v6535_v7 = vsel %vm6058_vm14, %v6534_v27, %v6530_v19  ;;  %v6706_v8 = vrot.slane %v18417_v32, %v13985_v5  ;;  %v18419_v22 = vld [vmem:[#allocation159_spill] sm:$0xff]  ;;  %v18421_v27 = vld [vmem:[#allocation162_spill] sm:$0xff] }
 0x983   :  { %v7264_v3 = vrot.slane %v18418_v35, %v14002_v0  ;;  %v6608_v16 = vrot.slane %v18419_v22, %v14108_v4  ;;  %v6599_v30 = vsel %vm6037_vm11, %v6598_v29, %v6594_v39  ;;  %v6668_v58 = vsel %vm16261_vm9, %v6667_v45, %v6663_v25  ;;  %v18420_v59 = vld [vmem:[#allocation259_spill] sm:$0xff]  ;;  %v18422_v35 = vld [vmem:[#allocation306_spill] sm:$0xff]  ;;  %v14711_v21 = vpop.permute.xlu1 %5525  ;;  %v14713_v22 = vpop.permute.xlu0 %5534 }
 0x984   :  { %v7259_v44 = vrot.slane %v18420_v59, %v13985_v5  ;;  %v6604_v55 = vsel %vm6044_vm12, %v6603_v15, %v6599_v30  ;;  %v6613_v19 = vrot.slane %v18421_v27, %v14156_v26  ;;  %v6673_v32 = vsel %vm6030_vm10, %v6672_v6, %v6668_v58  ;;  %v18423_v39 = vld [vmem:[#allocation171_spill] sm:$0xff]  ;;  %v18424_v15 = vld [vmem:[#allocation178_spill] sm:$0xff]  ;;  %v18427_v27 = vld [vmem:[#allocation520_spill] sm:$0xff] }
 0x985   :  { %v6707_v46 = vsel %vm5967_vm1, %v6706_v8, %v6702_v28  ;;  %5711 = vperm.xlu1 %8602, %v18422_v35   ;;  %v6682_v25 = vrot.slane %v18423_v39, %v14119_v63  ;;  %v6721_v45 = vrot.slane %v18424_v15, %v14025_v52  ;;  %v18425_v8 = vld [vmem:[#allocation169_spill] sm:$0xff]  ;;  %v18426_v28 = vld [vmem:[#allocation175_spill] sm:$0xff]  ;;  %v7274_v35 = vrot.slane %v18427_v27, %v14025_v52 }
 0x986   :  { %v6712_v29 = vsel %vm16259_vm2, %v6711_v51, %v6707_v46  ;;  %v7260_v30 = vsel %vm5967_vm1, %v7259_v44, %v7255_v62  ;;  %5720 = vperm.xlu0 %8601, %v13910_v23   ;;  %v6677_v6 = vrot.slane %v18425_v8, %v14073_v34  ;;  %v6716_v58 = vrot.slane %v18426_v28, %v13989_v9  ;;  %v18430_v23 = vld [vmem:[#allocation260_spill] sm:$0xff]  ;;  %v18431_v39 = vld [vmem:[#allocation161_spill] sm:$0xff]  ;;  %v18432_v28 = vld [vmem:[#allocation307_spill] sm:$0xff] }
 0x987   :  { %v7265_v59 = vsel %vm16259_vm2, %v7264_v3, %v7260_v30  ;;  %v14730_v46 = vsel %vm6065_vm15, %v6460_v14, %v6456_v33  ;;  %v14733_v51 = vsel %vm6065_vm15, %v6539_v36, %v6535_v7  ;;  %v6609_v44 = vsel %vm6051_vm13, %v6608_v16, %v6604_v55  ;;  %v14744_v14 = vpop.permute.xlu1 %5531  ;;  %v14746_v33 = vpop.permute.xlu0 %5540  ;;  %v18433_v7 = vld [vmem:[#allocation180_spill] sm:$0xff] }
 0x988   :  { %18428 = vst [vmem:[#allocation344_spill] sm:$0xff] %v14730_v46  ;;  %18429 = vst [vmem:[#allocation599_spill] sm:$0xff] %v14733_v51  ;;  %v7269_v62 = vrot.slane %v18430_v23, %v13989_v9  ;;  %v6618_v15 = vrot.slane %v18431_v39, %v14122_v20  ;;  %v6614_v8 = vsel %vm6058_vm14, %v6613_v19, %v6609_v44  ;;  %v18434_v19 = vld [vmem:[#allocation177_spill] sm:$0xff]  ;;  %v18436_v44 = vld [vmem:[#allocation526_spill] sm:$0xff] }
 0x989   :  { %v6678_v3 = vsel %vm6037_vm11, %v6677_v6, %v6673_v32  ;;  %v6717_v30 = vsel %vm5981_vm3, %v6716_v58, %v6712_v29  ;;  %5717 = vperm.xlu1 %8602, %v18432_v28   ;;  %v6731_v55 = vrot.slane %v18433_v7, %v14052_v40  ;;  %v6726_v32 = vrot.slane %v18434_v19, %v14014_v11  ;;  %v18435_v6 = vld [vmem:[#allocation517_spill] sm:$0xff]  ;;  %v18442_v28 = vld [vmem:[#allocation683_spill] sm:$0xff]  ;;  %v18444_v19 = vld [vmem:[#allocation308_spill] sm:$0xff] }
 0x98a   :  { %v6683_v16 = vsel %vm6044_vm12, %v6682_v25, %v6678_v3  ;;  %v6722_v36 = vsel %vm5988_vm4, %v6721_v45, %v6717_v30  ;;  %v7270_v27 = vsel %vm5981_vm3, %v7269_v62, %v7265_v59  ;;  %5726 = vperm.xlu0 %8601, %v13918_v42   ;;  %v7284_v58 = vrot.slane %v18435_v6, %v14052_v40  ;;  %v18438_v23 = vld [vmem:[#allocation681_spill] sm:$0xff]  ;;  %v18440_v62 = vld [vmem:[#allocation523_spill] sm:$0xff] }
 0x98b   :  { %v7275_v29 = vsel %vm5988_vm4, %v7274_v35, %v7270_v27  ;;  %v7334_v25 = vrot.slane %v18436_v44, %v13981_v60  ;;  %v14762_v45 = vsel %vm6065_vm15, %v6618_v15, %v6614_v8  ;;  %v6687_v39 = vrot.slane %v18438_v23, %v14108_v4  ;;  %v18439_v59 = vld [vmem:[#allocation261_spill] sm:$0xff]  ;;  %v18443_v15 = vld [vmem:[#allocation267_spill] sm:$0xff]  ;;  %v14778_v6 = vpop.permute.xlu1 %5537  ;;  %v14780_v44 = vpop.permute.xlu0 %5546 }
 0x98c   :  { %18437 = vst [vmem:[#allocation345_spill] sm:$0xff] %v14762_v45  ;;  %v7279_v42 = vrot.slane %v18439_v59, %v14014_v11  ;;  %v7343_v3 = vrot.slane %v18440_v62, %v14002_v0  ;;  %v6692_v7 = vrot.slane %v18442_v28, %v14156_v26  ;;  %v6727_v27 = vsel %vm5995_vm5, %v6726_v32, %v6722_v36  ;;  %v18446_v59 = vld [vmem:[#allocation179_spill] sm:$0xff]  ;;  %v18447_v36 = vld [vmem:[#allocation182_spill] sm:$0xff] }
 0x98d   :  { %v7338_v8 = vrot.slane %v18443_v15, %v13985_v5  ;;  %5723 = vperm.xlu1 %8602, %v18444_v19   ;;  %18445 = vst [vmem:[#allocation604_spill] sm:$0xff] %v14780_v44  ;;  %v6688_v23 = vsel %vm6051_vm13, %v6687_v39, %v6683_v16  ;;  %v6736_v62 = vrot.slane %v18446_v59, %v14031_v48  ;;  %v18448_v19 = vld [vmem:[#allocation522_spill] sm:$0xff] }
 0x98e   :  { %v6732_v30 = vsel %vm6002_vm6, %v6731_v55, %v6727_v27  ;;  %v7280_v28 = vsel %vm5995_vm5, %v7279_v42, %v7275_v29  ;;  %5732 = vperm.xlu0 %8601, %v13926_v50   ;;  %v6741_v32 = vrot.slane %v18447_v36, %v14068_v53  ;;  %v7294_v35 = vrot.slane %v18448_v19, %v14068_v53  ;;  %v18449_v16 = vld [vmem:[#allocation262_spill] sm:$0xff]  ;;  %v18450_v55 = vld [vmem:[#allocation528_spill] sm:$0xff] }
 0x98f   :  { %v7285_v15 = vsel %vm6002_vm6, %v7284_v58, %v7280_v28  ;;  %v7339_v45 = vsel %vm5967_vm1, %v7338_v8, %v7334_v25  ;;  %v7289_v39 = vrot.slane %v18449_v16, %v14031_v48  ;;  %v7353_v29 = vrot.slane %v18450_v55, %v14025_v52  ;;  %v18451_v50 = vld [vmem:[#allocation534_spill] sm:$0xff]  ;;  %v18453_v58 = vld [vmem:[#allocation181_spill] sm:$0xff]  ;;  %v18454_v36 = vld [vmem:[#allocation268_spill] sm:$0xff] }
 0x990   :  { %v7344_v59 = vsel %vm16259_vm2, %v7343_v3, %v7339_v45  ;;  %v7413_v42 = vrot.slane %v18451_v50, %v13981_v60  ;;  %v14802_v27 = vsel %vm6058_vm14, %v6692_v7, %v6688_v23  ;;  %v6746_v28 = vrot.slane %v18453_v58, %v14055_v24  ;;  %v18455_v8 = vld [vmem:[#allocation531_spill] sm:$0xff]  ;;  %v14811_v45 = vpop.permute.xlu1 %5543  ;;  %v14813_v3 = vpop.permute.xlu0 %5552 }
 0x991   :  { %18452 = vst [vmem:[#allocation346_spill] sm:$0xff] %v14802_v27  ;;  %v7348_v25 = vrot.slane %v18454_v36, %v13989_v9  ;;  %v7422_v19 = vrot.slane %v18455_v8, %v14002_v0  ;;  %v18456_v16 = vld [vmem:[#allocation563_spill] sm:$0xff]  ;;  %18457 = vst [vmem:[#allocation601_spill] sm:$0xff] %v14813_v3  ;;  %v6737_v55 = vsel %vm6009_vm7, %v6736_v62, %v6732_v30  ;;  %v18507_v3 = vld [vmem:[#allocation565_spill] sm:$0xff] }
 0x992   :  { %5729 = vperm.xlu1 %8602, %v18456_v16   ;;  %v18458_v7 = vld [vmem:[#allocation183_spill] sm:$0xff]  ;;  %v7290_v50 = vsel %vm6009_vm7, %v7289_v39, %v7285_v15  ;;  %5738 = vperm.xlu0 %8601, %v13934_v10   ;;  %v6742_v36 = vsel %vm6016_vm8, %v6741_v32, %v6737_v55  ;;  %v18462_v15 = vld [vmem:[#allocation525_spill] sm:$0xff]  ;;  %v18464_v55 = vld [vmem:[#allocation536_spill] sm:$0xff] }
 0x993   :  { %v18459_v58 = vld [vmem:[#allocation275_spill] sm:$0xff]  ;;  %v7295_v8 = vsel %vm6016_vm8, %v7294_v35, %v7290_v50  ;;  %v7349_v46 = vsel %vm5981_vm3, %v7348_v25, %v7344_v59  ;;  %v7363_v39 = vrot.slane %v18462_v15, %v14052_v40  ;;  %v18463_v10 = vld [vmem:[#allocation269_spill] sm:$0xff]  ;;  %v7432_v50 = vrot.slane %v18464_v55, %v14025_v52  ;;  %v18465_v59 = vld [vmem:[#allocation542_spill] sm:$0xff] }
 0x994   :  { %v7417_v27 = vrot.slane %v18459_v58, %v13985_v5  ;;  %v18460_v16 = vld [vmem:[#allocation519_spill] sm:$0xff]  ;;  %v7354_v23 = vsel %vm5988_vm4, %v7353_v29, %v7349_v46  ;;  %v7358_v32 = vrot.slane %v18463_v10, %v14014_v11  ;;  %v7492_v25 = vrot.slane %v18465_v59, %v13981_v60  ;;  %v14843_v46 = vpop.permute.xlu0 %5558 }
 0x995   :  { %v7304_v51 = vrot.slane %v18460_v16, %v14098_v61  ;;  %v18461_v30 = vld [vmem:[#allocation263_spill] sm:$0xff]  ;;  %v14841_v16 = vpop.permute.xlu1 %5549  ;;  %18466 = vst [vmem:[#allocation347_spill] sm:$0xff] %v14843_v46  ;;  %v14846_v29 = vsel %vm16261_vm9, %v6746_v28, %v6742_v36 }
 0x996   :  { %v7299_v62 = vrot.slane %v18461_v30, %v14055_v24  ;;  %v7418_v58 = vsel %vm5967_vm1, %v7417_v27, %v7413_v42  ;;  %5735 = vperm.xlu1 %8602, %v13922_v43   ;;  %v18467_v27 = vld [vmem:[#allocation276_spill] sm:$0xff]  ;;  %v18468_v30 = vld [vmem:[#allocation539_spill] sm:$0xff]  ;;  %5744 = vperm.xlu0 %8601, %v13942_v18   ;;  %v7359_v55 = vsel %vm5995_vm5, %v7358_v32, %v7354_v23  ;;  %v18474_v23 = vld [vmem:[#allocation533_spill] sm:$0xff] }
 0x997   :  { %v7423_v35 = vsel %vm16259_vm2, %v7422_v19, %v7418_v58  ;;  %v7427_v19 = vrot.slane %v18467_v27, %v13989_v9  ;;  %v7501_v15 = vrot.slane %v18468_v30, %v14002_v0  ;;  %v18469_v43 = vld [vmem:[#allocation524_spill] sm:$0xff]  ;;  %v18470_v28 = vld [vmem:[#allocation283_spill] sm:$0xff]  ;;  %v7364_v59 = vsel %vm6002_vm6, %v7363_v39, %v7359_v55  ;;  %v18472_v27 = vld [vmem:[#allocation530_spill] sm:$0xff] }
 0x998   :  { %v7300_v42 = vsel %vm16261_vm9, %v7299_v62, %v7295_v8  ;;  %v7314_v10 = vrot.slane %v18469_v43, %v14119_v63  ;;  %v7496_v36 = vrot.slane %v18470_v28, %v13985_v5  ;;  %v18471_v8 = vld [vmem:[#allocation264_spill] sm:$0xff]  ;;  %v7373_v30 = vrot.slane %v18472_v27, %v14068_v53  ;;  %v14875_v39 = vpop.permute.xlu0 %5564 }
 0x999   :  { %v7305_v58 = vsel %vm6030_vm10, %v7304_v51, %v7300_v42  ;;  %v7309_v62 = vrot.slane %v18471_v8, %v14073_v34  ;;  %v7428_v18 = vsel %vm5981_vm3, %v7427_v19, %v7423_v35  ;;  %v18473_v51 = vld [vmem:[#allocation270_spill] sm:$0xff]  ;;  %v7442_v32 = vrot.slane %v18474_v23, %v14052_v40  ;;  %v14873_v8 = vpop.permute.xlu1 %5555  ;;  %18476 = vst [vmem:[#allocation348_spill] sm:$0xff] %v14875_v39  ;;  %v18477_v35 = vld [vmem:[#allocation277_spill] sm:$0xff]  ;;  %v18480_v23 = vld [vmem:[#allocation284_spill] sm:$0xff] }
 0x99a   :  { %v7368_v42 = vrot.slane %v18473_v51, %v14031_v48  ;;  %v7433_v43 = vsel %vm5988_vm4, %v7432_v50, %v7428_v18  ;;  %v7497_v28 = vsel %vm5967_vm1, %v7496_v36, %v7492_v25  ;;  %5741 = vperm.xlu1 %8602, %v13930_v31   ;;  %18475 = vst [vmem:[#allocation606_spill] sm:$0xff] %v14873_v8  ;;  %v18478_v50 = vld [vmem:[#allocation544_spill] sm:$0xff]  ;;  %v18479_v25 = vld [vmem:[#allocation265_spill] sm:$0xff]  ;;  %v18483_v39 = vld [vmem:[#allocation271_spill] sm:$0xff] }
 0x99b   :  { %v7310_v55 = vsel %vm6037_vm11, %v7309_v62, %v7305_v58  ;;  %v7437_v19 = vrot.slane %v18477_v35, %v14014_v11  ;;  %v7502_v27 = vsel %vm16259_vm2, %v7501_v15, %v7497_v28  ;;  %v7511_v18 = vrot.slane %v18478_v50, %v14025_v52  ;;  %5750 = vperm.xlu0 %8601, %v13955_v56   ;;  %v18481_v62 = vld [vmem:[#allocation521_spill] sm:$0xff]  ;;  %v18482_v28 = vld [vmem:[#allocation527_spill] sm:$0xff] }
 0x99c   :  { %v7319_v36 = vrot.slane %v18479_v25, %v14108_v4  ;;  %v7315_v31 = vsel %vm6044_vm12, %v7314_v10, %v7310_v55  ;;  %v7369_v51 = vsel %vm6009_vm7, %v7368_v42, %v7364_v59  ;;  %v7506_v58 = vrot.slane %v18480_v23, %v13989_v9  ;;  %v18484_v59 = vld [vmem:[#allocation538_spill] sm:$0xff]  ;;  %v18485_v23 = vld [vmem:[#allocation309_spill] sm:$0xff]  ;;  %v18512_v8 = vld [vmem:[#allocation559_spill] sm:$0xff] }
 0x99d   :  { %v7324_v35 = vrot.slane %v18481_v62, %v14156_v26  ;;  %v7374_v15 = vsel %vm6016_vm8, %v7373_v30, %v7369_v51  ;;  %v7383_v50 = vrot.slane %v18482_v28, %v14098_v61  ;;  %v7438_v56 = vsel %vm5995_vm5, %v7437_v19, %v7433_v43  ;;  %v14903_v62 = vpop.permute.xlu1 %5561  ;;  %v14905_v30 = vpop.permute.xlu0 %5570  ;;  %v18488_v51 = vld [vmem:[#allocation184_spill] sm:$0xff]  ;;  %v18489_v43 = vld [vmem:[#allocation278_spill] sm:$0xff] }
 0x99e   :  { %v7378_v25 = vrot.slane %v18483_v39, %v14055_v24  ;;  %v7443_v10 = vsel %vm6002_vm6, %v7442_v32, %v7438_v56  ;;  %v7452_v42 = vrot.slane %v18484_v59, %v14068_v53  ;;  %v7507_v55 = vsel %vm5981_vm3, %v7506_v58, %v7502_v27  ;;  %5747 = vperm.xlu1 %8602, %v18485_v23   ;;  %v18490_v32 = vld [vmem:[#allocation541_spill] sm:$0xff]  ;;  %v18491_v27 = vld [vmem:[#allocation266_spill] sm:$0xff] }
 0x99f   :  { %18486 = vst [vmem:[#allocation603_spill] sm:$0xff] %v14903_v62  ;;  %18487 = vst [vmem:[#allocation349_spill] sm:$0xff] %v14905_v30  ;;  %v7447_v19 = vrot.slane %v18489_v43, %v14031_v48  ;;  %v7512_v39 = vsel %vm5988_vm4, %v7511_v18, %v7507_v55  ;;  %v7521_v56 = vrot.slane %v18490_v32, %v14052_v40  ;;  %5756 = vperm.xlu0 %8601, %v13963_v57   ;;  %v18492_v30 = vld [vmem:[#allocation285_spill] sm:$0xff]  ;;  %v18493_v18 = vld [vmem:[#allocation532_spill] sm:$0xff] }
 0x9a0   :  { %v7320_v59 = vsel %vm6051_vm13, %v7319_v36, %v7315_v31  ;;  %v7379_v23 = vsel %vm16261_vm9, %v7378_v25, %v7374_v15  ;;  %v7516_v28 = vrot.slane %v18492_v30, %v14014_v11  ;;  %v7393_v55 = vrot.slane %v18493_v18, %v14119_v63  ;;  %v18494_v57 = vld [vmem:[#allocation272_spill] sm:$0xff]  ;;  %v18495_v36 = vld [vmem:[#allocation535_spill] sm:$0xff]  ;;  %v18501_v18 = vld [vmem:[#allocation286_spill] sm:$0xff] }
 0x9a1   :  { %v7325_v46 = vsel %vm6058_vm14, %v7324_v35, %v7320_v59  ;;  %v7384_v43 = vsel %vm6030_vm10, %v7383_v50, %v7379_v23  ;;  %v7448_v32 = vsel %vm6009_vm7, %v7447_v19, %v7443_v10  ;;  %v7388_v62 = vrot.slane %v18494_v57, %v14073_v34  ;;  %v14933_v35 = vpop.permute.xlu1 %5567  ;;  %v14935_v50 = vpop.permute.xlu0 %5576  ;;  %v18497_v25 = vld [vmem:[#allocation279_spill] sm:$0xff]  ;;  %v18498_v19 = vld [vmem:[#allocation546_spill] sm:$0xff]  ;;  %v18502_v57 = vld [vmem:[#allocation556_spill] sm:$0xff] }
 0x9a2   :  { %v7453_v58 = vsel %vm6016_vm8, %v7452_v42, %v7448_v32  ;;  %v7462_v31 = vrot.slane %v18495_v36, %v14098_v61  ;;  %v7517_v15 = vsel %vm5995_vm5, %v7516_v28, %v7512_v39  ;;  %5753 = vperm.xlu1 %8602, %v13946_v49   ;;  %18496 = vst [vmem:[#allocation608_spill] sm:$0xff] %v14933_v35  ;;  %v18499_v42 = vld [vmem:[#allocation550_spill] sm:$0xff]  ;;  %v18500_v28 = vld [vmem:[#allocation273_spill] sm:$0xff] }
 0x9a3   :  { %v7457_v30 = vrot.slane %v18497_v25, %v14055_v24  ;;  %v7522_v10 = vsel %vm6002_vm6, %v7521_v56, %v7517_v15  ;;  %v7531_v59 = vrot.slane %v18498_v19, %v14068_v53  ;;  %v7571_v23 = vrot.slane %v18499_v42, %v13981_v60  ;;  %5762 = vperm.xlu0 %8601, %v13973_v13   ;;  %v18503_v15 = vld [vmem:[#allocation529_spill] sm:$0xff]  ;;  %v18504_v13 = vld [vmem:[#allocation291_spill] sm:$0xff] }
 0x9a4   :  { %v7398_v49 = vrot.slane %v18500_v28, %v14108_v4  ;;  %v7389_v39 = vsel %vm6037_vm11, %v7388_v62, %v7384_v43  ;;  %v7526_v32 = vrot.slane %v18501_v18, %v14031_v48  ;;  %v7580_v36 = vrot.slane %v18502_v57, %v14002_v0  ;;  %v18505_v28 = vld [vmem:[#allocation274_spill] sm:$0xff]  ;;  %v18506_v43 = vld [vmem:[#allocation540_spill] sm:$0xff] }
 0x9a5   :  { %v7394_v56 = vsel %vm6044_vm12, %v7393_v55, %v7389_v39  ;;  %v7403_v25 = vrot.slane %v18503_v15, %v14156_v26  ;;  %v7458_v19 = vsel %vm16261_vm9, %v7457_v30, %v7453_v58  ;;  %v7575_v42 = vrot.slane %v18504_v13, %v13985_v5  ;;  %v14965_v55 = vpop.permute.xlu1 %5573  ;;  %v14967_v39 = vpop.permute.xlu0 %5582  ;;  %v18508_v58 = vld [vmem:[#allocation280_spill] sm:$0xff]  ;;  %v18509_v13 = vld [vmem:[#allocation543_spill] sm:$0xff] }
 0x9a6   :  { %v7408_v35 = vrot.slane %v18505_v28, %v14122_v20  ;;  %v7463_v62 = vsel %vm6030_vm10, %v7462_v31, %v7458_v19  ;;  %v7472_v18 = vrot.slane %v18506_v43, %v14119_v63  ;;  %v7527_v57 = vsel %vm6009_vm7, %v7526_v32, %v7522_v10  ;;  %5759 = vperm.xlu1 %8602, %v18507_v3   ;;  %v18510_v28 = vld [vmem:[#allocation312_spill] sm:$0xff]  ;;  %v18511_v3 = vld [vmem:[#allocation287_spill] sm:$0xff] }
 0x9a7   :  { %v7467_v30 = vrot.slane %v18508_v58, %v14073_v34  ;;  %v7532_v15 = vsel %vm6016_vm8, %v7531_v59, %v7527_v57  ;;  %v7541_v31 = vrot.slane %v18509_v13, %v14098_v61  ;;  %v7576_v19 = vsel %vm5967_vm1, %v7575_v42, %v7571_v23  ;;  %5768 = vperm.xlu0 %8601, %v18510_v28   ;;  %v18513_v59 = vld [vmem:[#allocation281_spill] sm:$0xff]  ;;  %v18514_v23 = vld [vmem:[#allocation292_spill] sm:$0xff] }
 0x9a8   :  { %v7399_v10 = vsel %vm6051_vm13, %v7398_v49, %v7394_v56  ;;  %v7536_v32 = vrot.slane %v18511_v3, %v14055_v24  ;;  %v7581_v43 = vsel %vm16259_vm2, %v7580_v36, %v7576_v19  ;;  %v7590_v44 = vrot.slane %v18512_v8, %v14025_v52  ;;  %v18515_v56 = vld [vmem:[#allocation537_spill] sm:$0xff]  ;;  %v18516_v19 = vld [vmem:[#allocation311_spill] sm:$0xff] }
 0x9a9   :  { %v7404_v58 = vsel %vm6058_vm14, %v7403_v25, %v7399_v10  ;;  %v7477_v57 = vrot.slane %v18513_v59, %v14108_v4  ;;  %v7468_v13 = vsel %vm6037_vm11, %v7467_v30, %v7463_v62  ;;  %v7585_v42 = vrot.slane %v18514_v23, %v13989_v9  ;;  %v14995_v25 = vpop.permute.xlu1 %5579  ;;  %v14997_v10 = vpop.permute.xlu0 %5588  ;;  %v18517_v30 = vld [vmem:[#allocation548_spill] sm:$0xff] }
 0x9aa   :  { %v7473_v49 = vsel %vm6044_vm12, %v7472_v18, %v7468_v13  ;;  %v7482_v28 = vrot.slane %v18515_v56, %v14156_v26  ;;  %v7537_v36 = vsel %vm16261_vm9, %v7536_v32, %v7532_v15  ;;  %v7650_v8 = vrot.slane %v14182_v38, %v13981_v60  ;;  %5765 = vperm.xlu1 %8602, %v18516_v19   ;;  %v18518_v15 = vld [vmem:[#allocation314_spill] sm:$0xff]  ;;  %v18519_v38 = vld [vmem:[#allocation288_spill] sm:$0xff] }
 0x9ab   :  { %v7542_v62 = vsel %vm6030_vm10, %v7541_v31, %v7537_v36  ;;  %v7551_v3 = vrot.slane %v18517_v30, %v14119_v63  ;;  %v7586_v18 = vsel %vm5981_vm3, %v7585_v42, %v7581_v43  ;;  %v7659_v59 = vrot.slane %v14226_v37, %v14002_v0  ;;  %5774 = vperm.xlu0 %8601, %v18518_v15   ;;  %v18520_v23 = vld [vmem:[#allocation568_spill] sm:$0xff]  ;;  %v18522_v19 = vld [vmem:[#allocation298_spill] sm:$0xff] }
 0x9ac   :  { %v7546_v32 = vrot.slane %v18519_v38, %v14073_v34  ;;  %v7591_v13 = vsel %vm5988_vm4, %v7590_v44, %v7586_v18  ;;  %v7600_v56 = vrot.slane %v18520_v23, %v14052_v40  ;;  %v7654_v31 = vrot.slane %v14135_v2, %v13985_v5  ;;  %v18523_v44 = vld [vmem:[#allocation282_spill] sm:$0xff] }
 0x9ad   :  { %v18521_v36 = vrot.slane %v18491_v27, %v14122_v20  ;;  %v7409_v37 = vsel %vm6065_vm15, %v7408_v35, %v7404_v58  ;;  %v7478_v42 = vsel %vm6051_vm13, %v7477_v57, %v7473_v49  ;;  %v7595_v30 = vrot.slane %v18522_v19, %v14014_v11  ;;  %v18524_v23 = vld [vmem:[#allocation570_spill] sm:$0xff]  ;;  %v15027_v27 = vpop.permute.xlu1 %5585  ;;  %v18530_v19 = vld [vmem:[#allocation305_spill] sm:$0xff] }
 0x9ae   :  { %v7487_v18 = vrot.slane %v18523_v44, %v14122_v20  ;;  %v7483_v15 = vsel %vm6058_vm14, %v7482_v28, %v7478_v42  ;;  %v7547_v38 = vsel %vm6037_vm11, %v7546_v32, %v7542_v62  ;;  %v7655_v2 = vsel %vm5967_vm1, %v7654_v31, %v7650_v8  ;;  %5771 = vperm.xlu1 %8602, %v18524_v23   ;;  %v18525_v28 = vld [vmem:[#allocation315_spill] sm:$0xff]  ;;  %v18526_v62 = vld [vmem:[#allocation545_spill] sm:$0xff] }
 0x9af   :  { %v7330_v43 = vsel %vm6065_vm15, %v18521_v36, %v7325_v46  ;;  %v15029_v46 = vpop.permute.xlu0 %5594  ;;  %v7552_v35 = vsel %vm6044_vm12, %v7551_v3, %v7547_v38  ;;  %v7596_v58 = vsel %vm5995_vm5, %v7595_v30, %v7591_v13  ;;  %v7660_v57 = vsel %vm16259_vm2, %v7659_v59, %v7655_v2  ;;  %5780 = vperm.xlu0 %8601, %v18525_v28   ;;  %v18527_v31 = vld [vmem:[#allocation313_spill] sm:$0xff] }
 0x9b0   :  { %v7669_v49 = vrot.slane %v14260_v54, %v14025_v52  ;;  %v7561_v8 = vrot.slane %v18526_v62, %v14156_v26  ;;  %v7601_v32 = vsel %vm6002_vm6, %v7600_v56, %v7596_v58  ;;  %v7610_v36 = vrot.slane %v18527_v31, %v14068_v53  ;;  %v18529_v54 = vld [vmem:[#allocation289_spill] sm:$0xff]  ;;  %v18535_v62 = vld [vmem:[#allocation328_spill] sm:$0xff] }
 0x9b1   :  { %v7664_v3 = vrot.slane %v14184_v17, %v13989_v9  ;;  %v18528_v59 = vrot.slane %v18488_v51, %v14098_v61  ;;  %vm8549_vm2 = vcmask 1041408   ;;  %v7556_v42 = vrot.slane %v18529_v54, %v14108_v4  ;;  %v18531_v51 = vld [vmem:[#allocation567_spill] sm:$0xff] }
 0x9b2   :  { %v7605_v30 = vrot.slane %v18530_v19, %v14031_v48  ;;  %v8517_v56 = vsel %vm16260_vm0, %v7330_v43, %v14397_v41  ;;  %v8518_v44 = vsel %vm16260_vm0, %v7409_v37, %v14403_v47  ;;  %v7488_v17 = vsel %vm6065_vm15, %v7487_v18, %v7483_v15  ;;  %5777 = vperm.xlu1 %8602, %v18531_v51   ;;  %v18532_v41 = vld [vmem:[#allocation588_spill] sm:$0xff]  ;;  %v18533_v47 = vld [vmem:[#allocation317_spill] sm:$0xff] }
 0x9b3   :  { %v6752_v13 = vsel %vm6030_vm10, %v18528_v59, %v14846_v29  ;;  %v7665_v38 = vsel %vm5981_vm3, %v7664_v3, %v7660_v57  ;;  %v15060_v29 = vpop.permute.xlu1 %5591  ;;  %v15062_v2 = vpop.permute.xlu0 %5600  ;;  %v7557_v23 = vsel %vm6051_vm13, %v7556_v42, %v7552_v35  ;;  %v7679_v43 = vrot.slane %v18532_v41, %v14052_v40  ;;  %5786 = vperm.xlu0 %8601, %v18533_v47   ;;  %v18534_v15 = vld [vmem:[#allocation316_spill] sm:$0xff]  ;;  %v18538_v59 = vld [vmem:[#allocation290_spill] sm:$0xff] }
 0x9b4   :  { %v7606_v58 = vsel %vm6009_vm7, %v7605_v30, %v7601_v32  ;;  %v7670_v28 = vsel %vm5988_vm4, %v7669_v49, %v7665_v38  ;;  %v7562_v37 = vsel %vm6058_vm14, %v7561_v8, %v7557_v23  ;;  %v7620_v57 = vrot.slane %v18534_v15, %v14098_v61  ;;  %v18537_v32 = vld [vmem:[#allocation186_spill] sm:$0xff]  ;;  %v18544_v15 = vld [vmem:[#allocation329_spill] sm:$0xff] }
 0x9b5   :  { %v7611_v18 = vsel %vm6016_vm8, %v7610_v36, %v7606_v58  ;;  %v7674_v31 = vrot.slane %v18535_v62, %v14014_v11  ;;  %v18536_v35 = vrot.slane %v18458_v7, %v14073_v34  ;;  %v6761_v3 = vrot.slane %v18537_v32, %v14119_v63  ;;  %v18539_v36 = vld [vmem:[#allocation310_spill] sm:$0xff] }
 0x9b6   :  { %v7566_v8 = vrot.slane %v18538_v59, %v14122_v20  ;;  %v7615_v54 = vrot.slane %v18539_v36, %v14055_v24  ;;  %v8550_v42 = vsel %vm8549_vm2, %v8517_v56, 0.0  ;;  %v8551_v19 = vsel %vm8549_vm2, %v8518_v44, 0.0  ;;  %v18541_v56 = vld [vmem:[#allocation585_spill] sm:$0xff]  ;;  %v18542_v47 = vld [vmem:[#allocation318_spill] sm:$0xff] }
 0x9b7   :  { %v15080_v49 = vsel %vm6037_vm11, %v18536_v35, %v6752_v13  ;;  %v8519_v30 = vsel %vm16260_vm0, %v7488_v17, %v14472_v12  ;;  %v7675_v7 = vsel %vm5995_vm5, %v7674_v31, %v7670_v28  ;;  %v18540_v13 = vld [vmem:[#allocation569_spill] sm:$0xff]  ;;  %v15094_v38 = vpop.permute.xlu1 %5597  ;;  %v15096_v51 = vpop.permute.xlu0 %5606  ;;  %v7689_v44 = vrot.slane %v18541_v56, %v14068_v53  ;;  %5792 = vperm.xlu0 %8601, %v18542_v47   ;;  %v18545_v31 = vld [vmem:[#allocation594_spill] sm:$0xff] }
 0x9b8   :  { %5783 = vperm.xlu1 %8602, %v18540_v13   ;;  %v7567_v23 = vsel %vm6065_vm15, %v7566_v8, %v7562_v37  ;;  %v7616_v58 = vsel %vm16261_vm9, %v7615_v54, %v7611_v18  ;;  %v7680_v41 = vsel %vm6002_vm6, %v7679_v43, %v7675_v7  ;;  %v18543_v17 = vld [vmem:[#allocation573_spill] sm:$0xff]  ;;  %v7684_v62 = vrot.slane %v18544_v15, %v14031_v48  ;;  %v18546_v18 = vld [vmem:[#allocation572_spill] sm:$0xff]  ;;  %v18547_v8 = vld [vmem:[#allocation591_spill] sm:$0xff] }
 0x9b9   :  { %v7621_v12 = vsel %vm6030_vm10, %v7620_v57, %v7616_v58  ;;  %v7630_v28 = vrot.slane %v18543_v17, %v14119_v63  ;;  %v7729_v37 = vrot.slane %v18545_v31, %v13981_v60  ;;  %v15111_v35 = vadd.f32 %v8551_v19, %v8550_v42  ;;  %v18548_v54 = vld [vmem:[#allocation571_spill] sm:$0xff]  ;;  %v18552_v15 = vld [vmem:[#allocation590_spill] sm:$0xff] }
 0x9ba   :  { %v15114_v43 = vsel %vm8549_vm2, %v8519_v30, 0.0  ;;  %v7625_v59 = vrot.slane %v18546_v18, %v14073_v34  ;;  %v7738_v57 = vrot.slane %v18547_v8, %v14002_v0  ;;  %v15122_v36 = vsel %vm16260_vm0, %v7567_v23, %v14648_v1  ;;  %v18549_v42 = vld [vmem:[#allocation335_spill] sm:$0xff]  ;;  %v18550_v30 = vld [vmem:[#allocation574_spill] sm:$0xff] }
 0x9bb   :  { %v7635_v7 = vrot.slane %v18548_v54, %v14108_v4  ;;  %v7685_v13 = vsel %vm6009_vm7, %v7684_v62, %v7680_v41  ;;  %v7733_v19 = vrot.slane %v18549_v42, %v13985_v5  ;;  %v15130_v58 = vpop.permute.xlu1 %5603  ;;  %v15132_v56 = vpop.permute.xlu0 %5612  ;;  %v18551_v17 = vld [vmem:[#allocation319_spill] sm:$0xff]  ;;  %v7699_v31 = vrot.slane %v18552_v15, %v14098_v61  ;;  %v18553_v41 = vld [vmem:[#allocation320_spill] sm:$0xff]  ;;  %v18554_v18 = vld [vmem:[#allocation330_spill] sm:$0xff] }
 0x9bc   :  { %5789 = vperm.xlu1 %8602, %v18550_v30   ;;  %v7626_v47 = vsel %vm6037_vm11, %v7625_v59, %v7621_v12  ;;  %v7645_v1 = vrot.slane %v18551_v17, %v14122_v20  ;;  %v7690_v23 = vsel %vm6016_vm8, %v7689_v44, %v7685_v13  ;;  %5798 = vperm.xlu0 %8601, %v18553_v41   ;;  %v18555_v59 = vld [vmem:[#allocation580_spill] sm:$0xff]  ;;  %vm18556_vm0 = vcmask 195712  }
 0x9bd   :  { %v7631_v62 = vsel %vm6044_vm12, %v7630_v28, %v7626_v47  ;;  %v7694_v8 = vrot.slane %v18554_v18, %v14055_v24  ;;  %v7734_v54 = vsel %vm5967_vm1, %v7733_v19, %v7729_v37  ;;  %v7808_v12 = vrot.slane %v14711_v21, %v13981_v60  ;;  %v18557_v13 = vld [vmem:[#allocation596_spill] sm:$0xff]  ;;  %v18559_v37 = vld [vmem:[#allocation602_spill] sm:$0xff] }
 0x9be   :  { %v7640_v42 = vrot.slane %v18555_v59, %v14156_v26  ;;  %v7739_v44 = vsel %vm18556_vm0, %v7738_v57, %v7734_v54  ;;  %v7748_v30 = vrot.slane %v18557_v13, %v14025_v52  ;;  %v7817_v17 = vrot.slane %v14744_v14, %v14002_v0  ;;  %v18558_v47 = vld [vmem:[#allocation336_spill] sm:$0xff]  ;;  %v18561_v14 = vld [vmem:[#allocation331_spill] sm:$0xff]  ;;  %v18562_v13 = vld [vmem:[#allocation321_spill] sm:$0xff] }
 0x9bf   :  { %v7695_v28 = vsel %vm16261_vm9, %v7694_v8, %v7690_v23  ;;  %v7743_v15 = vrot.slane %v18558_v47, %v13989_v9  ;;  %v7812_v19 = vrot.slane %v18559_v37, %v13985_v5  ;;  %v7887_v21 = vrot.slane %v14965_v55, %v13981_v60  ;;  %v18560_v41 = vld [vmem:[#allocation576_spill] sm:$0xff]  ;;  %v15162_v57 = vpop.permute.xlu1 %5609  ;;  %v15164_v18 = vpop.permute.xlu0 %5618  ;;  %v18563_v55 = vld [vmem:[#allocation587_spill] sm:$0xff] }
 0x9c0   :  { %5795 = vperm.xlu1 %8602, %v18560_v41   ;;  %v7636_v54 = vsel %vm6051_vm13, %v7635_v7, %v7631_v62  ;;  %v7704_v23 = vrot.slane %v18561_v14, %v14073_v34  ;;  %v7700_v8 = vsel %vm6030_vm10, %v7699_v31, %v7695_v28  ;;  %v7896_v59 = vrot.slane %v14995_v25, %v14002_v0  ;;  %v18564_v14 = vld [vmem:[#allocation593_spill] sm:$0xff] }
 0x9c1   :  { %5804 = vperm.xlu0 %8601, %v18562_v13   ;;  %v7709_v47 = vrot.slane %v18563_v55, %v14119_v63  ;;  %v7744_v37 = vsel %vm5981_vm3, %v7743_v15, %v7739_v44  ;;  %v7813_v41 = vsel %vm5967_vm1, %v7812_v19, %v7808_v12  ;;  %v7891_v7 = vrot.slane %v14935_v50, %v13985_v5  ;;  %v18565_v55 = vld [vmem:[#allocation337_spill] sm:$0xff]  ;;  %v18566_v15 = vld [vmem:[#allocation578_spill] sm:$0xff] }
 0x9c2   :  { %v7749_v62 = vsel %vm5988_vm4, %v7748_v30, %v7744_v37  ;;  %v7758_v31 = vrot.slane %v18564_v14, %v14052_v40  ;;  %v7818_v28 = vsel %vm18556_vm0, %v7817_v17, %v7813_v41  ;;  %v7827_v25 = vrot.slane %v14778_v6, %v14025_v52  ;;  %v18567_v17 = vld [vmem:[#allocation332_spill] sm:$0xff]  ;;  %v18568_v41 = vld [vmem:[#allocation577_spill] sm:$0xff] }
 0x9c3   :  { %v7641_v13 = vsel %vm6058_vm14, %v7640_v42, %v7636_v54  ;;  %v7753_v44 = vrot.slane %v18565_v55, %v14014_v11  ;;  %v7822_v12 = vrot.slane %v14713_v22, %v13989_v9  ;;  %v7892_v50 = vsel %vm5967_vm1, %v7891_v7, %v7887_v21  ;;  %v15192_v30 = vpop.permute.xlu1 %5615  ;;  %v5625_v19 = vpop.permute.xlu0 %5624 }
 0x9c4   :  { %5801 = vperm.xlu1 %8602, %v18566_v15   ;;  %v7714_v37 = vrot.slane %v18567_v17, %v14108_v4  ;;  %v7705_v6 = vsel %vm6037_vm11, %v7704_v23, %v7700_v8  ;;  %v7897_v42 = vsel %vm18556_vm0, %v7896_v59, %v7892_v50  ;;  %v7906_v54 = vrot.slane %v15027_v27, %v14025_v52  ;;  %v18569_v23 = vld [vmem:[#allocation598_spill] sm:$0xff] }
 0x9c5   :  { %5810 = vperm.xlu0 %8601, %v18568_v41   ;;  %v7710_v22 = vsel %vm6044_vm12, %v7709_v47, %v7705_v6  ;;  %v7754_v21 = vsel %vm5995_vm5, %v7753_v44, %v7749_v62  ;;  %v7823_v7 = vsel %vm5981_vm3, %v7822_v12, %v7818_v28  ;;  %v7901_v14 = vrot.slane %v14967_v39, %v13989_v9  ;;  %v18570_v47 = vld [vmem:[#allocation338_spill] sm:$0xff] }
 0x9c6   :  { %v7759_v55 = vsel %vm6002_vm6, %v7758_v31, %v7754_v21  ;;  %v7768_v8 = vrot.slane %v18569_v23, %v14068_v53  ;;  %v7828_v59 = vsel %vm5988_vm4, %v7827_v25, %v7823_v7  ;;  %v7837_v27 = vrot.slane %v14811_v45, %v14052_v40  ;;  %v18571_v31 = vld [vmem:[#allocation575_spill] sm:$0xff]  ;;  %v18572_v25 = vld [vmem:[#allocation333_spill] sm:$0xff]  ;;  %v18573_v17 = vld [vmem:[#allocation582_spill] sm:$0xff] }
 0x9c7   :  { %v15213_v50 = vsel %vm6065_vm15, %v7645_v1, %v7641_v13  ;;  %v7763_v62 = vrot.slane %v18570_v47, %v14031_v48  ;;  %v7832_v28 = vrot.slane %v14746_v33, %v14014_v11  ;;  %v7902_v39 = vsel %vm5981_vm3, %v7901_v14, %v7897_v42  ;;  %v5622_v44 = vpop.permute.xlu1 %5621  ;;  %v5631_v12 = vpop.permute.xlu0 %5630  ;;  %v18575_v7 = vld [vmem:[#allocation339_spill] sm:$0xff]  ;;  %v18577_v47 = vld [vmem:[#allocation322_spill] sm:$0xff] }
 0x9c8   :  { %5807 = vperm.xlu1 %8602, %v18571_v31   ;;  %v7724_v15 = vrot.slane %v18572_v25, %v14122_v20  ;;  %v7715_v45 = vsel %vm6051_vm13, %v7714_v37, %v7710_v22  ;;  %v7907_v1 = vsel %vm5988_vm4, %v7906_v54, %v7902_v39  ;;  %v7916_v13 = vrot.slane %v15060_v29, %v14052_v40  ;;  %v18574_v37 = vld [vmem:[#allocation595_spill] sm:$0xff] }
 0x9c9   :  { %5816 = vperm.xlu0 %8601, %v18573_v17   ;;  %v7764_v33 = vsel %vm6009_vm7, %v7763_v62, %v7759_v55  ;;  %v7833_v6 = vsel %vm5995_vm5, %v7832_v28, %v7828_v59  ;;  %v7911_v42 = vrot.slane %v14997_v10, %v14014_v11  ;;  %v7966_v41 = vrot.slane %v5622_v44, %v13981_v60  ;;  %v18576_v55 = vld [vmem:[#allocation604_spill] sm:$0xff]  ;;  %v18578_v28 = vld [vmem:[#allocation589_spill] sm:$0xff]  ;;  %v18579_v44 = vld [vmem:[#allocation579_spill] sm:$0xff] }
 0x9ca   :  { %v7769_v21 = vsel %vm6016_vm8, %v7768_v8, %v7764_v33  ;;  %v7778_v22 = vrot.slane %v18574_v37, %v14098_v61  ;;  %v7838_v54 = vsel %vm6002_vm6, %v7837_v27, %v7833_v6  ;;  %v7847_v29 = vrot.slane %v14841_v16, %v14068_v53 }
 0x9cb   :  { %v7773_v14 = vrot.slane %v18575_v7, %v14055_v24  ;;  %v7842_v23 = vrot.slane %v18576_v55, %v14031_v48  ;;  %v7912_v10 = vsel %vm5995_vm5, %v7911_v42, %v7907_v1  ;;  %v7970_v59 = vrot.slane %v5625_v19, %v13985_v5  ;;  %v5628_v8 = vpop.permute.xlu1 %5627  ;;  %v5637_v62 = vpop.permute.xlu0 %5636  ;;  %v18580_v42 = vld [vmem:[#allocation606_spill] sm:$0xff]  ;;  %v18581_v7 = vld [vmem:[#allocation600_spill] sm:$0xff] }
 0x9cc   :  { %5813 = vperm.xlu1 %8602, %v18577_v47   ;;  %v7719_v27 = vrot.slane %v18578_v28, %v14156_v26  ;;  %v7917_v39 = vsel %vm6002_vm6, %v7916_v13, %v7912_v10  ;;  %v7926_v16 = vrot.slane %v15094_v38, %v14068_v53  ;;  %v7975_v31 = vrot.slane %v5628_v8, %v14002_v0  ;;  %v18585_v28 = vld [vmem:[#allocation327_spill] sm:$0xff] }
 0x9cd   :  { %5822 = vperm.xlu0 %8601, %v18579_v44   ;;  %v7774_v1 = vsel %vm16261_vm9, %v7773_v14, %v7769_v21  ;;  %v7843_v19 = vsel %vm6009_vm7, %v7842_v23, %v7838_v54  ;;  %v7921_v17 = vrot.slane %v15029_v46, %v14031_v48  ;;  %v7971_v33 = vsel %vm5967_vm1, %v7970_v59, %v7966_v41  ;;  %v18582_v21 = vld [vmem:[#allocation601_spill] sm:$0xff]  ;;  %v18583_v41 = vld [vmem:[#allocation323_spill] sm:$0xff] }
 0x9ce   :  { %v7779_v6 = vsel %vm6030_vm10, %v7778_v22, %v7774_v1  ;;  %v7848_v13 = vsel %vm6016_vm8, %v7847_v29, %v7843_v19  ;;  %v7857_v38 = vrot.slane %v18580_v42, %v14098_v61  ;;  %v7976_v37 = vsel %vm18556_vm0, %v7975_v31, %v7971_v33  ;;  %v18584_v29 = vld [vmem:[#allocation340_spill] sm:$0xff]  ;;  %v18586_v19 = vld [vmem:[#allocation603_spill] sm:$0xff]  ;;  %v18588_v42 = vld [vmem:[#allocation326_spill] sm:$0xff] }
 0x9cf   :  { %v7788_v55 = vrot.slane %v18581_v7, %v14119_v63  ;;  %v7852_v54 = vrot.slane %v18582_v21, %v14055_v24  ;;  %v7922_v14 = vsel %vm6009_vm7, %v7921_v17, %v7917_v39  ;;  %v7980_v46 = vrot.slane %v5631_v12, %v13989_v9  ;;  %v5634_v22 = vpop.permute.xlu1 %5633  ;;  %v5643_v23 = vpop.permute.xlu0 %5642 }
 0x9d0   :  { %5819 = vperm.xlu1 %8602, %v18583_v41   ;;  %v7783_v10 = vrot.slane %v18584_v29, %v14073_v34  ;;  %v7927_v59 = vsel %vm6016_vm8, %v7926_v16, %v7922_v14  ;;  %v7936_v47 = vrot.slane %v15130_v58, %v14098_v61  ;;  %v7985_v8 = vrot.slane %v5634_v22, %v14025_v52  ;;  %v18590_v14 = vld [vmem:[#allocation581_spill] sm:$0xff] }
 0x9d1   :  { %5864 = vperm.xlu0 %8601, %v18585_v28   ;;  %v7720_v39 = vsel %vm6058_vm14, %v7719_v27, %v7715_v45  ;;  %v7853_v12 = vsel %vm16261_vm9, %v7852_v54, %v7848_v13  ;;  %v7931_v31 = vrot.slane %v15062_v2, %v14055_v24  ;;  %v7981_v44 = vsel %vm5981_vm3, %v7980_v46, %v7976_v37  ;;  %v18587_v45 = vld [vmem:[#allocation347_spill] sm:$0xff]  ;;  %v18591_v46 = vld [vmem:[#allocation341_spill] sm:$0xff] }
 0x9d2   :  { %v7784_v1 = vsel %vm6037_vm11, %v7783_v10, %v7779_v6  ;;  %v7858_v16 = vsel %vm6030_vm10, %v7857_v38, %v7853_v12  ;;  %v7867_v58 = vrot.slane %v18586_v19, %v14119_v63  ;;  %v7986_v17 = vsel %vm5988_vm4, %v7985_v8, %v7981_v44  ;;  %v18589_v38 = vld [vmem:[#allocation343_spill] sm:$0xff]  ;;  %v18593_v12 = vld [vmem:[#allocation348_spill] sm:$0xff] }
 0x9d3   :  { %v7789_v33 = vsel %vm6044_vm12, %v7788_v55, %v7784_v1  ;;  %v7862_v27 = vrot.slane %v18587_v45, %v14073_v34  ;;  %v7932_v13 = vsel %vm16261_vm9, %v7931_v31, %v7927_v59  ;;  %v7990_v2 = vrot.slane %v5637_v62, %v14014_v11  ;;  %v5640_v37 = vpop.permute.xlu1 %5639  ;;  %v5649_v6 = vpop.permute.xlu0 %5648  ;;  %v18592_v59 = vld [vmem:[#allocation608_spill] sm:$0xff] }
 0x9d4   :  { %5861 = vperm.xlu1 %8602, %v18588_v42   ;;  %v7798_v7 = vrot.slane %v18589_v38, %v14156_v26  ;;  %v7937_v21 = vsel %vm6030_vm10, %v7936_v47, %v7932_v13  ;;  %v7946_v54 = vrot.slane %v15162_v57, %v14119_v63  ;;  %v7995_v55 = vrot.slane %v5640_v37, %v14052_v40  ;;  %v18594_v1 = vld [vmem:[#allocation324_spill] sm:$0xff]  ;;  %v18597_v42 = vld [vmem:[#allocation597_spill] sm:$0xff] }
 0x9d5   :  { %5867 = vperm.xlu0 %8601, %v18590_v14   ;;  %v7793_v41 = vrot.slane %v18591_v46, %v14108_v4  ;;  %v7863_v62 = vsel %vm6037_vm11, %v7862_v27, %v7858_v16  ;;  %v7941_v22 = vrot.slane %v15096_v51, %v14073_v34  ;;  %v7991_v29 = vsel %vm5995_vm5, %v7990_v2, %v7986_v17  ;;  %v18595_v17 = vld [vmem:[#allocation583_spill] sm:$0xff]  ;;  %v18600_v14 = vld [vmem:[#allocation584_spill] sm:$0xff] }
 0x9d6   :  { %v7725_v10 = vsel %vm6065_vm15, %v7724_v15, %v7720_v39  ;;  %v7868_v57 = vsel %vm6044_vm12, %v7867_v58, %v7863_v62  ;;  %v7877_v47 = vrot.slane %v18592_v59, %v14156_v26  ;;  %v7996_v8 = vsel %vm6002_vm6, %v7995_v55, %v7991_v29 }
 0x9d7   :  { %v7794_v28 = vsel %vm6051_vm13, %v7793_v41, %v7789_v33  ;;  %v7872_v31 = vrot.slane %v18593_v12, %v14108_v4  ;;  %v7942_v51 = vsel %vm6037_vm11, %v7941_v22, %v7937_v21  ;;  %v8000_v44 = vrot.slane %v5643_v23, %v14031_v48  ;;  %v5646_v25 = vpop.permute.xlu1 %5645  ;;  %v5655_v15 = vpop.permute.xlu0 %5654  ;;  %v18596_v33 = vld [vmem:[#allocation342_spill] sm:$0xff]  ;;  %v18599_v21 = vld [vmem:[#allocation349_spill] sm:$0xff]  ;;  %v18601_v41 = vld [vmem:[#allocation344_spill] sm:$0xff] }
 0x9d8   :  { %5825 = vperm.xlu1 %8602, %v18594_v1   ;;  %v7799_v39 = vsel %vm6058_vm14, %v7798_v7, %v7794_v28  ;;  %v7947_v16 = vsel %vm6044_vm12, %v7946_v54, %v7942_v51  ;;  %v7956_v19 = vrot.slane %v15192_v30, %v14156_v26  ;;  %v8005_v58 = vrot.slane %v5646_v25, %v14068_v53  ;;  %v18605_v25 = vld [vmem:[#allocation592_spill] sm:$0xff] }
 0x9d9   :  { %5870 = vperm.xlu0 %8601, %v18595_v17   ;;  %v7803_v45 = vrot.slane %v18596_v33, %v14122_v20  ;;  %v7873_v23 = vsel %vm6051_vm13, %v7872_v31, %v7868_v57  ;;  %v7951_v27 = vrot.slane %v15132_v56, %v14108_v4  ;;  %v8001_v13 = vsel %vm6009_vm7, %v8000_v44, %v7996_v8  ;;  %v18602_v57 = vld [vmem:[#allocation334_spill] sm:$0xff]  ;;  %v18604_v31 = vld [vmem:[#allocation188_spill] sm:$0xff] }
 0x9da   :  { %v8555_v2 = vsel %vm8549_vm2, %v15122_v36, 0.0  ;;  %vm18598_vm0 = vcmask 1041409   ;;  %v7878_v37 = vsel %vm6058_vm14, %v7877_v47, %v7873_v23  ;;  %v8006_v38 = vsel %vm6016_vm8, %v8005_v58, %v8001_v13  ;;  %v18608_v17 = vld [vmem:[#allocation586_spill] sm:$0xff] }
 0x9db   :  { %v8521_v30 = vsel %vm18598_vm0, %v15213_v50, %v18597_v42  ;;  %v7804_v7 = vsel %vm6065_vm15, %v7803_v45, %v7799_v39  ;;  %v7882_v54 = vrot.slane %v18599_v21, %v14122_v20  ;;  %v7952_v56 = vsel %vm6051_vm13, %v7951_v27, %v7947_v16  ;;  %v5652_v36 = vpop.permute.xlu1 %5651  ;;  %v5661_v46 = vpop.permute.xlu0 %5660  ;;  %v18609_v33 = vld [vmem:[#allocation346_spill] sm:$0xff]  ;;  %v18610_v45 = vld [vmem:[#allocation172_spill] sm:$0xff]  ;;  %v18612_v27 = vld [vmem:[#allocation185_spill] sm:$0xff] }
 0x9dc   :  { %v8010_v55 = vrot.slane %v5649_v6, %v14055_v24  ;;  %5828 = vperm.xlu1 %8602, %v18600_v14   ;;  %v8554_v50 = vadd.f32 %v15114_v43, %v15111_v35  ;;  %v8522_v62 = vsel %vm18598_vm0, %v7725_v10, %v18601_v41  ;;  %v7957_v22 = vsel %vm6058_vm14, %v7956_v19, %v7952_v56  ;;  %v18603_v10 = vld [vmem:[#allocation599_spill] sm:$0xff] }
 0x9dd   :  { %v8015_v29 = vrot.slane %v5652_v36, %v14098_v61  ;;  %5912 = vperm.xlu0 %8601, %v18602_v57   ;;  %v8557_v59 = vsel %vm8549_vm2, %v8521_v30, 0.0  ;;  %v7883_v6 = vsel %vm6065_vm15, %v7882_v54, %v7878_v37  ;;  %v7961_v47 = vrot.slane %v15164_v18, %v14122_v20  ;;  %v18613_v30 = vld [vmem:[#allocation448_spill] sm:$0xff]  ;;  %v18614_v37 = vld [vmem:[#allocation687_spill] sm:$0xff]  ;;  %v18616_v36 = vld [vmem:[#allocation325_spill] sm:$0xff] }
 0x9de   :  { %v8011_v8 = vsel %vm16261_vm9, %v8010_v55, %v8006_v38  ;;  %v6762_v35 = vsel %vm6044_vm12, %v6761_v3, %v15080_v49  ;;  %v8556_v43 = vadd.f32 %v8555_v2, %v8554_v50  ;;  %v8523_v28 = vsel %vm18598_vm0, %v7804_v7, %v18603_v10  ;;  %v18606_v3 = vld [vmem:[#allocation345_spill] sm:$0xff]  ;;  %vm18607_vm9 = vmmov %vm18598_vm0  ;;  %v18620_v10 = vld [vmem:[#allocation476_spill] sm:$0xff] }
 0x9df   :  { %v8016_v12 = vsel %vm6030_vm10, %v8015_v29, %v8011_v8  ;;  %v6771_v51 = vrot.slane %v18604_v31, %v14156_v26  ;;  %v8559_v44 = vsel %vm8549_vm2, %v8522_v62, 0.0  ;;  %v7962_v18 = vsel %vm6065_vm15, %v7961_v47, %v7957_v22  ;;  %v5658_v32 = vpop.permute.xlu1 %5657  ;;  %v5667_v39 = vpop.permute.xlu0 %5666  ;;  %v18619_v8 = vld [vmem:[#allocation187_spill] sm:$0xff] }
 0x9e0   :  { %v8020_v1 = vrot.slane %v5655_v15, %v14073_v34  ;;  %5909 = vperm.xlu1 %8602, %v18605_v25   ;;  %v8558_v49 = vadd.f32 %v8557_v59, %v8556_v43  ;;  %v8524_v16 = vsel %vm18607_vm9, %v7883_v6, %v18606_v3  ;;  %v8025_v19 = vrot.slane %v5658_v32, %v14119_v63  ;;  %vm18615_vm9 = vmmov %vm18598_vm0  ;;  %v18617_v59 = vld [vmem:[#allocation477_spill] sm:$0xff]  ;;  %v18618_v6 = vld [vmem:[#allocation23_spill] sm:$0xff] }
 0x9e1   :  { %v8040_v58 = vrot.slane %v5667_v39, %v14122_v20  ;;  %5873 = vperm.xlu0 %8601, %v18608_v17   ;;  %v18611_v23 = vrot.slane %v18610_v45, %v14122_v20  ;;  %v6766_v13 = vrot.slane %v18612_v27, %v14108_v4  ;;  %v8561_v2 = vsel %vm8549_vm2, %v8523_v28, 0.0  ;;  %v18621_v28 = vld [vmem:[#allocation26_spill] sm:$0xff]  ;;  %v18623_v25 = vld [vmem:[#allocation192_spill] sm:$0xff]  ;;  %v18626_v27 = vld [vmem:[#allocation189_spill] sm:$0xff] }
 0x9e2   :  { %v8021_v42 = vsel %vm6037_vm11, %v8020_v1, %v8016_v12  ;;  %v3867_v38 = vmul.f32 %v18614_v37, %v18613_v30  ;;  %v8560_v7 = vadd.f32 %v8559_v44, %v8558_v49  ;;  %v8563_v55 = vsel %vm8549_vm2, %v8524_v16, 0.0  ;;  %v18624_v45 = vld [vmem:[#allocation462_spill] sm:$0xff] }
 0x9e3   :  { %v6698_v15 = vsel %vm6065_vm15, %v18611_v23, %v18609_v33  ;;  %v8026_v54 = vsel %vm6044_vm12, %v8025_v19, %v8021_v42  ;;  %v6767_v56 = vsel %vm6051_vm13, %v6766_v13, %v6762_v35  ;;  %v8030_v14 = vrot.slane %v5661_v46, %v14108_v4  ;;  %v5664_v50 = vpop.permute.xlu1 %5663  ;;  %v5673_v41 = vpop.permute.xlu0 %5672  ;;  %v18625_v23 = vld [vmem:[#allocation12_spill] sm:$0xff]  ;;  %v18628_v42 = vld [vmem:[#allocation11_spill] sm:$0xff] }
 0x9e4   :  { %v8525_v21 = vsel %vm18615_vm9, %v7962_v18, %v6698_v15  ;;  %5831 = vperm.xlu1 %8602, %v18616_v36   ;;  %v6772_v62 = vsel %vm6058_vm14, %v6771_v51, %v6767_v56  ;;  %v8562_v22 = vadd.f32 %v8561_v2, %v8560_v7  ;;  %v8035_v29 = vrot.slane %v5664_v50, %v14156_v26  ;;  %v18622_v18 = vld [vmem:[#allocation190_spill] sm:$0xff] }
 0x9e5   :  { %v8049_v57 = vrot.slane %v5673_v41, %v13985_v5  ;;  %5834 = vperm.xlu0 %8601, %v3867_v38   ;;  %v3894_v47 = vmul.f32 %v18618_v6, %v18617_v59  ;;  %v6776_v35 = vrot.slane %v18619_v8, %v14122_v20  ;;  %v8565_v46 = vsel %vm8549_vm2, %v8525_v21, 0.0  ;;  %v18631_v41 = vld [vmem:[#allocation451_spill] sm:$0xff]  ;;  %v18634_v59 = vld [vmem:[#allocation450_spill] sm:$0xff]  ;;  %v18635_v6 = vld [vmem:[#allocation689_spill] sm:$0xff] }
 0x9e6   :  { %v8031_v43 = vsel %vm6051_vm13, %v8030_v14, %v8026_v54  ;;  %v3895_v12 = vmul.f32 %v18621_v28, %v18620_v10  ;;  %v8564_v31 = vadd.f32 %v8563_v55, %v8562_v22  ;;  %v6781_v1 = vrot.slane %v18622_v18, %v13981_v60  ;;  %v18630_v55 = vld [vmem:[#allocation194_spill] sm:$0xff]  ;;  %v18638_v18 = vld [vmem:[#allocation479_spill] sm:$0xff] }
 0x9e7   :  { %v8036_v51 = vsel %vm6058_vm14, %v8035_v29, %v8031_v43  ;;  %v6777_v44 = vsel %vm6065_vm15, %v6776_v35, %v6772_v62  ;;  %v6790_v32 = vrot.slane %v18623_v25, %v14002_v0  ;;  %v5670_v49 = vpop.permute.xlu1 %5669  ;;  %v5679_v3 = vpop.permute.xlu0 %5678  ;;  %v3881_v15 = vmul.f32 %v18625_v23, %v18624_v45  ;;  %v18632_v62 = vld [vmem:[#allocation686_spill] sm:$0xff]  ;;  %v18633_v29 = vld [vmem:[#allocation191_spill] sm:$0xff] }
 0x9e8   :  { %v8041_v39 = vsel %vm6065_vm15, %v8040_v58, %v8036_v51  ;;  %5915 = vperm.xlu1 %8602, %v3894_v47   ;;  %v8566_v16 = vadd.f32 %v8565_v46, %v8564_v31  ;;  %v8045_v17 = vrot.slane %v5670_v49, %v13981_v60  ;;  %v8059_v33 = vrot.slane %v5679_v3, %v13989_v9  ;;  %v18627_v58 = vld [vmem:[#allocation465_spill] sm:$0xff]  ;;  %v18641_v49 = vld [vmem:[#allocation478_spill] sm:$0xff]  ;;  %v18642_v3 = vld [vmem:[#allocation28_spill] sm:$0xff] }
 0x9e9   :  { %v8526_v19 = vsel %vm18598_vm0, %v8041_v39, %v6777_v44  ;;  %5918 = vperm.xlu0 %8601, %v3895_v12   ;;  %v6785_v13 = vrot.slane %v18626_v27, %v13985_v5  ;;  %v3882_v30 = vmul.f32 %v18628_v42, %v18627_v58  ;;  %vm18629_vm9 = vcmask 195712   ;;  %v18637_v12 = vld [vmem:[#allocation196_spill] sm:$0xff]  ;;  %v18643_v27 = vld [vmem:[#allocation198_spill] sm:$0xff] }
 0x9ea   :  { %v8567_v2 = vsel %vm8549_vm2, %v8526_v19, 0.0  ;;  %v8050_v38 = vsel %vm5967_vm1, %v8049_v57, %v8045_v17  ;;  %v6800_v14 = vrot.slane %v18630_v55, %v14025_v52  ;;  %v3868_v22 = vmul.f32 %v18632_v62, %v18631_v41  ;;  %vm18636_vm0 = vmmov %vm18629_vm9  ;;  %v18644_v42 = vld [vmem:[#allocation464_spill] sm:$0xff] }
 0x9eb   :  { %v15421_v37 = vadd.f32 %v8567_v2, %v8566_v16  ;;  %v6786_v7 = vsel %vm5967_vm1, %v6785_v13, %v6781_v1  ;;  %v5676_v21 = vpop.permute.xlu1 %5675  ;;  %v5685_v54 = vpop.permute.xlu0 %5684  ;;  %v6795_v57 = vrot.slane %v18633_v29, %v13989_v9  ;;  %v3869_v47 = vmul.f32 %v18635_v6, %v18634_v59  ;;  %v18639_v1 = vld [vmem:[#allocation25_spill] sm:$0xff]  ;;  %v18649_v29 = vld [vmem:[#allocation200_spill] sm:$0xff] }
 0x9ec   :  { %5876 = vperm.xlu1 %8602, %v3881_v15   ;;  %v6791_v56 = vsel %vm18629_vm9, %v6790_v32, %v6786_v7  ;;  %v8054_v36 = vrot.slane %v5676_v21, %v14002_v0  ;;  %v8069_v50 = vrot.slane %v5685_v54, %v14014_v11  ;;  %v6810_v31 = vrot.slane %v18637_v12, %v14052_v40  ;;  %v18640_v32 = vld [vmem:[#allocation193_spill] sm:$0xff]  ;;  %v18646_v7 = vld [vmem:[#allocation195_spill] sm:$0xff] }
 0x9ed   :  { %5879 = vperm.xlu0 %8601, %v3882_v30   ;;  %v6796_v35 = vsel %vm5981_vm3, %v6795_v57, %v6791_v56  ;;  %v3896_v25 = vmul.f32 %v18639_v1, %v18638_v18  ;;  %v6805_v39 = vrot.slane %v18640_v32, %v14014_v11  ;;  %v3897_v16 = vmul.f32 %v18642_v3, %v18641_v49  ;;  %v18645_v30 = vld [vmem:[#allocation14_spill] sm:$0xff]  ;;  %v18647_v54 = vld [vmem:[#allocation467_spill] sm:$0xff]  ;;  %v18648_v56 = vld [vmem:[#allocation13_spill] sm:$0xff] }
 0x9ee   :  { %v8055_v8 = vsel %vm18636_vm0, %v8054_v36, %v8050_v38  ;;  %v6801_v28 = vsel %vm5988_vm4, %v6800_v14, %v6796_v35  ;;  %v6820_v13 = vrot.slane %v18643_v27, %v14068_v53  ;;  %v3883_v38 = vmul.f32 %v18645_v30, %v18644_v42  ;;  %v18657_v32 = vld [vmem:[#allocation202_spill] sm:$0xff] }
 0x9ef   :  { %v5682_v46 = vpop.permute.xlu1 %5681  ;;  %v8060_v43 = vsel %vm5981_vm3, %v8059_v33, %v8055_v8  ;;  %v5691_v10 = vpop.permute.xlu0 %5690  ;;  %v6806_v17 = vsel %vm5995_vm5, %v6805_v39, %v6801_v28  ;;  %v6815_v21 = vrot.slane %v18646_v7, %v14031_v48  ;;  %v3884_v55 = vmul.f32 %v18648_v56, %v18647_v54  ;;  %v18651_v8 = vld [vmem:[#allocation688_spill] sm:$0xff]  ;;  %v18654_v28 = vld [vmem:[#allocation3_spill] sm:$0xff] }
 0x9f0   :  { %5837 = vperm.xlu1 %8602, %v3868_v22   ;;  %v8064_v51 = vrot.slane %v5682_v46, %v14025_v52  ;;  %v8079_v44 = vrot.slane %v5691_v10, %v14031_v48  ;;  %v6811_v15 = vsel %vm6002_vm6, %v6810_v31, %v6806_v17  ;;  %v6830_v57 = vrot.slane %v18649_v29, %v14098_v61  ;;  %v18652_v46 = vld [vmem:[#allocation197_spill] sm:$0xff]  ;;  %v18653_v10 = vld [vmem:[#allocation452_spill] sm:$0xff] }
 0x9f1   :  { %5840 = vperm.xlu0 %8601, %v3869_v47   ;;  %v6816_v36 = vsel %vm6009_vm7, %v6815_v21, %v6811_v15  ;;  %v18650_v47 = vld [vmem:[#allocation453_spill] sm:$0xff]  ;;  %v3871_v12 = vmul.f32 %v18654_v28, %v18653_v10  ;;  %vm18655_vm9 = vcmask 654912   ;;  %v6840_v39 = vrot.slane %v18657_v32, %v14119_v63  ;;  %v18662_v15 = vld [vmem:[#allocation30_spill] sm:$0xff]  ;;  %v18663_v7 = vld [vmem:[#allocation204_spill] sm:$0xff] }
 0x9f2   :  { %v8065_v19 = vsel %vm5988_vm4, %v8064_v51, %v8060_v43  ;;  %v6821_v22 = vsel %vm6016_vm8, %v6820_v13, %v6816_v36  ;;  %v3870_v35 = vmul.f32 %v18651_v8, %v18650_v47  ;;  %v6825_v43 = vrot.slane %v18652_v46, %v14055_v24  ;;  %vm18656_vm0 = vmmov %vm18655_vm9  ;;  %v18669_v10 = vld [vmem:[#allocation455_spill] sm:$0xff]  ;;  %v18670_v28 = vld [vmem:[#allocation690_spill] sm:$0xff] }
 0x9f3   :  { %v5688_v33 = vpop.permute.xlu1 %5687  ;;  %v8070_v45 = vsel %vm5995_vm5, %v8069_v50, %v8065_v19  ;;  %v5697_v23 = vpop.permute.xlu0 %5696  ;;  %v18659_v19 = vld [vmem:[#allocation27_spill] sm:$0xff]  ;;  %v6850_v21 = vrot.slane %v18663_v7, %v14156_v26  ;;  %v18681_v7 = vld [vmem:[#allocation32_spill] sm:$0xff] }
 0x9f4   :  { %5921 = vperm.xlu1 %8602, %v3896_v25   ;;  %v8074_v2 = vrot.slane %v5688_v33, %v14052_v40  ;;  %v8089_v58 = vrot.slane %v5697_v23, %v14055_v24  ;;  %v6826_v51 = vsel %vm18655_vm9, %v6825_v43, %v6821_v22  ;;  %v18660_v33 = vld [vmem:[#allocation199_spill] sm:$0xff]  ;;  %v18661_v23 = vld [vmem:[#allocation480_spill] sm:$0xff]  ;;  %vm18676_vm9 = vcmask 1041409  }
 0x9f5   :  { %5924 = vperm.xlu0 %8601, %v3897_v16   ;;  %v6831_v25 = vsel %vm6030_vm10, %v6830_v57, %v6826_v51  ;;  %v18658_v16 = vld [vmem:[#allocation481_spill] sm:$0xff]  ;;  %v3899_v27 = vmul.f32 %v18662_v15, %v18661_v23  ;;  %v18668_v22 = vld [vmem:[#allocation15_spill] sm:$0xff] }
 0x9f6   :  { %v8075_v14 = vsel %vm6002_vm6, %v8074_v2, %v8070_v45  ;;  %v3898_v17 = vmul.f32 %v18659_v19, %v18658_v16  ;;  %v6835_v45 = vrot.slane %v18660_v33, %v14073_v34 }
 0x9f7   :  { %v5694_v50 = vpop.permute.xlu1 %5693  ;;  %v8080_v41 = vsel %vm6009_vm7, %v8079_v44, %v8075_v14  ;;  %v5703_v62 = vpop.permute.xlu0 %5702  ;;  %v18665_v14 = vld [vmem:[#allocation16_spill] sm:$0xff] }
 0x9f8   :  { %5882 = vperm.xlu1 %8602, %v3883_v38   ;;  %v8084_v59 = vrot.slane %v5694_v50, %v14068_v53  ;;  %v8099_v6 = vrot.slane %v5703_v62, %v14073_v34  ;;  %v6836_v2 = vsel %vm6037_vm11, %v6835_v45, %v6831_v25  ;;  %v18666_v50 = vld [vmem:[#allocation201_spill] sm:$0xff] }
 0x9f9   :  { %5885 = vperm.xlu0 %8601, %v3884_v55   ;;  %v6841_v38 = vsel %vm6044_vm12, %v6840_v39, %v6836_v2  ;;  %v18664_v55 = vld [vmem:[#allocation466_spill] sm:$0xff]  ;;  %v18667_v62 = vld [vmem:[#allocation469_spill] sm:$0xff] }
 0x9fa   :  { %v8085_v31 = vsel %vm6016_vm8, %v8084_v59, %v8080_v41  ;;  %v3885_v36 = vmul.f32 %v18665_v14, %v18664_v55  ;;  %v6845_v41 = vrot.slane %v18666_v50, %v14108_v4  ;;  %v3886_v29 = vmul.f32 %v18668_v22, %v18667_v62  ;;  %v18674_v39 = vld [vmem:[#allocation206_spill] sm:$0xff] }
 0x9fb   :  { %v5700_v44 = vpop.permute.xlu1 %5699  ;;  %v8090_v18 = vsel %vm18656_vm0, %v8089_v58, %v8085_v31  ;;  %v5709_v1 = vpop.permute.xlu0 %5708  ;;  %v18671_v31 = vld [vmem:[#allocation203_spill] sm:$0xff]  ;;  %vm18682_vm0 = vcmask 195712  }
 0x9fc   :  { %5843 = vperm.xlu1 %8602, %v3870_v35   ;;  %v8094_v49 = vrot.slane %v5700_v44, %v14098_v61  ;;  %v8109_v3 = vrot.slane %v5709_v1, %v14108_v4  ;;  %v6846_v59 = vsel %vm6051_vm13, %v6845_v41, %v6841_v38  ;;  %v6855_v51 = vrot.slane %v18671_v31, %v14122_v20  ;;  %v18672_v44 = vld [vmem:[#allocation454_spill] sm:$0xff] }
 0x9fd   :  { %5846 = vperm.xlu0 %8601, %v3871_v12   ;;  %v6851_v35 = vsel %vm6058_vm14, %v6850_v21, %v6846_v59  ;;  %v3872_v12 = vmul.f32 %v18670_v28, %v18669_v10  ;;  %v18680_v38 = vld [vmem:[#allocation482_spill] sm:$0xff] }
 0x9fe   :  { %v8095_v13 = vsel %vm6030_vm10, %v8094_v49, %v8090_v18  ;;  %v18673_v18 = vld [vmem:[#allocation4_spill] sm:$0xff]  ;;  %v6856_v32 = vsel %vm6065_vm15, %v6855_v51, %v6851_v35  ;;  %v6860_v49 = vrot.slane %v18674_v39, %v13981_v60  ;;  %v3901_v21 = vmul.f32 %v18681_v7, %v18680_v38  ;;  %v18683_v41 = vld [vmem:[#allocation210_spill] sm:$0xff]  ;;  %v18688_v35 = vld [vmem:[#allocation17_spill] sm:$0xff] }
 0x9ff   :  { %v5706_v58 = vpop.permute.xlu1 %5705  ;;  %v8100_v42 = vsel %vm6037_vm11, %v8099_v6, %v8095_v13  ;;  %v5715_v30 = vpop.permute.xlu0 %5714  ;;  %v3873_v1 = vmul.f32 %v18673_v18, %v18672_v44  ;;  %v18678_v13 = vld [vmem:[#allocation29_spill] sm:$0xff]  ;;  %v6879_v62 = vrot.slane %v18683_v41, %v14025_v52  ;;  %v18690_v44 = vld [vmem:[#allocation212_spill] sm:$0xff]  ;;  %v18692_v39 = vld [vmem:[#allocation691_spill] sm:$0xff] }
 0xa00   :  { %5927 = vperm.xlu1 %8602, %v3898_v17   ;;  %v8104_v54 = vrot.slane %v5706_v58, %v14119_v63  ;;  %v8119_v56 = vrot.slane %v5715_v30, %v14122_v20  ;;  %v18675_v17 = vld [vmem:[#allocation208_spill] sm:$0xff]  ;;  %v18679_v58 = vld [vmem:[#allocation205_spill] sm:$0xff]  ;;  %v6889_v18 = vrot.slane %v18690_v44, %v14052_v40 }
 0xa01   :  { %5930 = vperm.xlu0 %8601, %v3899_v27   ;;  %v6869_v33 = vrot.slane %v18675_v17, %v14002_v0  ;;  %v18677_v27 = vld [vmem:[#allocation483_spill] sm:$0xff]  ;;  %v18695_v17 = vld [vmem:[#allocation6_spill] sm:$0xff]  ;;  %v18697_v7 = vld [vmem:[#allocation485_spill] sm:$0xff] }
 0xa02   :  { %v8105_v57 = vsel %vm6044_vm12, %v8104_v54, %v8100_v42  ;;  %v3900_v2 = vmul.f32 %v18678_v13, %v18677_v27  ;;  %v6864_v42 = vrot.slane %v18679_v58, %v13985_v5  ;;  %v18696_v58 = vld [vmem:[#allocation214_spill] sm:$0xff] }
 0xa03   :  { %v5712_v6 = vpop.permute.xlu1 %5711  ;;  %v8110_v47 = vsel %vm6051_vm13, %v8109_v3, %v8105_v57  ;;  %v5721_v8 = vpop.permute.xlu0 %5720  ;;  %v18684_v57 = vld [vmem:[#allocation468_spill] sm:$0xff] }
 0xa04   :  { %5888 = vperm.xlu1 %8602, %v3885_v36   ;;  %v8114_v46 = vrot.slane %v5712_v6, %v14156_v26  ;;  %v8128_v43 = vrot.slane %v5721_v8, %v13985_v5  ;;  %v6865_v55 = vsel %vm5967_vm1, %v6864_v42, %v6860_v49  ;;  %v18686_v6 = vld [vmem:[#allocation207_spill] sm:$0xff]  ;;  %v6899_v42 = vrot.slane %v18696_v58, %v14068_v53 }
 0xa05   :  { %5891 = vperm.xlu0 %8601, %v3886_v29   ;;  %v6870_v50 = vsel %vm18682_vm0, %v6869_v33, %v6865_v55  ;;  %v18687_v8 = vld [vmem:[#allocation471_spill] sm:$0xff] }
 0xa06   :  { %v8115_v25 = vsel %vm6058_vm14, %v8114_v46, %v8110_v47  ;;  %v6874_v47 = vrot.slane %v18686_v6, %v13989_v9  ;;  %v3888_v46 = vmul.f32 %v18688_v35, %v18687_v8  ;;  %v18699_v55 = vld [vmem:[#allocation211_spill] sm:$0xff]  ;;  %v18702_v6 = vld [vmem:[#allocation216_spill] sm:$0xff] }
 0xa07   :  { %v8120_v3 = vsel %vm6065_vm15, %v8119_v56, %v8115_v25  ;;  %v5718_v16 = vpop.permute.xlu1 %5717  ;;  %v5727_v19 = vpop.permute.xlu0 %5726 }
 0xa08   :  { %5849 = vperm.xlu1 %8602, %v3872_v12   ;;  %v8527_v45 = vsel %vm18676_vm9, %v8120_v3, %v6856_v32  ;;  %v8124_v23 = vrot.slane %v5718_v16, %v13981_v60  ;;  %v8138_v15 = vrot.slane %v5727_v19, %v13989_v9  ;;  %vm18689_vm9 = vmmov %vm18682_vm0  ;;  %v6875_v10 = vsel %vm5981_vm3, %v6874_v47, %v6870_v50  ;;  %v18691_v32 = vld [vmem:[#allocation457_spill] sm:$0xff]  ;;  %v18694_v19 = vld [vmem:[#allocation456_spill] sm:$0xff] }
 0xa09   :  { %5852 = vperm.xlu0 %8601, %v3873_v1   ;;  %v8569_v30 = vsel %vm8549_vm2, %v8527_v45, 0.0  ;;  %v6880_v51 = vsel %vm5988_vm4, %v6879_v62, %v6875_v10  ;;  %v3874_v49 = vmul.f32 %v18692_v39, %v18691_v32  ;;  %v18693_v3 = vld [vmem:[#allocation209_spill] sm:$0xff]  ;;  %v3875_v33 = vmul.f32 %v18695_v17, %v18694_v19  ;;  %v18701_v50 = vld [vmem:[#allocation34_spill] sm:$0xff] }
 0xa0a   :  { %v15536_v54 = vadd.f32 %v8569_v30, %v15421_v37  ;;  %v8129_v56 = vsel %vm5967_vm1, %v8128_v43, %v8124_v23  ;;  %v18685_v37 = vld [vmem:[#allocation18_spill] sm:$0xff]  ;;  %v6884_v16 = vrot.slane %v18693_v3, %v14014_v11  ;;  %v6909_v47 = vrot.slane %v18702_v6, %v14098_v61 }
 0xa0b   :  { %v5724_v14 = vpop.permute.xlu1 %5723  ;;  %v5733_v36 = vpop.permute.xlu0 %5732  ;;  %v3887_v59 = vmul.f32 %v18685_v37, %v18684_v57  ;;  %vm18708_vm0 = vcmask 654912   ;;  %v18710_v3 = vld [vmem:[#allocation218_spill] sm:$0xff] }
 0xa0c   :  { %5933 = vperm.xlu1 %8602, %v3900_v2   ;;  %v8133_v22 = vrot.slane %v5724_v14, %v14002_v0  ;;  %v8148_v29 = vrot.slane %v5733_v36, %v14014_v11  ;;  %v6885_v23 = vsel %vm5995_vm5, %v6884_v16, %v6880_v51  ;;  %v6894_v14 = vrot.slane %v18699_v55, %v14031_v48  ;;  %v18700_v36 = vld [vmem:[#allocation484_spill] sm:$0xff]  ;;  %v18707_v51 = vld [vmem:[#allocation33_spill] sm:$0xff] }
 0xa0d   :  { %5936 = vperm.xlu0 %8601, %v3901_v21   ;;  %v6890_v2 = vsel %vm6002_vm6, %v6889_v18, %v6885_v23  ;;  %v18698_v21 = vld [vmem:[#allocation31_spill] sm:$0xff]  ;;  %v3903_v41 = vmul.f32 %v18701_v50, %v18700_v36  ;;  %v6919_v16 = vrot.slane %v18710_v3, %v14119_v63  ;;  %v18716_v55 = vld [vmem:[#allocation220_spill] sm:$0xff] }
 0xa0e   :  { %v8134_v43 = vsel %vm18689_vm9, %v8133_v22, %v8129_v56  ;;  %v3902_v56 = vmul.f32 %v18698_v21, %v18697_v7  ;;  %v6895_v22 = vsel %vm6009_vm7, %v6894_v14, %v6890_v2  ;;  %vm18709_vm9 = vmmov %vm18708_vm0  ;;  %v18715_v2 = vld [vmem:[#allocation36_spill] sm:$0xff]  ;;  %v6929_v14 = vrot.slane %v18716_v55, %v14156_v26 }
 0xa0f   :  { %v5730_v28 = vpop.permute.xlu1 %5729  ;;  %v8139_v12 = vsel %vm5981_vm3, %v8138_v15, %v8134_v43  ;;  %v5739_v31 = vpop.permute.xlu0 %5738  ;;  %v18704_v43 = vld [vmem:[#allocation20_spill] sm:$0xff] }
 0xa10   :  { %5894 = vperm.xlu1 %8602, %v3887_v59   ;;  %v8143_v1 = vrot.slane %v5730_v28, %v14025_v52  ;;  %v8158_v25 = vrot.slane %v5739_v31, %v14031_v48  ;;  %v6900_v59 = vsel %vm6016_vm8, %v6899_v42, %v6895_v22  ;;  %v18705_v28 = vld [vmem:[#allocation213_spill] sm:$0xff]  ;;  %v18706_v31 = vld [vmem:[#allocation487_spill] sm:$0xff] }
 0xa11   :  { %5897 = vperm.xlu0 %8601, %v3888_v46   ;;  %v18703_v46 = vld [vmem:[#allocation470_spill] sm:$0xff]  ;;  %v3904_v44 = vmul.f32 %v18707_v51, %v18706_v31  ;;  %v18722_v31 = vld [vmem:[#allocation489_spill] sm:$0xff]  ;;  %v18723_v51 = vld [vmem:[#allocation35_spill] sm:$0xff] }
 0xa12   :  { %v8144_v45 = vsel %vm5988_vm4, %v8143_v1, %v8139_v12  ;;  %v3889_v10 = vmul.f32 %v18704_v43, %v18703_v46  ;;  %v6904_v12 = vrot.slane %v18705_v28, %v14055_v24 }
 0xa13   :  { %v5736_v15 = vpop.permute.xlu1 %5735  ;;  %v8149_v27 = vsel %vm5995_vm5, %v8148_v29, %v8144_v45  ;;  %v5745_v13 = vpop.permute.xlu0 %5744  ;;  %v18712_v45 = vld [vmem:[#allocation19_spill] sm:$0xff] }
 0xa14   :  { %5855 = vperm.xlu1 %8602, %v3874_v49   ;;  %v8153_v30 = vrot.slane %v5736_v15, %v14052_v40  ;;  %v8168_v38 = vrot.slane %v5745_v13, %v14055_v24  ;;  %v6905_v1 = vsel %vm18708_vm0, %v6904_v12, %v6900_v59  ;;  %v18713_v15 = vld [vmem:[#allocation215_spill] sm:$0xff]  ;;  %v18714_v13 = vld [vmem:[#allocation486_spill] sm:$0xff]  ;;  %v18721_v59 = vld [vmem:[#allocation37_spill] sm:$0xff]  ;;  %vm18727_vm0 = vcmask 1041409  }
 0xa15   :  { %5858 = vperm.xlu0 %8601, %v3875_v33   ;;  %v6910_v49 = vsel %vm6030_vm10, %v6909_v47, %v6905_v1  ;;  %v18711_v33 = vld [vmem:[#allocation473_spill] sm:$0xff]  ;;  %v3905_v58 = vmul.f32 %v18715_v2, %v18714_v13 }
 0xa16   :  { %v8154_v62 = vsel %vm6002_vm6, %v8153_v30, %v8149_v27  ;;  %v3890_v23 = vmul.f32 %v18712_v45, %v18711_v33  ;;  %v6914_v27 = vrot.slane %v18713_v15, %v14073_v34 }
 0xa17   :  { %v5742_v29 = vpop.permute.xlu1 %5741  ;;  %v8159_v57 = vsel %vm6009_vm7, %v8158_v25, %v8154_v62  ;;  %v5751_v37 = vpop.permute.xlu0 %5750  ;;  %v18718_v62 = vld [vmem:[#allocation22_spill] sm:$0xff] }
 0xa18   :  { %5939 = vperm.xlu1 %8602, %v3902_v56   ;;  %v8163_v8 = vrot.slane %v5742_v29, %v14068_v53  ;;  %v8178_v35 = vrot.slane %v5751_v37, %v14073_v34  ;;  %v6915_v30 = vsel %vm6037_vm11, %v6914_v27, %v6910_v49  ;;  %v18719_v29 = vld [vmem:[#allocation217_spill] sm:$0xff]  ;;  %v18720_v37 = vld [vmem:[#allocation488_spill] sm:$0xff] }
 0xa19   :  { %5942 = vperm.xlu0 %8601, %v3903_v41   ;;  %v6920_v56 = vsel %vm6044_vm12, %v6919_v16, %v6915_v30  ;;  %v18717_v41 = vld [vmem:[#allocation472_spill] sm:$0xff]  ;;  %v3907_v6 = vmul.f32 %v18721_v59, %v18720_v37  ;;  %v18728_v27 = vld [vmem:[#allocation221_spill] sm:$0xff] }
 0xa1a   :  { %v8164_v18 = vsel %vm6016_vm8, %v8163_v8, %v8159_v57  ;;  %v3891_v22 = vmul.f32 %v18718_v62, %v18717_v41  ;;  %v6924_v57 = vrot.slane %v18719_v29, %v14108_v4  ;;  %v6943_v13 = vrot.slane %v18728_v27, %v13985_v5  ;;  %v18733_v59 = vld [vmem:[#allocation228_spill] sm:$0xff] }
 0xa1b   :  { %v5748_v25 = vpop.permute.xlu1 %5747  ;;  %v8169_v32 = vsel %vm18709_vm9, %v8168_v38, %v8164_v18  ;;  %v5757_v39 = vpop.permute.xlu0 %5756  ;;  %v18724_v18 = vld [vmem:[#allocation219_spill] sm:$0xff]  ;;  %vm18729_vm9 = vcmask 195712  }
 0xa1c   :  { %5900 = vperm.xlu1 %8602, %v3889_v10   ;;  %v8173_v19 = vrot.slane %v5748_v25, %v14098_v61  ;;  %v8188_v17 = vrot.slane %v5757_v39, %v14108_v4  ;;  %v6925_v8 = vsel %vm6051_vm13, %v6924_v57, %v6920_v56  ;;  %v6934_v1 = vrot.slane %v18724_v18, %v14122_v20  ;;  %v18725_v39 = vld [vmem:[#allocation222_spill] sm:$0xff] }
 0xa1d   :  { %5945 = vperm.xlu0 %8601, %v3904_v44   ;;  %v6930_v10 = vsel %vm6058_vm14, %v6929_v14, %v6925_v8  ;;  %v3906_v44 = vmul.f32 %v18723_v51, %v18722_v31  ;;  %v6939_v49 = vrot.slane %v18725_v39, %v13981_v60  ;;  %v18730_v56 = vld [vmem:[#allocation226_spill] sm:$0xff] }
 0xa1e   :  { %v8174_v42 = vsel %vm6030_vm10, %v8173_v19, %v8169_v32  ;;  %v6935_v32 = vsel %vm6065_vm15, %v6934_v1, %v6930_v10  ;;  %v6958_v55 = vrot.slane %v18730_v56, %v14025_v52 }
 0xa1f   :  { %v5754_v38 = vpop.permute.xlu1 %5753  ;;  %v8179_v7 = vsel %vm6037_vm11, %v8178_v35, %v8174_v42  ;;  %v5763_v21 = vpop.permute.xlu0 %5762  ;;  %v6944_v30 = vsel %vm5967_vm1, %v6943_v13, %v6939_v49  ;;  %v18738_v13 = vld [vmem:[#allocation229_spill] sm:$0xff] }
 0xa20   :  { %5903 = vperm.xlu1 %8602, %v3890_v23   ;;  %v8183_v36 = vrot.slane %v5754_v38, %v14119_v63  ;;  %v8198_v50 = vrot.slane %v5763_v21, %v14122_v20 }
 0xa21   :  { %5948 = vperm.xlu0 %8601, %v3905_v58  }
 0xa22   :  { %v8184_v47 = vsel %vm6044_vm12, %v8183_v36, %v8179_v7 }
 0xa23   :  { %v5760_v35 = vpop.permute.xlu1 %5759  ;;  %v8189_v46 = vsel %vm6051_vm13, %v8188_v17, %v8184_v47  ;;  %v5769_v43 = vpop.permute.xlu0 %5768  ;;  %v18726_v17 = vld [vmem:[#allocation224_spill] sm:$0xff] }
 0xa24   :  { %5906 = vperm.xlu1 %8602, %v3891_v22   ;;  %v8193_v28 = vrot.slane %v5760_v35, %v14156_v26  ;;  %v8207_v12 = vrot.slane %v5769_v43, %v13985_v5  ;;  %v6948_v33 = vrot.slane %v18726_v17, %v14002_v0  ;;  %v18734_v35 = vld [vmem:[#allocation225_spill] sm:$0xff] }
 0xa25   :  { %5954 = vperm.xlu0 %8601, %v3907_v6   ;;  %v6968_v6 = vrot.slane %v18733_v59, %v14052_v40 }
 0xa26   :  { %v8194_v25 = vsel %vm6058_vm14, %v8193_v28, %v8189_v46  ;;  %v6949_v21 = vsel %vm18729_vm9, %v6948_v33, %v6944_v30  ;;  %v6963_v46 = vrot.slane %v18734_v35, %v14014_v11 }
 0xa27   :  { %v8199_v3 = vsel %vm6065_vm15, %v8198_v50, %v8194_v25  ;;  %v5766_v16 = vpop.permute.xlu1 %5765  ;;  %v5775_v19 = vpop.permute.xlu0 %5774  ;;  %v18731_v50 = vld [vmem:[#allocation223_spill] sm:$0xff] }
 0xa28   :  { %5951 = vperm.xlu1 %8602, %v3906_v44   ;;  %v8528_v45 = vsel %vm18727_vm0, %v8199_v3, %v6935_v32  ;;  %v8203_v23 = vrot.slane %v5766_v16, %v13981_v60  ;;  %v8217_v15 = vrot.slane %v5775_v19, %v13989_v9  ;;  %v6953_v41 = vrot.slane %v18731_v50, %v13989_v9  ;;  %vm18732_vm0 = vmmov %vm18729_vm9  ;;  %v18735_v44 = vld [vmem:[#allocation230_spill] sm:$0xff]  ;;  %v18736_v32 = vld [vmem:[#allocation227_spill] sm:$0xff] }
 0xa29   :  { %v8571_v2 = vsel %vm8549_vm2, %v8528_v45, 0.0  ;;  %v6978_v18 = vrot.slane %v18735_v44, %v14068_v53  ;;  %v6973_v39 = vrot.slane %v18736_v32, %v14031_v48  ;;  %v18737_v45 = vld [vmem:[#allocation232_spill] sm:$0xff]  ;;  %vm18739_vm9 = vcmask 654912  }
 0xa2a   :  { %v15645_v58 = vadd.f32 %v8571_v2, %v15536_v54  ;;  %v8208_v42 = vsel %vm5967_vm1, %v8207_v12, %v8203_v23  ;;  %v6954_v62 = vsel %vm5981_vm3, %v6953_v41, %v6949_v21  ;;  %v6988_v23 = vrot.slane %v18737_v45, %v14098_v61  ;;  %v18742_v41 = vld [vmem:[#allocation231_spill] sm:$0xff] }
 0xa2b   :  { %v5772_v38 = vpop.permute.xlu1 %5771  ;;  %v5781_v7 = vpop.permute.xlu0 %5780  ;;  %v6959_v37 = vsel %vm5988_vm4, %v6958_v55, %v6954_v62  ;;  %v6983_v2 = vrot.slane %v18738_v13, %v14055_v24  ;;  %v18741_v55 = vld [vmem:[#allocation490_spill] sm:$0xff] }
 0xa2c   :  { %v8212_v14 = vrot.slane %v5772_v38, %v14002_v0  ;;  %v8227_v36 = vrot.slane %v5781_v7, %v14014_v11  ;;  %v6964_v10 = vsel %vm5995_vm5, %v6963_v46, %v6959_v37  ;;  %v18744_v46 = vld [vmem:[#allocation233_spill] sm:$0xff] }
 0xa2d   :  { %v6969_v51 = vsel %vm6002_vm6, %v6968_v6, %v6964_v10  ;;  %v18743_v6 = vld [vmem:[#allocation491_spill] sm:$0xff] }
 0xa2e   :  { %v8213_v54 = vsel %vm18732_vm0, %v8212_v14, %v8208_v42  ;;  %v6974_v3 = vsel %vm6009_vm7, %v6973_v39, %v6969_v51  ;;  %vm18740_vm0 = vmmov %vm18739_vm9  ;;  %v6998_v14 = vrot.slane %v18741_v55, %v14119_v63 }
 0xa2f   :  { %v5778_v22 = vpop.permute.xlu1 %5777  ;;  %v8218_v29 = vsel %vm5981_vm3, %v8217_v15, %v8213_v54  ;;  %v5787_v57 = vpop.permute.xlu0 %5786  ;;  %v6979_v33 = vsel %vm6016_vm8, %v6978_v18, %v6974_v3  ;;  %v6993_v54 = vrot.slane %v18742_v41, %v14073_v34 }
 0xa30   :  { %v8222_v47 = vrot.slane %v5778_v22, %v14025_v52  ;;  %v8237_v8 = vrot.slane %v5787_v57, %v14031_v48  ;;  %v6984_v30 = vsel %vm18739_vm9, %v6983_v2, %v6979_v33  ;;  %vm18746_vm9 = vcmask 1041409  }
 0xa31   :  { %v6989_v56 = vsel %vm6030_vm10, %v6988_v23, %v6984_v30 }
 0xa32   :  { %v8223_v43 = vsel %vm5988_vm4, %v8222_v47, %v8218_v29  ;;  %v6994_v22 = vsel %vm6037_vm11, %v6993_v54, %v6989_v56  ;;  %v7008_v47 = vrot.slane %v18743_v6, %v14156_v26 }
 0xa33   :  { %v5784_v28 = vpop.permute.xlu1 %5783  ;;  %v8228_v12 = vsel %vm5995_vm5, %v8227_v36, %v8223_v43  ;;  %v5793_v31 = vpop.permute.xlu0 %5792  ;;  %v6999_v59 = vsel %vm6044_vm12, %v6998_v14, %v6994_v22  ;;  %v7003_v43 = vrot.slane %v18744_v46, %v14108_v4 }
 0xa34   :  { %v8232_v1 = vrot.slane %v5784_v28, %v14052_v40  ;;  %v8247_v25 = vrot.slane %v5793_v31, %v14055_v24 }
 0xa35   :  { %v7004_v28 = vsel %vm6051_vm13, %v7003_v43, %v6999_v59 }
 0xa36   :  { %v8233_v49 = vsel %vm6002_vm6, %v8232_v1, %v8228_v12  ;;  %v7009_v44 = vsel %vm6058_vm14, %v7008_v47, %v7004_v28 }
 0xa37   :  { %v5790_v16 = vpop.permute.xlu1 %5789  ;;  %v8238_v19 = vsel %vm6009_vm7, %v8237_v8, %v8233_v49  ;;  %v5799_v17 = vpop.permute.xlu0 %5798 }
 0xa38   :  { %v8242_v15 = vrot.slane %v5790_v16, %v14068_v53  ;;  %v8257_v27 = vrot.slane %v5799_v17, %v14073_v34 }
 0xa3a   :  { %v8243_v42 = vsel %vm6016_vm8, %v8242_v15, %v8238_v19 }
 0xa3b   :  { %v5796_v38 = vpop.permute.xlu1 %5795  ;;  %v8248_v7 = vsel %vm18740_vm0, %v8247_v25, %v8243_v42  ;;  %v18745_v25 = vld [vmem:[#allocation234_spill] sm:$0xff]  ;;  %vm18747_vm0 = vcmask 195712  }
 0xa3c   :  { %v5805_v21 = vpop.permute.xlu0 %5804  ;;  %v8252_v36 = vrot.slane %v5796_v38, %v14098_v61  ;;  %v7013_v32 = vrot.slane %v18745_v25, %v14122_v20 }
 0xa3d   :  { %v8267_v50 = vrot.slane %v5805_v21, %v14108_v4 }
 0xa3e   :  { %v8253_v62 = vsel %vm6030_vm10, %v8252_v36, %v8248_v7  ;;  %v7014_v49 = vsel %vm6065_vm15, %v7013_v32, %v7009_v44 }
 0xa3f   :  { %v5802_v29 = vpop.permute.xlu1 %5801  ;;  %v8258_v57 = vsel %vm6037_vm11, %v8257_v27, %v8253_v62 }
 0xa40   :  { %v5811_v37 = vpop.permute.xlu0 %5810  ;;  %v8262_v8 = vrot.slane %v5802_v29, %v14119_v63 }
 0xa41   :  { %v8277_v35 = vrot.slane %v5811_v37, %v14122_v20 }
 0xa42   :  { %v8263_v10 = vsel %vm6044_vm12, %v8262_v8, %v8258_v57 }
 0xa43   :  { %v5808_v12 = vpop.permute.xlu1 %5807  ;;  %v8268_v31 = vsel %vm6051_vm13, %v8267_v50, %v8263_v10 }
 0xa44   :  { %v5817_v51 = vpop.permute.xlu0 %5816  ;;  %v8272_v18 = vrot.slane %v5808_v12, %v14156_v26 }
 0xa45   :  { %v8286_v1 = vrot.slane %v5817_v51, %v13985_v5 }
 0xa46   :  { %v8273_v39 = vsel %vm6058_vm14, %v8272_v18, %v8268_v31 }
 0xa47   :  { %v8278_v3 = vsel %vm6065_vm15, %v8277_v35, %v8273_v39  ;;  %v5814_v16 = vpop.permute.xlu1 %5813 }
 0xa48   :  { %v5823_v19 = vpop.permute.xlu0 %5822  ;;  %v8529_v17 = vsel %vm18746_vm9, %v8278_v3, %v7014_v49  ;;  %v8282_v33 = vrot.slane %v5814_v16, %v13981_v60  ;;  %vm18748_vm9 = vmmov %vm18747_vm0 }
 0xa49   :  { %v8296_v45 = vrot.slane %v5823_v19, %v13989_v9  ;;  %v8573_v23 = vsel %vm8549_vm2, %v8529_v17, 0.0 }
 0xa4a   :  { %v8287_v15 = vsel %vm5967_vm1, %v8286_v1, %v8282_v33  ;;  %v15723_v27 = vadd.f32 %v8573_v23, %v15645_v58 }
 0xa4b   :  { %v5820_v13 = vpop.permute.xlu1 %5819 }
 0xa4c   :  { %v5865_v2 = vpop.permute.xlu0 %5864  ;;  %v8291_v42 = vrot.slane %v5820_v13, %v14002_v0  ;;  %v18750_v13 = vld [vmem:[#allocation492_spill] sm:$0xff] }
 0xa4d   :  { %v8365_v30 = vrot.slane %v5865_v2, %v13985_v5  ;;  %v7027_v2 = vrot.slane %v18750_v13, %v14002_v0 }
 0xa4e   :  { %v8292_v38 = vsel %vm18747_vm0, %v8291_v42, %v8287_v15  ;;  %vm18751_vm0 = vcmask 654912  }
 0xa4f   :  { %v5862_v7 = vpop.permute.xlu1 %5861  ;;  %v8297_v56 = vsel %vm5981_vm3, %v8296_v45, %v8292_v38  ;;  %v18749_v45 = vld [vmem:[#allocation494_spill] sm:$0xff] }
 0xa50   :  { %v5868_v21 = vpop.permute.xlu0 %5867  ;;  %v8361_v55 = vrot.slane %v5862_v7, %v13981_v60  ;;  %v7018_v23 = vrot.slane %v18749_v45, %v13981_v60  ;;  %v18752_v7 = vld [vmem:[#allocation235_spill] sm:$0xff] }
 0xa51   :  { %v8370_v14 = vrot.slane %v5868_v21, %v14002_v0  ;;  %v7022_v21 = vrot.slane %v18752_v7, %v13985_v5 }
 0xa52   :  { %v8366_v36 = vsel %vm5967_vm1, %v8365_v30, %v8361_v55 }
 0xa53   :  { %v8371_v58 = vsel %vm18748_vm9, %v8370_v14, %v8366_v36  ;;  %v5826_v50 = vpop.permute.xlu1 %5825  ;;  %v18753_v14 = vld [vmem:[#allocation496_spill] sm:$0xff] }
 0xa54   :  { %v5871_v41 = vpop.permute.xlu0 %5870  ;;  %v8301_v54 = vrot.slane %v5826_v50, %v14025_v52  ;;  %v7037_v36 = vrot.slane %v18753_v14, %v14025_v52 }
 0xa55   :  { %v8375_v62 = vrot.slane %v5871_v41, %v13989_v9  ;;  %v18754_v41 = vld [vmem:[#allocation236_spill] sm:$0xff] }
 0xa56   :  { %v8302_v22 = vsel %vm5988_vm4, %v8301_v54, %v8297_v56  ;;  %v7023_v56 = vsel %vm5967_vm1, %v7022_v21, %v7018_v23  ;;  %v7032_v54 = vrot.slane %v18754_v41, %v13989_v9  ;;  %v18759_v23 = vld [vmem:[#allocation495_spill] sm:$0xff]  ;;  %v18761_v21 = vld [vmem:[#allocation502_spill] sm:$0xff] }
 0xa57   :  { %v8376_v29 = vsel %vm5981_vm3, %v8375_v62, %v8371_v58  ;;  %v5829_v57 = vpop.permute.xlu1 %5828  ;;  %v7028_v55 = vsel %vm18748_vm9, %v7027_v2, %v7023_v56  ;;  %v7097_v56 = vrot.slane %v18761_v21, %v13981_v60  ;;  %v18763_v41 = vld [vmem:[#allocation243_spill] sm:$0xff]  ;;  %vm18764_vm9 = vmmov %vm18751_vm0 }
 0xa58   :  { %v15737_v37 = vpop.permute.xlu0 %5912  ;;  %v8306_v59 = vrot.slane %v5829_v57, %v14014_v11 }
 0xa5a   :  { %v8307_v6 = vsel %vm5995_vm5, %v8306_v59, %v8302_v22 }
 0xa5b   :  { %v15741_v47 = vpop.permute.xlu1 %5909 }
 0xa5c   :  { %v5874_v8 = vpop.permute.xlu0 %5873 }
 0xa5d   :  { %v8380_v35 = vrot.slane %v5874_v8, %v14025_v52 }
 0xa5f   :  { %v8381_v46 = vsel %vm5988_vm4, %v8380_v35, %v8376_v29  ;;  %v5832_v43 = vpop.permute.xlu1 %5831  ;;  %v7033_v29 = vsel %vm5981_vm3, %v7032_v54, %v7028_v55  ;;  %v7101_v54 = vrot.slane %v18763_v41, %v13985_v5 }
 0xa60   :  { %v5835_v10 = vpop.permute.xlu0 %5834  ;;  %v8311_v28 = vrot.slane %v5832_v43, %v14052_v40  ;;  %v7038_v59 = vsel %vm5988_vm4, %v7037_v36, %v7033_v29  ;;  %v18762_v36 = vld [vmem:[#allocation499_spill] sm:$0xff]  ;;  %v18765_v29 = vld [vmem:[#allocation500_spill] sm:$0xff] }
 0xa61   :  { %v8316_v12 = vrot.slane %v5835_v10, %v14031_v48  ;;  %v18756_v10 = vld [vmem:[#allocation237_spill] sm:$0xff] }
 0xa62   :  { %v8312_v31 = vsel %vm6002_vm6, %v8311_v28, %v8307_v6  ;;  %v18755_v6 = vld [vmem:[#allocation493_spill] sm:$0xff]  ;;  %v7042_v28 = vrot.slane %v18756_v10, %v14014_v11  ;;  %v7102_v10 = vsel %vm5967_vm1, %v7101_v54, %v7097_v56 }
 0xa63   :  { %v8317_v51 = vsel %vm6009_vm7, %v8316_v12, %v8312_v31  ;;  %v15749_v44 = vpop.permute.xlu1 %5915  ;;  %v7047_v8 = vrot.slane %v18755_v6, %v14052_v40 }
 0xa64   :  { %v15751_v18 = vpop.permute.xlu0 %5918 }
 0xa67   :  { %v5877_v1 = vpop.permute.xlu1 %5876 }
 0xa68   :  { %v5880_v25 = vpop.permute.xlu0 %5879  ;;  %v8385_v32 = vrot.slane %v5877_v1, %v14014_v11 }
 0xa69   :  { %v8390_v39 = vrot.slane %v5880_v25, %v14052_v40 }
 0xa6a   :  { %v8386_v49 = vsel %vm5995_vm5, %v8385_v32, %v8381_v46  ;;  %v18757_v32 = vld [vmem:[#allocation498_spill] sm:$0xff] }
 0xa6b   :  { %v8391_v3 = vsel %vm6002_vm6, %v8390_v39, %v8386_v49  ;;  %v5838_v16 = vpop.permute.xlu1 %5837  ;;  %v7057_v39 = vrot.slane %v18757_v32, %v14068_v53 }
 0xa6c   :  { %v5841_v19 = vpop.permute.xlu0 %5840  ;;  %v8321_v17 = vrot.slane %v5838_v16, %v14068_v53 }
 0xa6d   :  { %v8326_v33 = vrot.slane %v5841_v19, %v14055_v24  ;;  %v18758_v19 = vld [vmem:[#allocation238_spill] sm:$0xff] }
 0xa6e   :  { %v8322_v15 = vsel %vm6016_vm8, %v8321_v17, %v8317_v51  ;;  %v7043_v51 = vsel %vm5995_vm5, %v7042_v28, %v7038_v59  ;;  %v7052_v17 = vrot.slane %v18758_v19, %v14031_v48 }
 0xa6f   :  { %v8327_v42 = vsel %vm18751_vm0, %v8326_v33, %v8322_v15  ;;  %v15765_v30 = vpop.permute.xlu1 %5921  ;;  %v7048_v25 = vsel %vm6002_vm6, %v7047_v8, %v7043_v51  ;;  %v7067_v15 = vrot.slane %v18759_v23, %v14098_v61 }
 0xa70   :  { %v15767_v38 = vpop.permute.xlu0 %5924  ;;  %v7053_v33 = vsel %vm6009_vm7, %v7052_v17, %v7048_v25  ;;  %v18771_v17 = vld [vmem:[#allocation507_spill] sm:$0xff] }
 0xa71   :  { %v7058_v45 = vsel %vm6016_vm8, %v7057_v39, %v7053_v33  ;;  %v18770_v39 = vld [vmem:[#allocation244_spill] sm:$0xff]  ;;  %v7185_v33 = vrot.slane %v18771_v17, %v14002_v0 }
 0xa72   :  { %v7111_v19 = vrot.slane %v18770_v39, %v13989_v9  ;;  %v18781_v39 = vld [vmem:[#allocation246_spill] sm:$0xff] }
 0xa73   :  { %v5883_v58 = vpop.permute.xlu1 %5882 }
 0xa74   :  { %v5886_v50 = vpop.permute.xlu0 %5885  ;;  %v8395_v62 = vrot.slane %v5883_v58, %v14031_v48  ;;  %v7106_v58 = vrot.slane %v18762_v36, %v14002_v0 }
 0xa75   :  { %v8400_v22 = vrot.slane %v5886_v50, %v14068_v53 }
 0xa76   :  { %v8396_v57 = vsel %vm6009_vm7, %v8395_v62, %v8391_v3 }
 0xa77   :  { %v8401_v35 = vsel %vm6016_vm8, %v8400_v22, %v8396_v57  ;;  %v5844_v46 = vpop.permute.xlu1 %5843  ;;  %v7077_v57 = vrot.slane %v18765_v29, %v14119_v63 }
 0xa78   :  { %v5847_v43 = vpop.permute.xlu0 %5846  ;;  %v8331_v12 = vrot.slane %v5844_v46, %v14098_v61  ;;  %v18766_v46 = vld [vmem:[#allocation240_spill] sm:$0xff] }
 0xa79   :  { %v8336_v31 = vrot.slane %v5847_v43, %v14073_v34  ;;  %v7072_v43 = vrot.slane %v18766_v46, %v14073_v34 }
 0xa7a   :  { %v8332_v1 = vsel %vm6030_vm10, %v8331_v12, %v8327_v42  ;;  %v18760_v42 = vld [vmem:[#allocation239_spill] sm:$0xff] }
 0xa7b   :  { %v8337_v49 = vsel %vm6037_vm11, %v8336_v31, %v8332_v1  ;;  %v15795_v3 = vpop.permute.xlu1 %5927  ;;  %v7062_v7 = vrot.slane %v18760_v42, %v14055_v24  ;;  %v18768_v31 = vld [vmem:[#allocation504_spill] sm:$0xff]  ;;  %v18769_v1 = vld [vmem:[#allocation510_spill] sm:$0xff] }
 0xa7c   :  { %v15797_v16 = vpop.permute.xlu0 %5930  ;;  %v7116_v51 = vrot.slane %v18768_v31, %v14025_v52  ;;  %v7176_v25 = vrot.slane %v18769_v1, %v13981_v60  ;;  %v8449_v1 = vrot.slane %v15749_v44, %v14002_v0  ;;  %v18783_v0 = vld [vmem:[#allocation509_spill] sm:$0xff] }
 0xa7d   :  { %v7063_v50 = vsel %vm18751_vm0, %v7062_v7, %v7058_v45  ;;  %vm18767_vm0 = vcmask 195712   ;;  %v7205_v44 = vrot.slane %v18783_v0, %v14052_v40 }
 0xa7e   :  { %v7068_v22 = vsel %vm6030_vm10, %v7067_v15, %v7063_v50  ;;  %v18772_v15 = vld [vmem:[#allocation497_spill] sm:$0xff] }
 0xa7f   :  { %v5889_v13 = vpop.permute.xlu1 %5888  ;;  %v7073_v32 = vsel %vm6037_vm11, %v7072_v43, %v7068_v22 }
 0xa80   :  { %v5892_v2 = vpop.permute.xlu0 %5891  ;;  %v8405_v55 = vrot.slane %v5889_v13, %v14055_v24  ;;  %v7078_v23 = vsel %vm6044_vm12, %v7077_v57, %v7073_v32  ;;  %v7087_v13 = vrot.slane %v18772_v15, %v14156_v26  ;;  %v18778_v57 = vld [vmem:[#allocation512_spill] sm:$0xff] }
 0xa81   :  { %v8410_v14 = vrot.slane %v5892_v2, %v14098_v61  ;;  %v18773_v2 = vld [vmem:[#allocation251_spill] sm:$0xff] }
 0xa82   :  { %v8406_v62 = vsel %vm18764_vm9, %v8405_v55, %v8401_v35  ;;  %v7107_v35 = vsel %vm18767_vm0, %v7106_v58, %v7102_v10  ;;  %v7180_v42 = vrot.slane %v18773_v2, %v13985_v5  ;;  %v18774_v55 = vld [vmem:[#allocation241_spill] sm:$0xff]  ;;  %vm18777_vm9 = vmmov %vm18767_vm0  ;;  %v18780_v10 = vld [vmem:[#allocation252_spill] sm:$0xff] }
 0xa83   :  { %v8411_v59 = vsel %vm6030_vm10, %v8410_v14, %v8406_v62  ;;  %v5850_v6 = vpop.permute.xlu1 %5849  ;;  %v7082_v14 = vrot.slane %v18774_v55, %v14108_v4  ;;  %v7112_v36 = vsel %vm5981_vm3, %v7111_v19, %v7107_v35  ;;  %v18775_v58 = vld [vmem:[#allocation501_spill] sm:$0xff]  ;;  %v7131_v19 = vrot.slane %v18781_v39, %v14031_v48  ;;  %v18792_v39 = vld [vmem:[#allocation508_spill] sm:$0xff] }
 0xa84   :  { %v5853_v8 = vpop.permute.xlu0 %5852  ;;  %v8341_v28 = vrot.slane %v5850_v6, %v14119_v63  ;;  %v7126_v50 = vrot.slane %v18775_v58, %v14052_v40  ;;  %v7181_v41 = vsel %vm5967_vm1, %v7180_v42, %v7176_v25  ;;  %v18776_v62 = vld [vmem:[#allocation245_spill] sm:$0xff]  ;;  %v7195_v6 = vrot.slane %v18778_v57, %v14025_v52  ;;  %v18787_v57 = vld [vmem:[#allocation514_spill] sm:$0xff] }
 0xa85   :  { %v8346_v12 = vrot.slane %v5853_v8, %v14108_v4  ;;  %v7083_v54 = vsel %vm6051_vm13, %v7082_v14, %v7078_v23  ;;  %v7121_v22 = vrot.slane %v18776_v62, %v14014_v11  ;;  %v7186_v29 = vsel %vm18777_vm9, %v7185_v33, %v7181_v41  ;;  %v18779_v8 = vld [vmem:[#allocation242_spill] sm:$0xff]  ;;  %v18785_v41 = vld [vmem:[#allocation247_spill] sm:$0xff] }
 0xa86   :  { %v8342_v45 = vsel %vm6044_vm12, %v8341_v28, %v8337_v49  ;;  %v7117_v49 = vsel %vm5988_vm4, %v7116_v51, %v7112_v36  ;;  %v7092_v46 = vrot.slane %v18779_v8, %v14122_v20  ;;  %v7088_v43 = vsel %vm6058_vm14, %v7087_v13, %v7083_v54  ;;  %v18784_v13 = vld [vmem:[#allocation253_spill] sm:$0xff] }
 0xa87   :  { %v8347_v7 = vsel %vm6051_vm13, %v8346_v12, %v8342_v45  ;;  %v15843_v21 = vpop.permute.xlu1 %5933  ;;  %v7190_v28 = vrot.slane %v18780_v10, %v13989_v9  ;;  %v8440_v12 = vrot.slane %v15741_v47, %v13981_v60  ;;  %v7122_v51 = vsel %vm5995_vm5, %v7121_v22, %v7117_v49  ;;  %v18782_v47 = vld [vmem:[#allocation506_spill] sm:$0xff]  ;;  %v18786_v22 = vld [vmem:[#allocation503_spill] sm:$0xff] }
 0xa88   :  { %v15845_v56 = vpop.permute.xlu0 %5936  ;;  %v7127_v17 = vsel %vm6002_vm6, %v7126_v50, %v7122_v51  ;;  %v8444_v60 = vrot.slane %v15737_v37, %v13985_v5  ;;  %v7136_v45 = vrot.slane %v18782_v47, %v14068_v53  ;;  %v7200_v2 = vrot.slane %v18784_v13, %v14014_v11 }
 0xa89   :  { %v7191_v33 = vsel %vm5981_vm3, %v7190_v28, %v7186_v29  ;;  %v8454_v55 = vrot.slane %v15751_v18, %v13989_v9  ;;  %v8459_v49 = vrot.slane %v15765_v30, %v14025_v52  ;;  %v7093_v50 = vsel %vm6065_vm15, %v7092_v46, %v7088_v43 }
 0xa8a   :  { %v7196_v23 = vsel %vm5988_vm4, %v7195_v6, %v7191_v33  ;;  %v8445_v42 = vsel %vm5967_vm1, %v8444_v60, %v8440_v12  ;;  %v7141_v54 = vrot.slane %v18785_v41, %v14055_v24  ;;  %v7132_v9 = vsel %vm6009_vm7, %v7131_v19, %v7127_v17  ;;  %v18788_v12 = vld [vmem:[#allocation254_spill] sm:$0xff] }
 0xa8b   :  { %v5895_v35 = vpop.permute.xlu1 %5894  ;;  %v8450_v36 = vsel %vm18767_vm0, %v8449_v1, %v8445_v42  ;;  %v7201_v18 = vsel %vm5995_vm5, %v7200_v2, %v7196_v23  ;;  %v7137_v62 = vsel %vm6016_vm8, %v7136_v45, %v7132_v9  ;;  %v7146_v29 = vrot.slane %v18786_v22, %v14098_v61  ;;  %v18790_v1 = vld [vmem:[#allocation248_spill] sm:$0xff]  ;;  %v18795_v42 = vld [vmem:[#allocation249_spill] sm:$0xff] }
 0xa8c   :  { %v5898_v31 = vpop.permute.xlu0 %5897  ;;  %v8415_v25 = vrot.slane %v5895_v35, %v14073_v34  ;;  %v7206_v52 = vsel %vm6002_vm6, %v7205_v44, %v7201_v18  ;;  %v7215_v6 = vrot.slane %v18787_v57, %v14068_v53  ;;  %v8455_v8 = vsel %vm5981_vm3, %v8454_v55, %v8450_v36  ;;  %v18794_v44 = vld [vmem:[#allocation255_spill] sm:$0xff] }
 0xa8d   :  { %v8420_v32 = vrot.slane %v5898_v31, %v14119_v63  ;;  %v8464_v46 = vrot.slane %v15767_v38, %v14014_v11  ;;  %v7210_v35 = vrot.slane %v18788_v12, %v14031_v48  ;;  %v8460_v31 = vsel %vm5988_vm4, %v8459_v49, %v8455_v8 }
 0xa8e   :  { %v8416_v15 = vsel %vm6037_vm11, %v8415_v25, %v8411_v59  ;;  %vm18789_vm1 = vcmask 1041409   ;;  %v7151_v25 = vrot.slane %v18790_v1, %v14073_v34  ;;  %vm18791_vm3 = vcmask 654912  }
 0xa8f   :  { %v8421_v5 = vsel %vm6044_vm12, %v8420_v32, %v8416_v15  ;;  %v5856_v37 = vpop.permute.xlu1 %5855  ;;  %v7142_v32 = vsel %vm18791_vm3, %v7141_v54, %v7137_v62  ;;  %v7156_v19 = vrot.slane %v18792_v39, %v14119_v63  ;;  %v7211_v17 = vsel %vm6009_vm7, %v7210_v35, %v7206_v52  ;;  %vm18797_vm4 = vmmov %vm18791_vm3  ;;  %v18799_v54 = vld [vmem:[#allocation256_spill] sm:$0xff] }
 0xa90   :  { %v5859_v14 = vpop.permute.xlu0 %5858  ;;  %v8351_v58 = vrot.slane %v5856_v37, %v14156_v26  ;;  %v7147_v38 = vsel %vm6030_vm10, %v7146_v29, %v7142_v32  ;;  %v8465_v47 = vsel %vm5995_vm5, %v8464_v46, %v8460_v31  ;;  %v8474_v45 = vrot.slane %v15797_v16, %v14031_v48  ;;  %v18796_v48 = vld [vmem:[#allocation505_spill] sm:$0xff]  ;;  %v18800_v29 = vld [vmem:[#allocation250_spill] sm:$0xff]  ;;  %vm18801_vm5 = vmmov %vm18791_vm3 }
 0xa91   :  { %v8356_v59 = vrot.slane %v5859_v14, %v14122_v20  ;;  %v7220_v15 = vrot.slane %v18794_v44, %v14055_v24  ;;  %v7161_v55 = vrot.slane %v18795_v42, %v14108_v4  ;;  %v7152_v37 = vsel %vm6037_vm11, %v7151_v25, %v7147_v38 }
 0xa92   :  { %v8352_v30 = vsel %vm6058_vm14, %v8351_v58, %v8347_v7  ;;  %v8469_v7 = vrot.slane %v15795_v3, %v14052_v40  ;;  %v7216_v40 = vsel %vm6016_vm8, %v7215_v6, %v7211_v17  ;;  %v18793_v3 = vld [vmem:[#allocation511_spill] sm:$0xff]  ;;  %v7157_v14 = vsel %vm6044_vm12, %v7156_v19, %v7152_v37 }
 0xa93   :  { %v8357_v43 = vsel %vm6065_vm15, %v8356_v59, %v8352_v30  ;;  %v5940_v10 = vpop.permute.xlu1 %5939  ;;  %v7225_v60 = vrot.slane %v18793_v3, %v14098_v61  ;;  %v7166_v16 = vrot.slane %v18796_v48, %v14156_v26  ;;  %v7221_v36 = vsel %vm18797_vm4, %v7220_v15, %v7216_v40  ;;  %v18805_v40 = vld [vmem:[#allocation258_spill] sm:$0xff] }
 0xa94   :  { %v5943_v28 = vpop.permute.xlu0 %5942  ;;  %v8530_v51 = vsel %vm18789_vm1, %v8357_v43, %v7093_v50  ;;  %v8470_v13 = vsel %vm6002_vm6, %v8469_v7, %v8465_v47  ;;  %v8484_v50 = vrot.slane %v15845_v56, %v14055_v24  ;;  %v7230_v9 = vrot.slane %v18799_v54, %v14073_v34  ;;  %v18802_v43 = vld [vmem:[#allocation513_spill] sm:$0xff]  ;;  %vm18804_vm6 = vmmov %vm18789_vm1 }
 0xa95   :  { %v8575_v11 = vsel %vm8549_vm2, %v8530_v51, 0.0  ;;  %v7226_v58 = vsel %vm6030_vm10, %v7225_v60, %v7221_v36  ;;  %v8475_v59 = vsel %vm6009_vm7, %v8474_v45, %v8470_v13  ;;  %v8489_v62 = vrot.slane %v5940_v10, %v14098_v61  ;;  %v18803_v7 = vld [vmem:[#allocation257_spill] sm:$0xff]  ;;  %vm18806_vm7 = vmmov %vm18789_vm1 }
 0xa96   :  { %v8576_v33 = vadd.f32 %v8575_v11, %v15723_v27  ;;  %v8479_v27 = vrot.slane %v15843_v21, %v14068_v53  ;;  %v18798_v53 = vld [vmem:[#allocation516_spill] sm:$0xff]  ;;  %v7171_v52 = vrot.slane %v18800_v29, %v14122_v20  ;;  %v7162_v30 = vsel %vm6051_vm13, %v7161_v55, %v7157_v14 }
 0xa97   :  { %v5901_v23 = vpop.permute.xlu1 %5900  ;;  %v7235_v21 = vrot.slane %v18798_v53, %v14119_v63  ;;  %v7231_v57 = vsel %vm6037_vm11, %v7230_v9, %v7226_v58  ;;  %v7167_v56 = vsel %vm6058_vm14, %v7166_v16, %v7162_v30  ;;  %v8494_v61 = vrot.slane %v5943_v28, %v14073_v34 }
 0xa98   :  { %v5946_v0 = vpop.permute.xlu0 %5945  ;;  %v8425_v2 = vrot.slane %v5901_v23, %v14108_v4  ;;  %v8480_v18 = vsel %vm6016_vm8, %v8479_v27, %v8475_v59  ;;  %v7245_v10 = vrot.slane %v18802_v43, %v14156_v26  ;;  %v7240_v51 = vrot.slane %v18803_v7, %v14108_v4 }
 0xa99   :  { %v7236_v6 = vsel %vm6044_vm12, %v7235_v21, %v7231_v57  ;;  %v8485_v8 = vsel %vm18801_vm5, %v8484_v50, %v8480_v18  ;;  %v8499_v35 = vrot.slane %v5946_v0, %v14119_v63  ;;  %v7172_v25 = vsel %vm6065_vm15, %v7171_v52, %v7167_v56 }
 0xa9a   :  { %v8426_v49 = vsel %vm6051_vm13, %v8425_v2, %v8421_v5  ;;  %v8490_v12 = vsel %vm6030_vm10, %v8489_v62, %v8485_v8  ;;  %v7241_v28 = vsel %vm6051_vm13, %v7240_v51, %v7236_v6  ;;  %v7250_v3 = vrot.slane %v18805_v40, %v14122_v20 }
 0xa9b   :  { %v5904_v41 = vpop.permute.xlu1 %5903  ;;  %v8495_v11 = vsel %vm6037_vm11, %v8494_v61, %v8490_v12  ;;  %v7246_v63 = vsel %vm6058_vm14, %v7245_v10, %v7241_v28  ;;  %v8585_v27 = vstv %s16000_s2  ;;  %vm8593_vm8 = vcmask 1024  }
 0xa9c   :  { %v8430_v5 = vrot.slane %v5904_v41, %v14156_v26  ;;  %v5949_v22 = vpop.permute.xlu0 %5948  ;;  %v8500_v19 = vsel %vm6044_vm12, %v8499_v35, %v8495_v11  ;;  %v7251_v44 = vsel %vm6065_vm15, %v7250_v3, %v7246_v63 }
 0xa9d   :  { %v8504_v1 = vrot.slane %v5949_v22, %v14108_v4 }
 0xa9e   :  { %v8431_v24 = vsel %vm6058_vm14, %v8430_v5, %v8426_v49 }
 0xa9f   :  { %v5907_v46 = vpop.permute.xlu1 %5906  ;;  %v8505_v60 = vsel %vm6051_vm13, %v8504_v1, %v8500_v19 }
 0xaa0   :  { %v8435_v31 = vrot.slane %v5907_v46, %v14122_v20  ;;  %v5955_v34 = vpop.permute.xlu0 %5954 }
 0xaa1   :  { %v8514_v47 = vrot.slane %v5955_v34, %v14122_v20 }
 0xaa2   :  { %v8436_v32 = vsel %vm6065_vm15, %v8435_v31, %v8431_v24 }
 0xaa3   :  { %v8531_v38 = vsel %vm18804_vm6, %v8436_v32, %v7172_v25  ;;  %v5952_v39 = vpop.permute.xlu1 %5951 }
 0xaa4   :  { %v8509_v17 = vrot.slane %v5952_v39, %v14156_v26  ;;  %v8577_v4 = vsel %vm8549_vm2, %v8531_v38, 0.0 }
 0xaa5   :  { %v8578_v45 = vadd.f32 %v8577_v4, %v8576_v33 }
 0xaa6   :  { %v8510_v23 = vsel %vm6058_vm14, %v8509_v17, %v8505_v60 }
 0xaa7   :  { %v8515_v0 = vsel %vm6065_vm15, %v8514_v47, %v8510_v23 }
 0xaa8   :  { %v8532_v15 = vsel %vm18806_vm7, %v8515_v0, %v7251_v44 }
 0xaa9   :  { %v8579_v26 = vsel %vm8549_vm2, %v8532_v15, 0.0 }
 0xaaa   :  { %v8580_v13 = vadd.f32 %v8579_v26, %v8578_v45 }
 0xaac   :  { %8581 = vadd.xlane.f32.xlu1 %v8580_v13 }
 0xb35   :  { %v8582_v2 = vpop.xlane.xlu1 %8581 }
 0xb36   :  { %v8583_v42 = vmul.f32 0.015625, %v8582_v2 }
 0xb38   :  { %v8586_v20 = vadd.f32 %v8585_v27, %v8583_v42 }
 0xb3a   :  { %v8599_v33 = vmul.f32 -1.442695, %v8586_v20 }
 0xb3c   :  { %8603 = vpow2.f32 %v8599_v33 }
 0xb49   :  { %v8604_v55 = vpop.eup %8603 }
 0xb4a   :  { %v8590_v37 = vadd.f32 1.0, %v8604_v55 }
 0xb4c   :  { %8605 = vrcp.f32 %v8590_v37 }
 0xb59   :  { %v8606_v14 = vpop.eup %8605 }
 0xb5a   :  { %8594 = vst.msk [vmem:[%s16001_s3] sm:$0x3] %vm8593_vm8, %v8606_v14 }

</bundles_post_ra>
